<compile_context>
chip_gen: v7x
topology: tpu7x:2x2x1
jax: 0.10.0
libtpu: 0.0.40
codegen_flags: <defaults>
</compile_context>

<pallas_src>
import functools

import jax
import jax.numpy as jnp
from jax.experimental import pallas as pl
from jax.experimental.pallas import tpu as pltpu
from jax.scipy.linalg import block_diag


NEG_SLOPE = 0.01  # PyTorch LeakyReLU default


def _leaky_relu(v):
    # max(v, a*v) == leaky_relu(v) for 0 <= a <= 1: one mul + one max (2 VALU ops).
    return jnp.maximum(v, NEG_SLOPE * v)


def a2c_move_kernel(
    # blocked inputs
    x_ref, mask_ref,
    # VMEM-resident packed parameters
    w1_ref, b1_ref,      # (S, 2048) bf16 / (1, 2048) f32 : actor||critic first layer
    w2a_ref, b2a_ref,    # (1024, 512) bf16 / (1, 512) f32 : actor 2nd layer (move-W2 folded in)
    w2c_ref, b2c_ref,    # (1024, 512) bf16 / (1, 512) f32 : critic 2nd layer
    w3_ref, b3_ref,      # (1024, OUT_LANES) bf16 / (1, OUT_LANES) f32 : stacked final layer
    # single lane-dense output: lanes [:A] = masked logits, lane A = value
    out_ref,
    *, num_actions,
):
    x = x_ref[...]                                                    # (TB, S) bf16, no lane slicing

    # Layer 1 (both branches at once): one K=S matmul into 2048 lanes.
    h1 = _leaky_relu(
        jnp.dot(x, w1_ref[...], preferred_element_type=jnp.float32) + b1_ref[...]
    ).astype(jnp.bfloat16)                                            # (TB, 2048)

    # Layer 2 per branch.  Only slice is the 1024-aligned actor/critic split.
    h2a = _leaky_relu(
        jnp.dot(h1[:, :1024], w2a_ref[...], preferred_element_type=jnp.float32)
        + b2a_ref[...]).astype(jnp.bfloat16)                          # (TB, 512)
    h2c = _leaky_relu(
        jnp.dot(h1[:, 1024:], w2c_ref[...], preferred_element_type=jnp.float32)
        + b2c_ref[...]).astype(jnp.bfloat16)                          # (TB, 512)

    # Final layers merged: 512-aligned concat + one matmul into the output slab.
    h2 = jnp.concatenate([h2a, h2c], axis=-1)                         # (TB, 1024)
    out = jnp.dot(h2, w3_ref[...], preferred_element_type=jnp.float32) + b3_ref[...]

    # Build the 128-lane mask in-register from the raw (TB, A) mask:
    # lanes [:A] = mask, lane A = 1 (value passes through), rest = 0.
    # TODO(synk): mask-by-multiplication matches the PyTorch code but sets masked
    # logits to 0 (not -inf), which is probably not the intended masking semantics.
    tb, out_lanes = out.shape
    parts = [mask_ref[...].astype(jnp.float32), jnp.ones((tb, 1), jnp.float32)]
    rem = out_lanes - num_actions - 1
    if rem:
        parts.append(jnp.zeros((tb, rem), jnp.float32))
    m = jnp.concatenate(parts, axis=-1)                               # (TB, OUT_LANES)

    out_ref[...] = out * m


def pack_params(raw, state_size, len_action_space):
    """Pack raw per-layer f32 params into the kernel's fused bf16 layout."""
    A = len_action_space
    S = state_size
    out_lanes = 128 * max(1, (A + 1 + 127) // 128)
    bf16 = jnp.bfloat16

    def branch(p, out_col, out_dim):
        wm1_bd = block_diag(*([p["wm1"]] * 4))                        # (56, 224)
        wm2_bd = block_diag(*([p["wm2"]] * 4))                        # (224, 224)
        bm1_t = jnp.tile(p["bm1"], 4)                                 # (224,)
        bm2_t = jnp.tile(p["bm2"], 4)                                 # (224,)

        # Layer 1: block-diag(move, pre) -> (S, 1024)
        w1 = jnp.zeros((S, 1024), jnp.float32)
        w1 = w1.at[:56, :224].set(wm1_bd)
        w1 = w1.at[56:, 224:].set(p["w1"])
        b1 = jnp.concatenate([bm1_t, p["b1"]])                        # (1024,)

        # Layer 2 with the move head's Linear(56,56) folded in (exact algebra):
        #   cat(h_move @ Wm2 + bm2, pre) @ W2 + b2
        # = h1 @ vstack(Wm2_bd @ W2[:224], W2[224:]) + (bm2 @ W2[:224] + b2)
        w2 = jnp.concatenate([wm2_bd @ p["w2"][:224], p["w2"][224:]], axis=0)  # (1024, 512)
        b2 = bm2_t @ p["w2"][:224] + p["b2"]                          # (512,)

        # Final layer padded into a lane-dense (512, out_lanes) slab at out_col.
        w3 = jnp.zeros((512, out_lanes), jnp.float32)
        w3 = w3.at[:, out_col:out_col + out_dim].set(p["w3"])
        b3 = jnp.zeros((out_lanes,), jnp.float32)
        b3 = b3.at[out_col:out_col + out_dim].set(p["b3"])
        return w1, b1, w2, b2, w3, b3

    aw1, ab1, aw2, ab2, aw3, ab3 = branch(raw["actor"], 0, A)          # logits -> lanes [0, A)
    cw1, cb1, cw2, cb2, cw3, cb3 = branch(raw["critic"], A, 1)         # value  -> lane A

    return dict(
        w1=jnp.concatenate([aw1, cw1], axis=1).astype(bf16),           # (S, 2048)
        b1=jnp.concatenate([ab1, cb1]).reshape(1, 2048),
        w2a=aw2.astype(bf16), b2a=ab2.reshape(1, 512),
        w2c=cw2.astype(bf16), b2c=cb2.reshape(1, 512),
        w3=jnp.concatenate([aw3, cw3], axis=0).astype(bf16),           # (1024, out_lanes)
        b3=(ab3 + cb3).reshape(1, out_lanes),
    )


def init_params(key, state_size, len_action_space):
    """Deterministic synthetic parameters (PyTorch-Linear-style init)."""
    ks = jax.random.split(key, 2)

    def mk(k, shape, fan_in):
        bound = 1.0 / jnp.sqrt(jnp.float32(fan_in))
        return jax.random.uniform(k, shape, jnp.float32, -bound, bound)

    def branch_raw(kb, out_dim):
        k = jax.random.split(kb, 10)
        return dict(
            wm1=mk(k[0], (14, 56), 14), bm1=mk(k[1], (56,), 14),
            wm2=mk(k[2], (56, 56), 56), bm2=mk(k[3], (56,), 56),
            w1=mk(k[4], (state_size - 56, 1024 - 224), state_size - 56),
            b1=mk(k[5], (1024 - 224,), state_size - 56),
            w2=mk(k[6], (1024, 512), 1024), b2=mk(k[7], (512,), 1024),
            w3=mk(k[8], (512, out_dim), 512), b3=mk(k[9], (out_dim,), 512),
        )

    raw = dict(actor=branch_raw(ks[0], len_action_space),
               critic=branch_raw(ks[1], 1))
    return pack_params(raw, state_size, len_action_space), raw


def _pick_tile_b(batch):
    # v5e/v6e: stream as many rows per weight load as possible (single step for
    # B<=512).  v7x: 512-row tiles keep both TensorCores busy for large B.
    if batch <= 512:
        return batch
    for t in (512, 256, 128):
        if batch % t == 0:
            return t
    return 128


@functools.partial(jax.jit, static_argnames=("tile_b",))
def a2c_move_forward(x, mask, params, *, tile_b=None):
    B, S = x.shape
    A = mask.shape[1]
    out_lanes = params["w3"].shape[1]
    if tile_b is None:
        tile_b = _pick_tile_b(B)
    grid = (pl.cdiv(B, tile_b),)

    # bf16 activations at the call boundary; raw (B, A) mask, no HBM padding.
    x_bf = x.astype(jnp.bfloat16)
    mask_bf = mask.astype(jnp.bfloat16)

    ordered = (params["w1"], params["b1"], params["w2a"], params["b2a"],
               params["w2c"], params["b2c"], params["w3"], params["b3"])

    def resident(p):
        # Full-array block, constant block index -> fetched once, stays in VMEM.
        # TODO(synk): pipeline_mode=pl.Buffered(1) would drop the redundant second
        # buffer of the ~3 MB resident weights (only matters near v7x's 64 MiB VMEM).
        return pl.BlockSpec(p.shape, lambda i: (0, 0))

    in_specs = (
        [pl.BlockSpec((tile_b, S), lambda i: (i, 0)),
         pl.BlockSpec((tile_b, A), lambda i: (i, 0))]
        + [resident(p) for p in ordered]
    )
    out_spec = pl.BlockSpec((tile_b, out_lanes), lambda i: (i, 0))

    # Advisory cost estimate so XLA can overlap this call with neighboring ops.
    per_row_macs = S * 2048 + 2 * 1024 * 512 + 1024 * out_lanes
    flops = 2 * per_row_macs * B
    param_bytes = sum(int(p.size) * p.dtype.itemsize for p in ordered)
    io_bytes = int(x_bf.size) * 2 + int(mask_bf.size) * 2 + B * out_lanes * 4

    out = pl.pallas_call(
        functools.partial(a2c_move_kernel, num_actions=A),
        out_shape=jax.ShapeDtypeStruct((B, out_lanes), jnp.float32),
        grid=grid,
        in_specs=in_specs,
        out_specs=out_spec,
        compiler_params=pltpu.CompilerParams(
            dimension_semantics=("parallel",),
            vmem_limit_bytes=32 * 1024 * 1024,
        ),
        cost_estimate=pl.CostEstimate(
            flops=flops, transcendentals=0,
            bytes_accessed=param_bytes + io_bytes),
    )(x_bf, mask_bf, *ordered)

    # TODO(synk): torch.distributions.Categorical has no Pallas equivalent; we
    # return the masked logits that parameterize it.
    # TODO(synk): the reference forward() calls self.critic(...) which does not
    # exist on the module; we follow critic_forward() and use critic_2.
    # TODO(synk): for tiny batches called once per rollout step (esp. v5e) the
    # ~3 MB weight-DMA prologue dominates; a cross-call weight-prefetch
    # pallas_call (semaphore + VMEM-ref future) would hide it — out of scope here.
    logits = out[:, :A]
    values = out[:, A]
    return logits, values


def reference_forward_packed(x, mask, params, len_action_space):
    """Pure-JAX mirror of the kernel (same packed bf16 params, same dtype chain)."""
    A = len_action_space
    xb = x.astype(jnp.bfloat16)
    h1 = _leaky_relu(jnp.dot(xb, params["w1"], preferred_element_type=jnp.float32)
                     + params["b1"]).astype(jnp.bfloat16)
    h2a = _leaky_relu(jnp.dot(h1[:, :1024], params["w2a"],
                              preferred_element_type=jnp.float32)
                      + params["b2a"]).astype(jnp.bfloat16)
    h2c = _leaky_relu(jnp.dot(h1[:, 1024:], params["w2c"],
                              preferred_element_type=jnp.float32)
                      + params["b2c"]).astype(jnp.bfloat16)
    h2 = jnp.concatenate([h2a, h2c], axis=-1)
    out = jnp.dot(h2, params["w3"], preferred_element_type=jnp.float32) + params["b3"]
    return out[:, :A] * mask, out[:, A]


def reference_forward_f32(x, mask, raw, len_action_space):
    """Original-module structure, unfolded f32 weights — validates the packing."""
    def branch(p):
        xm = x[:, :56].reshape(-1, 4, 14)
        h = _leaky_relu(jnp.einsum("bgi,io->bgo", xm, p["wm1"]) + p["bm1"])
        move = (jnp.einsum("bgi,io->bgo", h, p["wm2"]) + p["bm2"]).reshape(x.shape[0], 224)
        pre = _leaky_relu(x[:, 56:] @ p["w1"] + p["b1"])
        h2 = _leaky_relu(jnp.concatenate([move, pre], axis=-1) @ p["w2"] + p["b2"])
        return h2 @ p["w3"] + p["b3"]

    policy = branch(raw["actor"]) * mask
    values = jnp.squeeze(branch(raw["critic"]), axis=-1)
    return policy, values


if __name__ == "__main__":
    B = 256                   # single grid step (tile_b = B)
    STATE_SIZE = 128          # -> actor_1/critic_1: Linear(72, 800)
    LEN_ACTION_SPACE = 16

    key = jax.random.PRNGKey(0)
    k_param, k_x, k_mask = jax.random.split(key, 3)

    params, raw = init_params(k_param, STATE_SIZE, LEN_ACTION_SPACE)
    x = jax.random.normal(k_x, (B, STATE_SIZE), jnp.float32)
    mask = (jax.random.uniform(k_mask, (B, LEN_ACTION_SPACE)) > 0.3).astype(jnp.float32)

    logits, values = a2c_move_forward(x, mask, params)
    jax.block_until_ready((logits, values))

    assert logits.shape == (B, LEN_ACTION_SPACE)
    assert values.shape == (B,)

    # Exact-mirror check (same packed bf16 params / dtype chain as the kernel).
    ref_l, ref_v = reference_forward_packed(x, mask, params, LEN_ACTION_SPACE)
    assert jnp.allclose(logits, ref_l, atol=2e-3, rtol=2e-3)
    assert jnp.allclose(values, ref_v, atol=2e-3, rtol=2e-3)

    # Structural check vs. the original (unfolded, f32) module math: validates the
    # block-diag / wm2-fold / final-merge packing at bf16-level tolerance.
    f32_l, f32_v = reference_forward_f32(x, mask, raw, LEN_ACTION_SPACE)
    assert jnp.allclose(logits, f32_l, atol=5e-2, rtol=5e-2)
    assert jnp.allclose(values, f32_v, atol=5e-2, rtol=5e-2)

    print("KERNEL_OK")
</pallas_src>

<mosaic_0001>
module attributes {stable_mosaic.version = 11 : i64} {
  func.func @a2c_move_kernel(%arg0: i32, %arg1: memref<256x128xbf16, #tpu.memory_space<vmem>>, %arg2: memref<256x16xbf16, #tpu.memory_space<vmem>>, %arg3: memref<128x2048xbf16, #tpu.memory_space<vmem>>, %arg4: memref<1x2048xf32, #tpu.memory_space<vmem>>, %arg5: memref<1024x512xbf16, #tpu.memory_space<vmem>>, %arg6: memref<1x512xf32, #tpu.memory_space<vmem>>, %arg7: memref<1024x512xbf16, #tpu.memory_space<vmem>>, %arg8: memref<1x512xf32, #tpu.memory_space<vmem>>, %arg9: memref<1024x128xbf16, #tpu.memory_space<vmem>>, %arg10: memref<1x128xf32, #tpu.memory_space<vmem>>, %arg11: memref<256x128xf32, #tpu.memory_space<vmem>>) attributes {dimension_semantics = [#tpu.dimension_semantics<parallel>], iteration_bounds = array<i64: 1>, scalar_prefetch = 0 : i64, scratch_operands = 0 : i64, tpu.core_type = #tpu.core_type<tc>, window_params = [{transform_indices = @transform_0, window_bounds = array<i64: 256, 128>}, {transform_indices = @transform_1, window_bounds = array<i64: 256, 16>}, {pipeline_mode = #tpu.pipeline_mode<synchronous>, transform_indices = @transform_2, window_bounds = array<i64: 128, 2048>}, {pipeline_mode = #tpu.pipeline_mode<synchronous>, transform_indices = @transform_3, window_bounds = array<i64: 1, 2048>}, {pipeline_mode = #tpu.pipeline_mode<synchronous>, transform_indices = @transform_4, window_bounds = array<i64: 1024, 512>}, {pipeline_mode = #tpu.pipeline_mode<synchronous>, transform_indices = @transform_5, window_bounds = array<i64: 1, 512>}, {pipeline_mode = #tpu.pipeline_mode<synchronous>, transform_indices = @transform_6, window_bounds = array<i64: 1024, 512>}, {pipeline_mode = #tpu.pipeline_mode<synchronous>, transform_indices = @transform_7, window_bounds = array<i64: 1, 512>}, {pipeline_mode = #tpu.pipeline_mode<synchronous>, transform_indices = @transform_8, window_bounds = array<i64: 1024, 128>}, {pipeline_mode = #tpu.pipeline_mode<synchronous>, transform_indices = @transform_9, window_bounds = array<i64: 1, 128>}, {transform_indices = @transform_10, window_bounds = array<i64: 256, 128>}]} {
    %c0 = arith.constant 0 : index
    %c0_0 = arith.constant 0 : index
    %0 = vector.load %arg1[%c0, %c0_0] : memref<256x128xbf16, #tpu.memory_space<vmem>>, vector<256x128xbf16>
    %c0_1 = arith.constant 0 : index
    %c0_2 = arith.constant 0 : index
    %1 = vector.load %arg3[%c0_1, %c0_2] : memref<128x2048xbf16, #tpu.memory_space<vmem>>, vector<128x2048xbf16>
    %cst = arith.constant dense<0.000000e+00> : vector<256x2048xf32>
    %2 = tpu.matmul %0, %1, %cst {dimension_numbers = #tpu.dot_dimension_numbers<[1], [0], [0], [1], [0, 0, 1, 1], [], []>} : vector<256x128xbf16>, vector<128x2048xbf16>, vector<256x2048xf32> -> vector<256x2048xf32>
    %c0_3 = arith.constant 0 : index
    %c0_4 = arith.constant 0 : index
    %3 = vector.load %arg4[%c0_3, %c0_4] : memref<1x2048xf32, #tpu.memory_space<vmem>>, vector<1x2048xf32>
    %4 = vector.broadcast %3 : vector<1x2048xf32> to vector<256x2048xf32>
    %5 = arith.addf %2, %4 : vector<256x2048xf32>
    %cst_5 = arith.constant 0.00999999977 : f32
    %6 = vector.broadcast %cst_5 : f32 to vector<256x2048xf32>
    %7 = arith.mulf %6, %5 : vector<256x2048xf32>
    %8 = arith.maximumf %5, %7 : vector<256x2048xf32>
    %9 = arith.truncf %8 : vector<256x2048xf32> to vector<256x2048xbf16>
    %10 = vector.extract_strided_slice %9 {offsets = [0, 0], sizes = [256, 1024], strides = [1, 1]} : vector<256x2048xbf16> to vector<256x1024xbf16>
    %c0_6 = arith.constant 0 : index
    %c0_7 = arith.constant 0 : index
    %11 = vector.load %arg5[%c0_6, %c0_7] : memref<1024x512xbf16, #tpu.memory_space<vmem>>, vector<1024x512xbf16>
    %cst_8 = arith.constant dense<0.000000e+00> : vector<256x512xf32>
    %12 = tpu.matmul %10, %11, %cst_8 {dimension_numbers = #tpu.dot_dimension_numbers<[1], [0], [0], [1], [0, 0, 1, 1], [], []>} : vector<256x1024xbf16>, vector<1024x512xbf16>, vector<256x512xf32> -> vector<256x512xf32>
    %c0_9 = arith.constant 0 : index
    %c0_10 = arith.constant 0 : index
    %13 = vector.load %arg6[%c0_9, %c0_10] : memref<1x512xf32, #tpu.memory_space<vmem>>, vector<1x512xf32>
    %14 = vector.broadcast %13 : vector<1x512xf32> to vector<256x512xf32>
    %15 = arith.addf %12, %14 : vector<256x512xf32>
    %cst_11 = arith.constant 0.00999999977 : f32
    %16 = vector.broadcast %cst_11 : f32 to vector<256x512xf32>
    %17 = arith.mulf %16, %15 : vector<256x512xf32>
    %18 = arith.maximumf %15, %17 : vector<256x512xf32>
    %19 = arith.truncf %18 : vector<256x512xf32> to vector<256x512xbf16>
    %20 = vector.extract_strided_slice %9 {offsets = [0, 1024], sizes = [256, 1024], strides = [1, 1]} : vector<256x2048xbf16> to vector<256x1024xbf16>
    %c0_12 = arith.constant 0 : index
    %c0_13 = arith.constant 0 : index
    %21 = vector.load %arg7[%c0_12, %c0_13] : memref<1024x512xbf16, #tpu.memory_space<vmem>>, vector<1024x512xbf16>
    %cst_14 = arith.constant dense<0.000000e+00> : vector<256x512xf32>
    %22 = tpu.matmul %20, %21, %cst_14 {dimension_numbers = #tpu.dot_dimension_numbers<[1], [0], [0], [1], [0, 0, 1, 1], [], []>} : vector<256x1024xbf16>, vector<1024x512xbf16>, vector<256x512xf32> -> vector<256x512xf32>
    %c0_15 = arith.constant 0 : index
    %c0_16 = arith.constant 0 : index
    %23 = vector.load %arg8[%c0_15, %c0_16] : memref<1x512xf32, #tpu.memory_space<vmem>>, vector<1x512xf32>
    %24 = vector.broadcast %23 : vector<1x512xf32> to vector<256x512xf32>
    %25 = arith.addf %22, %24 : vector<256x512xf32>
    %cst_17 = arith.constant 0.00999999977 : f32
    %26 = vector.broadcast %cst_17 : f32 to vector<256x512xf32>
    %27 = arith.mulf %26, %25 : vector<256x512xf32>
    %28 = arith.maximumf %25, %27 : vector<256x512xf32>
    %29 = arith.truncf %28 : vector<256x512xf32> to vector<256x512xbf16>
    %30 = tpu.concatenate %19, %29 in 1 : vector<256x512xbf16>, vector<256x512xbf16> -> vector<256x1024xbf16>
    %c0_18 = arith.constant 0 : index
    %c0_19 = arith.constant 0 : index
    %31 = vector.load %arg9[%c0_18, %c0_19] : memref<1024x128xbf16, #tpu.memory_space<vmem>>, vector<1024x128xbf16>
    %cst_20 = arith.constant dense<0.000000e+00> : vector<256x128xf32>
    %32 = tpu.matmul %30, %31, %cst_20 {dimension_numbers = #tpu.dot_dimension_numbers<[1], [0], [0], [1], [0, 0, 1, 1], [], []>} : vector<256x1024xbf16>, vector<1024x128xbf16>, vector<256x128xf32> -> vector<256x128xf32>
    %c0_21 = arith.constant 0 : index
    %c0_22 = arith.constant 0 : index
    %33 = vector.load %arg10[%c0_21, %c0_22] : memref<1x128xf32, #tpu.memory_space<vmem>>, vector<1x128xf32>
    %34 = vector.broadcast %33 : vector<1x128xf32> to vector<256x128xf32>
    %35 = arith.addf %32, %34 : vector<256x128xf32>
    %c0_23 = arith.constant 0 : index
    %c0_24 = arith.constant 0 : index
    %36 = vector.load %arg2[%c0_23, %c0_24] : memref<256x16xbf16, #tpu.memory_space<vmem>>, vector<256x16xbf16>
    %37 = arith.extf %36 : vector<256x16xbf16> to vector<256x16xf32>
    %cst_25 = arith.constant 1.000000e+00 : f32
    %38 = vector.broadcast %cst_25 : f32 to vector<256x1xf32>
    %cst_26 = arith.constant 0.000000e+00 : f32
    %39 = vector.broadcast %cst_26 : f32 to vector<256x111xf32>
    %40 = tpu.concatenate %37, %38, %39 in 1 : vector<256x16xf32>, vector<256x1xf32>, vector<256x111xf32> -> vector<256x128xf32>
    %41 = arith.mulf %35, %40 : vector<256x128xf32>
    %c0_27 = arith.constant 0 : index
    %c0_28 = arith.constant 0 : index
    %42 = vector.load %arg11[%c0_27, %c0_28] : memref<256x128xf32, #tpu.memory_space<vmem>>, vector<256x128xf32>
    tpu.vector_store %arg11[%c0_27, %c0_28], %41 {strides = array<i32>} : memref<256x128xf32, #tpu.memory_space<vmem>>, vector<256x128xf32>,
    return
  }
  func.func @transform_0(%arg0: i32) -> (i32, i32) {
    %c0_i32 = arith.constant 0 : i32
    %c0_i32_0 = arith.constant 0 : i32
    return %arg0, %c0_i32 : i32, i32
  }
  func.func @transform_1(%arg0: i32) -> (i32, i32) {
    %c0_i32 = arith.constant 0 : i32
    %c0_i32_0 = arith.constant 0 : i32
    return %arg0, %c0_i32 : i32, i32
  }
  func.func @transform_2(%arg0: i32) -> (i32, i32) {
    %c0_i32 = arith.constant 0 : i32
    %c0_i32_0 = arith.constant 0 : i32
    %c0_i32_1 = arith.constant 0 : i32
    return %c0_i32, %c0_i32_0 : i32, i32
  }
  func.func @transform_3(%arg0: i32) -> (i32, i32) {
    %c0_i32 = arith.constant 0 : i32
    %c0_i32_0 = arith.constant 0 : i32
    %c0_i32_1 = arith.constant 0 : i32
    return %c0_i32, %c0_i32_0 : i32, i32
  }
  func.func @transform_4(%arg0: i32) -> (i32, i32) {
    %c0_i32 = arith.constant 0 : i32
    %c0_i32_0 = arith.constant 0 : i32
    %c0_i32_1 = arith.constant 0 : i32
    return %c0_i32, %c0_i32_0 : i32, i32
  }
  func.func @transform_5(%arg0: i32) -> (i32, i32) {
    %c0_i32 = arith.constant 0 : i32
    %c0_i32_0 = arith.constant 0 : i32
    %c0_i32_1 = arith.constant 0 : i32
    return %c0_i32, %c0_i32_0 : i32, i32
  }
  func.func @transform_6(%arg0: i32) -> (i32, i32) {
    %c0_i32 = arith.constant 0 : i32
    %c0_i32_0 = arith.constant 0 : i32
    %c0_i32_1 = arith.constant 0 : i32
    return %c0_i32, %c0_i32_0 : i32, i32
  }
  func.func @transform_7(%arg0: i32) -> (i32, i32) {
    %c0_i32 = arith.constant 0 : i32
    %c0_i32_0 = arith.constant 0 : i32
    %c0_i32_1 = arith.constant 0 : i32
    return %c0_i32, %c0_i32_0 : i32, i32
  }
  func.func @transform_8(%arg0: i32) -> (i32, i32) {
    %c0_i32 = arith.constant 0 : i32
    %c0_i32_0 = arith.constant 0 : i32
    %c0_i32_1 = arith.constant 0 : i32
    return %c0_i32, %c0_i32_0 : i32, i32
  }
  func.func @transform_9(%arg0: i32) -> (i32, i32) {
    %c0_i32 = arith.constant 0 : i32
    %c0_i32_0 = arith.constant 0 : i32
    %c0_i32_1 = arith.constant 0 : i32
    return %c0_i32, %c0_i32_0 : i32, i32
  }
  func.func @transform_10(%arg0: i32) -> (i32, i32) {
    %c0_i32 = arith.constant 0 : i32
    %c0_i32_0 = arith.constant 0 : i32
    return %arg0, %c0_i32 : i32, i32
  }
}

</mosaic_0001>

<bundles_post_ra>
// kernel: a2c_move_forward.1
= control target key start
LH: loop header
LB: loop body
LE: loop exit
PB: predicated region body
PF: predicated region fallthrough
CT: control target
= control target key end

     0   :  { %15 = vsyncpa [#allocation3], 0  ;;  %s18911_s0 = inlined_call_operand.vmem [shape: bf16[256,128], index: 0, kind: input, shape index: {}]   ;;  %s18912_s1 = inlined_call_operand.vmem [shape: bf16[256,16], index: 1, kind: input, shape index: {}]   ;;  %s18913_s2 = inlined_call_operand.hbm [shape: bf16[128,2048], index: 2, kind: input, shape index: {}]   ;;  %s18914_s3 = inlined_call_operand.vmem [shape: f32[1,2048], index: 3, kind: input, shape index: {}]   ;;  %s18915_s4 = inlined_call_operand.hbm [shape: bf16[1024,512], index: 4, kind: input, shape index: {}]   ;;  %s18916_s5 = inlined_call_operand.vmem [shape: f32[1,512], index: 5, kind: input, shape index: {}]   ;;  %s18917_s6 = inlined_call_operand.hbm [shape: bf16[1024,512], index: 6, kind: input, shape index: {}]   ;;  %s18918_s7 = inlined_call_operand.vmem [shape: f32[1,512], index: 7, kind: input, shape index: {}]   ;;  %s18919_s8 = inlined_call_operand.vmem [shape: bf16[1024,128], index: 8, kind: input, shape index: {}]   ;;  %s18920_s9 = inlined_call_operand.vmem [shape: f32[1,128], index: 9, kind: input, shape index: {}]   ;;  %s18921_s10 = inlined_call_operand.vmem [shape: f32[256,128], index: 10, kind: output, shape index: {}]  }
   0x1   :  { %16 = vsyncpa [#allocation5], 0  ;;  %s15336_s13 = smov [#allocation4]   ;;  %s15266_s17 = scalar_lea.hbm %s18915_s4, 32768 }
   0x2   :  { %s40_s14 = sshll.u32 %s15336_s13, 4  ;;  %p15267_p0 = scmp.ne.s32.totalorder %s18915_s4, %s15266_s17  ;;  %s41_s14 = int_to_ptr.vmem [resolvable:$true] %s40_s14 }
   0x3   :  { %p15270_p1 = scmp.lt.u32.totalorder %s15266_s17, %s18915_s4 }
   0x5   :  { %p15272_p2 = pnand %p15270_p1, %p15267_p0 }
   0x7   :  { %15275 = shalt.err (!%p15272_p2)
}
   0x8   :  { %s15276_s22 = scalar_lea.vmem %s41_s14, 32768  ;;  %p15281_p4 = scmp.lt.s32.totalorder %s41_s14, %s41_s14 }
   0x9   :  { %p15277_p3 = scmp.ne.s32.totalorder %s41_s14, %s15276_s22  ;;  %p15282_p5 = scmp.lt.s32.totalorder %s15276_s22, %s15276_s22 }
   0xb   :  { %p15283_p6 = por %p15282_p5, %p15281_p4 }
   0xd   :  { %p15284_p7 = pnand %p15283_p6, %p15277_p3 }
   0xf   :  { %15287 = shalt.err (!%p15284_p7)
}
  0x10   :  { %s15337_s23 = smov 256   ;;  %s15338_s24 = smov 16  }
  0x11   :  { %46 = dma.hbm_to_vmem [thread:$0]  %s18915_s4, 32768, %s41_s14, [#allocation5], %s15337_s23, %s15337_s23, %s15338_s24  }
  0x12   :  { %s15339_s27 = smov [#allocation2]   ;;  %s15288_s11 = scalar_lea.hbm %s18913_s2, 16384 }
  0x13   :  { %s26_s28 = sshll.u32 %s15339_s27, 4  ;;  %p15289_p8 = scmp.ne.s32.totalorder %s18913_s2, %s15288_s11  ;;  %s27_s28 = int_to_ptr.vmem [resolvable:$true] %s26_s28 }
  0x14   :  { %p15292_p9 = scmp.lt.u32.totalorder %s15288_s11, %s18913_s2 }
  0x16   :  { %p15294_p10 = pnand %p15292_p9, %p15289_p8 }
  0x18   :  { %15297 = shalt.err (!%p15294_p10)
}
  0x19   :  { %s15298_s17 = scalar_lea.vmem %s27_s28, 16384  ;;  %p15303_p12 = scmp.lt.s32.totalorder %s27_s28, %s27_s28 }
  0x1a   :  { %p15299_p11 = scmp.ne.s32.totalorder %s27_s28, %s15298_s17  ;;  %p15304_p13 = scmp.lt.s32.totalorder %s15298_s17, %s15298_s17 }
  0x1c   :  { %p15305_p0 = por %p15304_p13, %p15303_p12 }
  0x1e   :  { %p15306_p1 = pnand %p15305_p0, %p15299_p11 }
  0x20   :  { %15309 = shalt.err (!%p15306_p1)
}
  0x21   :  { %s15340_s4 = smov 1024   ;;  %s15341_s14 = smov 64  }
  0x22   :  { %32 = dma.hbm_to_vmem [thread:$0]  %s18913_s2, 16384, %s27_s28, [#allocation3], %s15340_s4, %s15340_s4, %s15341_s14  }
  0x23   :  { %s15342_s20 = smov [#allocation6]   ;;  %s15310_s26 = scalar_lea.hbm %s18917_s6, 32768 }
  0x24   :  { %s54_s21 = sshll.u32 %s15342_s20, 4  ;;  %p15311_p2 = scmp.ne.s32.totalorder %s18917_s6, %s15310_s26  ;;  %s55_s21 = int_to_ptr.vmem [resolvable:$true] %s54_s21 }
  0x25   :  { %p15314_p3 = scmp.lt.u32.totalorder %s15310_s26, %s18917_s6 }
  0x27   :  { %p15316_p4 = pnand %p15314_p3, %p15311_p2 }
  0x29   :  { %15319 = shalt.err (!%p15316_p4)
}
  0x2a   :  { %s15320_s12 = scalar_lea.vmem %s55_s21, 32768  ;;  %p15325_p6 = scmp.lt.s32.totalorder %s55_s21, %s55_s21 }
  0x2b   :  { %p15321_p5 = scmp.ne.s32.totalorder %s55_s21, %s15320_s12  ;;  %p15326_p7 = scmp.lt.s32.totalorder %s15320_s12, %s15320_s12 }
  0x2d   :  { %p15327_p8 = por %p15326_p7, %p15325_p6 }
  0x2f   :  { %p15328_p9 = pnand %p15327_p8, %p15321_p5 }
  0x31   :  { %15331 = shalt.err (!%p15328_p9)
}
  0x32   :  { %60 = dma.hbm_to_vmem [thread:$0]  %s18917_s6, 32768, %s55_s21, [#allocation5], %s15337_s23, %s15337_s23, %s15338_s24  }
  0x33   :  { %15332 = dma.done.wait [#allocation3], 16384  }
  0x34   :  { %15333 = vsyncadd [#allocation3], 4294950912 }
  0x35   :  { %15334 = dma.done.wait [#allocation5], 65536  }
  0x36   :  { %15335 = vsyncadd [#allocation5], 4294901760  ;;  %v18924_v0 = vmov 0   ;;  %v109_v1 = vld [vmem:[#allocation2] sm:$0xff]  ;;  %v110_v3 = vld [vmem:[#allocation2 + $0x8] sm:$0xff]  ;;  %vm11952_vm0 = vcmask 130048  }
  0x37   :  { %1089 = vmatprep.mubr.bf16.mxu0 %v18924_v0  ;;  %1282 = vmatprep.mubr.bf16.mxu1 %v18924_v0  ;;  %v117_v2 = vld [vmem:[#allocation2 + $0x40] sm:$0xff]  ;;  %v118_v5 = vld [vmem:[#allocation2 + $0x48] sm:$0xff]  ;;  %v111_v62 = vld [vmem:[#allocation2 + $0x10] sm:$0xff]  ;;  %vm11985_vm1 = vcmask 138240  }
  0x38   :  { %v12105_v4 = vcombine.high %v109_v1, %v117_v2  ;;  %v12104_v6 = vcombine.low %v109_v1, %v117_v2  ;;  %v125_v7 = vld [vmem:[#allocation2 + $0x80] sm:$0xff]  ;;  %v12107_v9 = vcombine.high %v110_v3, %v118_v5  ;;  %v12106_v10 = vcombine.low %v110_v3, %v118_v5  ;;  %v126_v12 = vld [vmem:[#allocation2 + $0x88] sm:$0xff]  ;;  %v119_v63 = vld [vmem:[#allocation2 + $0x50] sm:$0xff] }
  0x39   :  { %v133_v8 = vld [vmem:[#allocation2 + $0xc0] sm:$0xff]  ;;  %v134_v13 = vld [vmem:[#allocation2 + $0xc8] sm:$0xff]  ;;  %v112_v2 = vld [vmem:[#allocation2 + $0x18] sm:$0xff] }
  0x3a   :  { %v12121_v11 = vcombine.high %v125_v7, %v133_v8  ;;  %v141_v14 = vld [vmem:[#allocation2 + $0x100] sm:$0xff]  ;;  %1057 = vmatprep.subr.bf16.mxu0 %v12105_v4  ;;  %v12123_v15 = vcombine.high %v126_v12, %v134_v13  ;;  %v142_v17 = vld [vmem:[#allocation2 + $0x108] sm:$0xff]  ;;  %1250 = vmatprep.subr.bf16.mxu1 %v12107_v9  ;;  %v12120_v19 = vcombine.low %v125_v7, %v133_v8  ;;  %v120_v3 = vld [vmem:[#allocation2 + $0x58] sm:$0xff] }
  0x3b   :  { %v149_v16 = vld [vmem:[#allocation2 + $0x140] sm:$0xff]  ;;  %v150_v18 = vld [vmem:[#allocation2 + $0x148] sm:$0xff]  ;;  %1058 = vmatpush1.bf16.msra.mxu0 %v12104_v6  ;;  %1251 = vmatpush1.bf16.msra.mxu1 %v12106_v10  ;;  %v12122_v20 = vcombine.low %v126_v12, %v134_v13  ;;  %v12109_v6 = vcombine.high %v111_v62, %v119_v63  ;;  %v12111_v8 = vcombine.high %v112_v2, %v120_v3  ;;  %v127_v9 = vld [vmem:[#allocation2 + $0x90] sm:$0xff] }
  0x3c   :  { %1059 = vmatprep.subr.bf16.mxu0 %v12121_v11  ;;  %v12137_v21 = vcombine.high %v141_v14, %v149_v16  ;;  %1252 = vmatprep.subr.bf16.mxu1 %v12123_v15  ;;  %v12139_v22 = vcombine.high %v142_v17, %v150_v18  ;;  %v157_v23 = vld [vmem:[#allocation2 + $0x180] sm:$0xff]  ;;  %v158_v25 = vld [vmem:[#allocation2 + $0x188] sm:$0xff]  ;;  %v12136_v27 = vcombine.low %v141_v14, %v149_v16  ;;  %v135_v10 = vld [vmem:[#allocation2 + $0xd0] sm:$0xff] }
  0x3d   :  { %v165_v24 = vld [vmem:[#allocation2 + $0x1c0] sm:$0xff]  ;;  %v166_v26 = vld [vmem:[#allocation2 + $0x1c8] sm:$0xff]  ;;  %v12138_v28 = vcombine.low %v142_v17, %v150_v18  ;;  %v12108_v11 = vcombine.low %v111_v62, %v119_v63  ;;  %v128_v12 = vld [vmem:[#allocation2 + $0x98] sm:$0xff]  ;;  %v12110_v14 = vcombine.low %v112_v2, %v120_v3  ;;  %v12125_v16 = vcombine.high %v127_v9, %v135_v10 }
  0x3e   :  { %v12153_v29 = vcombine.high %v157_v23, %v165_v24  ;;  %v12155_v30 = vcombine.high %v158_v25, %v166_v26  ;;  %v173_v31 = vld [vmem:[#allocation2 + $0x200] sm:$0xff]  ;;  %v174_v33 = vld [vmem:[#allocation2 + $0x208] sm:$0xff]  ;;  %v12152_v35 = vcombine.low %v157_v23, %v165_v24  ;;  %v12154_v36 = vcombine.low %v158_v25, %v166_v26  ;;  %v136_v13 = vld [vmem:[#allocation2 + $0xd8] sm:$0xff] }
  0x3f   :  { %1060 = vmatpush1.bf16.msra.mxu0 %v12120_v19  ;;  %1253 = vmatpush1.bf16.msra.mxu1 %v12122_v20  ;;  %v181_v32 = vld [vmem:[#allocation2 + $0x240] sm:$0xff]  ;;  %v182_v34 = vld [vmem:[#allocation2 + $0x248] sm:$0xff]  ;;  %v143_v15 = vld [vmem:[#allocation2 + $0x110] sm:$0xff]  ;;  %v12127_v18 = vcombine.high %v128_v12, %v136_v13  ;;  %v12126_v23 = vcombine.low %v128_v12, %v136_v13 }
  0x40   :  { %1061 = vmatprep.subr.bf16.mxu0 %v12137_v21  ;;  %1254 = vmatprep.subr.bf16.mxu1 %v12139_v22  ;;  %v12169_v37 = vcombine.high %v173_v31, %v181_v32  ;;  %v189_v38 = vld [vmem:[#allocation2 + $0x280] sm:$0xff]  ;;  %v12171_v39 = vcombine.high %v174_v33, %v182_v34  ;;  %v190_v41 = vld [vmem:[#allocation2 + $0x288] sm:$0xff]  ;;  %v12168_v43 = vcombine.low %v173_v31, %v181_v32  ;;  %v151_v17 = vld [vmem:[#allocation2 + $0x150] sm:$0xff] }
  0x41   :  { %v197_v40 = vld [vmem:[#allocation2 + $0x2c0] sm:$0xff]  ;;  %v198_v42 = vld [vmem:[#allocation2 + $0x2c8] sm:$0xff]  ;;  %v12170_v44 = vcombine.low %v174_v33, %v182_v34  ;;  %v144_v19 = vld [vmem:[#allocation2 + $0x118] sm:$0xff]  ;;  %v12124_v21 = vcombine.low %v127_v9, %v135_v10  ;;  %v12141_v24 = vcombine.high %v143_v15, %v151_v17 }
  0x42   :  { %v12185_v45 = vcombine.high %v189_v38, %v197_v40  ;;  %v12187_v46 = vcombine.high %v190_v41, %v198_v42  ;;  %v205_v47 = vld [vmem:[#allocation2 + $0x300] sm:$0xff]  ;;  %v206_v49 = vld [vmem:[#allocation2 + $0x308] sm:$0xff]  ;;  %v12184_v51 = vcombine.low %v189_v38, %v197_v40  ;;  %v12186_v52 = vcombine.low %v190_v41, %v198_v42  ;;  %v152_v20 = vld [vmem:[#allocation2 + $0x158] sm:$0xff] }
  0x43   :  { %1062 = vmatpush1.bf16.msra.mxu0 %v12136_v27  ;;  %1255 = vmatpush1.bf16.msra.mxu1 %v12138_v28  ;;  %v213_v48 = vld [vmem:[#allocation2 + $0x340] sm:$0xff]  ;;  %v214_v50 = vld [vmem:[#allocation2 + $0x348] sm:$0xff]  ;;  %v159_v25 = vld [vmem:[#allocation2 + $0x190] sm:$0xff] }
  0x44   :  { %1063 = vmatprep.subr.bf16.mxu0 %v12153_v29  ;;  %1256 = vmatprep.subr.bf16.mxu1 %v12155_v30  ;;  %v12201_v53 = vcombine.high %v205_v47, %v213_v48  ;;  %v12203_v54 = vcombine.high %v206_v49, %v214_v50  ;;  %v221_v55 = vld [vmem:[#allocation2 + $0x380] sm:$0xff]  ;;  %v222_v57 = vld [vmem:[#allocation2 + $0x388] sm:$0xff]  ;;  %v12200_v59 = vcombine.low %v205_v47, %v213_v48  ;;  %v167_v26 = vld [vmem:[#allocation2 + $0x1d0] sm:$0xff] }
  0x45   :  { %v229_v56 = vld [vmem:[#allocation2 + $0x3c0] sm:$0xff]  ;;  %v230_v58 = vld [vmem:[#allocation2 + $0x3c8] sm:$0xff]  ;;  %v12202_v60 = vcombine.low %v206_v49, %v214_v50  ;;  %v12143_v29 = vcombine.high %v144_v19, %v152_v20  ;;  %v160_v30 = vld [vmem:[#allocation2 + $0x198] sm:$0xff]  ;;  %v12157_v40 = vcombine.high %v159_v25, %v167_v26 }
  0x46   :  { %v12217_v61 = vcombine.high %v221_v55, %v229_v56  ;;  %v12219_v1 = vcombine.high %v222_v57, %v230_v58  ;;  %v12216_v4 = vcombine.low %v221_v55, %v229_v56  ;;  %v12218_v5 = vcombine.low %v222_v57, %v230_v58  ;;  %v14368_v7 = vld [vmem:[%s18911_s0] sm:$0xff]   ;;  %v14369_v22 = vld [vmem:[%s18911_s0 + $0x8] sm:$0xff]   ;;  %v168_v31 = vld [vmem:[#allocation2 + $0x1d8] sm:$0xff] }
  0x47   :  { %1064 = vmatpush1.bf16.msra.mxu0 %v12152_v35  ;;  %1257 = vmatpush1.bf16.msra.mxu1 %v12154_v36  ;;  %v15450_v27 = vld [vmem:[#allocation2 + $0x20] sm:$0xff]  ;;  %v15457_v33 = vld [vmem:[#allocation2 + $0x28] sm:$0xff]  ;;  %v12140_v36 = vcombine.low %v143_v15, %v151_v17  ;;  %v183_v38 = vld [vmem:[#allocation2 + $0x250] sm:$0xff]  ;;  %v12158_v48 = vcombine.low %v160_v30, %v168_v31 }
  0x48   :  { %1065 = vmatprep.subr.bf16.mxu0 %v12169_v37  ;;  %1258 = vmatprep.subr.bf16.mxu1 %v12171_v39  ;;  %v15452_v28 = vld [vmem:[#allocation2 + $0x60] sm:$0xff]  ;;  %v15459_v34 = vld [vmem:[#allocation2 + $0x68] sm:$0xff]  ;;  %v175_v37 = vld [vmem:[#allocation2 + $0x210] sm:$0xff]  ;;  %v12142_v39 = vcombine.low %v144_v19, %v152_v20 }
  0x49   :  { %v12112_v32 = vcombine.low %v15450_v27, %v15452_v28  ;;  %v12114_v35 = vcombine.low %v15457_v33, %v15459_v34  ;;  %v176_v41 = vld [vmem:[#allocation2 + $0x218] sm:$0xff]  ;;  %v199_v47 = vld [vmem:[#allocation2 + $0x2d0] sm:$0xff]  ;;  %v12173_v49 = vcombine.high %v175_v37, %v183_v38  ;;  %v12115_v15 = vcombine.high %v15457_v33, %v15459_v34  ;;  %v14376_v19 = vld [vmem:[%s18911_s0 + $0x40] sm:$0xff]  }
  0x4a   :  { %v184_v42 = vld [vmem:[#allocation2 + $0x258] sm:$0xff]  ;;  %v215_v55 = vld [vmem:[#allocation2 + $0x350] sm:$0xff]  ;;  %v14377_v20 = vld [vmem:[%s18911_s0 + $0x48] sm:$0xff]  }
  0x4b   :  { %1066 = vmatpush1.bf16.msra.mxu0 %v12168_v43  ;;  %1259 = vmatpush1.bf16.msra.mxu1 %v12170_v44  ;;  %v12159_v43 = vcombine.high %v160_v30, %v168_v31  ;;  %v14370_v44 = vld [vmem:[%s18911_s0 + $0x10] sm:$0xff]   ;;  %v192_v50 = vld [vmem:[#allocation2 + $0x298] sm:$0xff]  ;;  %v12174_v56 = vcombine.low %v176_v41, %v184_v42  ;;  %v137_v30 = vld [vmem:[#allocation2 + $0xe0] sm:$0xff] }
  0x4c   :  { %1067 = vmatprep.subr.bf16.mxu0 %v12185_v45  ;;  %1260 = vmatprep.subr.bf16.mxu1 %v12187_v46  ;;  %v12156_v45 = vcombine.low %v159_v25, %v167_v26  ;;  %v191_v46 = vld [vmem:[#allocation2 + $0x290] sm:$0xff]  ;;  %v14383_v26 = vld [vmem:[%s18911_s0 + $0x78] sm:$0xff]   ;;  %v130_v31 = vld [vmem:[#allocation2 + $0xa8] sm:$0xff] }
  0x4d   :  { %v12189_v57 = vcombine.high %v191_v46, %v199_v47  ;;  %v12188_v62 = vcombine.low %v191_v46, %v199_v47  ;;  %v223_v63 = vld [vmem:[#allocation2 + $0x390] sm:$0xff]  ;;  %v161_v47 = vld [vmem:[#allocation2 + $0x1a0] sm:$0xff] }
  0x4e   :  { %v14374_v17 = vld [vmem:[%s18911_s0 + $0x30] sm:$0xff]   ;;  %v177_v34 = vld [vmem:[#allocation2 + $0x220] sm:$0xff] }
  0x4f   :  { %1068 = vmatpush1.bf16.msra.mxu0 %v12184_v51  ;;  %1261 = vmatpush1.bf16.msra.mxu1 %v12186_v52  ;;  %v200_v51 = vld [vmem:[#allocation2 + $0x2d8] sm:$0xff]  ;;  %v12175_v52 = vcombine.high %v176_v41, %v184_v42  ;;  %v14382_v25 = vld [vmem:[%s18911_s0 + $0x70] sm:$0xff]   ;;  %v15216_v42 = vld [vmem:[%s18911_s0] sm:$0xff]  }
  0x50   :  { %1069 = vmatprep.subr.bf16.mxu0 %v12201_v53  ;;  %1262 = vmatprep.subr.bf16.mxu1 %v12203_v54  ;;  %v12172_v53 = vcombine.low %v175_v37, %v183_v38  ;;  %v207_v54 = vld [vmem:[#allocation2 + $0x310] sm:$0xff]  ;;  %v12191_v58 = vcombine.high %v192_v50, %v200_v51  ;;  %v12190_v2 = vcombine.low %v192_v50, %v200_v51  ;;  %v145_v37 = vld [vmem:[#allocation2 + $0x120] sm:$0xff]  ;;  %v162_v50 = vld [vmem:[#allocation2 + $0x1a8] sm:$0xff] }
  0x51   :  { %v12205_v3 = vcombine.high %v207_v54, %v215_v55  ;;  %v153_v38 = vld [vmem:[#allocation2 + $0x160] sm:$0xff]  ;;  %v170_v51 = vld [vmem:[#allocation2 + $0x1e8] sm:$0xff] }
  0x52   :  { %v12145_v46 = vcombine.high %v145_v37, %v153_v38  ;;  %v12144_v33 = vcombine.low %v145_v37, %v153_v38  ;;  %v15220_v38 = vld [vmem:[%s18911_s0 + $0x20] sm:$0xff]  }
  0x53   :  { %1070 = vmatpush1.bf16.msra.mxu0 %v12200_v59  ;;  %1263 = vmatpush1.bf16.msra.mxu1 %v12202_v60  ;;  %v208_v59 = vld [vmem:[#allocation2 + $0x318] sm:$0xff] }
  0x54   :  { %1071 = vmatprep.subr.bf16.mxu0 %v12217_v61  ;;  %1264 = vmatprep.subr.bf16.mxu1 %v12219_v1  ;;  %v216_v60 = vld [vmem:[#allocation2 + $0x358] sm:$0xff]  ;;  %v231_v1 = vld [vmem:[#allocation2 + $0x3d0] sm:$0xff] }
  0x55   :  { %v14371_v61 = vld [vmem:[%s18911_s0 + $0x18] sm:$0xff]   ;;  %v12221_v9 = vcombine.high %v223_v63, %v231_v1  ;;  %v12220_v12 = vcombine.low %v223_v63, %v231_v1  ;;  %v201_v63 = vld [vmem:[#allocation2 + $0x2e0] sm:$0xff]  ;;  %v12162_v1 = vcombine.low %v162_v50, %v170_v51 }
  0x57   :  { %1072 = vmatpush1.bf16.msra.mxu0 %v12216_v4  ;;  %1265 = vmatpush1.bf16.msra.mxu1 %v12218_v5  ;;  %v224_v4 = vld [vmem:[#allocation2 + $0x398] sm:$0xff] }
  0x58   :  { %1443 = vmatprep.subr.bf16.mxu0 %v12109_v6  ;;  %1636 = vmatprep.subr.bf16.mxu1 %v12111_v8  ;;  %v232_v5 = vld [vmem:[#allocation2 + $0x3d8] sm:$0xff]  ;;  %v12207_v6 = vcombine.high %v208_v59, %v216_v60  ;;  %v12206_v8 = vcombine.low %v208_v59, %v216_v60  ;;  %v15217_v59 = vld [vmem:[%s18911_s0 + $0x8] sm:$0xff]   ;;  %v12163_v60 = vcombine.high %v162_v50, %v170_v51  ;;  %v15226_v50 = vld [vmem:[%s18911_s0 + $0x50] sm:$0xff]  }
  0x59   :  { %v12223_v10 = vcombine.high %v224_v4, %v232_v5  ;;  %v12222_v13 = vcombine.low %v224_v4, %v232_v5  ;;  %v202_v4 = vld [vmem:[#allocation2 + $0x2e8] sm:$0xff] }
  0x5a   :  { %1090 = vmatmul.mubr.bf16.vlgmr.msra.gmra.mrb[0].mxu0 %v14368_v7  ;;  %1283 = vmatmul.mubr.bf16.vlgmr.msra.gmra.mrb[0].mxu1 %v14368_v7  ;;  %v12204_v7 = vcombine.low %v207_v54, %v215_v55 }
  0x5b   :  { %1444 = vmatpush1.bf16.msra.mxu0 %v12108_v11  ;;  %1637 = vmatpush1.bf16.msra.mxu1 %v12110_v14  ;;  %v14372_v11 = vld [vmem:[%s18911_s0 + $0x20] sm:$0xff]   ;;  %v12113_v14 = vcombine.high %v15450_v27, %v15452_v28  ;;  %v15550_v27 = vld [vmem:[#allocation2 + $0x30] sm:$0xff] }
  0x5c   :  { %1099 = vmatprep.mubr.bf16.mxu0 %v18924_v0  ;;  %1292 = vmatprep.mubr.bf16.mxu1 %v18924_v0  ;;  %v15552_v28 = vld [vmem:[#allocation2 + $0x70] sm:$0xff] }
  0x5d   :  { %1445 = vmatprep.subr.bf16.mxu0 %v12125_v16  ;;  %1638 = vmatprep.subr.bf16.mxu1 %v12127_v18  ;;  %v14373_v16 = vld [vmem:[%s18911_s0 + $0x28] sm:$0xff]   ;;  %v14375_v18 = vld [vmem:[%s18911_s0 + $0x38] sm:$0xff]  }
  0x5f   :  { %1446 = vmatpush1.bf16.msra.mxu0 %v12124_v21  ;;  %1639 = vmatpush1.bf16.msra.mxu1 %v12126_v23  ;;  %v14378_v21 = vld [vmem:[%s18911_s0 + $0x50] sm:$0xff]   ;;  %v14380_v23 = vld [vmem:[%s18911_s0 + $0x60] sm:$0xff]  }
  0x60   :  { %1447 = vmatprep.subr.bf16.mxu0 %v12141_v24  ;;  %1640 = vmatprep.subr.bf16.mxu1 %v12143_v29  ;;  %v14381_v24 = vld [vmem:[%s18911_s0 + $0x68] sm:$0xff]   ;;  %v129_v29 = vld [vmem:[#allocation2 + $0xa0] sm:$0xff] }
  0x61   :  { %v12129_v41 = vcombine.high %v129_v29, %v137_v30 }
  0x62   :  { %1100 = vmatmul.mubr.bf16.gmra.mrb[4].mxu0 %v14369_v22  ;;  %1293 = vmatmul.mubr.bf16.gmra.mrb[4].mxu1 %v14369_v22  ;;  %v14379_v22 = vld [vmem:[%s18911_s0 + $0x58] sm:$0xff]  }
  0x63   :  { %1109 = vmatprep.mubr.bf16.mxu0 %v18924_v0  ;;  %1302 = vmatprep.mubr.bf16.mxu1 %v18924_v0 }
  0x64   :  { %1448 = vmatpush1.bf16.msra.mxu0 %v12140_v36  ;;  %1641 = vmatpush1.bf16.msra.mxu1 %v12142_v39  ;;  %v138_v36 = vld [vmem:[#allocation2 + $0xe8] sm:$0xff] }
  0x65   :  { %1449 = vmatprep.subr.bf16.mxu0 %v12157_v40  ;;  %1642 = vmatprep.subr.bf16.mxu1 %v12159_v43  ;;  %v146_v39 = vld [vmem:[#allocation2 + $0x128] sm:$0xff]  ;;  %v12131_v43 = vcombine.high %v130_v31, %v138_v36 }
  0x66   :  { %v154_v40 = vld [vmem:[#allocation2 + $0x168] sm:$0xff] }
  0x67   :  { %v12146_v54 = vcombine.low %v146_v39, %v154_v40 }
  0x68   :  { %1450 = vmatpush1.bf16.msra.mxu0 %v12156_v45  ;;  %1643 = vmatpush1.bf16.msra.mxu1 %v12158_v48  ;;  %v12130_v45 = vcombine.low %v130_v31, %v138_v36  ;;  %v169_v48 = vld [vmem:[#allocation2 + $0x1e0] sm:$0xff]  ;;  %v12117_v36 = vcombine.high %v15550_v27, %v15552_v28 }
  0x69   :  { %1451 = vmatprep.subr.bf16.mxu0 %v12173_v49  ;;  %1644 = vmatprep.subr.bf16.mxu1 %v12175_v52  ;;  %v12147_v49 = vcombine.high %v146_v39, %v154_v40  ;;  %v12161_v55 = vcombine.high %v161_v47, %v169_v48  ;;  %v15221_v39 = vld [vmem:[%s18911_s0 + $0x28] sm:$0xff]   ;;  %v15222_v40 = vld [vmem:[%s18911_s0 + $0x30] sm:$0xff]   ;;  %v15778_v52 = vld [vmem:[#allocation2 + $0x278] sm:$0xff] }
  0x6a   :  { %1110 = vmatmul.mubr.bf16.gmra.mrb[8].mxu0 %v14370_v44  ;;  %1303 = vmatmul.mubr.bf16.gmra.mrb[8].mxu1 %v14370_v44  ;;  %v12128_v44 = vcombine.low %v129_v29, %v137_v30 }
  0x6b   :  { %1119 = vmatprep.mubr.bf16.mxu0 %v18924_v0  ;;  %1312 = vmatprep.mubr.bf16.mxu1 %v18924_v0 }
  0x6c   :  { %1452 = vmatpush1.bf16.msra.mxu0 %v12172_v53  ;;  %1645 = vmatpush1.bf16.msra.mxu1 %v12174_v56  ;;  %v15558_v53 = vld [vmem:[#allocation2 + $0x78] sm:$0xff]  ;;  %v178_v56 = vld [vmem:[#allocation2 + $0x228] sm:$0xff] }
  0x6d   :  { %1453 = vmatprep.subr.bf16.mxu0 %v12189_v57  ;;  %1646 = vmatprep.subr.bf16.mxu1 %v12191_v58  ;;  %v186_v57 = vld [vmem:[#allocation2 + $0x268] sm:$0xff] }
  0x6e   :  { %v12179_v5 = vcombine.high %v178_v56, %v186_v57 }
  0x70   :  { %1454 = vmatpush1.bf16.msra.mxu0 %v12188_v62  ;;  %1647 = vmatpush1.bf16.msra.mxu1 %v12190_v2  ;;  %v193_v62 = vld [vmem:[#allocation2 + $0x2a0] sm:$0xff] }
  0x71   :  { %1455 = vmatprep.subr.bf16.mxu0 %v12205_v3  ;;  %1648 = vmatprep.subr.bf16.mxu1 %v12207_v6  ;;  %v194_v3 = vld [vmem:[#allocation2 + $0x2a8] sm:$0xff] }
  0x72   :  { %1120 = vmatmul.mubr.bf16.gmra.mrb[12].mxu0 %v14371_v61  ;;  %1313 = vmatmul.mubr.bf16.gmra.mrb[12].mxu1 %v14371_v61  ;;  %v12160_v61 = vcombine.low %v161_v47, %v169_v48  ;;  %v15225_v48 = vld [vmem:[%s18911_s0 + $0x48] sm:$0xff]  }
  0x73   :  { %1129 = vmatprep.mubr.bf16.mxu0 %v18924_v0  ;;  %1322 = vmatprep.mubr.bf16.mxu1 %v18924_v0 }
  0x74   :  { %1456 = vmatpush1.bf16.msra.mxu0 %v12204_v7  ;;  %1649 = vmatpush1.bf16.msra.mxu1 %v12206_v8  ;;  %v209_v7 = vld [vmem:[#allocation2 + $0x320] sm:$0xff] }
  0x75   :  { %1457 = vmatprep.subr.bf16.mxu0 %v12221_v9  ;;  %1650 = vmatprep.subr.bf16.mxu1 %v12223_v10  ;;  %v217_v8 = vld [vmem:[#allocation2 + $0x360] sm:$0xff]  ;;  %v12178_v9 = vcombine.low %v178_v56, %v186_v57  ;;  %v12193_v10 = vcombine.high %v193_v62, %v201_v63 }
  0x78   :  { %1458 = vmatpush1.bf16.msra.mxu0 %v12220_v12  ;;  %1651 = vmatpush1.bf16.msra.mxu1 %v12222_v13  ;;  %v218_v12 = vld [vmem:[#allocation2 + $0x368] sm:$0xff]  ;;  %v15218_v13 = vld [vmem:[%s18911_s0 + $0x10] sm:$0xff]  }
  0x79   :  { %1829 = vmatprep.subr.bf16.mxu0 %v12113_v14  ;;  %2022 = vmatprep.subr.bf16.mxu1 %v12115_v15  ;;  %v12195_v14 = vcombine.high %v194_v3, %v202_v4  ;;  %v12192_v15 = vcombine.low %v193_v62, %v201_v63 }
  0x7a   :  { %1130 = vmatmul.mubr.bf16.gmra.mrb[16].mxu0 %v14372_v11  ;;  %1323 = vmatmul.mubr.bf16.gmra.mrb[16].mxu1 %v14372_v11  ;;  %v210_v11 = vld [vmem:[#allocation2 + $0x328] sm:$0xff] }
  0x7b   :  { %1139 = vmatprep.mubr.bf16.mxu0 %v18924_v0  ;;  %1332 = vmatprep.mubr.bf16.mxu1 %v18924_v0 }
  0x82   :  { %1140 = vmatmul.mubr.bf16.gmra.mrb[20].mxu0 %v14373_v16  ;;  %1333 = vmatmul.mubr.bf16.gmra.mrb[20].mxu1 %v14373_v16  ;;  %v225_v16 = vld [vmem:[#allocation2 + $0x3a0] sm:$0xff] }
  0x83   :  { %1149 = vmatprep.mubr.bf16.mxu0 %v18924_v0  ;;  %1342 = vmatprep.mubr.bf16.mxu1 %v18924_v0 }
  0x8a   :  { %1150 = vmatmul.mubr.bf16.gmra.mrb[24].mxu0 %v14374_v17  ;;  %1343 = vmatmul.mubr.bf16.gmra.mrb[24].mxu1 %v14374_v17  ;;  %v233_v17 = vld [vmem:[#allocation2 + $0x3e0] sm:$0xff] }
  0x8b   :  { %1159 = vmatprep.mubr.bf16.mxu0 %v18924_v0  ;;  %1352 = vmatprep.mubr.bf16.mxu1 %v18924_v0  ;;  %v12224_v30 = vcombine.low %v225_v16, %v233_v17 }
  0x92   :  { %1160 = vmatmul.mubr.bf16.gmra.mrb[28].mxu0 %v14375_v18  ;;  %1353 = vmatmul.mubr.bf16.gmra.mrb[28].mxu1 %v14375_v18  ;;  %v12194_v18 = vcombine.low %v194_v3, %v202_v4 }
  0x93   :  { %1169 = vmatprep.mubr.bf16.mxu0 %v18924_v0  ;;  %1362 = vmatprep.mubr.bf16.mxu1 %v18924_v0 }
  0x9a   :  { %1170 = vmatmul.mubr.bf16.gmra.mrb[32].mxu0 %v14376_v19  ;;  %1363 = vmatmul.mubr.bf16.gmra.mrb[32].mxu1 %v14376_v19  ;;  %v12209_v19 = vcombine.high %v209_v7, %v217_v8 }
  0x9b   :  { %1179 = vmatprep.mubr.bf16.mxu0 %v18924_v0  ;;  %1372 = vmatprep.mubr.bf16.mxu1 %v18924_v0 }
  0xa2   :  { %1180 = vmatmul.mubr.bf16.gmra.mrb[36].mxu0 %v14377_v20  ;;  %1373 = vmatmul.mubr.bf16.gmra.mrb[36].mxu1 %v14377_v20  ;;  %v12211_v20 = vcombine.high %v210_v11, %v218_v12 }
  0xa3   :  { %1189 = vmatprep.mubr.bf16.mxu0 %v18924_v0  ;;  %1382 = vmatprep.mubr.bf16.mxu1 %v18924_v0 }
  0xaa   :  { %1190 = vmatmul.mubr.bf16.gmra.mrb[40].mxu0 %v14378_v21  ;;  %1383 = vmatmul.mubr.bf16.gmra.mrb[40].mxu1 %v14378_v21  ;;  %v226_v21 = vld [vmem:[#allocation2 + $0x3a8] sm:$0xff] }
  0xab   :  { %1199 = vmatprep.mubr.bf16.mxu0 %v18924_v0  ;;  %1392 = vmatprep.mubr.bf16.mxu1 %v18924_v0 }
  0xb2   :  { %1200 = vmatmul.mubr.bf16.gmra.mrb[44].mxu0 %v14379_v22  ;;  %1393 = vmatmul.mubr.bf16.gmra.mrb[44].mxu1 %v14379_v22  ;;  %v234_v22 = vld [vmem:[#allocation2 + $0x3e8] sm:$0xff] }
  0xb3   :  { %1209 = vmatprep.mubr.bf16.mxu0 %v18924_v0  ;;  %1402 = vmatprep.mubr.bf16.mxu1 %v18924_v0  ;;  %v12227_v29 = vcombine.high %v226_v21, %v234_v22  ;;  %v12226_v31 = vcombine.low %v226_v21, %v234_v22 }
  0xba   :  { %1210 = vmatmul.mubr.bf16.gmra.mrb[48].mxu0 %v14380_v23  ;;  %1403 = vmatmul.mubr.bf16.gmra.mrb[48].mxu1 %v14380_v23  ;;  %v12208_v23 = vcombine.low %v209_v7, %v217_v8 }
  0xbb   :  { %1219 = vmatprep.mubr.bf16.mxu0 %v18924_v0  ;;  %1412 = vmatprep.mubr.bf16.mxu1 %v18924_v0 }
  0xc2   :  { %1220 = vmatmul.mubr.bf16.gmra.mrb[52].mxu0 %v14381_v24  ;;  %1413 = vmatmul.mubr.bf16.gmra.mrb[52].mxu1 %v14381_v24  ;;  %v12210_v24 = vcombine.low %v210_v11, %v218_v12 }
  0xc3   :  { %1229 = vmatprep.mubr.bf16.mxu0 %v18924_v0  ;;  %1422 = vmatprep.mubr.bf16.mxu1 %v18924_v0 }
  0xca   :  { %1230 = vmatmul.mubr.bf16.gmra.mrb[56].mxu0 %v14382_v25  ;;  %1423 = vmatmul.mubr.bf16.gmra.mrb[56].mxu1 %v14382_v25  ;;  %v12225_v25 = vcombine.high %v225_v16, %v233_v17 }
  0xcb   :  { %1239 = vmatprep.mubr.bf16.mxu0 %v18924_v0  ;;  %1432 = vmatprep.mubr.bf16.mxu1 %v18924_v0 }
  0xd2   :  { %1240 = vmatmul.mubr.bf16.gmra.mrb[60].mxu0 %v14383_v26  ;;  %1433 = vmatmul.mubr.bf16.gmra.mrb[60].mxu1 %v14383_v26  ;;  %v15219_v26 = vld [vmem:[%s18911_s0 + $0x18] sm:$0xff]  }
  0xd3   :  { %1475 = vmatprep.mubr.bf16.mxu0 %v18924_v0  ;;  %1668 = vmatprep.mubr.bf16.mxu1 %v18924_v0 }
  0xda   :  { %1476 = vmatmul.mubr.bf16.vlgmr.msra.gmra.mrb[64].mxu0 %v15216_v42  ;;  %1669 = vmatmul.mubr.bf16.vlgmr.msra.gmra.mrb[64].mxu1 %v15216_v42  ;;  %v241_v42 = vlaneseq }
  0xdb   :  { %1830 = vmatpush1.bf16.msra.mxu0 %v12112_v32  ;;  %2023 = vmatpush1.bf16.msra.mxu1 %v12114_v35  ;;  %v15554_v32 = vld [vmem:[#allocation2 + $0x38] sm:$0xff]  ;;  %v185_v35 = vld [vmem:[#allocation2 + $0x260] sm:$0xff] }
  0xdc   :  { %1485 = vmatprep.mubr.bf16.mxu0 %v18924_v0  ;;  %1678 = vmatprep.mubr.bf16.mxu1 %v18924_v0  ;;  %v12177_v2 = vcombine.high %v177_v34, %v185_v35  ;;  %v12176_v6 = vcombine.low %v177_v34, %v185_v35  ;;  %v12119_v37 = vcombine.high %v15554_v32, %v15558_v53 }
  0xdd   :  { %1831 = vmatprep.subr.bf16.mxu0 %v12129_v41  ;;  %2024 = vmatprep.subr.bf16.mxu1 %v12131_v43  ;;  %v15223_v41 = vld [vmem:[%s18911_s0 + $0x38] sm:$0xff]   ;;  %v15601_v43 = vshrl.u32 %v241_v42, 7 }
  0xdf   :  { %1832 = vmatpush1.bf16.msra.mxu0 %v12128_v44  ;;  %2025 = vmatpush1.bf16.msra.mxu1 %v12130_v45  ;;  %v15224_v44 = vld [vmem:[%s18911_s0 + $0x40] sm:$0xff]   ;;  %v15609_v45 = vsub.s32 0, %v15601_v43  ;;  %v15615_v47 = vsub.s32 1, %v15601_v43  ;;  %v15636_v34 = vsub.s32 3, %v15601_v43 }
  0xe0   :  { %1833 = vmatprep.subr.bf16.mxu0 %v12145_v46  ;;  %2026 = vmatprep.subr.bf16.mxu1 %v12147_v49  ;;  %v15612_v46 = vsub.s32 2, %v15601_v43  ;;  %v237_v49 = vld [vmem:[%s18914_s3] sm:$0xff] }
  0xe1   :  { %19134 = vst [vmem:[#allocation9_spill] sm:$0xff] %v15609_v45  ;;  %19136 = vst [vmem:[#allocation11_spill] sm:$0xff] %v15615_v47  ;;  %v15629_v51 = vrot.slane %v237_v49, %v15609_v45  ;;  %v15639_v35 = vrot.slane %v237_v49, %v15615_v47  ;;  %v15646_v63 = vrot.slane %v237_v49, %v15636_v34 }
  0xe2   :  { %1486 = vmatmul.mubr.bf16.gmra.mrb[68].mxu0 %v15217_v59  ;;  %1679 = vmatmul.mubr.bf16.gmra.mrb[68].mxu1 %v15217_v59  ;;  %19135 = vst [vmem:[#allocation10_spill] sm:$0xff] %v15612_v46  ;;  %19137 = vst [vmem:[#allocation12_spill] sm:$0xff] %v15636_v34 }
  0xe3   :  { %1495 = vmatprep.mubr.bf16.mxu0 %v18924_v0  ;;  %1688 = vmatprep.mubr.bf16.mxu1 %v18924_v0 }
  0xe4   :  { %1834 = vmatpush1.bf16.msra.mxu0 %v12144_v33  ;;  %2027 = vmatpush1.bf16.msra.mxu1 %v12146_v54  ;;  %v15632_v33 = vrot.slane %v237_v49, %v15612_v46 }
  0xe5   :  { %1835 = vmatprep.subr.bf16.mxu0 %v12161_v55  ;;  %2028 = vmatprep.subr.bf16.mxu1 %v12163_v60 }
  0xe8   :  { %1836 = vmatpush1.bf16.msra.mxu0 %v12160_v61  ;;  %2029 = vmatpush1.bf16.msra.mxu1 %v12162_v1 }
  0xe9   :  { %1837 = vmatprep.subr.bf16.mxu0 %v12177_v2  ;;  %2030 = vmatprep.subr.bf16.mxu1 %v12179_v5 }
  0xea   :  { %1496 = vmatmul.mubr.bf16.gmra.mrb[72].mxu0 %v15218_v13  ;;  %1689 = vmatmul.mubr.bf16.gmra.mrb[72].mxu1 %v15218_v13 }
  0xeb   :  { %1505 = vmatprep.mubr.bf16.mxu0 %v18924_v0  ;;  %1698 = vmatprep.mubr.bf16.mxu1 %v18924_v0 }
  0xec   :  { %1838 = vmatpush1.bf16.msra.mxu0 %v12176_v6  ;;  %2031 = vmatpush1.bf16.msra.mxu1 %v12178_v9  ;;  %v15227_v9 = vld [vmem:[%s18911_s0 + $0x58] sm:$0xff]  }
  0xed   :  { %1839 = vmatprep.subr.bf16.mxu0 %v12193_v10  ;;  %2032 = vmatprep.subr.bf16.mxu1 %v12195_v14 }
  0xf0   :  { %1840 = vmatpush1.bf16.msra.mxu0 %v12192_v15  ;;  %2033 = vmatpush1.bf16.msra.mxu1 %v12194_v18 }
  0xf1   :  { %1841 = vmatprep.subr.bf16.mxu0 %v12209_v19  ;;  %2034 = vmatprep.subr.bf16.mxu1 %v12211_v20 }
  0xf2   :  { %1506 = vmatmul.mubr.bf16.gmra.mrb[76].mxu0 %v15219_v26  ;;  %1699 = vmatmul.mubr.bf16.gmra.mrb[76].mxu1 %v15219_v26 }
  0xf3   :  { %1515 = vmatprep.mubr.bf16.mxu0 %v18924_v0  ;;  %1708 = vmatprep.mubr.bf16.mxu1 %v18924_v0 }
  0xf4   :  { %1842 = vmatpush1.bf16.msra.mxu0 %v12208_v23  ;;  %2035 = vmatpush1.bf16.msra.mxu1 %v12210_v24 }
  0xf5   :  { %1843 = vmatprep.subr.bf16.mxu0 %v12225_v25  ;;  %2036 = vmatprep.subr.bf16.mxu1 %v12227_v29  ;;  %v15661_v29 = vld [vmem:[#allocation2 + $0xb0] sm:$0xff] }
  0xf8   :  { %1844 = vmatpush1.bf16.msra.mxu0 %v12224_v30  ;;  %2037 = vmatpush1.bf16.msra.mxu1 %v12226_v31  ;;  %v15663_v30 = vld [vmem:[#allocation2 + $0xf0] sm:$0xff] }
  0xf9   :  { %2215 = vmatprep.subr.bf16.mxu0 %v12117_v36  ;;  %2408 = vmatprep.subr.bf16.mxu1 %v12119_v37 }
  0xfa   :  { %1516 = vmatmul.mubr.bf16.gmra.mrb[80].mxu0 %v15220_v38  ;;  %1709 = vmatmul.mubr.bf16.gmra.mrb[80].mxu1 %v15220_v38 }
  0xfb   :  { %1525 = vmatprep.mubr.bf16.mxu0 %v18924_v0  ;;  %1718 = vmatprep.mubr.bf16.mxu1 %v18924_v0 }
 0x102   :  { %1526 = vmatmul.mubr.bf16.gmra.mrb[84].mxu0 %v15221_v39  ;;  %1719 = vmatmul.mubr.bf16.gmra.mrb[84].mxu1 %v15221_v39 }
 0x103   :  { %1535 = vmatprep.mubr.bf16.mxu0 %v18924_v0  ;;  %1728 = vmatprep.mubr.bf16.mxu1 %v18924_v0 }
 0x10a   :  { %1536 = vmatmul.mubr.bf16.gmra.mrb[88].mxu0 %v15222_v40  ;;  %1729 = vmatmul.mubr.bf16.gmra.mrb[88].mxu1 %v15222_v40 }
 0x10b   :  { %1545 = vmatprep.mubr.bf16.mxu0 %v18924_v0  ;;  %1738 = vmatprep.mubr.bf16.mxu1 %v18924_v0 }
 0x112   :  { %1546 = vmatmul.mubr.bf16.gmra.mrb[92].mxu0 %v15223_v41  ;;  %1739 = vmatmul.mubr.bf16.gmra.mrb[92].mxu1 %v15223_v41 }
 0x113   :  { %1555 = vmatprep.mubr.bf16.mxu0 %v18924_v0  ;;  %1748 = vmatprep.mubr.bf16.mxu1 %v18924_v0 }
 0x11a   :  { %1556 = vmatmul.mubr.bf16.gmra.mrb[96].mxu0 %v15224_v44  ;;  %1749 = vmatmul.mubr.bf16.gmra.mrb[96].mxu1 %v15224_v44 }
 0x11b   :  { %1565 = vmatprep.mubr.bf16.mxu0 %v18924_v0  ;;  %1758 = vmatprep.mubr.bf16.mxu1 %v18924_v0 }
 0x122   :  { %1566 = vmatmul.mubr.bf16.gmra.mrb[100].mxu0 %v15225_v48  ;;  %1759 = vmatmul.mubr.bf16.gmra.mrb[100].mxu1 %v15225_v48 }
 0x123   :  { %1575 = vmatprep.mubr.bf16.mxu0 %v18924_v0  ;;  %1768 = vmatprep.mubr.bf16.mxu1 %v18924_v0 }
 0x12a   :  { %1576 = vmatmul.mubr.bf16.gmra.mrb[104].mxu0 %v15226_v50  ;;  %1769 = vmatmul.mubr.bf16.gmra.mrb[104].mxu1 %v15226_v50 }
 0x12b   :  { %1585 = vmatprep.mubr.bf16.mxu0 %v18924_v0  ;;  %1778 = vmatprep.mubr.bf16.mxu1 %v18924_v0 }
 0x12d   :  { %v1091_v54 = vpop.f32.mrb[0].mxu0  ;;  %v1284_v56 = vpop.f32.mrb[0].mxu1 }
 0x12e   :  { %v1092_v55 = vadd.f32 %v1091_v54, %v15629_v51  ;;  %v1093_v57 = vpop.f32.mrb[1].mxu0  ;;  %v1285_v59 = vadd.f32 %v1284_v56, %v15632_v33  ;;  %v1286_v60 = vpop.f32.mrb[1].mxu1 }
 0x12f   :  { %v1095_v61 = vpop.f32.mrb[2].mxu0  ;;  %v1094_v62 = vadd.f32 %v1093_v57, %v15639_v35  ;;  %v1288_v3 = vpop.f32.mrb[2].mxu1  ;;  %v1287_v13 = vadd.f32 %v1286_v60, %v15646_v63  ;;  %v15673_v60 = vld [vmem:[#allocation2 + $0xb8] sm:$0xff] }
 0x130   :  { %v2601_v1 = vmul.f32 0.01, %v1092_v55  ;;  %v1096_v2 = vadd.f32 %v1095_v61, %v15629_v51  ;;  %v1097_v4 = vpop.f32.mrb[3].mxu0  ;;  %v2603_v5 = vmul.f32 0.01, %v1285_v59  ;;  %v1289_v6 = vadd.f32 %v1288_v3, %v15632_v33  ;;  %v1290_v7 = vpop.f32.mrb[3].mxu1 }
 0x131   :  { %v1098_v10 = vadd.f32 %v1097_v4, %v15639_v35  ;;  %v2602_v11 = vmul.f32 0.01, %v1094_v62  ;;  %v1291_v14 = vadd.f32 %v1290_v7, %v15646_v63  ;;  %v2604_v21 = vmul.f32 0.01, %v1287_v13  ;;  %v15675_v61 = vld [vmem:[#allocation2 + $0xf8] sm:$0xff]  ;;  %v15228_v3 = vld [vmem:[%s18911_s0 + $0x60] sm:$0xff]  }
 0x132   :  { %v2617_v8 = vmul.f32 0.01, %v1096_v2  ;;  %1586 = vmatmul.mubr.bf16.gmra.mrb[108].mxu0 %v15227_v9  ;;  %v2619_v12 = vmul.f32 0.01, %v1289_v6  ;;  %1779 = vmatmul.mubr.bf16.gmra.mrb[108].mxu1 %v15227_v9  ;;  %v3113_v15 = vmax.f32 %v1092_v55, %v2601_v1  ;;  %v3115_v18 = vmax.f32 %v1285_v59, %v2603_v5  ;;  %v15691_v9 = vld [vmem:[#allocation2 + $0x130] sm:$0xff] }
 0x133   :  { %1595 = vmatprep.mubr.bf16.mxu0 %v18924_v0  ;;  %1788 = vmatprep.mubr.bf16.mxu1 %v18924_v0  ;;  %v2618_v17 = vmul.f32 0.01, %v1098_v10  ;;  %v2620_v22 = vmul.f32 0.01, %v1291_v14  ;;  %v3114_v31 = vmax.f32 %v1094_v62, %v2602_v11  ;;  %v3116_v42 = vmax.f32 %v1287_v13, %v2604_v21  ;;  %v15771_v7 = vld [vmem:[#allocation2 + $0x270] sm:$0xff] }
 0x134   :  { %v3129_v16 = vmax.f32 %v1096_v2, %v2617_v8  ;;  %v3131_v19 = vmax.f32 %v1289_v6, %v2619_v12 }
 0x135   :  { %v1101_v20 = vpop.f32.mrb[4].mxu0  ;;  %v1294_v25 = vpop.f32.mrb[4].mxu1  ;;  %v3130_v36 = vmax.f32 %v1098_v10, %v2618_v17  ;;  %v3132_v55 = vmax.f32 %v1291_v14, %v2620_v22  ;;  %v15693_v10 = vld [vmem:[#allocation2 + $0x170] sm:$0xff]  ;;  %v15696_v14 = vld [vmem:[#allocation2 + $0x138] sm:$0xff] }
 0x136   :  { %v15658_v23 = vpack.c.bf16 %v3129_v16, %v3113_v15  ;;  %v1102_v24 = vadd.f32 %v1101_v20, %v15629_v51  ;;  %v1103_v26 = vpop.f32.mrb[5].mxu0  ;;  %v15665_v37 = vpack.c.bf16 %v3131_v19, %v3115_v18  ;;  %v1295_v38 = vadd.f32 %v1294_v25, %v15632_v33  ;;  %v1296_v39 = vpop.f32.mrb[5].mxu1  ;;  %v15700_v20 = vld [vmem:[#allocation2 + $0x178] sm:$0xff] }
 0x137   :  { %v1105_v40 = vpop.f32.mrb[6].mxu0  ;;  %v1104_v41 = vadd.f32 %v1103_v26, %v15639_v35  ;;  %v1298_v49 = vpop.f32.mrb[6].mxu1  ;;  %v15670_v54 = vpack.c.bf16 %v3130_v36, %v3114_v31  ;;  %v15681_v4 = vpack.c.bf16 %v3132_v55, %v3116_v42  ;;  %v15684_v5 = vadd.f32 %v1296_v39, %v15646_v63 }
 0x138   :  { %19138 = vst [vmem:[#allocation13_spill] sm:$0xff] %v15665_v37  ;;  %v2633_v44 = vmul.f32 0.01, %v1102_v24  ;;  %v1106_v48 = vadd.f32 %v1105_v40, %v15629_v51  ;;  %v1107_v50 = vpop.f32.mrb[7].mxu0  ;;  %v2635_v56 = vmul.f32 0.01, %v1295_v38  ;;  %v1299_v57 = vadd.f32 %v1298_v49, %v15632_v33 }
 0x139   :  { %v1300_v59 = vpop.f32.mrb[7].mxu1  ;;  %v1108_v62 = vadd.f32 %v1107_v50, %v15639_v35  ;;  %v2634_v1 = vmul.f32 0.01, %v1104_v41  ;;  %19139 = vst [vmem:[#allocation14_spill] sm:$0xff] %v15681_v4  ;;  %v2636_v16 = vmul.f32 0.01, %v15684_v5 }
 0x13a   :  { %v2649_v2 = vmul.f32 0.01, %v1106_v48  ;;  %1596 = vmatmul.mubr.bf16.gmra.mrb[112].mxu0 %v15228_v3  ;;  %v2651_v6 = vmul.f32 0.01, %v1299_v57  ;;  %1789 = vmatmul.mubr.bf16.gmra.mrb[112].mxu1 %v15228_v3  ;;  %v3145_v12 = vmax.f32 %v1102_v24, %v2633_v44  ;;  %v1301_v15 = vadd.f32 %v1300_v59, %v15646_v63 }
 0x13b   :  { %1605 = vmatprep.mubr.bf16.mxu0 %v18924_v0  ;;  %v2650_v11 = vmul.f32 0.01, %v1108_v62  ;;  %1798 = vmatprep.mubr.bf16.mxu1 %v18924_v0  ;;  %v3147_v17 = vmax.f32 %v1295_v38, %v2635_v56  ;;  %v3146_v21 = vmax.f32 %v1104_v41, %v2634_v1 }
 0x13c   :  { %v3161_v13 = vmax.f32 %v1106_v48, %v2649_v2  ;;  %v3163_v18 = vmax.f32 %v1299_v57, %v2651_v6  ;;  %v2652_v39 = vmul.f32 0.01, %v1301_v15 }
 0x13d   :  { %v1111_v19 = vpop.f32.mrb[8].mxu0  ;;  %v3162_v22 = vmax.f32 %v1108_v62, %v2650_v11  ;;  %v1304_v26 = vpop.f32.mrb[8].mxu1 }
 0x13e   :  { %v15702_v25 = vpack.c.bf16 %v3161_v13, %v3145_v12  ;;  %v1112_v24 = vadd.f32 %v1111_v19, %v15629_v51  ;;  %v1113_v31 = vpop.f32.mrb[9].mxu0  ;;  %v15707_v40 = vpack.c.bf16 %v3163_v18, %v3147_v17  ;;  %v1305_v38 = vadd.f32 %v1304_v26, %v15632_v33  ;;  %v1306_v42 = vpop.f32.mrb[9].mxu1  ;;  %v15229_v12 = vld [vmem:[%s18911_s0 + $0x68] sm:$0xff]  }
 0x13f   :  { %v1115_v44 = vpop.f32.mrb[10].mxu0  ;;  %v15710_v48 = vpack.c.bf16 %v3162_v22, %v3146_v21  ;;  %v1114_v41 = vadd.f32 %v1113_v31, %v15639_v35  ;;  %v1308_v55 = vpop.f32.mrb[10].mxu1  ;;  %v3148_v18 = vmax.f32 %v15684_v5, %v2636_v16  ;;  %v3164_v22 = vmax.f32 %v1301_v15, %v2652_v39 }
 0x140   :  { %19140 = vst [vmem:[#allocation15_spill] sm:$0xff] %v15707_v40  ;;  %v2665_v49 = vmul.f32 0.01, %v1112_v24  ;;  %v1116_v50 = vadd.f32 %v1115_v44, %v15629_v51  ;;  %v1117_v56 = vpop.f32.mrb[11].mxu0  ;;  %v2667_v62 = vmul.f32 0.01, %v1305_v38  ;;  %v1309_v1 = vadd.f32 %v1308_v55, %v15632_v33 }
 0x141   :  { %v1310_v2 = vpop.f32.mrb[11].mxu1  ;;  %v1118_v13 = vadd.f32 %v1117_v56, %v15639_v35  ;;  %v2666_v17 = vmul.f32 0.01, %v1114_v41  ;;  %v1307_v26 = vadd.f32 %v1306_v42, %v15646_v63  ;;  %v15732_v36 = vpack.c.bf16 %v3164_v22, %v3148_v18  ;;  %v15737_v42 = vld [vmem:[#allocation2 + $0x1b0] sm:$0xff] }
 0x142   :  { %v2681_v11 = vmul.f32 0.01, %v1116_v50  ;;  %1606 = vmatmul.mubr.bf16.gmra.mrb[116].mxu0 %v15229_v12  ;;  %v3177_v19 = vmax.f32 %v1112_v24, %v2665_v49  ;;  %v2683_v21 = vmul.f32 0.01, %v1309_v1  ;;  %1799 = vmatmul.mubr.bf16.gmra.mrb[116].mxu1 %v15229_v12  ;;  %v3179_v31 = vmax.f32 %v1305_v38, %v2667_v62  ;;  %v15739_v38 = vld [vmem:[#allocation2 + $0x1f0] sm:$0xff] }
 0x143   :  { %1615 = vmatprep.mubr.bf16.mxu0 %v18924_v0  ;;  %1808 = vmatprep.mubr.bf16.mxu1 %v18924_v0  ;;  %v2682_v55 = vmul.f32 0.01, %v1118_v13  ;;  %v1311_v6 = vadd.f32 %v1310_v2, %v15646_v63  ;;  %v3178_v3 = vmax.f32 %v1114_v41, %v2666_v17  ;;  %19141 = vst [vmem:[#allocation16_spill] sm:$0xff] %v15732_v36  ;;  %v2668_v5 = vmul.f32 0.01, %v1307_v26 }
 0x144   :  { %v3193_v44 = vmax.f32 %v1116_v50, %v2681_v11  ;;  %v3195_v59 = vmax.f32 %v1309_v1, %v2683_v21  ;;  %v19149_v40 = vmov 0  }
 0x145   :  { %v1121_v56 = vpop.f32.mrb[12].mxu0  ;;  %v1314_v15 = vpop.f32.mrb[12].mxu1  ;;  %v3194_v49 = vmax.f32 %v1118_v13, %v2682_v55  ;;  %v2684_v50 = vmul.f32 0.01, %v1311_v6  ;;  %v3180_v12 = vmax.f32 %v1307_v26, %v2668_v5  ;;  %v15751_v55 = vld [vmem:[#allocation2 + $0x1f8] sm:$0xff]  ;;  %v15230_v5 = vld [vmem:[%s18911_s0 + $0x70] sm:$0xff]  }
 0x146   :  { %v15734_v16 = vpack.c.bf16 %v3193_v44, %v3177_v19  ;;  %v1122_v24 = vadd.f32 %v1121_v56, %v15629_v51  ;;  %v1123_v39 = vpop.f32.mrb[13].mxu0  ;;  %v15741_v62 = vpack.c.bf16 %v3195_v59, %v3179_v31  ;;  %v1315_v1 = vadd.f32 %v1314_v15, %v15632_v33  ;;  %v1316_v41 = vpop.f32.mrb[13].mxu1  ;;  %v15749_v31 = vld [vmem:[#allocation2 + $0x1b8] sm:$0xff] }
 0x147   :  { %v1125_v2 = vpop.f32.mrb[14].mxu0  ;;  %v1124_v11 = vadd.f32 %v1123_v39, %v15639_v35  ;;  %v1318_v19 = vpop.f32.mrb[14].mxu1  ;;  %v15746_v22 = vpack.c.bf16 %v3194_v49, %v3178_v3  ;;  %v3196_v44 = vmax.f32 %v1311_v6, %v2684_v50  ;;  %v15762_v49 = vadd.f32 %v1316_v41, %v15646_v63  ;;  %v15774_v41 = vld [vmem:[#allocation2 + $0x238] sm:$0xff] }
 0x148   :  { %19142 = vst [vmem:[#allocation17_spill] sm:$0xff] %v15734_v16  ;;  %19143 = vst [vmem:[#allocation18_spill] sm:$0xff] %v15741_v62  ;;  %v2697_v17 = vmul.f32 0.01, %v1122_v24  ;;  %v1126_v18 = vadd.f32 %v1125_v2, %v15629_v51  ;;  %v1127_v21 = vpop.f32.mrb[15].mxu0  ;;  %v1319_v13 = vadd.f32 %v1318_v19, %v15632_v33  ;;  %v1320_v59 = vpop.f32.mrb[15].mxu1 }
 0x149   :  { %19144 = vst [vmem:[#allocation19_spill] sm:$0xff] %v15746_v22  ;;  %v2699_v56 = vmul.f32 0.01, %v1315_v1  ;;  %v1128_v15 = vadd.f32 %v1127_v21, %v15639_v35  ;;  %v2698_v39 = vmul.f32 0.01, %v1124_v11  ;;  %v15759_v6 = vpack.c.bf16 %v3196_v44, %v3180_v12  ;;  %v15769_v21 = vld [vmem:[#allocation2 + $0x230] sm:$0xff] }
 0x14a   :  { %v2713_v26 = vmul.f32 0.01, %v1126_v18  ;;  %1616 = vmatmul.mubr.bf16.gmra.mrb[120].mxu0 %v15230_v5  ;;  %v2715_v50 = vmul.f32 0.01, %v1319_v13  ;;  %1809 = vmatmul.mubr.bf16.gmra.mrb[120].mxu1 %v15230_v5  ;;  %v3209_v12 = vmax.f32 %v1122_v24, %v2697_v17  ;;  %v1321_v5 = vadd.f32 %v1320_v59, %v15646_v63 }
 0x14b   :  { %19145 = vst [vmem:[#allocation20_spill] sm:$0xff] %v15759_v6  ;;  %1625 = vmatprep.mubr.bf16.mxu0 %v18924_v0  ;;  %v2714_v3 = vmul.f32 0.01, %v1128_v15  ;;  %1818 = vmatprep.mubr.bf16.mxu1 %v18924_v0  ;;  %v2700_v57 = vmul.f32 0.01, %v15762_v49  ;;  %v3211_v8 = vmax.f32 %v1315_v1, %v2699_v56  ;;  %v3210_v19 = vmax.f32 %v1124_v11, %v2698_v39 }
 0x14c   :  { %v3225_v44 = vmax.f32 %v1126_v18, %v2713_v26  ;;  %v3227_v2 = vmax.f32 %v1319_v13, %v2715_v50  ;;  %v2716_v0 = vmul.f32 0.01, %v1321_v5 }
 0x14d   :  { %v1131_v58 = vpop.f32.mrb[16].mxu0  ;;  %v3226_v62 = vmax.f32 %v1128_v15, %v2714_v3  ;;  %v1324_v17 = vpop.f32.mrb[16].mxu1 }
 0x14e   :  { %v15780_v6 = vpack.c.bf16 %v3225_v44, %v3209_v12  ;;  %v1132_v24 = vadd.f32 %v1131_v58, %v15629_v51  ;;  %v1133_v18 = vpop.f32.mrb[17].mxu0  ;;  %v15785_v59 = vpack.c.bf16 %v3227_v2, %v3211_v8  ;;  %v1325_v1 = vadd.f32 %v1324_v17, %v15632_v33  ;;  %v1326_v56 = vpop.f32.mrb[17].mxu1 }
 0x14f   :  { %v1135_v13 = vpop.f32.mrb[18].mxu0  ;;  %v15788_v50 = vpack.c.bf16 %v3226_v62, %v3210_v19  ;;  %v1134_v11 = vadd.f32 %v1133_v18, %v15639_v35  ;;  %v1328_v58 = vpop.f32.mrb[18].mxu1  ;;  %v3212_v8 = vmax.f32 %v15762_v49, %v2700_v57  ;;  %v3228_v62 = vmax.f32 %v1321_v5, %v2716_v0 }
 0x150   :  { %19146 = vst [vmem:[#allocation21_spill] sm:$0xff] %v15780_v6  ;;  %19147 = vst [vmem:[#allocation22_spill] sm:$0xff] %v15785_v59  ;;  %v2729_v15 = vmul.f32 0.01, %v1132_v24  ;;  %v1136_v39 = vadd.f32 %v1135_v13, %v15629_v51  ;;  %v1137_v3 = vpop.f32.mrb[19].mxu0  ;;  %v1329_v44 = vadd.f32 %v1328_v58, %v15632_v33  ;;  %v1330_v17 = vpop.f32.mrb[19].mxu1  ;;  %v1327_v36 = vadd.f32 %v1326_v56, %v15646_v63 }
 0x151   :  { %19148 = vst [vmem:[#allocation23_spill] sm:$0xff] %v15788_v50  ;;  %v2731_v2 = vmul.f32 0.01, %v1325_v1  ;;  %v15231_v13 = vld [vmem:[%s18911_s0 + $0x78] sm:$0xff]   ;;  %v1138_v26 = vadd.f32 %v1137_v3, %v15639_v35  ;;  %v2730_v12 = vmul.f32 0.01, %v1134_v11  ;;  %v1331_v6 = vadd.f32 %v1330_v17, %v15646_v63 }
 0x152   :  { %v2745_v18 = vmul.f32 0.01, %v1136_v39  ;;  %1626 = vmatmul.mubr.bf16.gmra.mrb[124].mxu0 %v15231_v13  ;;  %v3241_v59 = vmax.f32 %v1132_v24, %v2729_v15  ;;  %v2747_v58 = vmul.f32 0.01, %v1329_v44  ;;  %1819 = vmatmul.mubr.bf16.gmra.mrb[124].mxu1 %v15231_v13  ;;  %v15810_v22 = vpack.c.bf16 %v3228_v62, %v3212_v8  ;;  %v15815_v56 = vld [vmem:[#allocation2 + $0x2b0] sm:$0xff] }
 0x153   :  { %1861 = vmatprep.mubr.bf16.mxu0 %v19149_v40  ;;  %v3243_v19 = vmax.f32 %v1325_v1, %v2731_v2  ;;  %2054 = vmatprep.mubr.bf16.mxu1 %v19149_v40  ;;  %v2746_v4 = vmul.f32 0.01, %v1138_v26  ;;  %v3242_v16 = vmax.f32 %v1134_v11, %v2730_v12  ;;  %v2732_v57 = vmul.f32 0.01, %v1327_v36  ;;  %v15817_v1 = vld [vmem:[#allocation2 + $0x2f0] sm:$0xff] }
 0x154   :  { %v3257_v37 = vmax.f32 %v1136_v39, %v2745_v18  ;;  %v3259_v50 = vmax.f32 %v1329_v44, %v2747_v58  ;;  %19150 = vst [vmem:[#allocation24_spill] sm:$0xff] %v15810_v22  ;;  %v2748_v39 = vmul.f32 0.01, %v1331_v6 }
 0x155   :  { %v1141_v3 = vpop.f32.mrb[20].mxu0  ;;  %v1334_v0 = vpop.f32.mrb[20].mxu1  ;;  %v3258_v15 = vmax.f32 %v1138_v26, %v2746_v4 }
 0x156   :  { %v15812_v49 = vpack.c.bf16 %v3257_v37, %v3241_v59  ;;  %v1142_v24 = vadd.f32 %v1141_v3, %v15629_v51  ;;  %v1143_v5 = vpop.f32.mrb[21].mxu0  ;;  %v15819_v2 = vpack.c.bf16 %v3259_v50, %v3243_v19  ;;  %v1335_v44 = vadd.f32 %v1334_v0, %v15632_v33  ;;  %v1336_v11 = vpop.f32.mrb[21].mxu1 }
 0x157   :  { %v1145_v12 = vpop.f32.mrb[22].mxu0  ;;  %v1144_v8 = vadd.f32 %v1143_v5, %v15639_v35  ;;  %v3244_v37 = vmax.f32 %v1327_v36, %v2732_v57  ;;  %v1338_v62 = vpop.f32.mrb[22].mxu1  ;;  %v15824_v13 = vpack.c.bf16 %v3258_v15, %v3242_v16  ;;  %v3260_v58 = vmax.f32 %v1331_v6, %v2748_v39  ;;  %v15232_v36 = vld [vmem:[%s18911_s0] sm:$0xff]  }
 0x158   :  { %19151 = vst [vmem:[#allocation25_spill] sm:$0xff] %v15819_v2  ;;  %v2761_v59 = vmul.f32 0.01, %v1142_v24  ;;  %v1146_v17 = vadd.f32 %v1145_v12, %v15629_v51  ;;  %v1147_v18 = vpop.f32.mrb[23].mxu0  ;;  %v2763_v3 = vmul.f32 0.01, %v1335_v44  ;;  %v1339_v4 = vadd.f32 %v1338_v62, %v15632_v33 }
 0x159   :  { %v1340_v26 = vpop.f32.mrb[23].mxu1  ;;  %v1148_v50 = vadd.f32 %v1147_v18, %v15639_v35  ;;  %v2762_v19 = vmul.f32 0.01, %v1144_v8  ;;  %v15833_v5 = vpack.c.bf16 %v3260_v58, %v3244_v37  ;;  %v1337_v16 = vadd.f32 %v1336_v11, %v15646_v63 }
 0x15a   :  { %v2777_v0 = vmul.f32 0.01, %v1146_v17  ;;  %1862 = vmatmul.mubr.bf16.vlgmr.msra.gmra.mrb[128].mxu0 %v15232_v36  ;;  %v3273_v6 = vmax.f32 %v1142_v24, %v2761_v59  ;;  %v2779_v15 = vmul.f32 0.01, %v1339_v4  ;;  %2055 = vmatmul.mubr.bf16.vlgmr.msra.gmra.mrb[128].mxu1 %v15232_v36  ;;  %v19153_v39 = vcombine.low %v15550_v27, %v15552_v28 }
 0x15b   :  { %19152 = vst [vmem:[#allocation26_spill] sm:$0xff] %v15833_v5  ;;  %v2778_v62 = vmul.f32 0.01, %v1148_v50  ;;  %v3275_v18 = vmax.f32 %v1335_v44, %v2763_v3  ;;  %v19154_v57 = vcombine.low %v15554_v32, %v15558_v53  ;;  %1871 = vmatprep.mubr.bf16.mxu0 %v19149_v40  ;;  %v1341_v24 = vadd.f32 %v1340_v26, %v15646_v63 }
 0x15c   :  { %2216 = vmatpush1.bf16.msra.mxu0 %v19153_v39  ;;  %v3289_v2 = vmax.f32 %v1146_v17, %v2777_v0  ;;  %v2764_v11 = vmul.f32 0.01, %v1337_v16  ;;  %v3291_v37 = vmax.f32 %v1339_v4, %v2779_v15  ;;  %2064 = vmatprep.mubr.bf16.mxu1 %v19149_v40  ;;  %v19155_v27 = vcombine.high %v15661_v29, %v15663_v30 }
 0x15d   :  { %2409 = vmatpush1.bf16.msra.mxu1 %v19154_v57  ;;  %v1151_v59 = vpop.f32.mrb[24].mxu0  ;;  %v3274_v28 = vmax.f32 %v1144_v8, %v2762_v19  ;;  %v3290_v44 = vmax.f32 %v1148_v50, %v2778_v62  ;;  %v1344_v53 = vpop.f32.mrb[24].mxu1  ;;  %v19156_v3 = vcombine.high %v15673_v60, %v15675_v61  ;;  %v2780_v4 = vmul.f32 0.01, %v1341_v24  ;;  %v15862_v8 = vld [vmem:[#allocation2 + $0x2b8] sm:$0xff] }
 0x15e   :  { %2217 = vmatprep.subr.bf16.mxu0 %v19155_v27  ;;  %v15850_v17 = vpack.c.bf16 %v3289_v2, %v3273_v6  ;;  %v1152_v32 = vadd.f32 %v1151_v59, %v15629_v51  ;;  %v1153_v58 = vpop.f32.mrb[25].mxu0  ;;  %v3276_v26 = vmax.f32 %v1337_v16, %v2764_v11  ;;  %v15856_v0 = vpack.c.bf16 %v3291_v37, %v3275_v18  ;;  %v1346_v57 = vpop.f32.mrb[25].mxu1  ;;  %v15864_v50 = vld [vmem:[#allocation2 + $0x2f8] sm:$0xff] }
 0x15f   :  { %2410 = vmatprep.subr.bf16.mxu1 %v19156_v3  ;;  %v1345_v36 = vadd.f32 %v1344_v53, %v15632_v33  ;;  %v1155_v15 = vpop.f32.mrb[26].mxu0  ;;  %v19158_v2 = vcombine.low %v15661_v29, %v15663_v30  ;;  %v15866_v19 = vpack.c.bf16 %v3290_v44, %v3274_v28  ;;  %v1154_v6 = vadd.f32 %v1153_v58, %v15639_v35  ;;  %v1348_v62 = vpop.f32.mrb[26].mxu1  ;;  %v15887_v53 = vld [vmem:[#allocation2 + $0x370] sm:$0xff]  ;;  %v15233_v3 = vld [vmem:[%s18911_s0 + $0x8] sm:$0xff]  }
 0x160   :  { %19157 = vst [vmem:[#allocation27_spill] sm:$0xff] %v15856_v0  ;;  %v2793_v39 = vmul.f32 0.01, %v1152_v32  ;;  %v1156_v16 = vadd.f32 %v1155_v15, %v15629_v51  ;;  %v1157_v18 = vpop.f32.mrb[27].mxu0  ;;  %v19159_v11 = vcombine.low %v15673_v60, %v15675_v61  ;;  %v19160_v29 = vcombine.high %v15691_v9, %v15693_v10  ;;  %v1350_v28 = vpop.f32.mrb[27].mxu1  ;;  %v15885_v61 = vld [vmem:[#allocation2 + $0x330] sm:$0xff] }
 0x161   :  { %2218 = vmatpush1.bf16.msra.mxu0 %v19158_v2  ;;  %v3292_v30 = vmax.f32 %v1341_v24, %v2780_v4  ;;  %v15877_v37 = vadd.f32 %v1346_v57, %v15646_v63  ;;  %v2795_v59 = vmul.f32 0.01, %v1345_v36  ;;  %v1349_v27 = vadd.f32 %v1348_v62, %v15632_v33 }
 0x162   :  { %2411 = vmatpush1.bf16.msra.mxu1 %v19159_v11  ;;  %2219 = vmatprep.subr.bf16.mxu0 %v19160_v29  ;;  %v19161_v44 = vcombine.high %v15696_v14, %v15700_v20  ;;  %v1158_v24 = vadd.f32 %v1157_v18, %v15639_v35  ;;  %v2809_v58 = vmul.f32 0.01, %v1156_v16  ;;  %v2794_v57 = vmul.f32 0.01, %v1154_v6 }
 0x163   :  { %1872 = vmatmul.mubr.bf16.gmra.mrb[132].mxu0 %v15233_v3  ;;  %v15895_v15 = vpack.c.bf16 %v3292_v30, %v3276_v26  ;;  %v2811_v2 = vmul.f32 0.01, %v1349_v27  ;;  %2065 = vmatmul.mubr.bf16.gmra.mrb[132].mxu1 %v15233_v3  ;;  %v1351_v11 = vadd.f32 %v1350_v28, %v15646_v63  ;;  %v3305_v29 = vmax.f32 %v1152_v32, %v2793_v39 }
 0x164   :  { %2412 = vmatprep.subr.bf16.mxu1 %v19161_v44  ;;  %1881 = vmatprep.mubr.bf16.mxu0 %v19149_v40  ;;  %v2810_v18 = vmul.f32 0.01, %v1158_v24  ;;  %v3307_v44 = vmax.f32 %v1345_v36, %v2795_v59  ;;  %v3321_v12 = vmax.f32 %v1156_v16, %v2809_v58  ;;  %v19163_v4 = vcombine.low %v15691_v9, %v15693_v10  ;;  %v15924_v58 = vld [vmem:[#allocation2 + $0x338] sm:$0xff] }
 0x165   :  { %19162 = vst [vmem:[#allocation28_spill] sm:$0xff] %v15895_v15  ;;  %2074 = vmatprep.mubr.bf16.mxu1 %v19149_v40  ;;  %v2796_v26 = vmul.f32 0.01, %v15877_v37  ;;  %v3323_v30 = vmax.f32 %v1349_v27, %v2811_v2  ;;  %v1161_v3 = vpop.f32.mrb[28].mxu0  ;;  %v19164_v60 = vcombine.low %v15696_v14, %v15700_v20  ;;  %v19165_v28 = vcombine.high %v15737_v42, %v15739_v38  ;;  %v1354_v10 = vpop.f32.mrb[28].mxu1 }
 0x166   :  { %2220 = vmatpush1.bf16.msra.mxu0 %v19163_v4  ;;  %v3306_v32 = vmax.f32 %v1154_v6, %v2794_v57  ;;  %v3322_v36 = vmax.f32 %v1158_v24, %v2810_v18  ;;  %v2812_v39 = vmul.f32 0.01, %v1351_v11  ;;  %v15912_v16 = vpack.c.bf16 %v3321_v12, %v3305_v29  ;;  %v1163_v59 = vpop.f32.mrb[29].mxu0  ;;  %v1356_v24 = vpop.f32.mrb[29].mxu1  ;;  %v15926_v4 = vld [vmem:[#allocation2 + $0x378] sm:$0xff] }
 0x167   :  { %2413 = vmatpush1.bf16.msra.mxu1 %v19164_v60  ;;  %2221 = vmatprep.subr.bf16.mxu0 %v19165_v28  ;;  %v1162_v9 = vadd.f32 %v1161_v3, %v15629_v51  ;;  %v19166_v27 = vcombine.high %v15749_v31, %v15751_v55  ;;  %v3308_v20 = vmax.f32 %v15877_v37, %v2796_v26  ;;  %v1165_v12 = vpop.f32.mrb[30].mxu0  ;;  %v1358_v3 = vpop.f32.mrb[30].mxu1  ;;  %v18956_v5 = vsub.s32 5, %v15601_v43 }
 0x168   :  { %v15921_v60 = vpack.c.bf16 %v3323_v30, %v3307_v44  ;;  %v1355_v6 = vadd.f32 %v1354_v10, %v15632_v33  ;;  %v15928_v57 = vpack.c.bf16 %v3322_v36, %v3306_v32  ;;  %v1164_v2 = vadd.f32 %v1163_v59, %v15639_v35  ;;  %v1167_v28 = vpop.f32.mrb[31].mxu0  ;;  %v1360_v32 = vpop.f32.mrb[31].mxu1 }
 0x169   :  { %2414 = vmatprep.subr.bf16.mxu1 %v19166_v27  ;;  %v2825_v18 = vmul.f32 0.01, %v1162_v9  ;;  %v1166_v29 = vadd.f32 %v1165_v12, %v15629_v51  ;;  %v19168_v37 = vcombine.low %v15737_v42, %v15739_v38  ;;  %v3324_v44 = vmax.f32 %v1351_v11, %v2812_v39  ;;  %v15234_v39 = vld [vmem:[%s18911_s0 + $0x10] sm:$0xff]  }
 0x16a   :  { %19167 = vst [vmem:[#allocation29_spill] sm:$0xff] %v15921_v60  ;;  %v15936_v26 = vadd.f32 %v1356_v24, %v15646_v63  ;;  %v2827_v30 = vmul.f32 0.01, %v1355_v6  ;;  %v1359_v10 = vadd.f32 %v1358_v3, %v15632_v33  ;;  %v19169_v36 = vcombine.low %v15749_v31, %v15751_v55 }
 0x16b   :  { %2222 = vmatpush1.bf16.msra.mxu0 %v19168_v37  ;;  %v19170_v59 = vcombine.high %v15769_v21, %v15771_v7  ;;  %v12213_v42 = vcombine.high %v15885_v61, %v15887_v53  ;;  %v1168_v38 = vadd.f32 %v1167_v28, %v15639_v35  ;;  %v2841_v11 = vmul.f32 0.01, %v1166_v29  ;;  %2075 = vmatmul.mubr.bf16.gmra.mrb[136].mxu1 %v15234_v39  ;;  %v15961_v28 = vld [vmem:[#allocation2 + $0x3b0] sm:$0xff] }
 0x16c   :  { %2415 = vmatpush1.bf16.msra.mxu1 %v19169_v36  ;;  %1882 = vmatmul.mubr.bf16.gmra.mrb[136].mxu0 %v15234_v39  ;;  %v19171_v27 = vcombine.high %v15774_v41, %v15778_v52  ;;  %v2826_v55 = vmul.f32 0.01, %v1164_v2  ;;  %v15956_v24 = vpack.c.bf16 %v3324_v44, %v3308_v20  ;;  %v2843_v12 = vmul.f32 0.01, %v1359_v10  ;;  %v15963_v37 = vld [vmem:[#allocation2 + $0x3f0] sm:$0xff] }
 0x16d   :  { %2223 = vmatprep.subr.bf16.mxu0 %v19170_v59  ;;  %1891 = vmatprep.mubr.bf16.mxu0 %v19149_v40  ;;  %v12215_v3 = vcombine.high %v15924_v58, %v15926_v4  ;;  %v2842_v36 = vmul.f32 0.01, %v1168_v38  ;;  %v1361_v59 = vadd.f32 %v1360_v32, %v15646_v63  ;;  %v3339_v14 = vmax.f32 %v1355_v6, %v2827_v30  ;;  %v1171_v62 = vpop.f32.mrb[32].mxu0 }
 0x16e   :  { %2416 = vmatprep.subr.bf16.mxu1 %v19171_v27  ;;  %19172 = vst [vmem:[#allocation30_spill] sm:$0xff] %v15956_v24  ;;  %v3337_v27 = vmax.f32 %v1162_v9, %v2825_v18  ;;  %v3353_v31 = vmax.f32 %v1166_v29, %v2841_v11  ;;  %2084 = vmatprep.mubr.bf16.mxu1 %v19149_v40  ;;  %v2828_v44 = vmul.f32 0.01, %v15936_v26  ;;  %v1173_v30 = vpop.f32.mrb[33].mxu0 }
 0x16f   :  { %v19173_v20 = vcombine.low %v15769_v21, %v15771_v7  ;;  %v3355_v39 = vmax.f32 %v1359_v10, %v2843_v12  ;;  %v19174_v60 = vcombine.low %v15774_v41, %v15778_v52  ;;  %v19175_v32 = vcombine.high %v15815_v56, %v15817_v1  ;;  %v1364_v21 = vpop.f32.mrb[32].mxu1  ;;  %v1175_v11 = vpop.f32.mrb[34].mxu0 }
 0x170   :  { %v3338_v9 = vmax.f32 %v1164_v2, %v2826_v55  ;;  %v3354_v6 = vmax.f32 %v1168_v38, %v2842_v36  ;;  %v2844_v18 = vmul.f32 0.01, %v1361_v59  ;;  %v15977_v29 = vpack.c.bf16 %v3353_v31, %v3337_v27  ;;  %v1366_v38 = vpop.f32.mrb[33].mxu1  ;;  %v15989_v31 = vld [vmem:[#allocation2 + $0x3b8] sm:$0xff] }
 0x171   :  { %2224 = vmatpush1.bf16.msra.mxu0 %v19173_v20  ;;  %2417 = vmatpush1.bf16.msra.mxu1 %v19174_v60  ;;  %v1172_v7 = vadd.f32 %v1171_v62, %v15629_v51  ;;  %v19176_v10 = vcombine.high %v15862_v8, %v15864_v50  ;;  %v12228_v52 = vcombine.low %v15961_v28, %v15963_v37  ;;  %v15991_v62 = vld [vmem:[#allocation2 + $0x3f8] sm:$0xff]  ;;  %v1368_v20 = vpop.f32.mrb[34].mxu1 }
 0x172   :  { %2225 = vmatprep.subr.bf16.mxu0 %v19175_v32  ;;  %v3340_v41 = vmax.f32 %v15936_v26, %v2828_v44  ;;  %v15986_v60 = vpack.c.bf16 %v3355_v39, %v3339_v14  ;;  %v1365_v2 = vadd.f32 %v1364_v21, %v15632_v33  ;;  %v15993_v55 = vpack.c.bf16 %v3354_v6, %v3338_v9  ;;  %v1177_v32 = vpop.f32.mrb[35].mxu0  ;;  %v1370_v9 = vpop.f32.mrb[35].mxu1 }
 0x173   :  { %2418 = vmatprep.subr.bf16.mxu1 %v19176_v10  ;;  %v1174_v12 = vadd.f32 %v1173_v30, %v15639_v35  ;;  %v2857_v36 = vmul.f32 0.01, %v1172_v7  ;;  %v1176_v27 = vadd.f32 %v1175_v11, %v15629_v51  ;;  %v19178_v14 = vcombine.low %v15815_v56, %v15817_v1  ;;  %v15235_v1 = vld [vmem:[%s18911_s0 + $0x18] sm:$0xff]  }
 0x174   :  { %19177 = vst [vmem:[#allocation31_spill] sm:$0xff] %v15986_v60  ;;  %v3356_v26 = vmax.f32 %v1361_v59, %v2844_v18  ;;  %v16001_v44 = vadd.f32 %v1366_v38, %v15646_v63  ;;  %v2859_v39 = vmul.f32 0.01, %v1365_v2  ;;  %v1369_v21 = vadd.f32 %v1368_v20, %v15632_v33  ;;  %1892 = vmatmul.mubr.bf16.gmra.mrb[140].mxu0 %v15235_v1 }
 0x175   :  { %2226 = vmatpush1.bf16.msra.mxu0 %v19178_v14  ;;  %v19179_v6 = vcombine.low %v15862_v8, %v15864_v50  ;;  %v12229_v30 = vcombine.high %v15961_v28, %v15963_v37  ;;  %v1178_v10 = vadd.f32 %v1177_v32, %v15639_v35  ;;  %v2873_v56 = vmul.f32 0.01, %v1176_v27  ;;  %2085 = vmatmul.mubr.bf16.gmra.mrb[140].mxu1 %v15235_v1 }
 0x176   :  { %2227 = vmatprep.subr.bf16.mxu0 %v12213_v42  ;;  %v12231_v59 = vcombine.high %v15989_v31, %v15991_v62  ;;  %v2858_v18 = vmul.f32 0.01, %v1174_v12  ;;  %v16015_v38 = vpack.c.bf16 %v3356_v26, %v3340_v41  ;;  %v2875_v8 = vmul.f32 0.01, %v1369_v21  ;;  %1901 = vmatprep.mubr.bf16.mxu0 %v19149_v40 }
 0x177   :  { %2419 = vmatpush1.bf16.msra.mxu1 %v19179_v6  ;;  %v12230_v50 = vcombine.low %v15989_v31, %v15991_v62  ;;  %v2874_v42 = vmul.f32 0.01, %v1178_v10  ;;  %v1371_v11 = vadd.f32 %v1370_v9, %v15646_v63  ;;  %v3369_v20 = vmax.f32 %v1172_v7, %v2857_v36  ;;  %2094 = vmatprep.mubr.bf16.mxu1 %v19149_v40  ;;  %v1181_v6 = vpop.f32.mrb[36].mxu0  ;;  %v14386_v31 = vld [vmem:[#allocation4 + $0x4] ss:$16 sps:$4 sm:$0xff]  }
 0x178   :  { %2420 = vmatprep.subr.bf16.mxu1 %v12215_v3  ;;  %19180 = vst [vmem:[#allocation32_spill] sm:$0xff] %v16015_v38  ;;  %v3371_v32 = vmax.f32 %v1365_v2, %v2859_v39  ;;  %v3385_v14 = vmax.f32 %v1176_v27, %v2873_v56  ;;  %v19181_v3 = vcombine.low %v15885_v61, %v15887_v53  ;;  %v2860_v41 = vmul.f32 0.01, %v16001_v44  ;;  %v1374_v39 = vpop.f32.mrb[36].mxu1  ;;  %v1183_v61 = vpop.f32.mrb[37].mxu0 }
 0x179   :  { %v3387_v26 = vmax.f32 %v1369_v21, %v2875_v8  ;;  %v19182_v1 = vcombine.low %v15924_v58, %v15926_v4  ;;  %v3370_v62 = vmax.f32 %v1174_v12, %v2858_v18  ;;  %v3386_v7 = vmax.f32 %v1178_v10, %v2874_v42  ;;  %v14389_v53 = vld [vmem:[#allocation4 + $0xc] ss:$16 sps:$4 sm:$0xff]   ;;  %v1376_v4 = vpop.f32.mrb[37].mxu1 }
 0x17a   :  { %2228 = vmatpush1.bf16.msra.mxu0 %v19181_v3  ;;  %v2876_v2 = vmul.f32 0.01, %v1371_v11  ;;  %v16029_v36 = vpack.c.bf16 %v3385_v14, %v3369_v20  ;;  %v1182_v27 = vadd.f32 %v1181_v6, %v15629_v51  ;;  %v3372_v21 = vmax.f32 %v16001_v44, %v2860_v41  ;;  %v1378_v8 = vpop.f32.mrb[38].mxu1 }
 0x17b   :  { %2421 = vmatpush1.bf16.msra.mxu1 %v19182_v1  ;;  %2229 = vmatprep.subr.bf16.mxu0 %v12229_v30  ;;  %v16033_v9 = vpack.c.bf16 %v3387_v26, %v3371_v32  ;;  %v1375_v58 = vadd.f32 %v1374_v39, %v15632_v33  ;;  %v1185_v30 = vpop.f32.mrb[38].mxu0  ;;  %v16036_v56 = vpack.c.bf16 %v3386_v7, %v3370_v62  ;;  %v1380_v14 = vpop.f32.mrb[39].mxu1  ;;  %v15236_v26 = vld [vmem:[%s18911_s0 + $0x20] sm:$0xff]  }
 0x17c   :  { %2422 = vmatprep.subr.bf16.mxu1 %v12231_v59  ;;  %v1184_v12 = vadd.f32 %v1183_v61, %v15639_v35  ;;  %v2889_v10 = vmul.f32 0.01, %v1182_v27  ;;  %v1186_v18 = vadd.f32 %v1185_v30, %v15629_v51  ;;  %v1187_v42 = vpop.f32.mrb[39].mxu0  ;;  %v3388_v44 = vmax.f32 %v1371_v11, %v2876_v2  ;;  %1902 = vmatmul.mubr.bf16.gmra.mrb[144].mxu0 %v15236_v26 }
 0x17d   :  { %19183 = vst [vmem:[#allocation33_spill] sm:$0xff] %v16033_v9  ;;  %v1377_v59 = vadd.f32 %v1376_v4, %v15646_v63  ;;  %v2891_v20 = vmul.f32 0.01, %v1375_v58  ;;  %v1379_v32 = vadd.f32 %v1378_v8, %v15632_v33  ;;  %v1188_v3 = vadd.f32 %v1187_v42, %v15639_v35  ;;  %2095 = vmatmul.mubr.bf16.gmra.mrb[144].mxu1 %v15236_v26  ;;  %v1191_v2 = vpop.f32.mrb[40].mxu0  ;;  %v1384_v30 = vpop.f32.mrb[40].mxu1 }
 0x17e   :  { %2230 = vmatpush1.bf16.msra.mxu0 %v12228_v52  ;;  %v2905_v41 = vmul.f32 0.01, %v1186_v18  ;;  %v2890_v28 = vmul.f32 0.01, %v1184_v12  ;;  %v16049_v37 = vpack.c.bf16 %v3388_v44, %v3372_v21  ;;  %1911 = vmatprep.mubr.bf16.mxu0 %v19149_v40  ;;  %v3401_v6 = vmax.f32 %v1182_v27, %v2889_v10  ;;  %v1193_v8 = vpop.f32.mrb[41].mxu0 }
 0x17f   :  { %2423 = vmatpush1.bf16.msra.mxu1 %v12230_v50  ;;  %5439 = vmatprep.subr.bf16.mxu0 %v14386_v31  ;;  %v2907_v52 = vmul.f32 0.01, %v1379_v32  ;;  %v2906_v11 = vmul.f32 0.01, %v1188_v3  ;;  %v1381_v50 = vadd.f32 %v1380_v14, %v15646_v63  ;;  %v3403_v1 = vmax.f32 %v1375_v58, %v2891_v20  ;;  %v1386_v58 = vpop.f32.mrb[41].mxu1  ;;  %v1195_v10 = vpop.f32.mrb[42].mxu0 }
 0x180   :  { %6211 = vmatprep.subr.bf16.mxu1 %v14389_v53  ;;  %19184 = vst [vmem:[#allocation34_spill] sm:$0xff] %v16049_v37  ;;  %v3417_v31 = vmax.f32 %v1186_v18, %v2905_v41  ;;  %2104 = vmatprep.mubr.bf16.mxu1 %v19149_v40  ;;  %v2892_v62 = vmul.f32 0.01, %v1377_v59  ;;  %v3402_v39 = vmax.f32 %v1184_v12, %v2890_v28  ;;  %v1388_v14 = vpop.f32.mrb[42].mxu1 }
 0x181   :  { %v3419_v7 = vmax.f32 %v1379_v32, %v2907_v52  ;;  %v3418_v61 = vmax.f32 %v1188_v3, %v2906_v11  ;;  %v2908_v53 = vmul.f32 0.01, %v1381_v50  ;;  %v1192_v4 = vadd.f32 %v1191_v2, %v15629_v51  ;;  %v1197_v3 = vpop.f32.mrb[43].mxu0  ;;  %v1390_v52 = vpop.f32.mrb[43].mxu1 }
 0x182   :  { %v16054_v21 = vpack.c.bf16 %v3417_v31, %v3401_v6  ;;  %v3404_v42 = vmax.f32 %v1377_v59, %v2892_v62  ;;  %v1385_v27 = vadd.f32 %v1384_v30, %v15632_v33  ;;  %v1194_v20 = vadd.f32 %v1193_v8, %v15639_v35 }
 0x183   :  { %v16057_v44 = vpack.c.bf16 %v3419_v7, %v3403_v1  ;;  %v16060_v18 = vpack.c.bf16 %v3418_v61, %v3402_v39  ;;  %v2921_v12 = vmul.f32 0.01, %v1192_v4  ;;  %v1196_v32 = vadd.f32 %v1195_v10, %v15629_v51  ;;  %v15237_v1 = vld [vmem:[%s18911_s0 + $0x28] sm:$0xff]  }
 0x184   :  { %v3420_v41 = vmax.f32 %v1381_v50, %v2908_v53  ;;  %v1387_v26 = vadd.f32 %v1386_v58, %v15646_v63  ;;  %v2923_v28 = vmul.f32 0.01, %v1385_v27  ;;  %v1389_v59 = vadd.f32 %v1388_v14, %v15632_v33  ;;  %1912 = vmatmul.mubr.bf16.gmra.mrb[148].mxu0 %v15237_v1 }
 0x185   :  { %19185 = vst [vmem:[#allocation35_spill] sm:$0xff] %v16057_v44  ;;  %v1198_v11 = vadd.f32 %v1197_v3, %v15639_v35  ;;  %v2937_v6 = vmul.f32 0.01, %v1196_v32  ;;  %v2922_v31 = vmul.f32 0.01, %v1194_v20  ;;  %2105 = vmatmul.mubr.bf16.gmra.mrb[148].mxu1 %v15237_v1  ;;  %1921 = vmatprep.mubr.bf16.mxu0 %v19149_v40  ;;  %v1391_v2 = vadd.f32 %v1390_v52, %v15646_v63  ;;  %v1201_v58 = vpop.f32.mrb[44].mxu0 }
 0x186   :  { %v16070_v62 = vpack.c.bf16 %v3420_v41, %v3404_v42  ;;  %v2939_v7 = vmul.f32 0.01, %v1389_v59  ;;  %v3433_v39 = vmax.f32 %v1192_v4, %v2921_v12  ;;  %v3435_v61 = vmax.f32 %v1385_v27, %v2923_v28  ;;  %2114 = vmatprep.mubr.bf16.mxu1 %v19149_v40  ;;  %v1394_v1 = vpop.f32.mrb[44].mxu1  ;;  %v1203_v44 = vpop.f32.mrb[45].mxu0 }
 0x187   :  { %v2938_v50 = vmul.f32 0.01, %v1198_v11  ;;  %v3449_v53 = vmax.f32 %v1196_v32, %v2937_v6  ;;  %v2924_v30 = vmul.f32 0.01, %v1387_v26  ;;  %v3434_v10 = vmax.f32 %v1194_v20, %v2922_v31  ;;  %v1396_v27 = vpop.f32.mrb[45].mxu1  ;;  %v1205_v12 = vpop.f32.mrb[46].mxu0 }
 0x188   :  { %19186 = vst [vmem:[#allocation36_spill] sm:$0xff] %v16070_v62  ;;  %v3451_v8 = vmax.f32 %v1389_v59, %v2939_v7  ;;  %v2940_v3 = vmul.f32 0.01, %v1391_v2  ;;  %v1202_v41 = vadd.f32 %v1201_v58, %v15629_v51  ;;  %v1395_v4 = vadd.f32 %v1394_v1, %v15632_v33  ;;  %v1398_v52 = vpop.f32.mrb[46].mxu1 }
 0x189   :  { %v3450_v14 = vmax.f32 %v1198_v11, %v2938_v50  ;;  %v16075_v42 = vpack.c.bf16 %v3449_v53, %v3433_v39  ;;  %v3436_v62 = vmax.f32 %v1387_v26, %v2924_v30  ;;  %v1204_v28 = vadd.f32 %v1203_v44, %v15639_v35  ;;  %v1207_v11 = vpop.f32.mrb[47].mxu0  ;;  %v1400_v50 = vpop.f32.mrb[47].mxu1  ;;  %v15238_v53 = vld [vmem:[%s18911_s0 + $0x30] sm:$0xff]  }
 0x18a   :  { %v16078_v9 = vpack.c.bf16 %v3451_v8, %v3435_v61  ;;  %v2953_v20 = vmul.f32 0.01, %v1202_v41  ;;  %v1206_v59 = vadd.f32 %v1205_v12, %v15629_v51  ;;  %v3452_v6 = vmax.f32 %v1391_v2, %v2940_v3 }
 0x18b   :  { %v16081_v32 = vpack.c.bf16 %v3450_v14, %v3434_v10  ;;  %v1397_v31 = vadd.f32 %v1396_v27, %v15646_v63  ;;  %v2955_v7 = vmul.f32 0.01, %v1395_v4  ;;  %v1399_v26 = vadd.f32 %v1398_v52, %v15632_v33 }
 0x18c   :  { %19187 = vst [vmem:[#allocation37_spill] sm:$0xff] %v16078_v9  ;;  %v1208_v39 = vadd.f32 %v1207_v11, %v15639_v35  ;;  %v2969_v61 = vmul.f32 0.01, %v1206_v59  ;;  %1922 = vmatmul.mubr.bf16.gmra.mrb[152].mxu0 %v15238_v53  ;;  %v2954_v44 = vmul.f32 0.01, %v1204_v28  ;;  %v16091_v30 = vpack.c.bf16 %v3452_v6, %v3436_v62 }
 0x18d   :  { %v2971_v8 = vmul.f32 0.01, %v1399_v26  ;;  %2115 = vmatmul.mubr.bf16.gmra.mrb[152].mxu1 %v15238_v53  ;;  %1931 = vmatprep.mubr.bf16.mxu0 %v19149_v40  ;;  %v1401_v58 = vadd.f32 %v1400_v50, %v15646_v63  ;;  %v3465_v10 = vmax.f32 %v1202_v41, %v2953_v20  ;;  %v3467_v14 = vmax.f32 %v1395_v4, %v2955_v7  ;;  %v1211_v12 = vpop.f32.mrb[48].mxu0  ;;  %v1404_v53 = vpop.f32.mrb[48].mxu1 }
 0x18e   :  { %19188 = vst [vmem:[#allocation38_spill] sm:$0xff] %v16091_v30  ;;  %v2970_v2 = vmul.f32 0.01, %v1208_v39  ;;  %v3481_v3 = vmax.f32 %v1206_v59, %v2969_v61  ;;  %2124 = vmatprep.mubr.bf16.mxu1 %v19149_v40  ;;  %v2956_v1 = vmul.f32 0.01, %v1397_v31  ;;  %v3466_v52 = vmax.f32 %v1204_v28, %v2954_v44  ;;  %v1213_v30 = vpop.f32.mrb[49].mxu0 }
 0x18f   :  { %v3483_v27 = vmax.f32 %v1399_v26, %v2971_v8  ;;  %v2972_v9 = vmul.f32 0.01, %v1401_v58  ;;  %v1212_v6 = vadd.f32 %v1211_v12, %v15629_v51  ;;  %v1405_v41 = vadd.f32 %v1404_v53, %v15632_v33  ;;  %v1406_v4 = vpop.f32.mrb[49].mxu1  ;;  %v1215_v20 = vpop.f32.mrb[50].mxu0 }
 0x190   :  { %v3482_v11 = vmax.f32 %v1208_v39, %v2970_v2  ;;  %v16096_v62 = vpack.c.bf16 %v3481_v3, %v3465_v10  ;;  %v3468_v37 = vmax.f32 %v1397_v31, %v2956_v1  ;;  %v1214_v7 = vadd.f32 %v1213_v30, %v15639_v35  ;;  %v1408_v50 = vpop.f32.mrb[50].mxu1  ;;  %v1217_v39 = vpop.f32.mrb[51].mxu0  ;;  %v15239_v3 = vld [vmem:[%s18911_s0 + $0x38] sm:$0xff]  }
 0x191   :  { %v16099_v60 = vpack.c.bf16 %v3483_v27, %v3467_v14  ;;  %v2985_v28 = vmul.f32 0.01, %v1212_v6  ;;  %v1216_v26 = vadd.f32 %v1215_v20, %v15629_v51  ;;  %v3484_v61 = vmax.f32 %v1401_v58, %v2972_v9  ;;  %v1410_v2 = vpop.f32.mrb[51].mxu1 }
 0x192   :  { %19189 = vst [vmem:[#allocation39_spill] sm:$0xff] %v16096_v62  ;;  %v16102_v59 = vpack.c.bf16 %v3482_v11, %v3466_v52  ;;  %v1407_v44 = vadd.f32 %v1406_v4, %v15646_v63  ;;  %v2987_v8 = vmul.f32 0.01, %v1405_v41  ;;  %v1409_v31 = vadd.f32 %v1408_v50, %v15632_v33 }
 0x193   :  { %19190 = vst [vmem:[#allocation40_spill] sm:$0xff] %v16099_v60  ;;  %v1218_v10 = vadd.f32 %v1217_v39, %v15639_v35  ;;  %v3001_v14 = vmul.f32 0.01, %v1216_v26  ;;  %v2986_v30 = vmul.f32 0.01, %v1214_v7  ;;  %v16112_v1 = vpack.c.bf16 %v3484_v61, %v3468_v37 }
 0x194   :  { %1932 = vmatmul.mubr.bf16.gmra.mrb[156].mxu0 %v15239_v3  ;;  %v3003_v27 = vmul.f32 0.01, %v1409_v31  ;;  %v1411_v58 = vadd.f32 %v1410_v2, %v15646_v63  ;;  %v3497_v12 = vmax.f32 %v1212_v6, %v2985_v28  ;;  %v3499_v52 = vmax.f32 %v1405_v41, %v2987_v8 }
 0x195   :  { %19191 = vst [vmem:[#allocation41_spill] sm:$0xff] %v16112_v1  ;;  %2125 = vmatmul.mubr.bf16.gmra.mrb[156].mxu1 %v15239_v3  ;;  %1941 = vmatprep.mubr.bf16.mxu0 %v19149_v40  ;;  %v3002_v9 = vmul.f32 0.01, %v1218_v10  ;;  %v3513_v11 = vmax.f32 %v1216_v26, %v3001_v14  ;;  %v2988_v53 = vmul.f32 0.01, %v1407_v44  ;;  %v1221_v20 = vpop.f32.mrb[52].mxu0  ;;  %v3498_v50 = vmax.f32 %v1214_v7, %v2986_v30 }
 0x196   :  { %2134 = vmatprep.mubr.bf16.mxu1 %v19149_v40  ;;  %v3515_v4 = vmax.f32 %v1409_v31, %v3003_v27  ;;  %v3004_v60 = vmul.f32 0.01, %v1411_v58  ;;  %v1222_v61 = vadd.f32 %v1221_v20, %v15629_v51  ;;  %v1414_v3 = vpop.f32.mrb[52].mxu1  ;;  %v1223_v1 = vpop.f32.mrb[53].mxu0 }
 0x197   :  { %v3514_v39 = vmax.f32 %v1218_v10, %v3002_v9  ;;  %v16117_v37 = vpack.c.bf16 %v3513_v11, %v3497_v12  ;;  %v3500_v38 = vmax.f32 %v1407_v44, %v2988_v53  ;;  %v1415_v6 = vadd.f32 %v1414_v3, %v15632_v33  ;;  %v1416_v41 = vpop.f32.mrb[53].mxu1  ;;  %v1225_v28 = vpop.f32.mrb[54].mxu0  ;;  %v15240_v11 = vld [vmem:[%s18911_s0 + $0x40] sm:$0xff]  }
 0x198   :  { %v16120_v24 = vpack.c.bf16 %v3515_v4, %v3499_v52  ;;  %v1224_v8 = vadd.f32 %v1223_v1, %v15639_v35  ;;  %v3017_v7 = vmul.f32 0.01, %v1222_v61  ;;  %v1226_v31 = vadd.f32 %v1225_v28, %v15629_v51  ;;  %v1418_v2 = vpop.f32.mrb[54].mxu1  ;;  %v1227_v10 = vpop.f32.mrb[55].mxu0 }
 0x199   :  { %19192 = vst [vmem:[#allocation42_spill] sm:$0xff] %v16117_v37  ;;  %v16123_v26 = vpack.c.bf16 %v3514_v39, %v3498_v50  ;;  %v3516_v14 = vmax.f32 %v1411_v58, %v3004_v60  ;;  %v1417_v30 = vadd.f32 %v1416_v41, %v15646_v63  ;;  %v3019_v27 = vmul.f32 0.01, %v1415_v6  ;;  %v1420_v9 = vpop.f32.mrb[55].mxu1 }
 0x19a   :  { %19193 = vst [vmem:[#allocation43_spill] sm:$0xff] %v16120_v24  ;;  %v1419_v44 = vadd.f32 %v1418_v2, %v15632_v33  ;;  %v1228_v12 = vadd.f32 %v1227_v10, %v15639_v35  ;;  %v3033_v52 = vmul.f32 0.01, %v1226_v31  ;;  %v3018_v1 = vmul.f32 0.01, %v1224_v8 }
 0x19b   :  { %19194 = vst [vmem:[#allocation44_spill] sm:$0xff] %v16123_v26  ;;  %v16133_v53 = vpack.c.bf16 %v3516_v14, %v3500_v38  ;;  %v1421_v58 = vadd.f32 %v1420_v9, %v15646_v63  ;;  %v3529_v20 = vmax.f32 %v1222_v61, %v3017_v7  ;;  %v3531_v50 = vmax.f32 %v1415_v6, %v3019_v27 }
 0x19c   :  { %1942 = vmatmul.mubr.bf16.gmra.mrb[160].mxu0 %v15240_v11  ;;  %v3035_v4 = vmul.f32 0.01, %v1419_v44  ;;  %v3034_v60 = vmul.f32 0.01, %v1228_v12  ;;  %v3545_v39 = vmax.f32 %v1226_v31, %v3033_v52  ;;  %v3020_v3 = vmul.f32 0.01, %v1417_v30 }
 0x19d   :  { %19195 = vst [vmem:[#allocation45_spill] sm:$0xff] %v16133_v53  ;;  %2135 = vmatmul.mubr.bf16.gmra.mrb[160].mxu1 %v15240_v11  ;;  %1951 = vmatprep.mubr.bf16.mxu0 %v19149_v40  ;;  %v1231_v28 = vpop.f32.mrb[56].mxu0  ;;  %v3530_v2 = vmax.f32 %v1224_v8, %v3018_v1  ;;  %v3036_v24 = vmul.f32 0.01, %v1421_v58  ;;  %v1424_v11 = vpop.f32.mrb[56].mxu1 }
 0x19e   :  { %2144 = vmatprep.mubr.bf16.mxu1 %v19149_v40  ;;  %v3547_v41 = vmax.f32 %v1419_v44, %v3035_v4  ;;  %v3546_v10 = vmax.f32 %v1228_v12, %v3034_v60  ;;  %v16138_v38 = vpack.c.bf16 %v3545_v39, %v3529_v20  ;;  %v1232_v14 = vadd.f32 %v1231_v28, %v15629_v51  ;;  %v1233_v53 = vpop.f32.mrb[57].mxu0  ;;  %v1426_v6 = vpop.f32.mrb[57].mxu1  ;;  %v15241_v39 = vld [vmem:[%s18911_s0 + $0x48] sm:$0xff]  }
 0x19f   :  { %v3532_v0 = vmax.f32 %v1417_v30, %v3020_v3  ;;  %v1425_v61 = vadd.f32 %v1424_v11, %v15632_v33  ;;  %v1235_v7 = vpop.f32.mrb[58].mxu0  ;;  %v1234_v27 = vadd.f32 %v1233_v53, %v15639_v35  ;;  %v1428_v9 = vpop.f32.mrb[58].mxu1  ;;  %v3548_v52 = vmax.f32 %v1421_v58, %v3036_v24 }
 0x1a0   :  { %19196 = vst [vmem:[#allocation46_spill] sm:$0xff] %v16138_v38  ;;  %v16141_v15 = vpack.c.bf16 %v3547_v41, %v3531_v50  ;;  %v16144_v31 = vpack.c.bf16 %v3546_v10, %v3530_v2  ;;  %v3049_v8 = vmul.f32 0.01, %v1232_v14  ;;  %v1236_v44 = vadd.f32 %v1235_v7, %v15629_v51  ;;  %v1237_v12 = vpop.f32.mrb[59].mxu0  ;;  %v1430_v60 = vpop.f32.mrb[59].mxu1 }
 0x1a1   :  { %v1427_v1 = vadd.f32 %v1426_v6, %v15646_v63  ;;  %v3051_v4 = vmul.f32 0.01, %v1425_v61  ;;  %v1429_v30 = vadd.f32 %v1428_v9, %v15632_v33  ;;  %v1238_v20 = vadd.f32 %v1237_v12, %v15639_v35 }
 0x1a2   :  { %19197 = vst [vmem:[#allocation47_spill] sm:$0xff] %v16141_v15  ;;  %19198 = vst [vmem:[#allocation48_spill] sm:$0xff] %v16144_v31  ;;  %v3065_v50 = vmul.f32 0.01, %v1236_v44  ;;  %v3050_v3 = vmul.f32 0.01, %v1234_v27  ;;  %v16155_v41 = vpack.c.bf16 %v3548_v52, %v3532_v0  ;;  %v1431_v2 = vadd.f32 %v1430_v60, %v15646_v63 }
 0x1a3   :  { %v3067_v24 = vmul.f32 0.01, %v1429_v30  ;;  %v3066_v28 = vmul.f32 0.01, %v1238_v20  ;;  %v3561_v10 = vmax.f32 %v1232_v14, %v3049_v8  ;;  %v3563_v11 = vmax.f32 %v1425_v61, %v3051_v4  ;;  %v14398_v31 = vld [vmem:[#allocation4 + $0x44] ss:$16 sps:$4 sm:$0xff]  }
 0x1a4   :  { %1952 = vmatmul.mubr.bf16.gmra.mrb[164].mxu0 %v15241_v39  ;;  %19199 = vst [vmem:[#allocation49_spill] sm:$0xff] %v16155_v41  ;;  %v3577_v6 = vmax.f32 %v1236_v44, %v3065_v50  ;;  %v3052_v7 = vmul.f32 0.01, %v1427_v1  ;;  %v3562_v53 = vmax.f32 %v1234_v27, %v3050_v3  ;;  %v3068_v52 = vmul.f32 0.01, %v1431_v2 }
 0x1a5   :  { %2145 = vmatmul.mubr.bf16.gmra.mrb[164].mxu1 %v15241_v39  ;;  %1961 = vmatprep.mubr.bf16.mxu0 %v19149_v40  ;;  %v3579_v9 = vmax.f32 %v1429_v30, %v3067_v24  ;;  %v1241_v12 = vpop.f32.mrb[60].mxu0  ;;  %v3578_v0 = vmax.f32 %v1238_v20, %v3066_v28  ;;  %v1434_v41 = vpop.f32.mrb[60].mxu1  ;;  %v18958_v14 = vsub.s32 7, %v15601_v43 }
 0x1a6   :  { %2154 = vmatprep.mubr.bf16.mxu1 %v19149_v40  ;;  %v16161_v15 = vpack.c.bf16 %v3577_v6, %v3561_v10  ;;  %v1242_v39 = vadd.f32 %v1241_v12, %v15629_v51  ;;  %v1243_v58 = vpop.f32.mrb[61].mxu0  ;;  %v1435_v8 = vadd.f32 %v1434_v41, %v15632_v33  ;;  %v1436_v44 = vpop.f32.mrb[61].mxu1  ;;  %v3564_v24 = vmax.f32 %v1427_v1, %v3052_v7  ;;  %v15242_v41 = vld [vmem:[%s18914_s3] sm:$0xff] }
 0x1a7   :  { %v16166_v61 = vpack.c.bf16 %v3579_v9, %v3563_v11  ;;  %v1245_v4 = vpop.f32.mrb[62].mxu0  ;;  %v16169_v30 = vpack.c.bf16 %v3578_v0, %v3562_v53  ;;  %v1244_v27 = vadd.f32 %v1243_v58, %v15639_v35  ;;  %v1438_v50 = vpop.f32.mrb[62].mxu1  ;;  %v3580_v28 = vmax.f32 %v1431_v2, %v3068_v52 }
 0x1a8   :  { %19200 = vst [vmem:[#allocation50_spill] sm:$0xff] %v16161_v15  ;;  %v3081_v60 = vmul.f32 0.01, %v1242_v39  ;;  %v1246_v20 = vadd.f32 %v1245_v4, %v15629_v51  ;;  %v1247_v3 = vpop.f32.mrb[63].mxu0  ;;  %v3083_v10 = vmul.f32 0.01, %v1435_v8  ;;  %v1439_v6 = vadd.f32 %v1438_v50, %v15632_v33 }
 0x1a9   :  { %19201 = vst [vmem:[#allocation51_spill] sm:$0xff] %v16166_v61  ;;  %19202 = vst [vmem:[#allocation52_spill] sm:$0xff] %v16169_v30  ;;  %v1440_v11 = vpop.f32.mrb[63].mxu1  ;;  %v19203_v53 = vsub.s32 4, %v15601_v43  ;;  %v1248_v58 = vadd.f32 %v1247_v3, %v15639_v35  ;;  %v15243_v51 = vld [vmem:[%s18911_s0 + $0x50] sm:$0xff]   ;;  %v16185_v2 = vpack.c.bf16 %v3580_v28, %v3564_v24  ;;  %v16188_v33 = vadd.f32 %v1436_v44, %v15646_v63 }
 0x1aa   :  { %v3097_v12 = vmul.f32 0.01, %v1246_v20  ;;  %v3082_v1 = vmul.f32 0.01, %v1244_v27  ;;  %v3099_v7 = vmul.f32 0.01, %v1439_v6  ;;  %v3593_v4 = vmax.f32 %v1242_v39, %v3081_v60 }
 0x1ab   :  { %v16179_v9 = vrot.slane %v15242_v41, %v19203_v53  ;;  %19204 = vst [vmem:[#allocation53_spill] sm:$0xff] %v16185_v2  ;;  %v19205_v0 = vsub.s32 6, %v15601_v43  ;;  %v3098_v35 = vmul.f32 0.01, %v1248_v58  ;;  %v16198_v3 = vrot.slane %v15242_v41, %v18956_v5 }
 0x1ac   :  { %1962 = vmatmul.mubr.bf16.gmra.mrb[168].mxu0 %v15243_v51  ;;  %v3609_v50 = vmax.f32 %v1246_v20, %v3097_v12  ;;  %v16202_v44 = vrot.slane %v15242_v41, %v18958_v14  ;;  %v3595_v24 = vmax.f32 %v1435_v8, %v3083_v10  ;;  %v3611_v28 = vmax.f32 %v1439_v6, %v3099_v7 }
 0x1ad   :  { %2155 = vmatmul.mubr.bf16.gmra.mrb[168].mxu1 %v15243_v51  ;;  %v16192_v52 = vrot.slane %v15242_v41, %v19205_v0  ;;  %1971 = vmatprep.mubr.bf16.mxu0 %v19149_v40  ;;  %v1477_v53 = vpop.f32.mrb[64].mxu0  ;;  %v3594_v51 = vmax.f32 %v1244_v27, %v3082_v1  ;;  %v3610_v0 = vmax.f32 %v1248_v58, %v3098_v35  ;;  %v1670_v60 = vpop.f32.mrb[64].mxu1  ;;  %v3084_v5 = vmul.f32 0.01, %v16188_v33 }
 0x1ae   :  { %2164 = vmatprep.mubr.bf16.mxu1 %v19149_v40  ;;  %v16204_v61 = vpack.c.bf16 %v3609_v50, %v3593_v4  ;;  %v1478_v39 = vadd.f32 %v1477_v53, %v16179_v9  ;;  %v1479_v20 = vpop.f32.mrb[65].mxu0  ;;  %v1441_v12 = vadd.f32 %v1440_v11, %v15646_v63  ;;  %v16209_v2 = vpack.c.bf16 %v3611_v28, %v3595_v24  ;;  %v1672_v14 = vpop.f32.mrb[65].mxu1  ;;  %v15244_v28 = vld [vmem:[%s18911_s0 + $0x58] sm:$0xff]  }
 0x1af   :  { %v1671_v41 = vadd.f32 %v1670_v60, %v16192_v52  ;;  %v1481_v8 = vpop.f32.mrb[66].mxu0  ;;  %v16212_v10 = vpack.c.bf16 %v3610_v0, %v3594_v51  ;;  %v1674_v58 = vpop.f32.mrb[66].mxu1  ;;  %v1480_v7 = vadd.f32 %v1479_v20, %v16198_v3  ;;  %v1673_v35 = vadd.f32 %v1672_v14, %v16202_v44 }
 0x1b0   :  { %19206 = vst [vmem:[#allocation54_spill] sm:$0xff] %v16204_v61  ;;  %19207 = vst [vmem:[#allocation55_spill] sm:$0xff] %v16209_v2  ;;  %v2605_v27 = vmul.f32 0.01, %v1478_v39  ;;  %v1482_v6 = vadd.f32 %v1481_v8, %v16179_v9  ;;  %v1483_v1 = vpop.f32.mrb[67].mxu0  ;;  %v1675_v11 = vadd.f32 %v1674_v58, %v16192_v52  ;;  %v1676_v4 = vpop.f32.mrb[67].mxu1  ;;  %v3596_v51 = vmax.f32 %v16188_v33, %v3084_v5 }
 0x1b1   :  { %19208 = vst [vmem:[#allocation56_spill] sm:$0xff] %v16212_v10  ;;  %v2607_v63 = vmul.f32 0.01, %v1671_v41  ;;  %v1484_v50 = vadd.f32 %v1483_v1, %v16198_v3  ;;  %v3100_v53 = vmul.f32 0.01, %v1441_v12  ;;  %v1677_v8 = vadd.f32 %v1676_v4, %v16202_v44 }
 0x1b2   :  { %v2621_v24 = vmul.f32 0.01, %v1482_v6  ;;  %v2606_v0 = vmul.f32 0.01, %v1480_v7  ;;  %v3117_v60 = vmax.f32 %v1478_v39, %v2605_v27  ;;  %v2623_v20 = vmul.f32 0.01, %v1675_v11 }
 0x1b3   :  { %v2622_v14 = vmul.f32 0.01, %v1484_v50  ;;  %v3119_v58 = vmax.f32 %v1671_v41, %v2607_v63  ;;  %v3612_v2 = vmax.f32 %v1441_v12, %v3100_v53  ;;  %v2608_v22 = vmul.f32 0.01, %v1673_v35 }
 0x1b4   :  { %1972 = vmatmul.mubr.bf16.gmra.mrb[172].mxu0 %v15244_v28  ;;  %v3133_v1 = vmax.f32 %v1482_v6, %v2621_v24  ;;  %v3135_v61 = vmax.f32 %v1675_v11, %v2623_v20  ;;  %v3118_v15 = vmax.f32 %v1480_v7, %v2606_v0  ;;  %v2624_v5 = vmul.f32 0.01, %v1677_v8 }
 0x1b5   :  { %2165 = vmatmul.mubr.bf16.gmra.mrb[172].mxu1 %v15244_v28  ;;  %1981 = vmatprep.mubr.bf16.mxu0 %v19149_v40  ;;  %v1487_v10 = vpop.f32.mrb[68].mxu0  ;;  %v3134_v30 = vmax.f32 %v1484_v50, %v2622_v14  ;;  %v1680_v27 = vpop.f32.mrb[68].mxu1  ;;  %v16229_v38 = vpack.c.bf16 %v3612_v2, %v3596_v51  ;;  %v3120_v4 = vmax.f32 %v1673_v35, %v2608_v22 }
 0x1b6   :  { %2174 = vmatprep.mubr.bf16.mxu1 %v19149_v40  ;;  %v16226_v33 = vpack.c.bf16 %v3133_v1, %v3117_v60  ;;  %v1488_v39 = vadd.f32 %v1487_v10, %v16179_v9  ;;  %v1489_v28 = vpop.f32.mrb[69].mxu0  ;;  %v16231_v41 = vpack.c.bf16 %v3135_v61, %v3119_v58  ;;  %v1681_v6 = vadd.f32 %v1680_v27, %v16192_v52  ;;  %v1682_v12 = vpop.f32.mrb[69].mxu1 }
 0x1b7   :  { %19210 = vst [vmem:[#allocation58_spill] sm:$0xff] %v16229_v38  ;;  %v1491_v63 = vpop.f32.mrb[70].mxu0  ;;  %v16234_v11 = vpack.c.bf16 %v3134_v30, %v3118_v15  ;;  %v1490_v7 = vadd.f32 %v1489_v28, %v16198_v3  ;;  %v1684_v53 = vpop.f32.mrb[70].mxu1  ;;  %v3136_v0 = vmax.f32 %v1677_v8, %v2624_v5  ;;  %v1683_v2 = vadd.f32 %v1682_v12, %v16202_v44  ;;  %v15245_v15 = vld [vmem:[%s18911_s0 + $0x60] sm:$0xff]  }
 0x1b8   :  { %19209 = vst [vmem:[#allocation57_spill] sm:$0xff] %v16226_v33  ;;  %19211 = vst [vmem:[#allocation59_spill] sm:$0xff] %v16231_v41  ;;  %v2637_v50 = vmul.f32 0.01, %v1488_v39  ;;  %v1492_v24 = vadd.f32 %v1491_v63, %v16179_v9  ;;  %v1493_v10 = vpop.f32.mrb[71].mxu0  ;;  %v1685_v22 = vadd.f32 %v1684_v53, %v16192_v52  ;;  %v1686_v61 = vpop.f32.mrb[71].mxu1 }
 0x1b9   :  { %19212 = vst [vmem:[#allocation60_spill] sm:$0xff] %v16234_v11  ;;  %v2639_v51 = vmul.f32 0.01, %v1681_v6  ;;  %v1494_v35 = vadd.f32 %v1493_v10, %v16198_v3  ;;  %v2638_v30 = vmul.f32 0.01, %v1490_v7  ;;  %v16244_v20 = vpack.c.bf16 %v3136_v0, %v3120_v4 }
 0x1ba   :  { %v2653_v60 = vmul.f32 0.01, %v1492_v24  ;;  %v2655_v14 = vmul.f32 0.01, %v1685_v22  ;;  %v1687_v58 = vadd.f32 %v1686_v61, %v16202_v44  ;;  %v3149_v1 = vmax.f32 %v1488_v39, %v2637_v50 }
 0x1bb   :  { %19213 = vst [vmem:[#allocation61_spill] sm:$0xff] %v16244_v20  ;;  %v2654_v8 = vmul.f32 0.01, %v1494_v35  ;;  %v3151_v5 = vmax.f32 %v1681_v6, %v2639_v51  ;;  %v2640_v28 = vmul.f32 0.01, %v1683_v2  ;;  %v3150_v53 = vmax.f32 %v1490_v7, %v2638_v30 }
 0x1bc   :  { %1982 = vmatmul.mubr.bf16.gmra.mrb[176].mxu0 %v15245_v15  ;;  %v3165_v27 = vmax.f32 %v1492_v24, %v2653_v60  ;;  %v3167_v12 = vmax.f32 %v1685_v22, %v2655_v14  ;;  %v2656_v41 = vmul.f32 0.01, %v1687_v58 }
 0x1bd   :  { %2175 = vmatmul.mubr.bf16.gmra.mrb[176].mxu1 %v15245_v15  ;;  %1991 = vmatprep.mubr.bf16.mxu0 %v19149_v40  ;;  %v1497_v63 = vpop.f32.mrb[72].mxu0  ;;  %v3166_v10 = vmax.f32 %v1494_v35, %v2654_v8  ;;  %v1690_v15 = vpop.f32.mrb[72].mxu1  ;;  %v3152_v33 = vmax.f32 %v1683_v2, %v2640_v28 }
 0x1be   :  { %2184 = vmatprep.mubr.bf16.mxu1 %v19149_v40  ;;  %v16249_v4 = vpack.c.bf16 %v3165_v27, %v3149_v1  ;;  %v1498_v0 = vadd.f32 %v1497_v63, %v16179_v9  ;;  %v1499_v20 = vpop.f32.mrb[73].mxu0  ;;  %v16252_v11 = vpack.c.bf16 %v3167_v12, %v3151_v5  ;;  %v1691_v39 = vadd.f32 %v1690_v15, %v16192_v52  ;;  %v1692_v6 = vpop.f32.mrb[73].mxu1  ;;  %v15246_v27 = vld [vmem:[%s18911_s0 + $0x68] sm:$0xff]  }
 0x1bf   :  { %v1501_v50 = vpop.f32.mrb[74].mxu0  ;;  %v16255_v24 = vpack.c.bf16 %v3166_v10, %v3150_v53  ;;  %v1500_v51 = vadd.f32 %v1499_v20, %v16198_v3  ;;  %v1694_v61 = vpop.f32.mrb[74].mxu1  ;;  %v3168_v60 = vmax.f32 %v1687_v58, %v2656_v41  ;;  %v1693_v30 = vadd.f32 %v1692_v6, %v16202_v44 }
 0x1c0   :  { %19214 = vst [vmem:[#allocation62_spill] sm:$0xff] %v16249_v4  ;;  %19215 = vst [vmem:[#allocation63_spill] sm:$0xff] %v16252_v11  ;;  %v2669_v7 = vmul.f32 0.01, %v1498_v0  ;;  %v1502_v22 = vadd.f32 %v1501_v50, %v16179_v9  ;;  %v1503_v35 = vpop.f32.mrb[75].mxu0  ;;  %v1695_v2 = vadd.f32 %v1694_v61, %v16192_v52  ;;  %v1696_v8 = vpop.f32.mrb[75].mxu1 }
 0x1c1   :  { %19216 = vst [vmem:[#allocation64_spill] sm:$0xff] %v16255_v24  ;;  %v2671_v14 = vmul.f32 0.01, %v1691_v39  ;;  %v1504_v1 = vadd.f32 %v1503_v35, %v16198_v3  ;;  %v2670_v20 = vmul.f32 0.01, %v1500_v51  ;;  %v16265_v28 = vpack.c.bf16 %v3168_v60, %v3152_v33 }
 0x1c2   :  { %v2685_v5 = vmul.f32 0.01, %v1502_v22  ;;  %v2687_v12 = vmul.f32 0.01, %v1695_v2  ;;  %v1697_v58 = vadd.f32 %v1696_v8, %v16202_v44  ;;  %v3181_v63 = vmax.f32 %v1498_v0, %v2669_v7 }
 0x1c3   :  { %19217 = vst [vmem:[#allocation65_spill] sm:$0xff] %v16265_v28  ;;  %v2686_v41 = vmul.f32 0.01, %v1504_v1  ;;  %v3183_v53 = vmax.f32 %v1691_v39, %v2671_v14  ;;  %v2672_v15 = vmul.f32 0.01, %v1693_v30  ;;  %v3182_v61 = vmax.f32 %v1500_v51, %v2670_v20 }
 0x1c4   :  { %1992 = vmatmul.mubr.bf16.gmra.mrb[180].mxu0 %v15246_v27  ;;  %v3197_v10 = vmax.f32 %v1502_v22, %v2685_v5  ;;  %v3199_v6 = vmax.f32 %v1695_v2, %v2687_v12  ;;  %v2688_v11 = vmul.f32 0.01, %v1697_v58 }
 0x1c5   :  { %2185 = vmatmul.mubr.bf16.gmra.mrb[180].mxu1 %v15246_v27  ;;  %2001 = vmatprep.mubr.bf16.mxu0 %v19149_v40  ;;  %v1507_v50 = vpop.f32.mrb[76].mxu0  ;;  %v3198_v35 = vmax.f32 %v1504_v1, %v2686_v41  ;;  %v1700_v27 = vpop.f32.mrb[76].mxu1  ;;  %v3184_v4 = vmax.f32 %v1693_v30, %v2672_v15 }
 0x1c6   :  { %2194 = vmatprep.mubr.bf16.mxu1 %v19149_v40  ;;  %v16270_v33 = vpack.c.bf16 %v3197_v10, %v3181_v63  ;;  %v1508_v60 = vadd.f32 %v1507_v50, %v16179_v9  ;;  %v1509_v28 = vpop.f32.mrb[77].mxu0  ;;  %v16273_v24 = vpack.c.bf16 %v3199_v6, %v3183_v53  ;;  %v1701_v0 = vadd.f32 %v1700_v27, %v16192_v52  ;;  %v1702_v39 = vpop.f32.mrb[77].mxu1  ;;  %v15247_v10 = vld [vmem:[%s18911_s0 + $0x70] sm:$0xff]  }
 0x1c7   :  { %v1511_v7 = vpop.f32.mrb[78].mxu0  ;;  %v16276_v22 = vpack.c.bf16 %v3198_v35, %v3182_v61  ;;  %v1510_v14 = vadd.f32 %v1509_v28, %v16198_v3  ;;  %v1704_v8 = vpop.f32.mrb[78].mxu1  ;;  %v3200_v5 = vmax.f32 %v1697_v58, %v2688_v11  ;;  %v1703_v20 = vadd.f32 %v1702_v39, %v16202_v44 }
 0x1c8   :  { %19218 = vst [vmem:[#allocation66_spill] sm:$0xff] %v16270_v33  ;;  %19219 = vst [vmem:[#allocation67_spill] sm:$0xff] %v16273_v24  ;;  %v2701_v51 = vmul.f32 0.01, %v1508_v60  ;;  %v1512_v2 = vadd.f32 %v1511_v7, %v16179_v9  ;;  %v1513_v1 = vpop.f32.mrb[79].mxu0  ;;  %v1705_v30 = vadd.f32 %v1704_v8, %v16192_v52  ;;  %v1706_v41 = vpop.f32.mrb[79].mxu1 }
 0x1c9   :  { %19220 = vst [vmem:[#allocation68_spill] sm:$0xff] %v16276_v22  ;;  %v2703_v12 = vmul.f32 0.01, %v1701_v0  ;;  %v1514_v63 = vadd.f32 %v1513_v1, %v16198_v3  ;;  %v2702_v28 = vmul.f32 0.01, %v1510_v14  ;;  %v16286_v15 = vpack.c.bf16 %v3200_v5, %v3184_v4 }
 0x1ca   :  { %v2717_v53 = vmul.f32 0.01, %v1512_v2  ;;  %v2719_v6 = vmul.f32 0.01, %v1705_v30  ;;  %v1707_v58 = vadd.f32 %v1706_v41, %v16202_v44  ;;  %v3213_v50 = vmax.f32 %v1508_v60, %v2701_v51 }
 0x1cb   :  { %19221 = vst [vmem:[#allocation69_spill] sm:$0xff] %v16286_v15  ;;  %v2718_v11 = vmul.f32 0.01, %v1514_v63  ;;  %v3215_v61 = vmax.f32 %v1701_v0, %v2703_v12  ;;  %v2704_v27 = vmul.f32 0.01, %v1703_v20  ;;  %v3214_v8 = vmax.f32 %v1510_v14, %v2702_v28 }
 0x1cc   :  { %2002 = vmatmul.mubr.bf16.gmra.mrb[184].mxu0 %v15247_v10  ;;  %v3229_v35 = vmax.f32 %v1512_v2, %v2717_v53  ;;  %v3231_v39 = vmax.f32 %v1705_v30, %v2719_v6  ;;  %v2720_v24 = vmul.f32 0.01, %v1707_v58 }
 0x1cd   :  { %2195 = vmatmul.mubr.bf16.gmra.mrb[184].mxu1 %v15247_v10  ;;  %2011 = vmatprep.mubr.bf16.mxu0 %v19149_v40  ;;  %v1517_v7 = vpop.f32.mrb[80].mxu0  ;;  %v3230_v1 = vmax.f32 %v1514_v63, %v2718_v11  ;;  %v1710_v10 = vpop.f32.mrb[80].mxu1  ;;  %v3216_v53 = vmax.f32 %v1703_v20, %v2704_v27 }
 0x1ce   :  { %2204 = vmatprep.mubr.bf16.mxu1 %v19149_v40  ;;  %v16291_v4 = vpack.c.bf16 %v3229_v35, %v3213_v50  ;;  %v1518_v5 = vadd.f32 %v1517_v7, %v16179_v9  ;;  %v1519_v15 = vpop.f32.mrb[81].mxu0  ;;  %v16294_v33 = vpack.c.bf16 %v3231_v39, %v3215_v61  ;;  %v1711_v60 = vadd.f32 %v1710_v10, %v16192_v52  ;;  %v1712_v0 = vpop.f32.mrb[81].mxu1  ;;  %v15248_v39 = vld [vmem:[%s18911_s0 + $0x78] sm:$0xff]  }
 0x1cf   :  { %v1521_v51 = vpop.f32.mrb[82].mxu0  ;;  %v16297_v2 = vpack.c.bf16 %v3230_v1, %v3214_v8  ;;  %v1520_v12 = vadd.f32 %v1519_v15, %v16198_v3  ;;  %v1714_v41 = vpop.f32.mrb[82].mxu1  ;;  %v3232_v28 = vmax.f32 %v1707_v58, %v2720_v24  ;;  %v1713_v8 = vadd.f32 %v1712_v0, %v16202_v44 }
 0x1d0   :  { %19222 = vst [vmem:[#allocation70_spill] sm:$0xff] %v16291_v4  ;;  %19223 = vst [vmem:[#allocation71_spill] sm:$0xff] %v16294_v33  ;;  %v2733_v30 = vmul.f32 0.01, %v1518_v5  ;;  %v1522_v14 = vadd.f32 %v1521_v51, %v16179_v9  ;;  %v1523_v63 = vpop.f32.mrb[83].mxu0  ;;  %v1715_v11 = vadd.f32 %v1714_v41, %v16192_v52  ;;  %v1716_v50 = vpop.f32.mrb[83].mxu1 }
 0x1d1   :  { %19224 = vst [vmem:[#allocation72_spill] sm:$0xff] %v16297_v2  ;;  %v2735_v6 = vmul.f32 0.01, %v1711_v60  ;;  %v1524_v61 = vadd.f32 %v1523_v63, %v16198_v3  ;;  %v2734_v15 = vmul.f32 0.01, %v1520_v12  ;;  %v16306_v7 = vpack.c.bf16 %v3232_v28, %v3216_v53 }
 0x1d2   :  { %v2749_v35 = vmul.f32 0.01, %v1522_v14  ;;  %v2751_v1 = vmul.f32 0.01, %v1715_v11  ;;  %v3245_v20 = vmax.f32 %v1518_v5, %v2733_v30  ;;  %v1717_v27 = vadd.f32 %v1716_v50, %v16202_v44  ;;  %v14387_v50 = vld [vmem:[#allocation4 + $0x8] ss:$16 sps:$4 sm:$0xff]  }
 0x1d3   :  { %19225 = vst [vmem:[#allocation73_spill] sm:$0xff] %v16306_v7  ;;  %v2750_v24 = vmul.f32 0.01, %v1524_v61  ;;  %v3247_v10 = vmax.f32 %v1711_v60, %v2735_v6  ;;  %v3246_v63 = vmax.f32 %v1520_v12, %v2734_v15  ;;  %v14384_v7 = vld [vmem:[#allocation4] ss:$16 sps:$4 sm:$0xff]  }
 0x1d4   :  { %2012 = vmatmul.mubr.bf16.gmra.mrb[188].mxu0 %v15248_v39  ;;  %v3261_v58 = vmax.f32 %v1522_v14, %v2749_v35  ;;  %v3263_v51 = vmax.f32 %v1715_v11, %v2751_v1  ;;  %v2736_v4 = vmul.f32 0.01, %v1713_v8  ;;  %v14392_v60 = vld [vmem:[#allocation4 + $0x24] ss:$16 sps:$4 sm:$0xff]   ;;  %v2752_v1 = vmul.f32 0.01, %v1717_v27 }
 0x1d5   :  { %2205 = vmatmul.mubr.bf16.gmra.mrb[188].mxu1 %v15248_v39  ;;  %2247 = vmatprep.mubr.bf16.mxu0 %v19149_v40  ;;  %v1527_v41 = vpop.f32.mrb[84].mxu0  ;;  %v3262_v33 = vmax.f32 %v1524_v61, %v2750_v24  ;;  %v1720_v28 = vpop.f32.mrb[84].mxu1 }
 0x1d6   :  { %2440 = vmatprep.mubr.bf16.mxu1 %v19149_v40  ;;  %v16312_v53 = vpack.c.bf16 %v3261_v58, %v3245_v20  ;;  %v1528_v0 = vadd.f32 %v1527_v41, %v16179_v9  ;;  %v1529_v39 = vpop.f32.mrb[85].mxu0  ;;  %v16315_v2 = vpack.c.bf16 %v3263_v51, %v3247_v10  ;;  %v1721_v5 = vadd.f32 %v1720_v28, %v16192_v52  ;;  %v1722_v30 = vpop.f32.mrb[85].mxu1 }
 0x1d7   :  { %v1531_v14 = vpop.f32.mrb[86].mxu0  ;;  %v16318_v6 = vpack.c.bf16 %v3262_v33, %v3246_v63  ;;  %v1530_v12 = vadd.f32 %v1529_v39, %v16198_v3  ;;  %v1724_v35 = vpop.f32.mrb[86].mxu1  ;;  %v1723_v24 = vadd.f32 %v1722_v30, %v16202_v44  ;;  %v15249_v33 = vld [vmem:[%s18911_s0] sm:$0xff]   ;;  %v14395_v39 = vld [vmem:[#allocation4 + $0x2c] ss:$16 sps:$4 sm:$0xff]  }
 0x1d8   :  { %19226 = vst [vmem:[#allocation74_spill] sm:$0xff] %v16312_v53  ;;  %19227 = vst [vmem:[#allocation75_spill] sm:$0xff] %v16315_v2  ;;  %v2765_v11 = vmul.f32 0.01, %v1528_v0  ;;  %v1532_v61 = vadd.f32 %v1531_v14, %v16179_v9  ;;  %v1533_v15 = vpop.f32.mrb[87].mxu0  ;;  %v1725_v58 = vadd.f32 %v1724_v35, %v16192_v52  ;;  %v1726_v10 = vpop.f32.mrb[87].mxu1  ;;  %v3248_v14 = vmax.f32 %v1713_v8, %v2736_v4 }
 0x1d9   :  { %19228 = vst [vmem:[#allocation76_spill] sm:$0xff] %v16318_v6  ;;  %v2767_v20 = vmul.f32 0.01, %v1721_v5  ;;  %v1534_v51 = vadd.f32 %v1533_v15, %v16198_v3  ;;  %v2766_v41 = vmul.f32 0.01, %v1530_v12  ;;  %v3264_v2 = vmax.f32 %v1717_v27, %v2752_v1 }
 0x1da   :  { %v2781_v28 = vmul.f32 0.01, %v1532_v61  ;;  %v14390_v63 = vld [vmem:[#allocation4 + $0x20] ss:$16 sps:$4 sm:$0xff]   ;;  %v1727_v53 = vadd.f32 %v1726_v10, %v16202_v44  ;;  %v3277_v30 = vmax.f32 %v1528_v0, %v2765_v11  ;;  %v2783_v22 = vmul.f32 0.01, %v1725_v58 }
 0x1db   :  { %v3279_v6 = vmax.f32 %v1721_v5, %v2767_v20  ;;  %v14393_v35 = vld [vmem:[#allocation4 + $0x28] ss:$16 sps:$4 sm:$0xff]   ;;  %v2782_v15 = vmul.f32 0.01, %v1534_v51  ;;  %v16330_v37 = vpack.c.bf16 %v3264_v2, %v3248_v14  ;;  %v2768_v26 = vmul.f32 0.01, %v1723_v24 }
 0x1dc   :  { %2248 = vmatmul.mubr.bf16.vlgmr.msra.gmra.mrb[192].mxu0 %v15249_v33  ;;  %v3293_v38 = vmax.f32 %v1532_v61, %v2781_v28  ;;  %v2784_v62 = vmul.f32 0.01, %v1727_v53  ;;  %v3295_v4 = vmax.f32 %v1725_v58, %v2783_v22  ;;  %v14401_v27 = vld [vmem:[#allocation4 + $0x4c] ss:$16 sps:$4 sm:$0xff]   ;;  %v3278_v0 = vmax.f32 %v1530_v12, %v2766_v41 }
 0x1dd   :  { %2441 = vmatmul.mubr.bf16.vlgmr.msra.gmra.mrb[192].mxu1 %v15249_v33  ;;  %5440 = vmatpush1.bf16.msra.mxu0 %v14384_v7  ;;  %19229 = vst [vmem:[#allocation77_spill] sm:$0xff] %v16330_v37  ;;  %v1537_v8 = vpop.f32.mrb[88].mxu0  ;;  %v3294_v5 = vmax.f32 %v1534_v51, %v2782_v15  ;;  %v3280_v1 = vmax.f32 %v1723_v24, %v2768_v26  ;;  %v15250_v15 = vld [vmem:[%s18911_s0 + $0x8] sm:$0xff]  }
 0x1de   :  { %6212 = vmatpush1.bf16.msra.mxu1 %v14387_v50  ;;  %2257 = vmatprep.mubr.bf16.mxu0 %v19149_v40  ;;  %v16333_v7 = vpack.c.bf16 %v3293_v38, %v3277_v30  ;;  %v1538_v11 = vadd.f32 %v1537_v8, %v16179_v9  ;;  %v1730_v50 = vpop.f32.mrb[88].mxu1  ;;  %v1539_v61 = vpop.f32.mrb[89].mxu0  ;;  %v3296_v2 = vmax.f32 %v1727_v53, %v2784_v62  ;;  %v14399_v62 = vld [vmem:[#allocation4 + $0x48] ss:$16 sps:$4 sm:$0xff]  }
 0x1df   :  { %2450 = vmatprep.mubr.bf16.mxu1 %v19149_v40  ;;  %5441 = vmatprep.subr.bf16.mxu0 %v14392_v60  ;;  %v16336_v20 = vpack.c.bf16 %v3295_v4, %v3279_v6  ;;  %v1731_v22 = vadd.f32 %v1730_v50, %v16192_v52  ;;  %v1732_v58 = vpop.f32.mrb[89].mxu1  ;;  %v1541_v10 = vpop.f32.mrb[90].mxu0  ;;  %v14396_v60 = vld [vmem:[#allocation4 + $0x40] ss:$16 sps:$4 sm:$0xff]   ;;  %v16339_v28 = vpack.c.bf16 %v3294_v5, %v3278_v0 }
 0x1e0   :  { %6213 = vmatprep.subr.bf16.mxu1 %v14395_v39  ;;  %v1540_v38 = vadd.f32 %v1539_v61, %v16198_v3  ;;  %v2797_v12 = vmul.f32 0.01, %v1538_v11  ;;  %v1542_v51 = vadd.f32 %v1541_v10, %v16179_v9  ;;  %v1734_v41 = vpop.f32.mrb[90].mxu1  ;;  %v1543_v33 = vpop.f32.mrb[91].mxu0  ;;  %v16343_v26 = vpack.c.bf16 %v3296_v2, %v3280_v1  ;;  %v14404_v39 = vld [vmem:[#allocation4 + $0x64] ss:$16 sps:$4 sm:$0xff]  }
 0x1e1   :  { %19230 = vst [vmem:[#allocation78_spill] sm:$0xff] %v16336_v20  ;;  %5442 = vmatpush1.bf16.msra.mxu0 %v14390_v63  ;;  %v1733_v53 = vadd.f32 %v1732_v58, %v16202_v44  ;;  %v2799_v6 = vmul.f32 0.01, %v1731_v22  ;;  %v1735_v24 = vadd.f32 %v1734_v41, %v16192_v52  ;;  %v1736_v63 = vpop.f32.mrb[91].mxu1  ;;  %v1544_v14 = vadd.f32 %v1543_v33, %v16198_v3  ;;  %v14402_v1 = vld [vmem:[#allocation4 + $0x60] ss:$16 sps:$4 sm:$0xff]  }
 0x1e2   :  { %6214 = vmatpush1.bf16.msra.mxu1 %v14393_v35  ;;  %5443 = vmatprep.subr.bf16.mxu0 %v14398_v31  ;;  %19231 = vst [vmem:[#allocation79_spill] sm:$0xff] %v16343_v26  ;;  %v2813_v30 = vmul.f32 0.01, %v1542_v51  ;;  %v14407_v31 = vld [vmem:[#allocation4 + $0x6c] ss:$16 sps:$4 sm:$0xff]   ;;  %v1737_v4 = vadd.f32 %v1736_v63, %v16202_v44 }
 0x1e3   :  { %6215 = vmatprep.subr.bf16.mxu1 %v14401_v27  ;;  %v2798_v35 = vmul.f32 0.01, %v1540_v38  ;;  %v2815_v8 = vmul.f32 0.01, %v1735_v24  ;;  %v2814_v0 = vmul.f32 0.01, %v1544_v14  ;;  %v3309_v27 = vmax.f32 %v1538_v11, %v2797_v12 }
 0x1e4   :  { %2258 = vmatmul.mubr.bf16.gmra.mrb[196].mxu0 %v15250_v15  ;;  %v2800_v5 = vmul.f32 0.01, %v1733_v53  ;;  %v3311_v50 = vmax.f32 %v1731_v22, %v2799_v6  ;;  %v3325_v61 = vmax.f32 %v1542_v51, %v2813_v30  ;;  %v2816_v2 = vmul.f32 0.01, %v1737_v4  ;;  %v14405_v41 = vld [vmem:[#allocation4 + $0x68] ss:$16 sps:$4 sm:$0xff]  }
 0x1e5   :  { %2451 = vmatmul.mubr.bf16.gmra.mrb[196].mxu1 %v15250_v15  ;;  %2267 = vmatprep.mubr.bf16.mxu0 %v19149_v40  ;;  %v3327_v58 = vmax.f32 %v1735_v24, %v2815_v8  ;;  %v1547_v10 = vpop.f32.mrb[92].mxu0  ;;  %v14410_v33 = vld [vmem:[#allocation4 + $0x84] ss:$16 sps:$4 sm:$0xff]   ;;  %v3310_v63 = vmax.f32 %v1540_v38, %v2798_v35  ;;  %v3326_v15 = vmax.f32 %v1544_v14, %v2814_v0  ;;  %v1740_v11 = vpop.f32.mrb[92].mxu1  ;;  %v14413_v12 = vld [vmem:[#allocation4 + $0x8c] ss:$16 sps:$4 sm:$0xff]  }
 0x1e6   :  { %2460 = vmatprep.mubr.bf16.mxu1 %v19149_v40  ;;  %5444 = vmatpush1.bf16.msra.mxu0 %v14396_v60  ;;  %v16354_v20 = vpack.c.bf16 %v3325_v61, %v3309_v27  ;;  %v1548_v26 = vadd.f32 %v1547_v10, %v16179_v9  ;;  %v1549_v22 = vpop.f32.mrb[93].mxu0  ;;  %v3312_v51 = vmax.f32 %v1733_v53, %v2800_v5  ;;  %v14408_v30 = vld [vmem:[#allocation4 + $0x80] ss:$16 sps:$4 sm:$0xff]  }
 0x1e7   :  { %6216 = vmatpush1.bf16.msra.mxu1 %v14399_v62  ;;  %5445 = vmatprep.subr.bf16.mxu0 %v14404_v39  ;;  %v3328_v60 = vmax.f32 %v1737_v4, %v2816_v2  ;;  %v16357_v6 = vpack.c.bf16 %v3327_v58, %v3311_v50  ;;  %v1741_v24 = vadd.f32 %v1740_v11, %v16192_v52  ;;  %v1742_v62 = vpop.f32.mrb[93].mxu1  ;;  %v1551_v39 = vpop.f32.mrb[94].mxu0  ;;  %v14416_v2 = vld [vmem:[#allocation4 + $0xa4] ss:$16 sps:$4 sm:$0xff]  }
 0x1e8   :  { %19232 = vst [vmem:[#allocation80_spill] sm:$0xff] %v16354_v20  ;;  %6217 = vmatprep.subr.bf16.mxu1 %v14407_v31  ;;  %v16360_v8 = vpack.c.bf16 %v3326_v15, %v3310_v63  ;;  %v1550_v38 = vadd.f32 %v1549_v22, %v16198_v3  ;;  %v2829_v14 = vmul.f32 0.01, %v1548_v26  ;;  %v1552_v35 = vadd.f32 %v1551_v39, %v16179_v9  ;;  %v1744_v0 = vpop.f32.mrb[94].mxu1  ;;  %v1553_v27 = vpop.f32.mrb[95].mxu0  ;;  %v15251_v63 = vld [vmem:[%s18911_s0 + $0x10] sm:$0xff]  }
 0x1e9   :  { %19233 = vst [vmem:[#allocation81_spill] sm:$0xff] %v16357_v6  ;;  %v14411_v31 = vld [vmem:[#allocation4 + $0x88] ss:$16 sps:$4 sm:$0xff]   ;;  %v16364_v53 = vpack.c.bf16 %v3328_v60, %v3312_v51  ;;  %v1743_v4 = vadd.f32 %v1742_v62, %v16202_v44  ;;  %v2831_v5 = vmul.f32 0.01, %v1741_v24  ;;  %v1745_v50 = vadd.f32 %v1744_v0, %v16192_v52  ;;  %v1746_v61 = vpop.f32.mrb[95].mxu1 }
 0x1ea   :  { %5446 = vmatpush1.bf16.msra.mxu0 %v14402_v1  ;;  %v1554_v58 = vadd.f32 %v1553_v27, %v16198_v3  ;;  %v2845_v10 = vmul.f32 0.01, %v1552_v35  ;;  %v14419_v1 = vld [vmem:[#allocation4 + $0xac] ss:$16 sps:$4 sm:$0xff]   ;;  %v2830_v15 = vmul.f32 0.01, %v1550_v38  ;;  %v1747_v11 = vadd.f32 %v1746_v61, %v16202_v44 }
 0x1eb   :  { %19234 = vst [vmem:[#allocation82_spill] sm:$0xff] %v16364_v53  ;;  %6218 = vmatpush1.bf16.msra.mxu1 %v14405_v41  ;;  %5447 = vmatprep.subr.bf16.mxu0 %v14410_v33  ;;  %v2847_v22 = vmul.f32 0.01, %v1745_v50  ;;  %v2832_v33 = vmul.f32 0.01, %v1743_v4  ;;  %v3341_v51 = vmax.f32 %v1548_v26, %v2829_v14  ;;  %v3343_v60 = vmax.f32 %v1741_v24, %v2831_v5 }
 0x1ec   :  { %2268 = vmatmul.mubr.bf16.gmra.mrb[200].mxu0 %v15251_v63  ;;  %6219 = vmatprep.subr.bf16.mxu1 %v14413_v12  ;;  %v2846_v41 = vmul.f32 0.01, %v1554_v58  ;;  %v3357_v62 = vmax.f32 %v1552_v35, %v2845_v10  ;;  %v14414_v39 = vld [vmem:[#allocation4 + $0xa0] ss:$16 sps:$4 sm:$0xff]   ;;  %v2848_v0 = vmul.f32 0.01, %v1747_v11  ;;  %v3342_v53 = vmax.f32 %v1550_v38, %v2830_v15 }
 0x1ed   :  { %2461 = vmatmul.mubr.bf16.gmra.mrb[200].mxu1 %v15251_v63  ;;  %2277 = vmatprep.mubr.bf16.mxu0 %v19149_v40  ;;  %v3359_v27 = vmax.f32 %v1745_v50, %v2847_v22  ;;  %v1557_v12 = vpop.f32.mrb[96].mxu0  ;;  %v14417_v6 = vld [vmem:[#allocation4 + $0xa8] ss:$16 sps:$4 sm:$0xff]   ;;  %v14422_v61 = vld [vmem:[#allocation4 + $0xc4] ss:$16 sps:$4 sm:$0xff]   ;;  %v1750_v26 = vpop.f32.mrb[96].mxu1  ;;  %v3344_v35 = vmax.f32 %v1743_v4, %v2832_v33 }
 0x1ee   :  { %2470 = vmatprep.mubr.bf16.mxu1 %v19149_v40  ;;  %5448 = vmatpush1.bf16.msra.mxu0 %v14408_v30  ;;  %v3358_v63 = vmax.f32 %v1554_v58, %v2846_v41  ;;  %v16375_v37 = vpack.c.bf16 %v3357_v62, %v3341_v51  ;;  %v1558_v20 = vadd.f32 %v1557_v12, %v16179_v9  ;;  %v1559_v24 = vpop.f32.mrb[97].mxu0  ;;  %v14425_v14 = vld [vmem:[#allocation4 + $0xcc] ss:$16 sps:$4 sm:$0xff]   ;;  %v14420_v10 = vld [vmem:[#allocation4 + $0xc0] ss:$16 sps:$4 sm:$0xff]  }
 0x1ef   :  { %6220 = vmatpush1.bf16.msra.mxu1 %v14411_v31  ;;  %5449 = vmatprep.subr.bf16.mxu0 %v14416_v2  ;;  %v3360_v30 = vmax.f32 %v1747_v11, %v2848_v0  ;;  %v16378_v5 = vpack.c.bf16 %v3359_v27, %v3343_v60  ;;  %v1751_v50 = vadd.f32 %v1750_v26, %v16192_v52  ;;  %v1752_v31 = vpop.f32.mrb[97].mxu1  ;;  %v1561_v2 = vpop.f32.mrb[98].mxu0  ;;  %v15252_v12 = vld [vmem:[%s18911_s0 + $0x18] sm:$0xff]  }
 0x1f0   :  { %19235 = vst [vmem:[#allocation83_spill] sm:$0xff] %v16375_v37  ;;  %6221 = vmatprep.subr.bf16.mxu1 %v14419_v1  ;;  %v16381_v22 = vpack.c.bf16 %v3358_v63, %v3342_v53  ;;  %v1560_v38 = vadd.f32 %v1559_v24, %v16198_v3  ;;  %v2861_v58 = vmul.f32 0.01, %v1558_v20  ;;  %v1562_v15 = vadd.f32 %v1561_v2, %v16179_v9  ;;  %v1754_v41 = vpop.f32.mrb[98].mxu1  ;;  %v1563_v51 = vpop.f32.mrb[99].mxu0 }
 0x1f1   :  { %19236 = vst [vmem:[#allocation84_spill] sm:$0xff] %v16378_v5  ;;  %v14423_v1 = vld [vmem:[#allocation4 + $0xc8] ss:$16 sps:$4 sm:$0xff]   ;;  %v16385_v4 = vpack.c.bf16 %v3360_v30, %v3344_v35  ;;  %v1753_v11 = vadd.f32 %v1752_v31, %v16202_v44  ;;  %v2863_v33 = vmul.f32 0.01, %v1751_v50  ;;  %v1755_v60 = vadd.f32 %v1754_v41, %v16192_v52  ;;  %v1756_v62 = vpop.f32.mrb[99].mxu1 }
 0x1f2   :  { %19237 = vst [vmem:[#allocation85_spill] sm:$0xff] %v16381_v22  ;;  %5450 = vmatpush1.bf16.msra.mxu0 %v14414_v39  ;;  %v14428_v53 = vld [vmem:[#allocation4 + $0xe4] ss:$16 sps:$4 sm:$0xff]   ;;  %v1564_v0 = vadd.f32 %v1563_v51, %v16198_v3  ;;  %v2877_v27 = vmul.f32 0.01, %v1562_v15  ;;  %v1757_v26 = vadd.f32 %v1756_v62, %v16202_v44  ;;  %v3373_v35 = vmax.f32 %v1558_v20, %v2861_v58 }
 0x1f3   :  { %19238 = vst [vmem:[#allocation86_spill] sm:$0xff] %v16385_v4  ;;  %6222 = vmatpush1.bf16.msra.mxu1 %v14417_v6  ;;  %5451 = vmatprep.subr.bf16.mxu0 %v14422_v61  ;;  %v14431_v39 = vld [vmem:[#allocation4 + $0xec] ss:$16 sps:$4 sm:$0xff]   ;;  %v2862_v63 = vmul.f32 0.01, %v1560_v38  ;;  %v3375_v30 = vmax.f32 %v1751_v50, %v2863_v33 }
 0x1f4   :  { %2278 = vmatmul.mubr.bf16.gmra.mrb[204].mxu0 %v15252_v12  ;;  %6223 = vmatprep.subr.bf16.mxu1 %v14425_v14  ;;  %v2879_v24 = vmul.f32 0.01, %v1755_v60  ;;  %v2878_v6 = vmul.f32 0.01, %v1564_v0  ;;  %v2864_v61 = vmul.f32 0.01, %v1753_v11  ;;  %v3389_v31 = vmax.f32 %v1562_v15, %v2877_v27 }
 0x1f5   :  { %2471 = vmatmul.mubr.bf16.gmra.mrb[204].mxu1 %v15252_v12  ;;  %2287 = vmatprep.mubr.bf16.mxu0 %v19149_v40  ;;  %v14426_v2 = vld [vmem:[#allocation4 + $0xe0] ss:$16 sps:$4 sm:$0xff]   ;;  %v2880_v41 = vmul.f32 0.01, %v1757_v26  ;;  %v1567_v14 = vpop.f32.mrb[100].mxu0  ;;  %v3374_v4 = vmax.f32 %v1560_v38, %v2862_v63  ;;  %v1760_v20 = vpop.f32.mrb[100].mxu1 }
 0x1f6   :  { %2480 = vmatprep.mubr.bf16.mxu1 %v19149_v40  ;;  %5452 = vmatpush1.bf16.msra.mxu0 %v14420_v10  ;;  %v3391_v51 = vmax.f32 %v1755_v60, %v2879_v24  ;;  %v14429_v5 = vld [vmem:[#allocation4 + $0xe8] ss:$16 sps:$4 sm:$0xff]   ;;  %v14434_v62 = vld [vmem:[#allocation4 + $0x104] ss:$16 sps:$4 sm:$0xff]   ;;  %v3390_v12 = vmax.f32 %v1564_v0, %v2878_v6  ;;  %v16396_v37 = vpack.c.bf16 %v3389_v31, %v3373_v35  ;;  %v1569_v50 = vpop.f32.mrb[101].mxu0 }
 0x1f7   :  { %6224 = vmatpush1.bf16.msra.mxu1 %v14423_v1  ;;  %5453 = vmatprep.subr.bf16.mxu0 %v14428_v53  ;;  %v1568_v22 = vadd.f32 %v1567_v14, %v16179_v9  ;;  %v14437_v58 = vld [vmem:[#allocation4 + $0x10c] ss:$16 sps:$4 sm:$0xff]   ;;  %v3376_v15 = vmax.f32 %v1753_v11, %v2864_v61  ;;  %v3392_v10 = vmax.f32 %v1757_v26, %v2880_v41  ;;  %v1762_v1 = vpop.f32.mrb[101].mxu1  ;;  %v1571_v53 = vpop.f32.mrb[102].mxu0  ;;  %v14432_v27 = vld [vmem:[#allocation4 + $0x100] ss:$16 sps:$4 sm:$0xff]  }
 0x1f8   :  { %19239 = vst [vmem:[#allocation87_spill] sm:$0xff] %v16396_v37  ;;  %6225 = vmatprep.subr.bf16.mxu1 %v14431_v39  ;;  %v16399_v33 = vpack.c.bf16 %v3391_v51, %v3375_v30  ;;  %v1761_v60 = vadd.f32 %v1760_v20, %v16192_v52  ;;  %v16402_v24 = vpack.c.bf16 %v3390_v12, %v3374_v4  ;;  %v1764_v6 = vpop.f32.mrb[102].mxu1  ;;  %v1573_v35 = vpop.f32.mrb[103].mxu0  ;;  %v14435_v39 = vld [vmem:[#allocation4 + $0x108] ss:$16 sps:$4 sm:$0xff]   ;;  %v15253_v14 = vld [vmem:[%s18911_s0 + $0x20] sm:$0xff]  }
 0x1f9   :  { %v1570_v38 = vadd.f32 %v1569_v50, %v16198_v3  ;;  %v2893_v0 = vmul.f32 0.01, %v1568_v22  ;;  %v1572_v63 = vadd.f32 %v1571_v53, %v16179_v9  ;;  %v16406_v11 = vpack.c.bf16 %v3392_v10, %v3376_v15  ;;  %v1766_v31 = vpop.f32.mrb[103].mxu1  ;;  %v14440_v4 = vld [vmem:[#allocation4 + $0x124] ss:$16 sps:$4 sm:$0xff]  }
 0x1fa   :  { %19240 = vst [vmem:[#allocation88_spill] sm:$0xff] %v16399_v33  ;;  %19241 = vst [vmem:[#allocation89_spill] sm:$0xff] %v16402_v24  ;;  %5454 = vmatpush1.bf16.msra.mxu0 %v14426_v2  ;;  %v1763_v26 = vadd.f32 %v1762_v1, %v16202_v44  ;;  %v2895_v61 = vmul.f32 0.01, %v1761_v60  ;;  %v1765_v30 = vadd.f32 %v1764_v6, %v16192_v52  ;;  %v14443_v2 = vld [vmem:[#allocation4 + $0x12c] ss:$16 sps:$4 sm:$0xff]  }
 0x1fb   :  { %19242 = vst [vmem:[#allocation90_spill] sm:$0xff] %v16406_v11  ;;  %6226 = vmatpush1.bf16.msra.mxu1 %v14429_v5  ;;  %5455 = vmatprep.subr.bf16.mxu0 %v14434_v62  ;;  %v1574_v41 = vadd.f32 %v1573_v35, %v16198_v3  ;;  %v2909_v51 = vmul.f32 0.01, %v1572_v63  ;;  %v2894_v12 = vmul.f32 0.01, %v1570_v38  ;;  %v1767_v20 = vadd.f32 %v1766_v31, %v16202_v44 }
 0x1fc   :  { %2288 = vmatmul.mubr.bf16.gmra.mrb[208].mxu0 %v15253_v14  ;;  %6227 = vmatprep.subr.bf16.mxu1 %v14437_v58  ;;  %v2911_v50 = vmul.f32 0.01, %v1765_v30  ;;  %v2896_v62 = vmul.f32 0.01, %v1763_v26  ;;  %v3405_v15 = vmax.f32 %v1568_v22, %v2893_v0  ;;  %v3407_v10 = vmax.f32 %v1761_v60, %v2895_v61  ;;  %v14438_v53 = vld [vmem:[#allocation4 + $0x120] ss:$16 sps:$4 sm:$0xff]  }
 0x1fd   :  { %2481 = vmatmul.mubr.bf16.gmra.mrb[208].mxu1 %v15253_v14  ;;  %2297 = vmatprep.mubr.bf16.mxu0 %v19149_v40  ;;  %v2910_v5 = vmul.f32 0.01, %v1574_v41  ;;  %v3421_v1 = vmax.f32 %v1572_v63, %v2909_v51  ;;  %v2912_v6 = vmul.f32 0.01, %v1767_v20  ;;  %v1577_v58 = vpop.f32.mrb[104].mxu0  ;;  %v3406_v11 = vmax.f32 %v1570_v38, %v2894_v12  ;;  %v1770_v22 = vpop.f32.mrb[104].mxu1 }
 0x1fe   :  { %2490 = vmatprep.mubr.bf16.mxu1 %v19149_v40  ;;  %5456 = vmatpush1.bf16.msra.mxu0 %v14432_v27  ;;  %v3423_v35 = vmax.f32 %v1765_v30, %v2911_v50  ;;  %v14441_v33 = vld [vmem:[#allocation4 + $0x128] ss:$16 sps:$4 sm:$0xff]   ;;  %v14446_v31 = vld [vmem:[#allocation4 + $0x144] ss:$16 sps:$4 sm:$0xff]   ;;  %v1578_v24 = vadd.f32 %v1577_v58, %v16179_v9  ;;  %v1579_v60 = vpop.f32.mrb[105].mxu0  ;;  %v3408_v63 = vmax.f32 %v1763_v26, %v2896_v62 }
 0x1ff   :  { %6228 = vmatpush1.bf16.msra.mxu1 %v14435_v39  ;;  %5457 = vmatprep.subr.bf16.mxu0 %v14440_v4  ;;  %v3422_v14 = vmax.f32 %v1574_v41, %v2910_v5  ;;  %v16417_v37 = vpack.c.bf16 %v3421_v1, %v3405_v15  ;;  %v14449_v0 = vld [vmem:[#allocation4 + $0x14c] ss:$16 sps:$4 sm:$0xff]   ;;  %v3424_v27 = vmax.f32 %v1767_v20, %v2912_v6  ;;  %v1772_v39 = vpop.f32.mrb[105].mxu1  ;;  %v1581_v4 = vpop.f32.mrb[106].mxu0  ;;  %v14444_v51 = vld [vmem:[#allocation4 + $0x140] ss:$16 sps:$4 sm:$0xff]  }
 0x200   :  { %6229 = vmatprep.subr.bf16.mxu1 %v14443_v2  ;;  %v16420_v61 = vpack.c.bf16 %v3423_v35, %v3407_v10  ;;  %v1771_v30 = vadd.f32 %v1770_v22, %v16192_v52  ;;  %v1580_v38 = vadd.f32 %v1579_v60, %v16198_v3  ;;  %v2925_v41 = vmul.f32 0.01, %v1578_v24  ;;  %v1774_v5 = vpop.f32.mrb[106].mxu1  ;;  %v1583_v15 = vpop.f32.mrb[107].mxu0  ;;  %v14447_v2 = vld [vmem:[#allocation4 + $0x148] ss:$16 sps:$4 sm:$0xff]  }
 0x201   :  { %19243 = vst [vmem:[#allocation91_spill] sm:$0xff] %v16417_v37  ;;  %v16423_v50 = vpack.c.bf16 %v3422_v14, %v3406_v11  ;;  %v1582_v12 = vadd.f32 %v1581_v4, %v16179_v9  ;;  %v16427_v26 = vpack.c.bf16 %v3424_v27, %v3408_v63  ;;  %v1773_v20 = vadd.f32 %v1772_v39, %v16202_v44  ;;  %v1776_v1 = vpop.f32.mrb[107].mxu1  ;;  %v14452_v11 = vld [vmem:[#allocation4 + $0x164] ss:$16 sps:$4 sm:$0xff]   ;;  %v15254_v58 = vld [vmem:[%s18911_s0 + $0x28] sm:$0xff]  }
 0x202   :  { %19244 = vst [vmem:[#allocation92_spill] sm:$0xff] %v16420_v61  ;;  %5458 = vmatpush1.bf16.msra.mxu0 %v14438_v53  ;;  %v2927_v62 = vmul.f32 0.01, %v1771_v30  ;;  %v1775_v10 = vadd.f32 %v1774_v5, %v16192_v52  ;;  %v1584_v6 = vadd.f32 %v1583_v15, %v16198_v3  ;;  %v14455_v53 = vld [vmem:[#allocation4 + $0x16c] ss:$16 sps:$4 sm:$0xff]   ;;  %v1777_v22 = vadd.f32 %v1776_v1, %v16202_v44 }
 0x203   :  { %19245 = vst [vmem:[#allocation93_spill] sm:$0xff] %v16423_v50  ;;  %19246 = vst [vmem:[#allocation94_spill] sm:$0xff] %v16427_v26  ;;  %6230 = vmatpush1.bf16.msra.mxu1 %v14441_v33  ;;  %5459 = vmatprep.subr.bf16.mxu0 %v14446_v31  ;;  %v2941_v35 = vmul.f32 0.01, %v1582_v12  ;;  %v2926_v14 = vmul.f32 0.01, %v1580_v38  ;;  %v3437_v63 = vmax.f32 %v1578_v24, %v2925_v41 }
 0x204   :  { %2298 = vmatmul.mubr.bf16.gmra.mrb[212].mxu0 %v15254_v58  ;;  %6231 = vmatprep.subr.bf16.mxu1 %v14449_v0  ;;  %v2943_v60 = vmul.f32 0.01, %v1775_v10  ;;  %v2942_v33 = vmul.f32 0.01, %v1584_v6  ;;  %v2928_v31 = vmul.f32 0.01, %v1773_v20  ;;  %v3439_v27 = vmax.f32 %v1771_v30, %v2927_v62 }
 0x205   :  { %2491 = vmatmul.mubr.bf16.gmra.mrb[212].mxu1 %v15254_v58  ;;  %2307 = vmatprep.mubr.bf16.mxu0 %v19149_v40  ;;  %v3453_v39 = vmax.f32 %v1582_v12, %v2941_v35  ;;  %v14450_v4 = vld [vmem:[#allocation4 + $0x160] ss:$16 sps:$4 sm:$0xff]   ;;  %v2944_v5 = vmul.f32 0.01, %v1777_v22  ;;  %v1587_v0 = vpop.f32.mrb[108].mxu0  ;;  %v3438_v26 = vmax.f32 %v1580_v38, %v2926_v14  ;;  %v1780_v24 = vpop.f32.mrb[108].mxu1 }
 0x206   :  { %2500 = vmatprep.mubr.bf16.mxu1 %v19149_v40  ;;  %5460 = vmatpush1.bf16.msra.mxu0 %v14444_v51  ;;  %v3455_v15 = vmax.f32 %v1775_v10, %v2943_v60  ;;  %v14453_v61 = vld [vmem:[#allocation4 + $0x168] ss:$16 sps:$4 sm:$0xff]   ;;  %v14458_v1 = vld [vmem:[#allocation4 + $0x184] ss:$16 sps:$4 sm:$0xff]   ;;  %v3454_v58 = vmax.f32 %v1584_v6, %v2942_v33  ;;  %v1588_v50 = vadd.f32 %v1587_v0, %v16179_v9  ;;  %v1589_v30 = vpop.f32.mrb[109].mxu0 }
 0x207   :  { %6232 = vmatpush1.bf16.msra.mxu1 %v14447_v2  ;;  %5461 = vmatprep.subr.bf16.mxu0 %v14452_v11  ;;  %v16438_v37 = vpack.c.bf16 %v3453_v39, %v3437_v63  ;;  %v14461_v41 = vld [vmem:[#allocation4 + $0x18c] ss:$16 sps:$4 sm:$0xff]   ;;  %v3440_v12 = vmax.f32 %v1773_v20, %v2928_v31  ;;  %v3456_v51 = vmax.f32 %v1777_v22, %v2944_v5  ;;  %v1782_v2 = vpop.f32.mrb[109].mxu1  ;;  %v1591_v11 = vpop.f32.mrb[110].mxu0  ;;  %v14456_v35 = vld [vmem:[#allocation4 + $0x180] ss:$16 sps:$4 sm:$0xff]  }
 0x208   :  { %6233 = vmatprep.subr.bf16.mxu1 %v14455_v53  ;;  %v16441_v62 = vpack.c.bf16 %v3455_v15, %v3439_v27  ;;  %v1781_v10 = vadd.f32 %v1780_v24, %v16192_v52  ;;  %v16444_v60 = vpack.c.bf16 %v3454_v58, %v3438_v26  ;;  %v1590_v38 = vadd.f32 %v1589_v30, %v16198_v3  ;;  %v1784_v33 = vpop.f32.mrb[110].mxu1  ;;  %v1593_v63 = vpop.f32.mrb[111].mxu0  ;;  %v14459_v53 = vld [vmem:[#allocation4 + $0x188] ss:$16 sps:$4 sm:$0xff]   ;;  %v14464_v26 = vld [vmem:[#allocation4 + $0x1a4] ss:$16 sps:$4 sm:$0xff]  }
 0x209   :  { %19247 = vst [vmem:[#allocation95_spill] sm:$0xff] %v16438_v37  ;;  %v2957_v6 = vmul.f32 0.01, %v1588_v50  ;;  %v1592_v14 = vadd.f32 %v1591_v11, %v16179_v9  ;;  %v16448_v20 = vpack.c.bf16 %v3456_v51, %v3440_v12  ;;  %v1783_v22 = vadd.f32 %v1782_v2, %v16202_v44  ;;  %v1786_v39 = vpop.f32.mrb[111].mxu1  ;;  %v15255_v0 = vld [vmem:[%s18911_s0 + $0x30] sm:$0xff]  }
 0x20a   :  { %19248 = vst [vmem:[#allocation96_spill] sm:$0xff] %v16441_v62  ;;  %19249 = vst [vmem:[#allocation97_spill] sm:$0xff] %v16444_v60  ;;  %5462 = vmatpush1.bf16.msra.mxu0 %v14450_v4  ;;  %v2959_v31 = vmul.f32 0.01, %v1781_v10  ;;  %v1785_v27 = vadd.f32 %v1784_v33, %v16192_v52  ;;  %v1594_v5 = vadd.f32 %v1593_v63, %v16198_v3  ;;  %v14467_v4 = vld [vmem:[#allocation4 + $0x1ac] ss:$16 sps:$4 sm:$0xff]  }
 0x20b   :  { %19250 = vst [vmem:[#allocation98_spill] sm:$0xff] %v16448_v20  ;;  %6234 = vmatpush1.bf16.msra.mxu1 %v14453_v61  ;;  %5463 = vmatprep.subr.bf16.mxu0 %v14458_v1  ;;  %v2973_v15 = vmul.f32 0.01, %v1592_v14  ;;  %v2958_v58 = vmul.f32 0.01, %v1590_v38  ;;  %v1787_v24 = vadd.f32 %v1786_v39, %v16202_v44  ;;  %v3469_v12 = vmax.f32 %v1588_v50, %v2957_v6 }
 0x20c   :  { %2308 = vmatmul.mubr.bf16.gmra.mrb[216].mxu0 %v15255_v0  ;;  %6235 = vmatprep.subr.bf16.mxu1 %v14461_v41  ;;  %v2975_v30 = vmul.f32 0.01, %v1785_v27  ;;  %v2974_v61 = vmul.f32 0.01, %v1594_v5  ;;  %v2960_v1 = vmul.f32 0.01, %v1783_v22  ;;  %v3471_v51 = vmax.f32 %v1781_v10, %v2959_v31 }
 0x20d   :  { %2501 = vmatmul.mubr.bf16.gmra.mrb[216].mxu1 %v15255_v0  ;;  %2317 = vmatprep.mubr.bf16.mxu0 %v19149_v40  ;;  %v3485_v2 = vmax.f32 %v1592_v14, %v2973_v15  ;;  %v14462_v11 = vld [vmem:[#allocation4 + $0x1a0] ss:$16 sps:$4 sm:$0xff]   ;;  %v2976_v33 = vmul.f32 0.01, %v1787_v24  ;;  %v1597_v41 = vpop.f32.mrb[112].mxu0  ;;  %v3470_v20 = vmax.f32 %v1590_v38, %v2958_v58  ;;  %v1790_v50 = vpop.f32.mrb[112].mxu1 }
 0x20e   :  { %2510 = vmatprep.mubr.bf16.mxu1 %v19149_v40  ;;  %5464 = vmatpush1.bf16.msra.mxu0 %v14456_v35  ;;  %v3487_v63 = vmax.f32 %v1785_v27, %v2975_v30  ;;  %v14465_v62 = vld [vmem:[#allocation4 + $0x1a8] ss:$16 sps:$4 sm:$0xff]   ;;  %v14470_v39 = vld [vmem:[#allocation4 + $0x1c4] ss:$16 sps:$4 sm:$0xff]   ;;  %v3486_v0 = vmax.f32 %v1594_v5, %v2974_v61  ;;  %v1598_v60 = vadd.f32 %v1597_v41, %v16179_v9  ;;  %v1599_v10 = vpop.f32.mrb[113].mxu0 }
 0x20f   :  { %6236 = vmatpush1.bf16.msra.mxu1 %v14459_v53  ;;  %5465 = vmatprep.subr.bf16.mxu0 %v14464_v26  ;;  %v16459_v37 = vpack.c.bf16 %v3485_v2, %v3469_v12  ;;  %v14473_v6 = vld [vmem:[#allocation4 + $0x1cc] ss:$16 sps:$4 sm:$0xff]   ;;  %v3472_v14 = vmax.f32 %v1783_v22, %v2960_v1  ;;  %v3488_v35 = vmax.f32 %v1787_v24, %v2976_v33  ;;  %v1792_v53 = vpop.f32.mrb[113].mxu1  ;;  %v1601_v26 = vpop.f32.mrb[114].mxu0  ;;  %v14468_v15 = vld [vmem:[#allocation4 + $0x1c0] ss:$16 sps:$4 sm:$0xff]  }
 0x210   :  { %6237 = vmatprep.subr.bf16.mxu1 %v14467_v4  ;;  %v16462_v31 = vpack.c.bf16 %v3487_v63, %v3471_v51  ;;  %v1791_v27 = vadd.f32 %v1790_v50, %v16192_v52  ;;  %v16465_v30 = vpack.c.bf16 %v3486_v0, %v3470_v20  ;;  %v1600_v38 = vadd.f32 %v1599_v10, %v16198_v3  ;;  %v1794_v61 = vpop.f32.mrb[114].mxu1  ;;  %v1603_v12 = vpop.f32.mrb[115].mxu0  ;;  %v14471_v4 = vld [vmem:[#allocation4 + $0x1c8] ss:$16 sps:$4 sm:$0xff]   ;;  %v14476_v20 = vld [vmem:[#allocation4 + $0x1e4] ss:$16 sps:$4 sm:$0xff]  }
 0x211   :  { %19251 = vst [vmem:[#allocation99_spill] sm:$0xff] %v16459_v37  ;;  %v2989_v5 = vmul.f32 0.01, %v1598_v60  ;;  %v1602_v58 = vadd.f32 %v1601_v26, %v16179_v9  ;;  %v16469_v22 = vpack.c.bf16 %v3488_v35, %v3472_v14  ;;  %v1793_v24 = vadd.f32 %v1792_v53, %v16202_v44  ;;  %v1796_v2 = vpop.f32.mrb[115].mxu1  ;;  %v15256_v41 = vld [vmem:[%s18911_s0 + $0x38] sm:$0xff]  }
 0x212   :  { %19252 = vst [vmem:[#allocation100_spill] sm:$0xff] %v16462_v31  ;;  %19253 = vst [vmem:[#allocation101_spill] sm:$0xff] %v16465_v30  ;;  %5466 = vmatpush1.bf16.msra.mxu0 %v14462_v11  ;;  %v2991_v1 = vmul.f32 0.01, %v1791_v27  ;;  %v1795_v51 = vadd.f32 %v1794_v61, %v16192_v52  ;;  %v1604_v33 = vadd.f32 %v1603_v12, %v16198_v3  ;;  %v14479_v11 = vld [vmem:[#allocation4 + $0x1ec] ss:$16 sps:$4 sm:$0xff]  }
 0x213   :  { %19254 = vst [vmem:[#allocation102_spill] sm:$0xff] %v16469_v22  ;;  %6238 = vmatpush1.bf16.msra.mxu1 %v14465_v62  ;;  %5467 = vmatprep.subr.bf16.mxu0 %v14470_v39  ;;  %v3005_v63 = vmul.f32 0.01, %v1602_v58  ;;  %v2990_v0 = vmul.f32 0.01, %v1600_v38  ;;  %v1797_v50 = vadd.f32 %v1796_v2, %v16202_v44  ;;  %v3501_v14 = vmax.f32 %v1598_v60, %v2989_v5 }
 0x214   :  { %2318 = vmatmul.mubr.bf16.gmra.mrb[220].mxu0 %v15256_v41  ;;  %6239 = vmatprep.subr.bf16.mxu1 %v14473_v6  ;;  %v3007_v10 = vmul.f32 0.01, %v1795_v51  ;;  %v3006_v62 = vmul.f32 0.01, %v1604_v33  ;;  %v2992_v39 = vmul.f32 0.01, %v1793_v24  ;;  %v3503_v35 = vmax.f32 %v1791_v27, %v2991_v1 }
 0x215   :  { %2511 = vmatmul.mubr.bf16.gmra.mrb[220].mxu1 %v15256_v41  ;;  %2327 = vmatprep.mubr.bf16.mxu0 %v19149_v40  ;;  %v3517_v53 = vmax.f32 %v1602_v58, %v3005_v63  ;;  %v14474_v26 = vld [vmem:[#allocation4 + $0x1e0] ss:$16 sps:$4 sm:$0xff]   ;;  %v3008_v61 = vmul.f32 0.01, %v1797_v50  ;;  %v1607_v6 = vpop.f32.mrb[116].mxu0  ;;  %v3502_v22 = vmax.f32 %v1600_v38, %v2990_v0  ;;  %v1800_v60 = vpop.f32.mrb[116].mxu1 }
 0x216   :  { %2520 = vmatprep.mubr.bf16.mxu1 %v19149_v40  ;;  %5468 = vmatpush1.bf16.msra.mxu0 %v14468_v15  ;;  %v3519_v12 = vmax.f32 %v1795_v51, %v3007_v10  ;;  %v14477_v31 = vld [vmem:[#allocation4 + $0x1e8] ss:$16 sps:$4 sm:$0xff]   ;;  %v14482_v2 = vld [vmem:[#allocation4 + $0x204] ss:$16 sps:$4 sm:$0xff]   ;;  %v3518_v41 = vmax.f32 %v1604_v33, %v3006_v62  ;;  %v1608_v30 = vadd.f32 %v1607_v6, %v16179_v9  ;;  %v1609_v27 = vpop.f32.mrb[117].mxu0 }
 0x217   :  { %6240 = vmatpush1.bf16.msra.mxu1 %v14471_v4  ;;  %5469 = vmatprep.subr.bf16.mxu0 %v14476_v20  ;;  %v16480_v37 = vpack.c.bf16 %v3517_v53, %v3501_v14  ;;  %v14485_v5 = vld [vmem:[#allocation4 + $0x20c] ss:$16 sps:$4 sm:$0xff]   ;;  %v3504_v58 = vmax.f32 %v1793_v24, %v2992_v39  ;;  %v3520_v15 = vmax.f32 %v1797_v50, %v3008_v61  ;;  %v1802_v4 = vpop.f32.mrb[117].mxu1  ;;  %v1611_v20 = vpop.f32.mrb[118].mxu0  ;;  %v15257_v53 = vld [vmem:[%s18911_s0 + $0x40] sm:$0xff]  }
 0x218   :  { %6241 = vmatprep.subr.bf16.mxu1 %v14479_v11  ;;  %v16483_v1 = vpack.c.bf16 %v3519_v12, %v3503_v35  ;;  %v1801_v51 = vadd.f32 %v1800_v60, %v16192_v52  ;;  %v16486_v63 = vpack.c.bf16 %v3518_v41, %v3502_v22  ;;  %v1610_v38 = vadd.f32 %v1609_v27, %v16198_v3  ;;  %v1804_v10 = vpop.f32.mrb[118].mxu1  ;;  %v1613_v62 = vpop.f32.mrb[119].mxu0 }
 0x219   :  { %v3021_v33 = vmul.f32 0.01, %v1608_v30  ;;  %v1612_v0 = vadd.f32 %v1611_v20, %v16179_v9  ;;  %v16490_v11 = vpack.c.bf16 %v3520_v15, %v3504_v58  ;;  %v1803_v24 = vadd.f32 %v1802_v4, %v16202_v44  ;;  %v1806_v14 = vpop.f32.mrb[119].mxu1 }
 0x21a   :  { %19255 = vst [vmem:[#allocation103_spill] sm:$0xff] %v16483_v1  ;;  %5470 = vmatpush1.bf16.msra.mxu0 %v14474_v26  ;;  %v3023_v50 = vmul.f32 0.01, %v1801_v51  ;;  %v1805_v39 = vadd.f32 %v1804_v10, %v16192_v52  ;;  %v1614_v22 = vadd.f32 %v1613_v62, %v16198_v3  ;;  %v3022_v26 = vmul.f32 0.01, %v1610_v38 }
 0x21b   :  { %19256 = vst [vmem:[#allocation104_spill] sm:$0xff] %v16490_v11  ;;  %6242 = vmatpush1.bf16.msra.mxu1 %v14477_v31  ;;  %5632 = vmatprep.subr.bf16.mxu0 %v14482_v2  ;;  %v3037_v35 = vmul.f32 0.01, %v1612_v0  ;;  %v1807_v61 = vadd.f32 %v1806_v14, %v16202_v44  ;;  %v3024_v41 = vmul.f32 0.01, %v1803_v24  ;;  %v3533_v31 = vmax.f32 %v1608_v30, %v3021_v33 }
 0x21c   :  { %2328 = vmatmul.mubr.bf16.gmra.mrb[224].mxu0 %v15257_v53  ;;  %6404 = vmatprep.subr.bf16.mxu1 %v14485_v5  ;;  %v3039_v12 = vmul.f32 0.01, %v1805_v39  ;;  %v3038_v6 = vmul.f32 0.01, %v1614_v22  ;;  %v3535_v27 = vmax.f32 %v1801_v51, %v3023_v50  ;;  %v3534_v4 = vmax.f32 %v1610_v38, %v3022_v26 }
 0x21d   :  { %2521 = vmatmul.mubr.bf16.gmra.mrb[224].mxu1 %v15257_v53  ;;  %2337 = vmatprep.mubr.bf16.mxu0 %v19149_v40  ;;  %v3549_v2 = vmax.f32 %v1612_v0, %v3037_v35  ;;  %v3040_v60 = vmul.f32 0.01, %v1807_v61  ;;  %v1617_v15 = vpop.f32.mrb[120].mxu0  ;;  %v1810_v62 = vpop.f32.mrb[120].mxu1  ;;  %v3536_v53 = vmax.f32 %v1803_v24, %v3024_v41 }
 0x21e   :  { %2530 = vmatprep.mubr.bf16.mxu1 %v19149_v40  ;;  %v3551_v58 = vmax.f32 %v1805_v39, %v3039_v12  ;;  %v3550_v20 = vmax.f32 %v1614_v22, %v3038_v6  ;;  %v1618_v10 = vadd.f32 %v1617_v15, %v16179_v9  ;;  %v1619_v14 = vpop.f32.mrb[121].mxu0  ;;  %v1811_v30 = vadd.f32 %v1810_v62, %v16192_v52  ;;  %v1812_v33 = vpop.f32.mrb[121].mxu1 }
 0x21f   :  { %v16501_v5 = vpack.c.bf16 %v3549_v2, %v3533_v31  ;;  %v3552_v1 = vmax.f32 %v1807_v61, %v3040_v60  ;;  %v1621_v0 = vpop.f32.mrb[122].mxu0  ;;  %v1620_v51 = vadd.f32 %v1619_v14, %v16198_v3  ;;  %v1814_v39 = vpop.f32.mrb[122].mxu1  ;;  %v1813_v24 = vadd.f32 %v1812_v33, %v16202_v44  ;;  %v15258_v2 = vld [vmem:[%s18911_s0 + $0x48] sm:$0xff]  }
 0x220   :  { %v16504_v11 = vpack.c.bf16 %v3551_v58, %v3535_v27  ;;  %v16507_v35 = vpack.c.bf16 %v3550_v20, %v3534_v4  ;;  %v3053_v38 = vmul.f32 0.01, %v1618_v10  ;;  %v1622_v50 = vadd.f32 %v1621_v0, %v16179_v9  ;;  %v1623_v22 = vpop.f32.mrb[123].mxu0  ;;  %v1816_v6 = vpop.f32.mrb[123].mxu1 }
 0x221   :  { %19257 = vst [vmem:[#allocation105_spill] sm:$0xff] %v16501_v5  ;;  %v16511_v26 = vpack.c.bf16 %v3552_v1, %v3536_v53  ;;  %v3055_v61 = vmul.f32 0.01, %v1811_v30  ;;  %v1815_v12 = vadd.f32 %v1814_v39, %v16192_v52  ;;  %v1624_v41 = vadd.f32 %v1623_v22, %v16198_v3 }
 0x222   :  { %19258 = vst [vmem:[#allocation106_spill] sm:$0xff] %v16504_v11  ;;  %19259 = vst [vmem:[#allocation107_spill] sm:$0xff] %v16507_v35  ;;  %v3069_v31 = vmul.f32 0.01, %v1622_v50  ;;  %v3054_v60 = vmul.f32 0.01, %v1620_v51  ;;  %v1817_v27 = vadd.f32 %v1816_v6, %v16202_v44  ;;  %v3565_v4 = vmax.f32 %v1618_v10, %v3053_v38 }
 0x223   :  { %19260 = vst [vmem:[#allocation108_spill] sm:$0xff] %v16511_v26  ;;  %v3071_v58 = vmul.f32 0.01, %v1815_v12  ;;  %v3070_v1 = vmul.f32 0.01, %v1624_v41  ;;  %v3567_v14 = vmax.f32 %v1811_v30, %v3055_v61  ;;  %v238_v30 = vld [vmem:[%s18914_s3 + $0x8] sm:$0xff] }
 0x224   :  { %2338 = vmatmul.mubr.bf16.gmra.mrb[228].mxu0 %v15258_v2  ;;  %v3056_v15 = vmul.f32 0.01, %v1813_v24  ;;  %v3581_v20 = vmax.f32 %v1622_v50, %v3069_v31  ;;  %v3072_v62 = vmul.f32 0.01, %v1817_v27  ;;  %v3566_v0 = vmax.f32 %v1620_v51, %v3054_v60 }
 0x225   :  { %2531 = vmatmul.mubr.bf16.gmra.mrb[228].mxu1 %v15258_v2  ;;  %2347 = vmatprep.mubr.bf16.mxu0 %v19149_v40  ;;  %v3583_v53 = vmax.f32 %v1815_v12, %v3071_v58  ;;  %v1627_v33 = vpop.f32.mrb[124].mxu0  ;;  %v3582_v39 = vmax.f32 %v1624_v41, %v3070_v1  ;;  %v1820_v11 = vpop.f32.mrb[124].mxu1 }
 0x226   :  { %2540 = vmatprep.mubr.bf16.mxu1 %v19149_v40  ;;  %v16522_v22 = vpack.c.bf16 %v3581_v20, %v3565_v4  ;;  %v1628_v6 = vadd.f32 %v1627_v33, %v16179_v9  ;;  %v1629_v2 = vpop.f32.mrb[125].mxu0  ;;  %v3568_v26 = vmax.f32 %v1813_v24, %v3056_v15  ;;  %v3584_v5 = vmax.f32 %v1817_v27, %v3072_v62  ;;  %v1822_v38 = vpop.f32.mrb[125].mxu1  ;;  %v15259_v4 = vld [vmem:[%s18911_s0 + $0x50] sm:$0xff]  }
 0x227   :  { %v16525_v35 = vpack.c.bf16 %v3583_v53, %v3567_v14  ;;  %v1821_v10 = vadd.f32 %v1820_v11, %v16192_v52  ;;  %v1631_v50 = vpop.f32.mrb[126].mxu0  ;;  %v16531_v51 = vpack.c.bf16 %v3582_v39, %v3566_v0  ;;  %v1630_v61 = vadd.f32 %v1629_v2, %v16198_v3  ;;  %v1824_v31 = vpop.f32.mrb[126].mxu1 }
 0x228   :  { %19261 = vst [vmem:[#allocation109_spill] sm:$0xff] %v16522_v22  ;;  %v3085_v12 = vmul.f32 0.01, %v1628_v6  ;;  %v1632_v41 = vadd.f32 %v1631_v50, %v16179_v9  ;;  %v1633_v24 = vpop.f32.mrb[127].mxu0  ;;  %v16535_v60 = vpack.c.bf16 %v3584_v5, %v3568_v26  ;;  %v1825_v11 = vadd.f32 %v1824_v31, %v16192_v52  ;;  %v1826_v58 = vpop.f32.mrb[127].mxu1 }
 0x229   :  { %19262 = vst [vmem:[#allocation110_spill] sm:$0xff] %v16525_v35  ;;  %19263 = vst [vmem:[#allocation111_spill] sm:$0xff] %v16531_v51  ;;  %v3087_v27 = vmul.f32 0.01, %v1821_v10  ;;  %v1634_v1 = vadd.f32 %v1633_v24, %v16198_v3  ;;  %v16543_v20 = vrot.slane %v238_v30, %v15609_v45  ;;  %v3086_v9 = vmul.f32 0.01, %v1630_v61 }
 0x22a   :  { %19264 = vst [vmem:[#allocation112_spill] sm:$0xff] %v16535_v60  ;;  %v3101_v15 = vmul.f32 0.01, %v1632_v41  ;;  %v16546_v62 = vadd.f32 %v1822_v38, %v16202_v44  ;;  %v3103_v5 = vmul.f32 0.01, %v1825_v11  ;;  %v16549_v52 = vrot.slane %v238_v30, %v15612_v46 }
 0x22b   :  { %v16552_v3 = vrot.slane %v238_v30, %v15615_v47  ;;  %v3102_v26 = vmul.f32 0.01, %v1634_v1  ;;  %v3597_v14 = vmax.f32 %v1628_v6, %v3085_v12  ;;  %v16556_v33 = vrot.slane %v238_v30, %v15636_v34 }
 0x22c   :  { %2348 = vmatmul.mubr.bf16.gmra.mrb[232].mxu0 %v15259_v4  ;;  %v3613_v53 = vmax.f32 %v1632_v41, %v3101_v15  ;;  %v1827_v0 = vadd.f32 %v1826_v58, %v16202_v44  ;;  %v3599_v39 = vmax.f32 %v1821_v10, %v3087_v27  ;;  %v3615_v2 = vmax.f32 %v1825_v11, %v3103_v5 }
 0x22d   :  { %2541 = vmatmul.mubr.bf16.gmra.mrb[232].mxu1 %v15259_v4  ;;  %2357 = vmatprep.mubr.bf16.mxu0 %v19149_v40  ;;  %v1863_v38 = vpop.f32.mrb[128].mxu0  ;;  %v3598_v50 = vmax.f32 %v1630_v61, %v3086_v9  ;;  %v3614_v31 = vmax.f32 %v1634_v1, %v3102_v26  ;;  %v2056_v47 = vpop.f32.mrb[128].mxu1  ;;  %v3088_v6 = vmul.f32 0.01, %v16546_v62 }
 0x22e   :  { %2550 = vmatprep.mubr.bf16.mxu1 %v19149_v40  ;;  %v16560_v24 = vpack.c.bf16 %v3613_v53, %v3597_v14  ;;  %v1864_v4 = vadd.f32 %v1863_v38, %v16543_v20  ;;  %v1865_v46 = vpop.f32.mrb[129].mxu0  ;;  %v16564_v12 = vpack.c.bf16 %v3615_v2, %v3599_v39  ;;  %v2057_v30 = vadd.f32 %v2056_v47, %v16549_v52  ;;  %v2058_v44 = vpop.f32.mrb[129].mxu1  ;;  %v15260_v38 = vld [vmem:[%s18911_s0 + $0x58] sm:$0xff]  }
 0x22f   :  { %v1866_v41 = vadd.f32 %v1865_v46, %v16552_v3  ;;  %v1867_v10 = vpop.f32.mrb[130].mxu0  ;;  %v16568_v27 = vpack.c.bf16 %v3614_v31, %v3598_v50  ;;  %v2059_v11 = vadd.f32 %v2058_v44, %v16556_v33  ;;  %v2060_v1 = vpop.f32.mrb[130].mxu1  ;;  %v3104_v9 = vmul.f32 0.01, %v1827_v0 }
 0x230   :  { %19265 = vst [vmem:[#allocation113_spill] sm:$0xff] %v16560_v24  ;;  %19266 = vst [vmem:[#allocation114_spill] sm:$0xff] %v16564_v12  ;;  %v2609_v61 = vmul.f32 0.01, %v1864_v4  ;;  %v1868_v58 = vadd.f32 %v1867_v10, %v16543_v20  ;;  %v1869_v15 = vpop.f32.mrb[131].mxu0  ;;  %v2061_v14 = vadd.f32 %v2060_v1, %v16549_v52  ;;  %v2062_v53 = vpop.f32.mrb[131].mxu1  ;;  %v3600_v10 = vmax.f32 %v16546_v62, %v3088_v6 }
 0x231   :  { %19267 = vst [vmem:[#allocation115_spill] sm:$0xff] %v16568_v27  ;;  %v2611_v5 = vmul.f32 0.01, %v2057_v30  ;;  %v2610_v26 = vmul.f32 0.01, %v1866_v41  ;;  %v1870_v47 = vadd.f32 %v1869_v15, %v16552_v3  ;;  %v2063_v2 = vadd.f32 %v2062_v53, %v16556_v33 }
 0x232   :  { %v2612_v46 = vmul.f32 0.01, %v2059_v11  ;;  %v2625_v39 = vmul.f32 0.01, %v1868_v58  ;;  %v3121_v50 = vmax.f32 %v1864_v4, %v2609_v61  ;;  %v2627_v31 = vmul.f32 0.01, %v2061_v14 }
 0x233   :  { %v2626_v44 = vmul.f32 0.01, %v1870_v47  ;;  %v3123_v1 = vmax.f32 %v2057_v30, %v2611_v5  ;;  %v2628_v34 = vmul.f32 0.01, %v2063_v2  ;;  %v3616_v45 = vmax.f32 %v1827_v0, %v3104_v9 }
 0x234   :  { %2358 = vmatmul.mubr.bf16.gmra.mrb[236].mxu0 %v15260_v38  ;;  %v3137_v15 = vmax.f32 %v1868_v58, %v2625_v39  ;;  %v3122_v53 = vmax.f32 %v1866_v41, %v2610_v26  ;;  %v3124_v12 = vmax.f32 %v2059_v11, %v2612_v46  ;;  %v3139_v35 = vmax.f32 %v2061_v14, %v2627_v31 }
 0x235   :  { %2551 = vmatmul.mubr.bf16.gmra.mrb[236].mxu1 %v15260_v38  ;;  %2367 = vmatprep.mubr.bf16.mxu0 %v19149_v40  ;;  %v3138_v60 = vmax.f32 %v1870_v47, %v2626_v44  ;;  %v3140_v4 = vmax.f32 %v2063_v2, %v2628_v34  ;;  %v16584_v51 = vpack.c.bf16 %v3616_v45, %v3600_v10  ;;  %v15261_v2 = vld [vmem:[%s18911_s0 + $0x60] sm:$0xff]  }
 0x236   :  { %2560 = vmatprep.mubr.bf16.mxu1 %v19149_v40  ;;  %v1873_v24 = vpop.f32.mrb[132].mxu0  ;;  %v16581_v27 = vpack.c.bf16 %v3137_v15, %v3121_v50  ;;  %v2066_v38 = vpop.f32.mrb[132].mxu1  ;;  %v16586_v62 = vpack.c.bf16 %v3139_v35, %v3123_v1 }
 0x237   :  { %v1874_v61 = vadd.f32 %v1873_v24, %v16543_v20  ;;  %v1875_v22 = vpop.f32.mrb[133].mxu0  ;;  %v2067_v6 = vadd.f32 %v2066_v38, %v16549_v52  ;;  %v2068_v30 = vpop.f32.mrb[133].mxu1  ;;  %v16590_v11 = vpack.c.bf16 %v3138_v60, %v3122_v53  ;;  %v16594_v26 = vpack.c.bf16 %v3140_v4, %v3124_v12 }
 0x238   :  { %19268 = vst [vmem:[#allocation116_spill] sm:$0xff] %v16586_v62  ;;  %v1876_v0 = vadd.f32 %v1875_v22, %v16552_v3  ;;  %v1877_v41 = vpop.f32.mrb[134].mxu0  ;;  %v2069_v9 = vadd.f32 %v2068_v30, %v16556_v33  ;;  %v2070_v24 = vpop.f32.mrb[134].mxu1 }
 0x239   :  { %v2641_v58 = vmul.f32 0.01, %v1874_v61  ;;  %v1878_v34 = vadd.f32 %v1877_v41, %v16543_v20  ;;  %v1879_v5 = vpop.f32.mrb[135].mxu0  ;;  %19269 = vst [vmem:[#allocation117_spill] sm:$0xff] %v16594_v26  ;;  %v2643_v45 = vmul.f32 0.01, %v2067_v6  ;;  %v2071_v14 = vadd.f32 %v2070_v24, %v16549_v52 }
 0x23a   :  { %v2642_v35 = vmul.f32 0.01, %v1876_v0  ;;  %v1880_v47 = vadd.f32 %v1879_v5, %v16552_v3  ;;  %v2072_v22 = vpop.f32.mrb[135].mxu1  ;;  %v2644_v46 = vmul.f32 0.01, %v2069_v9 }
 0x23b   :  { %v2657_v39 = vmul.f32 0.01, %v1878_v34  ;;  %v2073_v60 = vadd.f32 %v2072_v22, %v16556_v33  ;;  %v2659_v50 = vmul.f32 0.01, %v2071_v14  ;;  %v3153_v12 = vmax.f32 %v1874_v61, %v2641_v58 }
 0x23c   :  { %2368 = vmatmul.mubr.bf16.gmra.mrb[240].mxu0 %v15261_v2  ;;  %v2658_v31 = vmul.f32 0.01, %v1880_v47  ;;  %v3155_v1 = vmax.f32 %v2067_v6, %v2643_v45  ;;  %v3154_v15 = vmax.f32 %v1876_v0, %v2642_v35  ;;  %v3156_v30 = vmax.f32 %v2069_v9, %v2644_v46 }
 0x23d   :  { %2561 = vmatmul.mubr.bf16.gmra.mrb[240].mxu1 %v15261_v2  ;;  %2377 = vmatprep.mubr.bf16.mxu0 %v19149_v40  ;;  %v3169_v44 = vmax.f32 %v1878_v34, %v2657_v39  ;;  %v2660_v10 = vmul.f32 0.01, %v2073_v60  ;;  %v3171_v53 = vmax.f32 %v2071_v14, %v2659_v50 }
 0x23e   :  { %2570 = vmatprep.mubr.bf16.mxu1 %v19149_v40  ;;  %v3170_v4 = vmax.f32 %v1880_v47, %v2658_v31  ;;  %v2076_v22 = vpop.f32.mrb[136].mxu1 }
 0x23f   :  { %v1883_v38 = vpop.f32.mrb[136].mxu0  ;;  %v16604_v41 = vpack.c.bf16 %v3169_v44, %v3153_v12  ;;  %v3172_v24 = vmax.f32 %v2073_v60, %v2660_v10  ;;  %v16607_v62 = vpack.c.bf16 %v3171_v53, %v3155_v1  ;;  %v2077_v61 = vadd.f32 %v2076_v22, %v16549_v52  ;;  %v2078_v34 = vpop.f32.mrb[137].mxu1 }
 0x240   :  { %v1884_v5 = vadd.f32 %v1883_v38, %v16543_v20  ;;  %v1885_v2 = vpop.f32.mrb[137].mxu0  ;;  %v16611_v0 = vpack.c.bf16 %v3170_v4, %v3154_v15  ;;  %v2079_v9 = vadd.f32 %v2078_v34, %v16556_v33  ;;  %v2080_v14 = vpop.f32.mrb[138].mxu1  ;;  %v15262_v15 = vld [vmem:[%s18911_s0 + $0x68] sm:$0xff]  }
 0x241   :  { %19270 = vst [vmem:[#allocation118_spill] sm:$0xff] %v16604_v41  ;;  %19271 = vst [vmem:[#allocation119_spill] sm:$0xff] %v16607_v62  ;;  %v1886_v58 = vadd.f32 %v1885_v2, %v16552_v3  ;;  %v1887_v6 = vpop.f32.mrb[138].mxu0  ;;  %v16615_v46 = vpack.c.bf16 %v3172_v24, %v3156_v30  ;;  %v2675_v39 = vmul.f32 0.01, %v2077_v61  ;;  %v2081_v50 = vadd.f32 %v2080_v14, %v16549_v52  ;;  %v2082_v12 = vpop.f32.mrb[139].mxu1 }
 0x242   :  { %v2673_v45 = vmul.f32 0.01, %v1884_v5  ;;  %v1888_v35 = vadd.f32 %v1887_v6, %v16543_v20  ;;  %v1889_v47 = vpop.f32.mrb[139].mxu0  ;;  %v2676_v44 = vmul.f32 0.01, %v2079_v9  ;;  %v2083_v1 = vadd.f32 %v2082_v12, %v16556_v33 }
 0x243   :  { %19272 = vst [vmem:[#allocation120_spill] sm:$0xff] %v16615_v46  ;;  %v2674_v60 = vmul.f32 0.01, %v1886_v58  ;;  %v1890_v31 = vadd.f32 %v1889_v47, %v16552_v3  ;;  %v2691_v53 = vmul.f32 0.01, %v2081_v50  ;;  %v3187_v22 = vmax.f32 %v2077_v61, %v2675_v39 }
 0x244   :  { %v2689_v10 = vmul.f32 0.01, %v1888_v35  ;;  %2378 = vmatmul.mubr.bf16.gmra.mrb[244].mxu0 %v15262_v15  ;;  %v3185_v38 = vmax.f32 %v1884_v5, %v2673_v45  ;;  %v2692_v24 = vmul.f32 0.01, %v2083_v1  ;;  %v3188_v47 = vmax.f32 %v2079_v9, %v2676_v44 }
 0x245   :  { %v2690_v4 = vmul.f32 0.01, %v1890_v31  ;;  %2571 = vmatmul.mubr.bf16.gmra.mrb[244].mxu1 %v15262_v15  ;;  %2387 = vmatprep.mubr.bf16.mxu0 %v19149_v40  ;;  %v3186_v2 = vmax.f32 %v1886_v58, %v2674_v60  ;;  %v3203_v34 = vmax.f32 %v2081_v50, %v2691_v53 }
 0x246   :  { %v3201_v30 = vmax.f32 %v1888_v35, %v2689_v10  ;;  %2580 = vmatprep.mubr.bf16.mxu1 %v19149_v40  ;;  %v3204_v62 = vmax.f32 %v2083_v1, %v2692_v24 }
 0x247   :  { %v3202_v6 = vmax.f32 %v1890_v31, %v2690_v4  ;;  %v1893_v14 = vpop.f32.mrb[140].mxu0  ;;  %v16628_v41 = vpack.c.bf16 %v3203_v34, %v3187_v22  ;;  %v15263_v22 = vld [vmem:[%s18911_s0 + $0x70] sm:$0xff]  }
 0x248   :  { %v16625_v12 = vpack.c.bf16 %v3201_v30, %v3185_v38  ;;  %v1894_v46 = vadd.f32 %v1893_v14, %v16543_v20  ;;  %v2086_v26 = vpop.f32.mrb[140].mxu1  ;;  %v1895_v15 = vpop.f32.mrb[141].mxu0  ;;  %v16636_v44 = vpack.c.bf16 %v3204_v62, %v3188_v47 }
 0x249   :  { %19274 = vst [vmem:[#allocation122_spill] sm:$0xff] %v16628_v41  ;;  %v2087_v5 = vadd.f32 %v2086_v26, %v16549_v52  ;;  %v1896_v45 = vadd.f32 %v1895_v15, %v16552_v3  ;;  %v2088_v35 = vpop.f32.mrb[141].mxu1  ;;  %v1897_v61 = vpop.f32.mrb[142].mxu0  ;;  %v16632_v58 = vpack.c.bf16 %v3202_v6, %v3186_v2 }
 0x24a   :  { %19273 = vst [vmem:[#allocation121_spill] sm:$0xff] %v16625_v12  ;;  %v2705_v39 = vmul.f32 0.01, %v1894_v46  ;;  %v2089_v9 = vadd.f32 %v2088_v35, %v16556_v33  ;;  %v1898_v60 = vadd.f32 %v1897_v61, %v16543_v20  ;;  %v2090_v50 = vpop.f32.mrb[142].mxu1  ;;  %v1899_v31 = vpop.f32.mrb[143].mxu0  ;;  %19276 = vst [vmem:[#allocation124_spill] sm:$0xff] %v16636_v44 }
 0x24b   :  { %19275 = vst [vmem:[#allocation123_spill] sm:$0xff] %v16632_v58  ;;  %v2707_v10 = vmul.f32 0.01, %v2087_v5  ;;  %v2706_v1 = vmul.f32 0.01, %v1896_v45  ;;  %v2091_v53 = vadd.f32 %v2090_v50, %v16549_v52  ;;  %v1900_v26 = vadd.f32 %v1899_v31, %v16552_v3  ;;  %v2092_v4 = vpop.f32.mrb[143].mxu1 }
 0x24c   :  { %v2708_v38 = vmul.f32 0.01, %v2089_v9  ;;  %v2721_v30 = vmul.f32 0.01, %v1898_v60  ;;  %v2093_v24 = vadd.f32 %v2092_v4, %v16556_v33  ;;  %2388 = vmatmul.mubr.bf16.gmra.mrb[248].mxu0 %v15263_v22  ;;  %v3217_v62 = vmax.f32 %v1894_v46, %v2705_v39 }
 0x24d   :  { %v2723_v2 = vmul.f32 0.01, %v2091_v53  ;;  %v2722_v34 = vmul.f32 0.01, %v1900_v26  ;;  %2581 = vmatmul.mubr.bf16.gmra.mrb[248].mxu1 %v15263_v22  ;;  %2397 = vmatprep.mubr.bf16.mxu0 %v19149_v40  ;;  %v3219_v47 = vmax.f32 %v2087_v5, %v2707_v10  ;;  %v3218_v15 = vmax.f32 %v1896_v45, %v2706_v1 }
 0x24e   :  { %v3233_v6 = vmax.f32 %v1898_v60, %v2721_v30  ;;  %v2724_v14 = vmul.f32 0.01, %v2093_v24  ;;  %2590 = vmatprep.mubr.bf16.mxu1 %v19149_v40  ;;  %v3220_v31 = vmax.f32 %v2089_v9, %v2708_v38 }
 0x24f   :  { %v3235_v35 = vmax.f32 %v2091_v53, %v2723_v2  ;;  %v3234_v61 = vmax.f32 %v1900_v26, %v2722_v34  ;;  %v1903_v50 = vpop.f32.mrb[144].mxu0 }
 0x250   :  { %v16646_v4 = vpack.c.bf16 %v3233_v6, %v3217_v62  ;;  %v3236_v41 = vmax.f32 %v2093_v24, %v2724_v14  ;;  %v1904_v44 = vadd.f32 %v1903_v50, %v16543_v20  ;;  %v2096_v12 = vpop.f32.mrb[144].mxu1  ;;  %v1905_v22 = vpop.f32.mrb[145].mxu0  ;;  %v15264_v14 = vld [vmem:[%s18911_s0 + $0x78] sm:$0xff]  }
 0x251   :  { %v16649_v58 = vpack.c.bf16 %v3235_v35, %v3219_v47  ;;  %v2097_v46 = vadd.f32 %v2096_v12, %v16549_v52  ;;  %v1906_v39 = vadd.f32 %v1905_v22, %v16552_v3  ;;  %v2098_v40 = vpop.f32.mrb[145].mxu1  ;;  %v1907_v5 = vpop.f32.mrb[146].mxu0  ;;  %v16653_v45 = vpack.c.bf16 %v3234_v61, %v3218_v15 }
 0x252   :  { %19277 = vst [vmem:[#allocation125_spill] sm:$0xff] %v16646_v4  ;;  %v2737_v60 = vmul.f32 0.01, %v1904_v44  ;;  %v2099_v9 = vadd.f32 %v2098_v40, %v16556_v33  ;;  %v1908_v10 = vadd.f32 %v1907_v5, %v16543_v20  ;;  %v2100_v1 = vpop.f32.mrb[146].mxu1  ;;  %v1909_v53 = vpop.f32.mrb[147].mxu0  ;;  %v16657_v26 = vpack.c.bf16 %v3236_v41, %v3220_v31 }
 0x253   :  { %19278 = vst [vmem:[#allocation126_spill] sm:$0xff] %v16649_v58  ;;  %19279 = vst [vmem:[#allocation127_spill] sm:$0xff] %v16653_v45  ;;  %v2739_v38 = vmul.f32 0.01, %v2097_v46  ;;  %v2738_v30 = vmul.f32 0.01, %v1906_v39  ;;  %v2101_v24 = vadd.f32 %v2100_v1, %v16549_v52  ;;  %v1910_v12 = vadd.f32 %v1909_v53, %v16552_v3 }
 0x254   :  { %19280 = vst [vmem:[#allocation128_spill] sm:$0xff] %v16657_v26  ;;  %v2102_v2 = vpop.f32.mrb[147].mxu1  ;;  %v2740_v34 = vmul.f32 0.01, %v2099_v9  ;;  %v2753_v62 = vmul.f32 0.01, %v1908_v10  ;;  %2398 = vmatmul.mubr.bf16.gmra.mrb[252].mxu0 %v15264_v14  ;;  %v3249_v41 = vmax.f32 %v1904_v44, %v2737_v60 }
 0x255   :  { %v2103_v6 = vadd.f32 %v2102_v2, %v16556_v33  ;;  %v2755_v47 = vmul.f32 0.01, %v2101_v24  ;;  %v2754_v15 = vmul.f32 0.01, %v1910_v12  ;;  %2591 = vmatmul.mubr.bf16.gmra.mrb[252].mxu1 %v15264_v14  ;;  %5471 = vmatprep.mubr.bf16.mxu0 %v15670_v54  ;;  %v3251_v50 = vmax.f32 %v2097_v46, %v2739_v38 }
 0x256   :  { %v3265_v35 = vmax.f32 %v1908_v10, %v2753_v62  ;;  %6243 = vmatprep.mubr.bf16.mxu1 %v15670_v54  ;;  %v3250_v31 = vmax.f32 %v1906_v39, %v2738_v30  ;;  %v3252_v1 = vmax.f32 %v2099_v9, %v2740_v34  ;;  %v14480_v39 = vld [vmem:[#allocation4 + $0x200] ss:$16 sps:$4 sm:$0xff]   ;;  %v14483_v10 = vld [vmem:[#allocation4 + $0x208] ss:$16 sps:$4 sm:$0xff]   ;;  %v14488_v62 = vld [vmem:[#allocation4 + $0x224] ss:$16 sps:$4 sm:$0xff]  }
 0x257   :  { %v2756_v61 = vmul.f32 0.01, %v2103_v6  ;;  %v3267_v22 = vmax.f32 %v2101_v24, %v2755_v47  ;;  %v3266_v40 = vmax.f32 %v1910_v12, %v2754_v15  ;;  %v1913_v5 = vpop.f32.mrb[148].mxu0 }
 0x258   :  { %v16667_v53 = vpack.c.bf16 %v3265_v35, %v3249_v41  ;;  %v1914_v58 = vadd.f32 %v1913_v5, %v16543_v20  ;;  %v2106_v26 = vpop.f32.mrb[148].mxu1  ;;  %v1915_v14 = vpop.f32.mrb[149].mxu0 }
 0x259   :  { %v3268_v2 = vmax.f32 %v2103_v6, %v2756_v61  ;;  %v16670_v4 = vpack.c.bf16 %v3267_v22, %v3251_v50  ;;  %v2107_v44 = vadd.f32 %v2106_v26, %v16549_v52  ;;  %v1916_v60 = vadd.f32 %v1915_v14, %v16552_v3  ;;  %v2108_v54 = vpop.f32.mrb[149].mxu1  ;;  %v1917_v46 = vpop.f32.mrb[150].mxu0  ;;  %v14491_v22 = vld [vmem:[#allocation4 + $0x22c] ss:$16 sps:$4 sm:$0xff]  }
 0x25a   :  { %19281 = vst [vmem:[#allocation129_spill] sm:$0xff] %v16667_v53  ;;  %v16674_v38 = vpack.c.bf16 %v3266_v40, %v3250_v31  ;;  %v2769_v9 = vmul.f32 0.01, %v1914_v58  ;;  %v2109_v30 = vadd.f32 %v2108_v54, %v16556_v33  ;;  %v1918_v24 = vadd.f32 %v1917_v46, %v16543_v20  ;;  %v2110_v12 = vpop.f32.mrb[150].mxu1  ;;  %v1919_v34 = vpop.f32.mrb[151].mxu0 }
 0x25b   :  { %19282 = vst [vmem:[#allocation130_spill] sm:$0xff] %v16670_v4  ;;  %v16678_v6 = vpack.c.bf16 %v3268_v2, %v3252_v1  ;;  %v2771_v47 = vmul.f32 0.01, %v2107_v44  ;;  %v2770_v26 = vmul.f32 0.01, %v1916_v60  ;;  %v2111_v15 = vadd.f32 %v2110_v12, %v16549_v52  ;;  %v2112_v35 = vpop.f32.mrb[151].mxu1 }
 0x25c   :  { %19283 = vst [vmem:[#allocation131_spill] sm:$0xff] %v16674_v38  ;;  %v1920_v41 = vadd.f32 %v1919_v34, %v16552_v3  ;;  %v2772_v61 = vmul.f32 0.01, %v2109_v30  ;;  %v2785_v50 = vmul.f32 0.01, %v1918_v24  ;;  %v2113_v31 = vadd.f32 %v2112_v35, %v16556_v33  ;;  %5472 = vmatmul.mubr.bf16.vlgmr.msra.gmra.mrb[0].mxu0 %v15658_v23 }
 0x25d   :  { %19284 = vst [vmem:[#allocation132_spill] sm:$0xff] %v16678_v6  ;;  %v2787_v40 = vmul.f32 0.01, %v2111_v15  ;;  %6244 = vmatmul.mubr.bf16.vlgmr.msra.gmra.mrb[0].mxu1 %v15658_v23  ;;  %5481 = vmatprep.mubr.bf16.mxu0 %v15710_v48  ;;  %v3281_v1 = vmax.f32 %v1914_v58, %v2769_v9  ;;  %v3283_v2 = vmax.f32 %v2107_v44, %v2771_v47  ;;  %v14486_v46 = vld [vmem:[#allocation4 + $0x220] ss:$16 sps:$4 sm:$0xff]  }
 0x25e   :  { %v2786_v5 = vmul.f32 0.01, %v1920_v41  ;;  %v3297_v14 = vmax.f32 %v1918_v24, %v2785_v50  ;;  %v2788_v54 = vmul.f32 0.01, %v2113_v31  ;;  %5633 = vmatpush1.bf16.msra.mxu0 %v14480_v39  ;;  %6253 = vmatprep.mubr.bf16.mxu1 %v15710_v48  ;;  %v3282_v12 = vmax.f32 %v1916_v60, %v2770_v26  ;;  %v14489_v6 = vld [vmem:[#allocation4 + $0x228] ss:$16 sps:$4 sm:$0xff]  }
 0x25f   :  { %v3299_v34 = vmax.f32 %v2111_v15, %v2787_v40  ;;  %v1923_v4 = vpop.f32.mrb[152].mxu0  ;;  %6405 = vmatpush1.bf16.msra.mxu1 %v14483_v10  ;;  %5634 = vmatprep.subr.bf16.mxu0 %v14488_v62  ;;  %v14494_v53 = vld [vmem:[#allocation4 + $0x244] ss:$16 sps:$4 sm:$0xff]   ;;  %v3284_v38 = vmax.f32 %v2109_v30, %v2772_v61  ;;  %v14497_v39 = vld [vmem:[#allocation4 + $0x24c] ss:$16 sps:$4 sm:$0xff]  }
 0x260   :  { %v3298_v35 = vmax.f32 %v1920_v41, %v2786_v5  ;;  %v16687_v23 = vpack.c.bf16 %v3297_v14, %v3281_v1  ;;  %v3300_v45 = vmax.f32 %v2113_v31, %v2788_v54  ;;  %v1924_v58 = vadd.f32 %v1923_v4, %v16543_v20  ;;  %v2116_v44 = vpop.f32.mrb[152].mxu1  ;;  %v1925_v9 = vpop.f32.mrb[153].mxu0  ;;  %6406 = vmatprep.subr.bf16.mxu1 %v14491_v22  ;;  %v14492_v47 = vld [vmem:[#allocation4 + $0x240] ss:$16 sps:$4 sm:$0xff]   ;;  %v14495_v26 = vld [vmem:[#allocation4 + $0x248] ss:$16 sps:$4 sm:$0xff]  }
 0x261   :  { %v16690_v48 = vpack.c.bf16 %v3299_v34, %v3283_v2  ;;  %v2117_v60 = vadd.f32 %v2116_v44, %v16549_v52  ;;  %v1926_v24 = vadd.f32 %v1925_v9, %v16552_v3  ;;  %v2118_v10 = vpop.f32.mrb[153].mxu1  ;;  %v1927_v62 = vpop.f32.mrb[154].mxu0  ;;  %v14500_v31 = vld [vmem:[#allocation4 + $0x264] ss:$16 sps:$4 sm:$0xff]  }
 0x262   :  { %v16694_v30 = vpack.c.bf16 %v3298_v35, %v3282_v12  ;;  %v2801_v15 = vmul.f32 0.01, %v1924_v58  ;;  %v16697_v41 = vadd.f32 %v2118_v10, %v16556_v33  ;;  %v1928_v4 = vadd.f32 %v1927_v62, %v16543_v20  ;;  %v2120_v61 = vpop.f32.mrb[154].mxu1  ;;  %v1929_v50 = vpop.f32.mrb[155].mxu0  ;;  %5635 = vmatpush1.bf16.msra.mxu0 %v14486_v46  ;;  %v14503_v46 = vld [vmem:[#allocation4 + $0x26c] ss:$16 sps:$4 sm:$0xff]  }
 0x263   :  { %19285 = vst [vmem:[#allocation133_spill] sm:$0xff] %v16690_v48  ;;  %v16700_v22 = vpack.c.bf16 %v3300_v45, %v3284_v38  ;;  %v2803_v40 = vmul.f32 0.01, %v2117_v60  ;;  %v2802_v5 = vmul.f32 0.01, %v1926_v24  ;;  %v2121_v1 = vadd.f32 %v2120_v61, %v16549_v52  ;;  %v2122_v14 = vpop.f32.mrb[155].mxu1  ;;  %6407 = vmatpush1.bf16.msra.mxu1 %v14489_v6  ;;  %5636 = vmatprep.subr.bf16.mxu0 %v14494_v53 }
 0x264   :  { %v1930_v2 = vadd.f32 %v1929_v50, %v16552_v3  ;;  %v2804_v54 = vmul.f32 0.01, %v16697_v41  ;;  %v2817_v12 = vmul.f32 0.01, %v1928_v4  ;;  %v2123_v34 = vadd.f32 %v2122_v14, %v16556_v33  ;;  %5482 = vmatmul.mubr.bf16.gmra.mrb[4].mxu0 %v15702_v25  ;;  %6408 = vmatprep.subr.bf16.mxu1 %v14497_v39  ;;  %v19287_v35 = vld [vmem:[#allocation19_spill] sm:$0xff] }
 0x265   :  { %19286 = vst [vmem:[#allocation134_spill] sm:$0xff] %v16700_v22  ;;  %v2819_v45 = vmul.f32 0.01, %v2121_v1  ;;  %6254 = vmatmul.mubr.bf16.gmra.mrb[4].mxu1 %v15702_v25  ;;  %5491 = vmatprep.mubr.bf16.mxu0 %v19287_v35  ;;  %v3313_v44 = vmax.f32 %v1924_v58, %v2801_v15  ;;  %v3315_v9 = vmax.f32 %v2117_v60, %v2803_v40  ;;  %v14498_v53 = vld [vmem:[#allocation4 + $0x260] ss:$16 sps:$4 sm:$0xff]  }
 0x266   :  { %v2818_v38 = vmul.f32 0.01, %v1930_v2  ;;  %v3329_v10 = vmax.f32 %v1928_v4, %v2817_v12  ;;  %v2820_v6 = vmul.f32 0.01, %v2123_v34  ;;  %6263 = vmatprep.mubr.bf16.mxu1 %v19287_v35  ;;  %5637 = vmatpush1.bf16.msra.mxu0 %v14492_v47  ;;  %v3314_v62 = vmax.f32 %v1926_v24, %v2802_v5  ;;  %v14501_v39 = vld [vmem:[#allocation4 + $0x268] ss:$16 sps:$4 sm:$0xff]  }
 0x267   :  { %v3331_v61 = vmax.f32 %v2121_v1, %v2819_v45  ;;  %v1933_v14 = vpop.f32.mrb[156].mxu0  ;;  %6409 = vmatpush1.bf16.msra.mxu1 %v14495_v26  ;;  %5638 = vmatprep.subr.bf16.mxu0 %v14500_v31  ;;  %v14506_v48 = vld [vmem:[#allocation4 + $0x284] ss:$16 sps:$4 sm:$0xff]   ;;  %v3316_v25 = vmax.f32 %v16697_v41, %v2804_v54  ;;  %v14509_v47 = vld [vmem:[#allocation4 + $0x28c] ss:$16 sps:$4 sm:$0xff]  }
 0x268   :  { %v3330_v50 = vmax.f32 %v1930_v2, %v2818_v38  ;;  %v16711_v22 = vpack.c.bf16 %v3329_v10, %v3313_v44  ;;  %v3332_v58 = vmax.f32 %v2123_v34, %v2820_v6  ;;  %v1934_v60 = vadd.f32 %v1933_v14, %v16543_v20  ;;  %v2126_v15 = vpop.f32.mrb[156].mxu1  ;;  %v1935_v4 = vpop.f32.mrb[157].mxu0  ;;  %6410 = vmatprep.subr.bf16.mxu1 %v14503_v46  ;;  %v14504_v1 = vld [vmem:[#allocation4 + $0x280] ss:$16 sps:$4 sm:$0xff]   ;;  %v14507_v2 = vld [vmem:[#allocation4 + $0x288] ss:$16 sps:$4 sm:$0xff]  }
 0x269   :  { %v16714_v40 = vpack.c.bf16 %v3331_v61, %v3315_v9  ;;  %v2127_v24 = vadd.f32 %v2126_v15, %v16549_v52  ;;  %v1936_v26 = vadd.f32 %v1935_v4, %v16552_v3  ;;  %v2128_v31 = vpop.f32.mrb[157].mxu1  ;;  %v1937_v5 = vpop.f32.mrb[158].mxu0  ;;  %v14512_v38 = vld [vmem:[#allocation4 + $0x2a4] ss:$16 sps:$4 sm:$0xff]  }
 0x26a   :  { %19288 = vst [vmem:[#allocation19_spill] sm:$0xff] %v16711_v22  ;;  %v16718_v41 = vpack.c.bf16 %v3330_v50, %v3314_v62  ;;  %v2833_v54 = vmul.f32 0.01, %v1934_v60  ;;  %v16721_v12 = vadd.f32 %v2128_v31, %v16556_v33  ;;  %v1938_v34 = vadd.f32 %v1937_v5, %v16543_v20  ;;  %v2130_v46 = vpop.f32.mrb[158].mxu1  ;;  %v1939_v45 = vpop.f32.mrb[159].mxu0  ;;  %5639 = vmatpush1.bf16.msra.mxu0 %v14498_v53  ;;  %v19292_v15 = vld [vmem:[#allocation17_spill] sm:$0xff] }
 0x26b   :  { %19289 = vst [vmem:[#allocation135_spill] sm:$0xff] %v16714_v40  ;;  %v16724_v35 = vpack.c.bf16 %v3332_v58, %v3316_v25  ;;  %v2835_v44 = vmul.f32 0.01, %v2127_v24  ;;  %v2834_v9 = vmul.f32 0.01, %v1936_v26  ;;  %v2131_v10 = vadd.f32 %v2130_v46, %v16549_v52  ;;  %v2132_v62 = vpop.f32.mrb[159].mxu1  ;;  %6411 = vmatpush1.bf16.msra.mxu1 %v14501_v39  ;;  %5640 = vmatprep.subr.bf16.mxu0 %v14506_v48 }
 0x26c   :  { %19290 = vst [vmem:[#allocation136_spill] sm:$0xff] %v16718_v41  ;;  %v1940_v6 = vadd.f32 %v1939_v45, %v16552_v3  ;;  %v2836_v61 = vmul.f32 0.01, %v16721_v12  ;;  %v2849_v50 = vmul.f32 0.01, %v1938_v34  ;;  %v2133_v14 = vadd.f32 %v2132_v62, %v16556_v33  ;;  %5492 = vmatmul.mubr.bf16.gmra.mrb[8].mxu0 %v19292_v15  ;;  %6412 = vmatprep.subr.bf16.mxu1 %v14509_v47  ;;  %v19293_v4 = vld [vmem:[#allocation23_spill] sm:$0xff] }
 0x26d   :  { %19291 = vst [vmem:[#allocation137_spill] sm:$0xff] %v16724_v35  ;;  %v14515_v53 = vld [vmem:[#allocation4 + $0x2ac] ss:$16 sps:$4 sm:$0xff]   ;;  %v2851_v25 = vmul.f32 0.01, %v2131_v10  ;;  %6264 = vmatmul.mubr.bf16.gmra.mrb[8].mxu1 %v19292_v15  ;;  %5501 = vmatprep.mubr.bf16.mxu0 %v19293_v4  ;;  %v3345_v31 = vmax.f32 %v1934_v60, %v2833_v54  ;;  %v3347_v5 = vmax.f32 %v2127_v24, %v2835_v44 }
 0x26e   :  { %v2850_v58 = vmul.f32 0.01, %v1940_v6  ;;  %v3361_v46 = vmax.f32 %v1938_v34, %v2849_v50  ;;  %v2852_v39 = vmul.f32 0.01, %v2133_v14  ;;  %6273 = vmatprep.mubr.bf16.mxu1 %v19293_v4  ;;  %5641 = vmatpush1.bf16.msra.mxu0 %v14504_v1  ;;  %v14510_v48 = vld [vmem:[#allocation4 + $0x2a0] ss:$16 sps:$4 sm:$0xff]   ;;  %v3346_v45 = vmax.f32 %v1936_v26, %v2834_v9 }
 0x26f   :  { %v3363_v62 = vmax.f32 %v2131_v10, %v2851_v25  ;;  %v1943_v35 = vpop.f32.mrb[160].mxu0  ;;  %6413 = vmatpush1.bf16.msra.mxu1 %v14507_v2  ;;  %5642 = vmatprep.subr.bf16.mxu0 %v14512_v38  ;;  %v14513_v47 = vld [vmem:[#allocation4 + $0x2a8] ss:$16 sps:$4 sm:$0xff]   ;;  %v14518_v22 = vld [vmem:[#allocation4 + $0x2c4] ss:$16 sps:$4 sm:$0xff]   ;;  %v3348_v15 = vmax.f32 %v16721_v12, %v2836_v61 }
 0x270   :  { %v3362_v40 = vmax.f32 %v1940_v6, %v2850_v58  ;;  %v16735_v41 = vpack.c.bf16 %v3361_v46, %v3345_v31  ;;  %v3364_v60 = vmax.f32 %v2133_v14, %v2852_v39  ;;  %v1944_v24 = vadd.f32 %v1943_v35, %v16543_v20  ;;  %v2136_v54 = vpop.f32.mrb[160].mxu1  ;;  %v1945_v34 = vpop.f32.mrb[161].mxu0  ;;  %6414 = vmatprep.subr.bf16.mxu1 %v14515_v53  ;;  %v14521_v1 = vld [vmem:[#allocation4 + $0x2cc] ss:$16 sps:$4 sm:$0xff]   ;;  %v14516_v10 = vld [vmem:[#allocation4 + $0x2c0] ss:$16 sps:$4 sm:$0xff]  }
 0x271   :  { %v16738_v44 = vpack.c.bf16 %v3363_v62, %v3347_v5  ;;  %v2137_v26 = vadd.f32 %v2136_v54, %v16549_v52  ;;  %v1946_v2 = vadd.f32 %v1945_v34, %v16552_v3  ;;  %v2138_v38 = vpop.f32.mrb[161].mxu1  ;;  %v1947_v9 = vpop.f32.mrb[162].mxu0  ;;  %v14519_v6 = vld [vmem:[#allocation4 + $0x2c8] ss:$16 sps:$4 sm:$0xff]   ;;  %v14524_v25 = vld [vmem:[#allocation4 + $0x2e4] ss:$16 sps:$4 sm:$0xff]  }
 0x272   :  { %19294 = vst [vmem:[#allocation17_spill] sm:$0xff] %v16735_v41  ;;  %v16742_v12 = vpack.c.bf16 %v3362_v40, %v3346_v45  ;;  %v2865_v61 = vmul.f32 0.01, %v1944_v24  ;;  %v16745_v50 = vadd.f32 %v2138_v38, %v16556_v33  ;;  %v1948_v35 = vadd.f32 %v1947_v9, %v16543_v20  ;;  %v2140_v14 = vpop.f32.mrb[162].mxu1  ;;  %v1949_v53 = vpop.f32.mrb[163].mxu0  ;;  %5643 = vmatpush1.bf16.msra.mxu0 %v14510_v48  ;;  %v19297_v54 = vld [vmem:[#allocation21_spill] sm:$0xff] }
 0x273   :  { %19295 = vst [vmem:[#allocation23_spill] sm:$0xff] %v16738_v44  ;;  %v16748_v58 = vpack.c.bf16 %v3364_v60, %v3348_v15  ;;  %v2867_v4 = vmul.f32 0.01, %v2137_v26  ;;  %v2866_v31 = vmul.f32 0.01, %v1946_v2  ;;  %v2141_v5 = vadd.f32 %v2140_v14, %v16549_v52  ;;  %v2142_v40 = vpop.f32.mrb[163].mxu1  ;;  %6415 = vmatpush1.bf16.msra.mxu1 %v14513_v47  ;;  %5644 = vmatprep.subr.bf16.mxu0 %v14518_v22 }
 0x274   :  { %v1950_v46 = vadd.f32 %v1949_v53, %v16552_v3  ;;  %v2868_v39 = vmul.f32 0.01, %v16745_v50  ;;  %v2881_v45 = vmul.f32 0.01, %v1948_v35  ;;  %v2143_v62 = vadd.f32 %v2142_v40, %v16556_v33  ;;  %5502 = vmatmul.mubr.bf16.gmra.mrb[12].mxu0 %v19297_v54  ;;  %6416 = vmatprep.subr.bf16.mxu1 %v14521_v1  ;;  %v14527_v48 = vld [vmem:[#allocation4 + $0x2ec] ss:$16 sps:$4 sm:$0xff]  }
 0x275   :  { %19296 = vst [vmem:[#allocation138_spill] sm:$0xff] %v16748_v58  ;;  %v2883_v15 = vmul.f32 0.01, %v2141_v5  ;;  %6274 = vmatmul.mubr.bf16.gmra.mrb[12].mxu1 %v19297_v54  ;;  %5511 = vmatprep.mubr.bf16.mxu0 %v15824_v13  ;;  %v3377_v34 = vmax.f32 %v1944_v24, %v2865_v61  ;;  %v3379_v38 = vmax.f32 %v2137_v26, %v2867_v4  ;;  %v14522_v22 = vld [vmem:[#allocation4 + $0x2e0] ss:$16 sps:$4 sm:$0xff]  }
 0x276   :  { %v2882_v60 = vmul.f32 0.01, %v1950_v46  ;;  %v3393_v9 = vmax.f32 %v1948_v35, %v2881_v45  ;;  %v2884_v47 = vmul.f32 0.01, %v2143_v62  ;;  %6283 = vmatprep.mubr.bf16.mxu1 %v15824_v13  ;;  %5645 = vmatpush1.bf16.msra.mxu0 %v14516_v10  ;;  %v3378_v14 = vmax.f32 %v1946_v2, %v2866_v31  ;;  %v14525_v1 = vld [vmem:[#allocation4 + $0x2e8] ss:$16 sps:$4 sm:$0xff]  }
 0x277   :  { %v3395_v53 = vmax.f32 %v2141_v5, %v2883_v15  ;;  %v1953_v44 = vpop.f32.mrb[164].mxu0  ;;  %6417 = vmatpush1.bf16.msra.mxu1 %v14519_v6  ;;  %5646 = vmatprep.subr.bf16.mxu0 %v14524_v25  ;;  %v14530_v58 = vld [vmem:[#allocation4 + $0x304] ss:$16 sps:$4 sm:$0xff]   ;;  %v3380_v54 = vmax.f32 %v16745_v50, %v2868_v39  ;;  %v14533_v13 = vld [vmem:[#allocation4 + $0x30c] ss:$16 sps:$4 sm:$0xff]  }
 0x278   :  { %v3394_v40 = vmax.f32 %v1950_v46, %v2882_v60  ;;  %v16759_v41 = vpack.c.bf16 %v3393_v9, %v3377_v34  ;;  %v3396_v24 = vmax.f32 %v2143_v62, %v2884_v47  ;;  %v1954_v26 = vadd.f32 %v1953_v44, %v16543_v20  ;;  %v2146_v61 = vpop.f32.mrb[164].mxu1  ;;  %v1955_v35 = vpop.f32.mrb[165].mxu0  ;;  %6418 = vmatprep.subr.bf16.mxu1 %v14527_v48  ;;  %v14528_v31 = vld [vmem:[#allocation4 + $0x300] ss:$16 sps:$4 sm:$0xff]   ;;  %v14531_v5 = vld [vmem:[#allocation4 + $0x308] ss:$16 sps:$4 sm:$0xff]  }
 0x279   :  { %v16762_v10 = vpack.c.bf16 %v3395_v53, %v3379_v38  ;;  %v2147_v2 = vadd.f32 %v2146_v61, %v16549_v52  ;;  %v1956_v6 = vadd.f32 %v1955_v35, %v16552_v3  ;;  %v2148_v25 = vpop.f32.mrb[165].mxu1  ;;  %v1957_v4 = vpop.f32.mrb[166].mxu0  ;;  %v14536_v48 = vld [vmem:[#allocation4 + $0x324] ss:$16 sps:$4 sm:$0xff]  }
 0x27a   :  { %v16766_v50 = vpack.c.bf16 %v3394_v40, %v3378_v14  ;;  %v2897_v46 = vmul.f32 0.01, %v1954_v26  ;;  %v16769_v39 = vadd.f32 %v2148_v25, %v16556_v33  ;;  %v1958_v44 = vadd.f32 %v1957_v4, %v16543_v20  ;;  %v2150_v45 = vpop.f32.mrb[166].mxu1  ;;  %v1959_v62 = vpop.f32.mrb[167].mxu0  ;;  %5647 = vmatpush1.bf16.msra.mxu0 %v14522_v22  ;;  %v14539_v22 = vld [vmem:[#allocation4 + $0x32c] ss:$16 sps:$4 sm:$0xff]  }
 0x27b   :  { %19298 = vst [vmem:[#allocation21_spill] sm:$0xff] %v16762_v10  ;;  %v16772_v15 = vpack.c.bf16 %v3396_v24, %v3380_v54  ;;  %v2899_v60 = vmul.f32 0.01, %v2147_v2  ;;  %v2898_v34 = vmul.f32 0.01, %v1956_v6  ;;  %v2151_v38 = vadd.f32 %v2150_v45, %v16549_v52  ;;  %v2152_v47 = vpop.f32.mrb[167].mxu1  ;;  %6419 = vmatpush1.bf16.msra.mxu1 %v14525_v1  ;;  %5648 = vmatprep.subr.bf16.mxu0 %v14530_v58 }
 0x27c   :  { %v1960_v9 = vadd.f32 %v1959_v62, %v16552_v3  ;;  %v2900_v14 = vmul.f32 0.01, %v16769_v39  ;;  %v2913_v53 = vmul.f32 0.01, %v1958_v44  ;;  %v2153_v40 = vadd.f32 %v2152_v47, %v16556_v33  ;;  %5512 = vmatmul.mubr.bf16.gmra.mrb[16].mxu0 %v15812_v49  ;;  %6420 = vmatprep.subr.bf16.mxu1 %v14533_v13  ;;  %v14534_v58 = vld [vmem:[#allocation4 + $0x320] ss:$16 sps:$4 sm:$0xff]  }
 0x27d   :  { %19299 = vst [vmem:[#allocation139_spill] sm:$0xff] %v16772_v15  ;;  %v2915_v54 = vmul.f32 0.01, %v2151_v38  ;;  %6284 = vmatmul.mubr.bf16.gmra.mrb[16].mxu1 %v15812_v49  ;;  %5521 = vmatprep.mubr.bf16.mxu0 %v15866_v19  ;;  %v3409_v61 = vmax.f32 %v1954_v26, %v2897_v46  ;;  %v3411_v35 = vmax.f32 %v2147_v2, %v2899_v60  ;;  %v14537_v13 = vld [vmem:[#allocation4 + $0x328] ss:$16 sps:$4 sm:$0xff]  }
 0x27e   :  { %v2914_v24 = vmul.f32 0.01, %v1960_v9  ;;  %v3425_v25 = vmax.f32 %v1958_v44, %v2913_v53  ;;  %v2916_v1 = vmul.f32 0.01, %v2153_v40  ;;  %6293 = vmatprep.mubr.bf16.mxu1 %v15866_v19  ;;  %5649 = vmatpush1.bf16.msra.mxu0 %v14528_v31  ;;  %v3410_v4 = vmax.f32 %v1956_v6, %v2898_v34  ;;  %v14542_v10 = vld [vmem:[#allocation4 + $0x344] ss:$16 sps:$4 sm:$0xff]  }
 0x27f   :  { %v3427_v45 = vmax.f32 %v2151_v38, %v2915_v54  ;;  %v1963_v47 = vpop.f32.mrb[168].mxu0  ;;  %6421 = vmatpush1.bf16.msra.mxu1 %v14531_v5  ;;  %5650 = vmatprep.subr.bf16.mxu0 %v14536_v48  ;;  %v3412_v49 = vmax.f32 %v16769_v39, %v2900_v14  ;;  %v14545_v19 = vld [vmem:[#allocation4 + $0x34c] ss:$16 sps:$4 sm:$0xff]   ;;  %v14540_v34 = vld [vmem:[#allocation4 + $0x340] ss:$16 sps:$4 sm:$0xff]  }
 0x280   :  { %v3426_v62 = vmax.f32 %v1960_v9, %v2914_v24  ;;  %v16783_v15 = vpack.c.bf16 %v3425_v25, %v3409_v61  ;;  %v3428_v26 = vmax.f32 %v2153_v40, %v2916_v1  ;;  %v1964_v2 = vadd.f32 %v1963_v47, %v16543_v20  ;;  %v2156_v46 = vpop.f32.mrb[168].mxu1  ;;  %v1965_v44 = vpop.f32.mrb[169].mxu0  ;;  %6422 = vmatprep.subr.bf16.mxu1 %v14539_v22  ;;  %v14543_v38 = vld [vmem:[#allocation4 + $0x348] ss:$16 sps:$4 sm:$0xff]   ;;  %v14548_v54 = vld [vmem:[#allocation4 + $0x364] ss:$16 sps:$4 sm:$0xff]  }
 0x281   :  { %v16786_v31 = vpack.c.bf16 %v3427_v45, %v3411_v35  ;;  %v2157_v6 = vadd.f32 %v2156_v46, %v16549_v52  ;;  %v1966_v5 = vadd.f32 %v1965_v44, %v16552_v3  ;;  %v2158_v48 = vpop.f32.mrb[169].mxu1  ;;  %v1967_v60 = vpop.f32.mrb[170].mxu0 }
 0x282   :  { %v16790_v39 = vpack.c.bf16 %v3426_v62, %v3410_v4  ;;  %v2929_v9 = vmul.f32 0.01, %v1964_v2  ;;  %v16793_v14 = vadd.f32 %v2158_v48, %v16556_v33  ;;  %v1968_v53 = vadd.f32 %v1967_v60, %v16543_v20  ;;  %v2160_v40 = vpop.f32.mrb[170].mxu1  ;;  %v1969_v22 = vpop.f32.mrb[171].mxu0  ;;  %5651 = vmatpush1.bf16.msra.mxu0 %v14534_v58  ;;  %v14551_v58 = vld [vmem:[#allocation4 + $0x36c] ss:$16 sps:$4 sm:$0xff]  }
 0x283   :  { %19300 = vst [vmem:[#allocation140_spill] sm:$0xff] %v16786_v31  ;;  %v16796_v24 = vpack.c.bf16 %v3428_v26, %v3412_v49  ;;  %v2931_v61 = vmul.f32 0.01, %v2157_v6  ;;  %v2930_v35 = vmul.f32 0.01, %v1966_v5  ;;  %v2161_v25 = vadd.f32 %v2160_v40, %v16549_v52  ;;  %v2162_v4 = vpop.f32.mrb[171].mxu1  ;;  %6423 = vmatpush1.bf16.msra.mxu1 %v14537_v13  ;;  %5652 = vmatprep.subr.bf16.mxu0 %v14542_v10 }
 0x284   :  { %v1970_v1 = vadd.f32 %v1969_v22, %v16552_v3  ;;  %v2932_v45 = vmul.f32 0.01, %v16793_v14  ;;  %v2945_v62 = vmul.f32 0.01, %v1968_v53  ;;  %v2163_v47 = vadd.f32 %v2162_v4, %v16556_v33  ;;  %5522 = vmatmul.mubr.bf16.gmra.mrb[20].mxu0 %v15850_v17  ;;  %6424 = vmatprep.subr.bf16.mxu1 %v14545_v19  ;;  %v14546_v10 = vld [vmem:[#allocation4 + $0x360] ss:$16 sps:$4 sm:$0xff]  }
 0x285   :  { %19301 = vst [vmem:[#allocation141_spill] sm:$0xff] %v16796_v24  ;;  %v2947_v49 = vmul.f32 0.01, %v2161_v25  ;;  %6294 = vmatmul.mubr.bf16.gmra.mrb[20].mxu1 %v15850_v17  ;;  %5531 = vmatprep.mubr.bf16.mxu0 %v15928_v57  ;;  %v3441_v46 = vmax.f32 %v1964_v2, %v2929_v9  ;;  %v3443_v44 = vmax.f32 %v2157_v6, %v2931_v61  ;;  %v14549_v19 = vld [vmem:[#allocation4 + $0x368] ss:$16 sps:$4 sm:$0xff]  }
 0x286   :  { %v2946_v26 = vmul.f32 0.01, %v1970_v1  ;;  %v3457_v48 = vmax.f32 %v1968_v53, %v2945_v62  ;;  %v2948_v13 = vmul.f32 0.01, %v2163_v47  ;;  %6303 = vmatprep.mubr.bf16.mxu1 %v15928_v57  ;;  %5653 = vmatpush1.bf16.msra.mxu0 %v14540_v34  ;;  %v3442_v60 = vmax.f32 %v1966_v5, %v2930_v35  ;;  %v14554_v31 = vld [vmem:[#allocation4 + $0x384] ss:$16 sps:$4 sm:$0xff]  }
 0x287   :  { %v3459_v40 = vmax.f32 %v2161_v25, %v2947_v49  ;;  %v1973_v4 = vpop.f32.mrb[172].mxu0  ;;  %6425 = vmatpush1.bf16.msra.mxu1 %v14543_v38  ;;  %5654 = vmatprep.subr.bf16.mxu0 %v14548_v54  ;;  %v3444_v17 = vmax.f32 %v16793_v14, %v2932_v45  ;;  %v14557_v57 = vld [vmem:[#allocation4 + $0x38c] ss:$16 sps:$4 sm:$0xff]   ;;  %v14552_v35 = vld [vmem:[#allocation4 + $0x380] ss:$16 sps:$4 sm:$0xff]  }
 0x288   :  { %v3458_v22 = vmax.f32 %v1970_v1, %v2946_v26  ;;  %v16807_v24 = vpack.c.bf16 %v3457_v48, %v3441_v46  ;;  %v3460_v2 = vmax.f32 %v2163_v47, %v2948_v13  ;;  %v1974_v6 = vadd.f32 %v1973_v4, %v16543_v20  ;;  %v2166_v9 = vpop.f32.mrb[172].mxu1  ;;  %v1975_v53 = vpop.f32.mrb[173].mxu0  ;;  %6426 = vmatprep.subr.bf16.mxu1 %v14551_v58  ;;  %v14555_v25 = vld [vmem:[#allocation4 + $0x388] ss:$16 sps:$4 sm:$0xff]   ;;  %v14560_v49 = vld [vmem:[#allocation4 + $0x3a4] ss:$16 sps:$4 sm:$0xff]  }
 0x289   :  { %v16810_v34 = vpack.c.bf16 %v3459_v40, %v3443_v44  ;;  %v2167_v5 = vadd.f32 %v2166_v9, %v16549_v52  ;;  %v1976_v38 = vadd.f32 %v1975_v53, %v16552_v3  ;;  %v2168_v54 = vpop.f32.mrb[173].mxu1  ;;  %v1977_v61 = vpop.f32.mrb[174].mxu0 }
 0x28a   :  { %v16814_v14 = vpack.c.bf16 %v3458_v22, %v3442_v60  ;;  %v2961_v1 = vmul.f32 0.01, %v1974_v6  ;;  %v16817_v45 = vadd.f32 %v2168_v54, %v16556_v33  ;;  %v1978_v62 = vadd.f32 %v1977_v61, %v16543_v20  ;;  %v2170_v47 = vpop.f32.mrb[174].mxu1  ;;  %v1979_v58 = vpop.f32.mrb[175].mxu0  ;;  %5655 = vmatpush1.bf16.msra.mxu0 %v14546_v10  ;;  %v14563_v10 = vld [vmem:[#allocation4 + $0x3ac] ss:$16 sps:$4 sm:$0xff]  }
 0x28b   :  { %19302 = vst [vmem:[#allocation142_spill] sm:$0xff] %v16810_v34  ;;  %v16820_v26 = vpack.c.bf16 %v3460_v2, %v3444_v17  ;;  %v2963_v46 = vmul.f32 0.01, %v2167_v5  ;;  %v2962_v44 = vmul.f32 0.01, %v1976_v38  ;;  %v2171_v48 = vadd.f32 %v2170_v47, %v16549_v52  ;;  %v2172_v60 = vpop.f32.mrb[175].mxu1  ;;  %6427 = vmatpush1.bf16.msra.mxu1 %v14549_v19  ;;  %5656 = vmatprep.subr.bf16.mxu0 %v14554_v31 }
 0x28c   :  { %v1980_v13 = vadd.f32 %v1979_v58, %v16552_v3  ;;  %v2964_v40 = vmul.f32 0.01, %v16817_v45  ;;  %v2977_v22 = vmul.f32 0.01, %v1978_v62  ;;  %v2173_v4 = vadd.f32 %v2172_v60, %v16556_v33  ;;  %5532 = vmatmul.mubr.bf16.gmra.mrb[24].mxu0 %v15912_v16  ;;  %6428 = vmatprep.subr.bf16.mxu1 %v14557_v57  ;;  %v14558_v31 = vld [vmem:[#allocation4 + $0x3a0] ss:$16 sps:$4 sm:$0xff]  }
 0x28d   :  { %19303 = vst [vmem:[#allocation143_spill] sm:$0xff] %v16820_v26  ;;  %v2979_v17 = vmul.f32 0.01, %v2171_v48  ;;  %6304 = vmatmul.mubr.bf16.gmra.mrb[24].mxu1 %v15912_v16  ;;  %5541 = vmatprep.mubr.bf16.mxu0 %v15993_v55  ;;  %v3473_v9 = vmax.f32 %v1974_v6, %v2961_v1  ;;  %v3475_v53 = vmax.f32 %v2167_v5, %v2963_v46  ;;  %v14561_v57 = vld [vmem:[#allocation4 + $0x3a8] ss:$16 sps:$4 sm:$0xff]  }
 0x28e   :  { %v2978_v2 = vmul.f32 0.01, %v1980_v13  ;;  %v3489_v54 = vmax.f32 %v1978_v62, %v2977_v22  ;;  %v2980_v19 = vmul.f32 0.01, %v2173_v4  ;;  %6313 = vmatprep.mubr.bf16.mxu1 %v15993_v55  ;;  %5657 = vmatpush1.bf16.msra.mxu0 %v14552_v35  ;;  %v3474_v61 = vmax.f32 %v1976_v38, %v2962_v44  ;;  %v14566_v34 = vld [vmem:[#allocation4 + $0x3c4] ss:$16 sps:$4 sm:$0xff]  }
 0x28f   :  { %v3491_v47 = vmax.f32 %v2171_v48, %v2979_v17  ;;  %v1983_v60 = vpop.f32.mrb[176].mxu0  ;;  %6429 = vmatpush1.bf16.msra.mxu1 %v14555_v25  ;;  %5658 = vmatprep.subr.bf16.mxu0 %v14560_v49  ;;  %v3476_v16 = vmax.f32 %v16817_v45, %v2964_v40  ;;  %v14569_v55 = vld [vmem:[#allocation4 + $0x3cc] ss:$16 sps:$4 sm:$0xff]   ;;  %v14564_v44 = vld [vmem:[#allocation4 + $0x3c0] ss:$16 sps:$4 sm:$0xff]  }
 0x290   :  { %v3490_v58 = vmax.f32 %v1980_v13, %v2978_v2  ;;  %v16831_v26 = vpack.c.bf16 %v3489_v54, %v3473_v9  ;;  %v3492_v6 = vmax.f32 %v2173_v4, %v2980_v19  ;;  %v1984_v5 = vadd.f32 %v1983_v60, %v16543_v20  ;;  %v2176_v1 = vpop.f32.mrb[176].mxu1  ;;  %v1985_v62 = vpop.f32.mrb[177].mxu0  ;;  %6430 = vmatprep.subr.bf16.mxu1 %v14563_v10  ;;  %v14567_v48 = vld [vmem:[#allocation4 + $0x3c8] ss:$16 sps:$4 sm:$0xff]   ;;  %v14572_v17 = vld [vmem:[#allocation4 + $0x3e4] ss:$16 sps:$4 sm:$0xff]  }
 0x291   :  { %v16834_v35 = vpack.c.bf16 %v3491_v47, %v3475_v53  ;;  %v2177_v38 = vadd.f32 %v2176_v1, %v16549_v52  ;;  %v1986_v25 = vadd.f32 %v1985_v62, %v16552_v3  ;;  %v2178_v49 = vpop.f32.mrb[177].mxu1  ;;  %v1987_v46 = vpop.f32.mrb[178].mxu0 }
 0x292   :  { %19304 = vst [vmem:[#allocation144_spill] sm:$0xff] %v16831_v26  ;;  %v16838_v45 = vpack.c.bf16 %v3490_v58, %v3474_v61  ;;  %v2993_v13 = vmul.f32 0.01, %v1984_v5  ;;  %v2179_v40 = vadd.f32 %v2178_v49, %v16556_v33  ;;  %v1988_v22 = vadd.f32 %v1987_v46, %v16543_v20  ;;  %v2180_v4 = vpop.f32.mrb[178].mxu1  ;;  %v1989_v10 = vpop.f32.mrb[179].mxu0  ;;  %5659 = vmatpush1.bf16.msra.mxu0 %v14558_v31 }
 0x293   :  { %19305 = vst [vmem:[#allocation145_spill] sm:$0xff] %v16834_v35  ;;  %v16842_v2 = vpack.c.bf16 %v3492_v6, %v3476_v16  ;;  %v2995_v9 = vmul.f32 0.01, %v2177_v38  ;;  %v2994_v53 = vmul.f32 0.01, %v1986_v25  ;;  %v2181_v54 = vadd.f32 %v2180_v4, %v16549_v52  ;;  %v2182_v47 = vpop.f32.mrb[179].mxu1  ;;  %6431 = vmatpush1.bf16.msra.mxu1 %v14561_v57  ;;  %5660 = vmatprep.subr.bf16.mxu0 %v14566_v34 }
 0x294   :  { %v1990_v19 = vadd.f32 %v1989_v10, %v16552_v3  ;;  %v2996_v61 = vmul.f32 0.01, %v2179_v40  ;;  %v3009_v58 = vmul.f32 0.01, %v1988_v22  ;;  %v2183_v60 = vadd.f32 %v2182_v47, %v16556_v33  ;;  %5542 = vmatmul.mubr.bf16.gmra.mrb[28].mxu0 %v15977_v29  ;;  %6432 = vmatprep.subr.bf16.mxu1 %v14569_v55  ;;  %v14575_v31 = vld [vmem:[#allocation4 + $0x3ec] ss:$16 sps:$4 sm:$0xff]  }
 0x295   :  { %19306 = vst [vmem:[#allocation146_spill] sm:$0xff] %v16842_v2  ;;  %v3011_v1 = vmul.f32 0.01, %v2181_v54  ;;  %6314 = vmatmul.mubr.bf16.gmra.mrb[28].mxu1 %v15977_v29  ;;  %5551 = vmatprep.mubr.bf16.mxu0 %v16036_v56  ;;  %v3505_v6 = vmax.f32 %v1984_v5, %v2993_v13  ;;  %v3507_v62 = vmax.f32 %v2177_v38, %v2995_v9  ;;  %v14570_v34 = vld [vmem:[#allocation4 + $0x3e0] ss:$16 sps:$4 sm:$0xff]  }
 0x296   :  { %v3010_v16 = vmul.f32 0.01, %v1990_v19  ;;  %v3521_v49 = vmax.f32 %v1988_v22, %v3009_v58  ;;  %v3012_v46 = vmul.f32 0.01, %v2183_v60  ;;  %6323 = vmatprep.mubr.bf16.mxu1 %v16036_v56  ;;  %5661 = vmatpush1.bf16.msra.mxu0 %v14564_v44  ;;  %v3506_v57 = vmax.f32 %v1986_v25, %v2994_v53  ;;  %v14573_v55 = vld [vmem:[#allocation4 + $0x3e8] ss:$16 sps:$4 sm:$0xff]  }
 0x297   :  { %v3523_v4 = vmax.f32 %v2181_v54, %v3011_v1  ;;  %v1993_v47 = vpop.f32.mrb[180].mxu0  ;;  %6433 = vmatpush1.bf16.msra.mxu1 %v14567_v48  ;;  %5662 = vmatprep.subr.bf16.mxu0 %v14572_v17  ;;  %v14578_v35 = vld [vmem:[#allocation4 + $0x404] ss:$16 sps:$4 sm:$0xff]   ;;  %v3508_v2 = vmax.f32 %v2179_v40, %v2996_v61  ;;  %v14581_v56 = vld [vmem:[#allocation4 + $0x40c] ss:$16 sps:$4 sm:$0xff]  }
 0x298   :  { %v3522_v10 = vmax.f32 %v1990_v19, %v3010_v16  ;;  %v16851_v29 = vpack.c.bf16 %v3521_v49, %v3505_v6  ;;  %v3524_v26 = vmax.f32 %v2183_v60, %v3012_v46  ;;  %v1994_v5 = vadd.f32 %v1993_v47, %v16543_v20  ;;  %v2186_v38 = vpop.f32.mrb[180].mxu1  ;;  %v1995_v13 = vpop.f32.mrb[181].mxu0  ;;  %6434 = vmatprep.subr.bf16.mxu1 %v14575_v31 }
 0x299   :  { %v16854_v44 = vpack.c.bf16 %v3523_v4, %v3507_v62  ;;  %v2187_v25 = vadd.f32 %v2186_v38, %v16549_v52  ;;  %v1996_v22 = vadd.f32 %v1995_v13, %v16552_v3  ;;  %v2188_v48 = vpop.f32.mrb[181].mxu1  ;;  %v1997_v17 = vpop.f32.mrb[182].mxu0 }
 0x29a   :  { %v16858_v9 = vpack.c.bf16 %v3522_v10, %v3506_v57  ;;  %v3025_v40 = vmul.f32 0.01, %v1994_v5  ;;  %v2189_v53 = vadd.f32 %v2188_v48, %v16556_v33  ;;  %v1998_v54 = vadd.f32 %v1997_v17, %v16543_v20  ;;  %v2190_v19 = vpop.f32.mrb[182].mxu1  ;;  %v1999_v61 = vpop.f32.mrb[183].mxu0  ;;  %5663 = vmatpush1.bf16.msra.mxu0 %v14570_v34 }
 0x29b   :  { %19307 = vst [vmem:[#allocation147_spill] sm:$0xff] %v16854_v44  ;;  %v16862_v58 = vpack.c.bf16 %v3524_v26, %v3508_v2  ;;  %v3027_v60 = vmul.f32 0.01, %v2187_v25  ;;  %v3026_v31 = vmul.f32 0.01, %v1996_v22  ;;  %v2191_v1 = vadd.f32 %v2190_v19, %v16549_v52  ;;  %v2192_v6 = vpop.f32.mrb[183].mxu1  ;;  %6435 = vmatpush1.bf16.msra.mxu1 %v14573_v55  ;;  %5825 = vmatprep.subr.bf16.mxu0 %v14578_v35 }
 0x29c   :  { %v2000_v16 = vadd.f32 %v1999_v61, %v16552_v3  ;;  %v3028_v62 = vmul.f32 0.01, %v2189_v53  ;;  %v3041_v49 = vmul.f32 0.01, %v1998_v54  ;;  %v2193_v46 = vadd.f32 %v2192_v6, %v16556_v33  ;;  %5552 = vmatmul.mubr.bf16.gmra.mrb[32].mxu0 %v16029_v36  ;;  %6597 = vmatprep.subr.bf16.mxu1 %v14581_v56  ;;  %v14590_v44 = vld [vmem:[#allocation4 + $0x444] ss:$16 sps:$4 sm:$0xff]  }
 0x29d   :  { %19308 = vst [vmem:[#allocation148_spill] sm:$0xff] %v16862_v58  ;;  %v3043_v57 = vmul.f32 0.01, %v2191_v1  ;;  %6324 = vmatmul.mubr.bf16.gmra.mrb[32].mxu1 %v16029_v36  ;;  %5561 = vmatprep.mubr.bf16.mxu0 %v16060_v18  ;;  %v3537_v26 = vmax.f32 %v1994_v5, %v3025_v40  ;;  %v3539_v10 = vmax.f32 %v2187_v25, %v3027_v60 }
 0x29e   :  { %v3042_v34 = vmul.f32 0.01, %v2000_v16  ;;  %v3553_v2 = vmax.f32 %v1998_v54, %v3041_v49  ;;  %v3044_v4 = vmul.f32 0.01, %v2193_v46  ;;  %6333 = vmatprep.mubr.bf16.mxu1 %v16060_v18  ;;  %v3538_v35 = vmax.f32 %v1996_v22, %v3026_v31 }
 0x29f   :  { %v3555_v47 = vmax.f32 %v2191_v1, %v3043_v57  ;;  %v2003_v38 = vpop.f32.mrb[184].mxu0  ;;  %v3540_v13 = vmax.f32 %v2189_v53, %v3028_v62 }
 0x2a0   :  { %v3554_v55 = vmax.f32 %v2000_v16, %v3042_v34  ;;  %v16871_v48 = vpack.c.bf16 %v3553_v2, %v3537_v26  ;;  %v3556_v56 = vmax.f32 %v2193_v46, %v3044_v4  ;;  %v2004_v17 = vadd.f32 %v2003_v38, %v16543_v20  ;;  %v2196_v19 = vpop.f32.mrb[184].mxu1  ;;  %v2005_v36 = vpop.f32.mrb[185].mxu0 }
 0x2a1   :  { %v16874_v61 = vpack.c.bf16 %v3555_v47, %v3539_v10  ;;  %v2197_v5 = vadd.f32 %v2196_v19, %v16549_v52  ;;  %v2006_v40 = vadd.f32 %v2005_v36, %v16552_v3  ;;  %v2198_v18 = vpop.f32.mrb[185].mxu1  ;;  %v2007_v25 = vpop.f32.mrb[186].mxu0 }
 0x2a2   :  { %v16878_v22 = vpack.c.bf16 %v3554_v55, %v3538_v35  ;;  %v3057_v54 = vmul.f32 0.01, %v2004_v17  ;;  %v2199_v53 = vadd.f32 %v2198_v18, %v16556_v33  ;;  %v2008_v60 = vadd.f32 %v2007_v25, %v16543_v20  ;;  %v2200_v31 = vpop.f32.mrb[186].mxu1  ;;  %v2009_v1 = vpop.f32.mrb[187].mxu0 }
 0x2a3   :  { %19309 = vst [vmem:[#allocation149_spill] sm:$0xff] %v16874_v61  ;;  %v16882_v16 = vpack.c.bf16 %v3556_v56, %v3540_v13  ;;  %v3059_v6 = vmul.f32 0.01, %v2197_v5  ;;  %v3058_v62 = vmul.f32 0.01, %v2006_v40  ;;  %v2201_v49 = vadd.f32 %v2200_v31, %v16549_v52  ;;  %v2202_v57 = vpop.f32.mrb[187].mxu1 }
 0x2a4   :  { %v2010_v46 = vadd.f32 %v2009_v1, %v16552_v3  ;;  %v3060_v34 = vmul.f32 0.01, %v2199_v53  ;;  %v3073_v26 = vmul.f32 0.01, %v2008_v60  ;;  %v2203_v2 = vadd.f32 %v2202_v57, %v16556_v33  ;;  %5562 = vmatmul.mubr.bf16.gmra.mrb[36].mxu0 %v16054_v21 }
 0x2a5   :  { %19310 = vst [vmem:[#allocation150_spill] sm:$0xff] %v16882_v16  ;;  %v3075_v4 = vmul.f32 0.01, %v2201_v49  ;;  %6334 = vmatmul.mubr.bf16.gmra.mrb[36].mxu1 %v16054_v21  ;;  %5571 = vmatprep.mubr.bf16.mxu0 %v16081_v32  ;;  %v3569_v35 = vmax.f32 %v2004_v17, %v3057_v54  ;;  %v3571_v38 = vmax.f32 %v2197_v5, %v3059_v6 }
 0x2a6   :  { %v3074_v10 = vmul.f32 0.01, %v2010_v46  ;;  %v3585_v47 = vmax.f32 %v2008_v60, %v3073_v26  ;;  %v3076_v55 = vmul.f32 0.01, %v2203_v2  ;;  %6343 = vmatprep.mubr.bf16.mxu1 %v16081_v32  ;;  %v3570_v13 = vmax.f32 %v2006_v40, %v3058_v62 }
 0x2a7   :  { %v3587_v56 = vmax.f32 %v2201_v49, %v3075_v4  ;;  %v2013_v36 = vpop.f32.mrb[188].mxu0  ;;  %v3572_v18 = vmax.f32 %v2199_v53, %v3060_v34 }
 0x2a8   :  { %v3586_v19 = vmax.f32 %v2010_v46, %v3074_v10  ;;  %v16891_v25 = vpack.c.bf16 %v3585_v47, %v3569_v35  ;;  %v3588_v31 = vmax.f32 %v2203_v2, %v3076_v55  ;;  %v2014_v1 = vadd.f32 %v2013_v36, %v16543_v20  ;;  %v2206_v57 = vpop.f32.mrb[188].mxu1  ;;  %v2015_v21 = vpop.f32.mrb[189].mxu0 }
 0x2a9   :  { %v16894_v61 = vpack.c.bf16 %v3587_v56, %v3571_v38  ;;  %v2207_v17 = vadd.f32 %v2206_v57, %v16549_v52  ;;  %v2016_v54 = vadd.f32 %v2015_v21, %v16552_v3  ;;  %v2208_v32 = vpop.f32.mrb[189].mxu1  ;;  %v2017_v5 = vpop.f32.mrb[190].mxu0  ;;  %v19313_v38 = vsub.s32 4, %v15601_v43 }
 0x2aa   :  { %v16898_v40 = vpack.c.bf16 %v3586_v19, %v3570_v13  ;;  %v3089_v60 = vmul.f32 0.01, %v2014_v1  ;;  %v2209_v53 = vadd.f32 %v2208_v32, %v16556_v33  ;;  %v2018_v6 = vadd.f32 %v2017_v5, %v16543_v20  ;;  %v2210_v62 = vpop.f32.mrb[190].mxu1  ;;  %v2019_v49 = vpop.f32.mrb[191].mxu0  ;;  %v15265_v20 = vld [vmem:[%s18914_s3 + $0x8] sm:$0xff] }
 0x2ab   :  { %19311 = vst [vmem:[#allocation151_spill] sm:$0xff] %v16894_v61  ;;  %v16902_v46 = vpack.c.bf16 %v3588_v31, %v3572_v18  ;;  %v3091_v34 = vmul.f32 0.01, %v2207_v17  ;;  %v3090_v26 = vmul.f32 0.01, %v2016_v54  ;;  %v2211_v2 = vadd.f32 %v2210_v62, %v16549_v52  ;;  %v2212_v10 = vpop.f32.mrb[191].mxu1 }
 0x2ac   :  { %v2020_v4 = vadd.f32 %v2019_v49, %v16552_v3  ;;  %v3092_v35 = vmul.f32 0.01, %v2209_v53  ;;  %v3105_v47 = vmul.f32 0.01, %v2018_v6  ;;  %v2213_v55 = vadd.f32 %v2212_v10, %v16556_v33  ;;  %5572 = vmatmul.mubr.bf16.gmra.mrb[40].mxu0 %v16075_v42 }
 0x2ad   :  { %19312 = vst [vmem:[#allocation152_spill] sm:$0xff] %v16902_v46  ;;  %v16913_v13 = vrot.slane %v15265_v20, %v19313_v38  ;;  %v3107_v56 = vmul.f32 0.01, %v2211_v2  ;;  %6344 = vmatmul.mubr.bf16.gmra.mrb[40].mxu1 %v16075_v42  ;;  %5581 = vmatprep.mubr.bf16.mxu0 %v16102_v59  ;;  %v19314_v52 = vsub.s32 6, %v15601_v43  ;;  %v19315_v33 = vsub.s32 5, %v15601_v43 }
 0x2ae   :  { %v3106_v19 = vmul.f32 0.01, %v2020_v4  ;;  %v3601_v18 = vmax.f32 %v2014_v1, %v3089_v60  ;;  %v3617_v31 = vmax.f32 %v2018_v6, %v3105_v47  ;;  %v3108_v57 = vmul.f32 0.01, %v2213_v55  ;;  %6353 = vmatprep.mubr.bf16.mxu1 %v16102_v59 }
 0x2af   :  { %v16919_v3 = vrot.slane %v15265_v20, %v19314_v52  ;;  %v16923_v36 = vrot.slane %v15265_v20, %v19315_v33  ;;  %v19316_v21 = vsub.s32 7, %v15601_v43  ;;  %v3603_v42 = vmax.f32 %v2207_v17, %v3091_v34  ;;  %v2249_v10 = vpop.f32.mrb[192].mxu0 }
 0x2b0   :  { %v3602_v5 = vmax.f32 %v2016_v54, %v3090_v26  ;;  %v3619_v62 = vmax.f32 %v2211_v2, %v3107_v56  ;;  %v3618_v49 = vmax.f32 %v2020_v4, %v3106_v19  ;;  %v3604_v38 = vmax.f32 %v2209_v53, %v3092_v35  ;;  %v2442_v1 = vpop.f32.mrb[192].mxu1  ;;  %v2251_v60 = vpop.f32.mrb[193].mxu0 }
 0x2b1   :  { %v16928_v32 = vrot.slane %v15265_v20, %v19316_v21  ;;  %v16930_v52 = vpack.c.bf16 %v3617_v31, %v3601_v18  ;;  %v3620_v61 = vmax.f32 %v2213_v55, %v3108_v57  ;;  %v2250_v33 = vadd.f32 %v2249_v10, %v16913_v13  ;;  %v2444_v47 = vpop.f32.mrb[193].mxu1  ;;  %v2253_v17 = vpop.f32.mrb[194].mxu0 }
 0x2b2   :  { %v16933_v6 = vpack.c.bf16 %v3619_v62, %v3603_v42  ;;  %v2443_v59 = vadd.f32 %v2442_v1, %v16919_v3  ;;  %v2252_v43 = vadd.f32 %v2251_v60, %v16923_v36  ;;  %v16937_v54 = vpack.c.bf16 %v3618_v49, %v3602_v5  ;;  %v2446_v2 = vpop.f32.mrb[194].mxu1  ;;  %v2255_v4 = vpop.f32.mrb[195].mxu0  ;;  %v19320_v42 = vld [vmem:[#allocation39_spill] sm:$0xff]  ;;  %v19321_v49 = vld [vmem:[#allocation44_spill] sm:$0xff] }
 0x2b3   :  { %19317 = vst [vmem:[#allocation153_spill] sm:$0xff] %v16930_v52  ;;  %v2613_v34 = vmul.f32 0.01, %v2250_v33  ;;  %v2445_v53 = vadd.f32 %v2444_v47, %v16928_v32  ;;  %v2254_v26 = vadd.f32 %v2253_v17, %v16913_v13  ;;  %v16941_v35 = vpack.c.bf16 %v3620_v61, %v3604_v38  ;;  %v2448_v18 = vpop.f32.mrb[195].mxu1 }
 0x2b4   :  { %19318 = vst [vmem:[#allocation154_spill] sm:$0xff] %v16933_v6  ;;  %v2615_v55 = vmul.f32 0.01, %v2443_v59  ;;  %v2614_v20 = vmul.f32 0.01, %v2252_v43  ;;  %v2447_v56 = vadd.f32 %v2446_v2, %v16919_v3  ;;  %v2256_v19 = vadd.f32 %v2255_v4, %v16923_v36  ;;  %5582 = vmatmul.mubr.bf16.gmra.mrb[44].mxu0 %v19320_v42 }
 0x2b5   :  { %19319 = vst [vmem:[#allocation155_spill] sm:$0xff] %v16941_v35  ;;  %v2616_v31 = vmul.f32 0.01, %v2445_v53  ;;  %v2629_v57 = vmul.f32 0.01, %v2254_v26  ;;  %v2449_v21 = vadd.f32 %v2448_v18, %v16928_v32  ;;  %6354 = vmatmul.mubr.bf16.gmra.mrb[44].mxu1 %v19320_v42  ;;  %5591 = vmatprep.mubr.bf16.mxu0 %v19321_v49  ;;  %v3125_v61 = vmax.f32 %v2250_v33, %v2613_v34 }
 0x2b6   :  { %v2631_v5 = vmul.f32 0.01, %v2447_v56  ;;  %v2630_v62 = vmul.f32 0.01, %v2256_v19  ;;  %6363 = vmatprep.mubr.bf16.mxu1 %v19321_v49  ;;  %v3127_v1 = vmax.f32 %v2443_v59, %v2615_v55  ;;  %v3126_v60 = vmax.f32 %v2252_v43, %v2614_v20 }
 0x2b7   :  { %v3141_v10 = vmax.f32 %v2254_v26, %v2629_v57  ;;  %v2632_v38 = vmul.f32 0.01, %v2449_v21  ;;  %v2259_v2 = vpop.f32.mrb[196].mxu0  ;;  %v3128_v4 = vmax.f32 %v2445_v53, %v2616_v31 }
 0x2b8   :  { %v3143_v47 = vmax.f32 %v2447_v56, %v2631_v5  ;;  %v3142_v17 = vmax.f32 %v2256_v19, %v2630_v62  ;;  %v2260_v35 = vadd.f32 %v2259_v2, %v16913_v13  ;;  %v2452_v46 = vpop.f32.mrb[196].mxu1  ;;  %v2261_v42 = vpop.f32.mrb[197].mxu0 }
 0x2b9   :  { %v16950_v18 = vpack.c.bf16 %v3141_v10, %v3125_v61  ;;  %v3144_v6 = vmax.f32 %v2449_v21, %v2632_v38  ;;  %v2453_v33 = vadd.f32 %v2452_v46, %v16919_v3  ;;  %v2262_v34 = vadd.f32 %v2261_v42, %v16923_v36  ;;  %v2454_v26 = vpop.f32.mrb[197].mxu1  ;;  %v2263_v59 = vpop.f32.mrb[198].mxu0  ;;  %v19326_v38 = vld [vmem:[#allocation42_spill] sm:$0xff] }
 0x2ba   :  { %v16953_v16 = vpack.c.bf16 %v3143_v47, %v3127_v1  ;;  %v16957_v43 = vpack.c.bf16 %v3142_v17, %v3126_v60  ;;  %v2645_v55 = vmul.f32 0.01, %v2260_v35  ;;  %v2455_v53 = vadd.f32 %v2454_v26, %v16928_v32  ;;  %v2456_v56 = vpop.f32.mrb[198].mxu1  ;;  %v2265_v19 = vpop.f32.mrb[199].mxu0  ;;  %v19327_v47 = vld [vmem:[#allocation48_spill] sm:$0xff] }
 0x2bb   :  { %19322 = vst [vmem:[#allocation39_spill] sm:$0xff] %v16950_v18  ;;  %v2264_v20 = vadd.f32 %v2263_v59, %v16913_v13  ;;  %v16961_v31 = vpack.c.bf16 %v3144_v6, %v3128_v4  ;;  %v2647_v57 = vmul.f32 0.01, %v2453_v33  ;;  %v2646_v21 = vmul.f32 0.01, %v2262_v34  ;;  %v2458_v62 = vpop.f32.mrb[199].mxu1 }
 0x2bc   :  { %19323 = vst [vmem:[#allocation44_spill] sm:$0xff] %v16953_v16  ;;  %19324 = vst [vmem:[#allocation156_spill] sm:$0xff] %v16957_v43  ;;  %v2457_v5 = vadd.f32 %v2456_v56, %v16919_v3  ;;  %v2266_v46 = vadd.f32 %v2265_v19, %v16923_v36  ;;  %v2648_v49 = vmul.f32 0.01, %v2455_v53  ;;  %v2459_v10 = vadd.f32 %v2458_v62, %v16928_v32 }
 0x2bd   :  { %19325 = vst [vmem:[#allocation157_spill] sm:$0xff] %v16961_v31  ;;  %v2661_v61 = vmul.f32 0.01, %v2264_v20  ;;  %5592 = vmatmul.mubr.bf16.gmra.mrb[48].mxu0 %v19326_v38  ;;  %6364 = vmatmul.mubr.bf16.gmra.mrb[48].mxu1 %v19326_v38  ;;  %v3157_v6 = vmax.f32 %v2260_v35, %v2645_v55  ;;  %v3159_v4 = vmax.f32 %v2453_v33, %v2647_v57 }
 0x2be   :  { %v2663_v1 = vmul.f32 0.01, %v2457_v5  ;;  %v2662_v60 = vmul.f32 0.01, %v2266_v46  ;;  %5601 = vmatprep.mubr.bf16.mxu0 %v19327_v47  ;;  %v2664_v2 = vmul.f32 0.01, %v2459_v10  ;;  %6373 = vmatprep.mubr.bf16.mxu1 %v19327_v47  ;;  %v3158_v42 = vmax.f32 %v2262_v34, %v2646_v21 }
 0x2bf   :  { %v3173_v17 = vmax.f32 %v2264_v20, %v2661_v61  ;;  %v2269_v56 = vpop.f32.mrb[200].mxu0  ;;  %v3160_v19 = vmax.f32 %v2455_v53, %v2648_v49 }
 0x2c0   :  { %v3175_v26 = vmax.f32 %v2457_v5, %v2663_v1  ;;  %v3174_v59 = vmax.f32 %v2266_v46, %v2662_v60  ;;  %v3176_v16 = vmax.f32 %v2459_v10, %v2664_v2  ;;  %v2270_v31 = vadd.f32 %v2269_v56, %v16913_v13  ;;  %v2462_v18 = vpop.f32.mrb[200].mxu1  ;;  %v2271_v38 = vpop.f32.mrb[201].mxu0  ;;  %v19332_v2 = vld [vmem:[#allocation46_spill] sm:$0xff] }
 0x2c1   :  { %v16970_v62 = vpack.c.bf16 %v3173_v17, %v3157_v6  ;;  %v2463_v35 = vadd.f32 %v2462_v18, %v16919_v3  ;;  %v2272_v55 = vadd.f32 %v2271_v38, %v16923_v36  ;;  %v2464_v20 = vpop.f32.mrb[201].mxu1  ;;  %v2273_v33 = vpop.f32.mrb[202].mxu0 }
 0x2c2   :  { %v16973_v43 = vpack.c.bf16 %v3175_v26, %v3159_v4  ;;  %v16977_v34 = vpack.c.bf16 %v3174_v59, %v3158_v42  ;;  %v2677_v57 = vmul.f32 0.01, %v2270_v31  ;;  %v2465_v53 = vadd.f32 %v2464_v20, %v16928_v32  ;;  %v2466_v5 = vpop.f32.mrb[202].mxu1  ;;  %v2275_v46 = vpop.f32.mrb[203].mxu0  ;;  %v19333_v26 = vld [vmem:[#allocation52_spill] sm:$0xff] }
 0x2c3   :  { %19328 = vst [vmem:[#allocation42_spill] sm:$0xff] %v16970_v62  ;;  %v2274_v21 = vadd.f32 %v2273_v33, %v16913_v13  ;;  %v16981_v49 = vpack.c.bf16 %v3176_v16, %v3160_v19  ;;  %v2679_v61 = vmul.f32 0.01, %v2463_v35  ;;  %v2678_v10 = vmul.f32 0.01, %v2272_v55  ;;  %v2468_v60 = vpop.f32.mrb[203].mxu1 }
 0x2c4   :  { %19329 = vst [vmem:[#allocation48_spill] sm:$0xff] %v16973_v43  ;;  %19330 = vst [vmem:[#allocation158_spill] sm:$0xff] %v16977_v34  ;;  %v2467_v1 = vadd.f32 %v2466_v5, %v16919_v3  ;;  %v2276_v18 = vadd.f32 %v2275_v46, %v16923_v36  ;;  %v2680_v47 = vmul.f32 0.01, %v2465_v53  ;;  %v2469_v17 = vadd.f32 %v2468_v60, %v16928_v32 }
 0x2c5   :  { %19331 = vst [vmem:[#allocation159_spill] sm:$0xff] %v16981_v49  ;;  %v2693_v6 = vmul.f32 0.01, %v2274_v21  ;;  %5602 = vmatmul.mubr.bf16.gmra.mrb[52].mxu0 %v19332_v2  ;;  %6374 = vmatmul.mubr.bf16.gmra.mrb[52].mxu1 %v19332_v2  ;;  %v3189_v16 = vmax.f32 %v2270_v31, %v2677_v57  ;;  %v3191_v19 = vmax.f32 %v2463_v35, %v2679_v61 }
 0x2c6   :  { %v2695_v4 = vmul.f32 0.01, %v2467_v1  ;;  %v2694_v42 = vmul.f32 0.01, %v2276_v18  ;;  %5611 = vmatprep.mubr.bf16.mxu0 %v19333_v26  ;;  %v2696_v56 = vmul.f32 0.01, %v2469_v17  ;;  %6383 = vmatprep.mubr.bf16.mxu1 %v19333_v26  ;;  %v3190_v38 = vmax.f32 %v2272_v55, %v2678_v10 }
 0x2c7   :  { %v3205_v59 = vmax.f32 %v2274_v21, %v2693_v6  ;;  %v2279_v5 = vpop.f32.mrb[204].mxu0  ;;  %v3192_v46 = vmax.f32 %v2465_v53, %v2680_v47 }
 0x2c8   :  { %v3207_v20 = vmax.f32 %v2467_v1, %v2695_v4  ;;  %v3206_v33 = vmax.f32 %v2276_v18, %v2694_v42  ;;  %v3208_v43 = vmax.f32 %v2469_v17, %v2696_v56  ;;  %v2280_v49 = vadd.f32 %v2279_v5, %v16913_v13  ;;  %v2472_v62 = vpop.f32.mrb[204].mxu1  ;;  %v2281_v2 = vpop.f32.mrb[205].mxu0  ;;  %v19338_v56 = vld [vmem:[#allocation50_spill] sm:$0xff] }
 0x2c9   :  { %v16990_v60 = vpack.c.bf16 %v3205_v59, %v3189_v16  ;;  %v2473_v31 = vadd.f32 %v2472_v62, %v16919_v3  ;;  %v2282_v57 = vadd.f32 %v2281_v2, %v16923_v36  ;;  %v2474_v21 = vpop.f32.mrb[205].mxu1  ;;  %v2283_v35 = vpop.f32.mrb[206].mxu0 }
 0x2ca   :  { %v16993_v34 = vpack.c.bf16 %v3207_v20, %v3191_v19  ;;  %v16997_v55 = vpack.c.bf16 %v3206_v33, %v3190_v38  ;;  %v2709_v61 = vmul.f32 0.01, %v2280_v49  ;;  %v2475_v53 = vadd.f32 %v2474_v21, %v16928_v32  ;;  %v2476_v1 = vpop.f32.mrb[206].mxu1  ;;  %v2285_v18 = vpop.f32.mrb[207].mxu0  ;;  %v19339_v20 = vld [vmem:[#allocation56_spill] sm:$0xff] }
 0x2cb   :  { %19334 = vst [vmem:[#allocation46_spill] sm:$0xff] %v16990_v60  ;;  %v2284_v10 = vadd.f32 %v2283_v35, %v16913_v13  ;;  %v17001_v47 = vpack.c.bf16 %v3208_v43, %v3192_v46  ;;  %v2711_v6 = vmul.f32 0.01, %v2473_v31  ;;  %v2710_v17 = vmul.f32 0.01, %v2282_v57  ;;  %v2478_v42 = vpop.f32.mrb[207].mxu1 }
 0x2cc   :  { %19335 = vst [vmem:[#allocation52_spill] sm:$0xff] %v16993_v34  ;;  %19336 = vst [vmem:[#allocation160_spill] sm:$0xff] %v16997_v55  ;;  %v2477_v4 = vadd.f32 %v2476_v1, %v16919_v3  ;;  %v2286_v62 = vadd.f32 %v2285_v18, %v16923_v36  ;;  %v2712_v26 = vmul.f32 0.01, %v2475_v53  ;;  %v2479_v59 = vadd.f32 %v2478_v42, %v16928_v32 }
 0x2cd   :  { %19337 = vst [vmem:[#allocation161_spill] sm:$0xff] %v17001_v47  ;;  %v2725_v16 = vmul.f32 0.01, %v2284_v10  ;;  %5612 = vmatmul.mubr.bf16.gmra.mrb[56].mxu0 %v19338_v56  ;;  %6384 = vmatmul.mubr.bf16.gmra.mrb[56].mxu1 %v19338_v56  ;;  %v3221_v43 = vmax.f32 %v2280_v49, %v2709_v61  ;;  %v3223_v46 = vmax.f32 %v2473_v31, %v2711_v6 }
 0x2ce   :  { %v2727_v19 = vmul.f32 0.01, %v2477_v4  ;;  %v2726_v38 = vmul.f32 0.01, %v2286_v62  ;;  %5621 = vmatprep.mubr.bf16.mxu0 %v19339_v20  ;;  %v2728_v5 = vmul.f32 0.01, %v2479_v59  ;;  %6393 = vmatprep.mubr.bf16.mxu1 %v19339_v20  ;;  %v3222_v2 = vmax.f32 %v2282_v57, %v2710_v17 }
 0x2cf   :  { %v3237_v33 = vmax.f32 %v2284_v10, %v2725_v16  ;;  %v2289_v1 = vpop.f32.mrb[208].mxu0  ;;  %v3224_v18 = vmax.f32 %v2475_v53, %v2712_v26 }
 0x2d0   :  { %v3239_v21 = vmax.f32 %v2477_v4, %v2727_v19  ;;  %v3238_v35 = vmax.f32 %v2286_v62, %v2726_v38  ;;  %v3240_v34 = vmax.f32 %v2479_v59, %v2728_v5  ;;  %v2290_v47 = vadd.f32 %v2289_v1, %v16913_v13  ;;  %v2482_v60 = vpop.f32.mrb[208].mxu1  ;;  %v2291_v56 = vpop.f32.mrb[209].mxu0  ;;  %v19344_v5 = vld [vmem:[#allocation54_spill] sm:$0xff] }
 0x2d1   :  { %v17010_v42 = vpack.c.bf16 %v3237_v33, %v3221_v43  ;;  %v2483_v49 = vadd.f32 %v2482_v60, %v16919_v3  ;;  %v2292_v61 = vadd.f32 %v2291_v56, %v16923_v36  ;;  %v2484_v10 = vpop.f32.mrb[209].mxu1  ;;  %v2293_v31 = vpop.f32.mrb[210].mxu0 }
 0x2d2   :  { %v17013_v55 = vpack.c.bf16 %v3239_v21, %v3223_v46  ;;  %v17017_v57 = vpack.c.bf16 %v3238_v35, %v3222_v2  ;;  %v2741_v6 = vmul.f32 0.01, %v2290_v47  ;;  %v2485_v53 = vadd.f32 %v2484_v10, %v16928_v32  ;;  %v2486_v4 = vpop.f32.mrb[210].mxu1  ;;  %v2295_v62 = vpop.f32.mrb[211].mxu0  ;;  %v19345_v21 = vld [vmem:[#allocation14_spill] sm:$0xff] }
 0x2d3   :  { %19340 = vst [vmem:[#allocation50_spill] sm:$0xff] %v17010_v42  ;;  %v2294_v17 = vadd.f32 %v2293_v31, %v16913_v13  ;;  %v17021_v26 = vpack.c.bf16 %v3240_v34, %v3224_v18  ;;  %v2743_v16 = vmul.f32 0.01, %v2483_v49  ;;  %v2742_v59 = vmul.f32 0.01, %v2292_v61  ;;  %v2488_v38 = vpop.f32.mrb[211].mxu1 }
 0x2d4   :  { %19341 = vst [vmem:[#allocation56_spill] sm:$0xff] %v17013_v55  ;;  %19342 = vst [vmem:[#allocation162_spill] sm:$0xff] %v17017_v57  ;;  %v2487_v19 = vadd.f32 %v2486_v4, %v16919_v3  ;;  %v2296_v60 = vadd.f32 %v2295_v62, %v16923_v36  ;;  %v2744_v20 = vmul.f32 0.01, %v2485_v53  ;;  %v2489_v33 = vadd.f32 %v2488_v38, %v16928_v32 }
 0x2d5   :  { %19343 = vst [vmem:[#allocation163_spill] sm:$0xff] %v17021_v26  ;;  %v2757_v43 = vmul.f32 0.01, %v2294_v17  ;;  %5622 = vmatmul.mubr.bf16.gmra.mrb[60].mxu0 %v19344_v5  ;;  %6394 = vmatmul.mubr.bf16.gmra.mrb[60].mxu1 %v19344_v5  ;;  %v3253_v34 = vmax.f32 %v2290_v47, %v2741_v6  ;;  %v3255_v18 = vmax.f32 %v2483_v49, %v2743_v16  ;;  %v14579_v16 = vld [vmem:[#allocation4 + $0x408] ss:$16 sps:$4 sm:$0xff]  }
 0x2d6   :  { %v2759_v46 = vmul.f32 0.01, %v2487_v19  ;;  %v2758_v2 = vmul.f32 0.01, %v2296_v60  ;;  %5664 = vmatprep.mubr.bf16.mxu0 %v19345_v21  ;;  %v2760_v1 = vmul.f32 0.01, %v2489_v33  ;;  %6436 = vmatprep.mubr.bf16.mxu1 %v19345_v21  ;;  %v3254_v56 = vmax.f32 %v2292_v61, %v2742_v59 }
 0x2d7   :  { %v3269_v35 = vmax.f32 %v2294_v17, %v2757_v43  ;;  %v2299_v4 = vpop.f32.mrb[212].mxu0  ;;  %v3256_v62 = vmax.f32 %v2485_v53, %v2744_v20  ;;  %v14576_v61 = vld [vmem:[#allocation4 + $0x400] ss:$16 sps:$4 sm:$0xff]  }
 0x2d8   :  { %v3271_v10 = vmax.f32 %v2487_v19, %v2759_v46  ;;  %v3270_v31 = vmax.f32 %v2296_v60, %v2758_v2  ;;  %v3272_v55 = vmax.f32 %v2489_v33, %v2760_v1  ;;  %v2300_v26 = vadd.f32 %v2299_v4, %v16913_v13  ;;  %v2492_v42 = vpop.f32.mrb[212].mxu1  ;;  %v2301_v5 = vpop.f32.mrb[213].mxu0  ;;  %v14584_v33 = vld [vmem:[#allocation4 + $0x424] ss:$16 sps:$4 sm:$0xff]  }
 0x2d9   :  { %v17030_v38 = vpack.c.bf16 %v3269_v35, %v3253_v34  ;;  %v2493_v47 = vadd.f32 %v2492_v42, %v16919_v3  ;;  %v2302_v6 = vadd.f32 %v2301_v5, %v16923_v36  ;;  %v2494_v17 = vpop.f32.mrb[213].mxu1  ;;  %v2303_v49 = vpop.f32.mrb[214].mxu0 }
 0x2da   :  { %v17033_v57 = vpack.c.bf16 %v3271_v10, %v3255_v18  ;;  %v17037_v59 = vpack.c.bf16 %v3270_v31, %v3254_v56  ;;  %v2773_v53 = vmul.f32 0.01, %v2300_v26  ;;  %v2495_v19 = vadd.f32 %v2494_v17, %v16928_v32  ;;  %v2496_v20 = vpop.f32.mrb[214].mxu1  ;;  %v2305_v43 = vpop.f32.mrb[215].mxu0  ;;  %v19350_v10 = vld [vmem:[#allocation13_spill] sm:$0xff] }
 0x2db   :  { %19346 = vst [vmem:[#allocation54_spill] sm:$0xff] %v17030_v38  ;;  %v2304_v60 = vadd.f32 %v2303_v49, %v16913_v13  ;;  %v17041_v46 = vpack.c.bf16 %v3272_v55, %v3256_v62  ;;  %v2775_v2 = vmul.f32 0.01, %v2493_v47  ;;  %v2774_v42 = vmul.f32 0.01, %v2302_v6  ;;  %v2498_v35 = vpop.f32.mrb[215].mxu1 }
 0x2dc   :  { %19347 = vst [vmem:[#allocation14_spill] sm:$0xff] %v17033_v57  ;;  %19348 = vst [vmem:[#allocation164_spill] sm:$0xff] %v17037_v59  ;;  %v2497_v21 = vadd.f32 %v2496_v20, %v16919_v3  ;;  %v2306_v34 = vadd.f32 %v2305_v43, %v16923_v36  ;;  %v2776_v1 = vmul.f32 0.01, %v2495_v19  ;;  %v2499_v56 = vadd.f32 %v2498_v35, %v16928_v32  ;;  %v14587_v31 = vld [vmem:[#allocation4 + $0x42c] ss:$16 sps:$4 sm:$0xff]  }
 0x2dd   :  { %19349 = vst [vmem:[#allocation165_spill] sm:$0xff] %v17041_v46  ;;  %v2789_v18 = vmul.f32 0.01, %v2304_v60  ;;  %5665 = vmatmul.mubr.bf16.vlgmr.msra.gmra.mrb[0].mxu0 %v19350_v10  ;;  %6437 = vmatmul.mubr.bf16.vlgmr.msra.gmra.mrb[0].mxu1 %v19350_v10  ;;  %v19351_v55 = vld [vmem:[#allocation16_spill] sm:$0xff]  ;;  %v3285_v62 = vmax.f32 %v2300_v26, %v2773_v53  ;;  %v3287_v17 = vmax.f32 %v2493_v47, %v2775_v2  ;;  %v14582_v43 = vld [vmem:[#allocation4 + $0x420] ss:$16 sps:$4 sm:$0xff]  }
 0x2de   :  { %v2791_v4 = vmul.f32 0.01, %v2497_v21  ;;  %v2790_v5 = vmul.f32 0.01, %v2306_v34  ;;  %5674 = vmatprep.mubr.bf16.mxu0 %v19351_v55  ;;  %v2792_v20 = vmul.f32 0.01, %v2499_v56  ;;  %5826 = vmatpush1.bf16.msra.mxu0 %v14576_v61  ;;  %v3286_v57 = vmax.f32 %v2302_v6, %v2774_v42 }
 0x2df   :  { %v3301_v49 = vmax.f32 %v2304_v60, %v2789_v18  ;;  %6446 = vmatprep.mubr.bf16.mxu1 %v19351_v55  ;;  %v2309_v38 = vpop.f32.mrb[216].mxu0  ;;  %6598 = vmatpush1.bf16.msra.mxu1 %v14579_v16  ;;  %v14585_v59 = vld [vmem:[#allocation4 + $0x428] ss:$16 sps:$4 sm:$0xff]   ;;  %v3288_v58 = vmax.f32 %v2495_v19, %v2776_v1  ;;  %v14593_v61 = vld [vmem:[#allocation4 + $0x44c] ss:$16 sps:$4 sm:$0xff]  }
 0x2e0   :  { %v3303_v46 = vmax.f32 %v2497_v21, %v2791_v4  ;;  %v3302_v35 = vmax.f32 %v2306_v34, %v2790_v5  ;;  %5827 = vmatprep.subr.bf16.mxu0 %v14584_v33  ;;  %v3304_v52 = vmax.f32 %v2499_v56, %v2792_v20  ;;  %v2310_v26 = vadd.f32 %v2309_v38, %v16913_v13  ;;  %v2502_v47 = vpop.f32.mrb[216].mxu1  ;;  %v2311_v53 = vpop.f32.mrb[217].mxu0  ;;  %v14588_v42 = vld [vmem:[#allocation4 + $0x440] ss:$16 sps:$4 sm:$0xff]   ;;  %v14591_v21 = vld [vmem:[#allocation4 + $0x448] ss:$16 sps:$4 sm:$0xff]  }
 0x2e1   :  { %v17050_v10 = vpack.c.bf16 %v3301_v49, %v3285_v62  ;;  %6599 = vmatprep.subr.bf16.mxu1 %v14587_v31  ;;  %v2503_v6 = vadd.f32 %v2502_v47, %v16919_v3  ;;  %v2312_v2 = vadd.f32 %v2311_v53, %v16923_v36  ;;  %v2504_v16 = vpop.f32.mrb[217].mxu1  ;;  %v2313_v33 = vpop.f32.mrb[218].mxu0  ;;  %v19357_v47 = vld [vmem:[#allocation20_spill] sm:$0xff] }
 0x2e2   :  { %v17053_v60 = vpack.c.bf16 %v3303_v46, %v3287_v17  ;;  %v17057_v19 = vpack.c.bf16 %v3302_v35, %v3286_v57  ;;  %v2805_v34 = vmul.f32 0.01, %v2310_v26  ;;  %v17060_v1 = vadd.f32 %v2504_v16, %v16928_v32  ;;  %v2506_v18 = vpop.f32.mrb[218].mxu1  ;;  %v2315_v56 = vpop.f32.mrb[219].mxu0  ;;  %5828 = vmatpush1.bf16.msra.mxu0 %v14582_v43  ;;  %v14596_v46 = vld [vmem:[#allocation4 + $0x464] ss:$16 sps:$4 sm:$0xff]  }
 0x2e3   :  { %19352 = vst [vmem:[#allocation13_spill] sm:$0xff] %v17050_v10  ;;  %v2314_v38 = vadd.f32 %v2313_v33, %v16913_v13  ;;  %v17063_v31 = vpack.c.bf16 %v3304_v52, %v3288_v58  ;;  %v2807_v4 = vmul.f32 0.01, %v2503_v6  ;;  %v2806_v5 = vmul.f32 0.01, %v2312_v2  ;;  %v2508_v57 = vpop.f32.mrb[219].mxu1  ;;  %6600 = vmatpush1.bf16.msra.mxu1 %v14585_v59  ;;  %5829 = vmatprep.subr.bf16.mxu0 %v14590_v44 }
 0x2e4   :  { %19353 = vst [vmem:[#allocation16_spill] sm:$0xff] %v17053_v60  ;;  %19354 = vst [vmem:[#allocation166_spill] sm:$0xff] %v17057_v19  ;;  %v2507_v55 = vadd.f32 %v2506_v18, %v16919_v3  ;;  %v2316_v62 = vadd.f32 %v2315_v56, %v16923_v36  ;;  %v2808_v17 = vmul.f32 0.01, %v17060_v1  ;;  %v2509_v20 = vadd.f32 %v2508_v57, %v16928_v32  ;;  %v19356_v35 = vld [vmem:[#allocation15_spill] sm:$0xff] }
 0x2e5   :  { %19355 = vst [vmem:[#allocation167_spill] sm:$0xff] %v17063_v31  ;;  %v2821_v49 = vmul.f32 0.01, %v2314_v38  ;;  %5675 = vmatmul.mubr.bf16.gmra.mrb[4].mxu0 %v19356_v35  ;;  %6601 = vmatprep.subr.bf16.mxu1 %v14593_v61  ;;  %v14599_v43 = vld [vmem:[#allocation4 + $0x46c] ss:$16 sps:$4 sm:$0xff]   ;;  %v3317_v53 = vmax.f32 %v2310_v26, %v2805_v34  ;;  %v3319_v16 = vmax.f32 %v2503_v6, %v2807_v4 }
 0x2e6   :  { %v2823_v58 = vmul.f32 0.01, %v2507_v55  ;;  %v2822_v52 = vmul.f32 0.01, %v2316_v62  ;;  %6447 = vmatmul.mubr.bf16.gmra.mrb[4].mxu1 %v19356_v35  ;;  %5684 = vmatprep.mubr.bf16.mxu0 %v19357_v47  ;;  %v2824_v59 = vmul.f32 0.01, %v2509_v20  ;;  %v3318_v18 = vmax.f32 %v2312_v2, %v2806_v5 }
 0x2e7   :  { %v3333_v33 = vmax.f32 %v2314_v38, %v2821_v49  ;;  %6456 = vmatprep.mubr.bf16.mxu1 %v19357_v47  ;;  %5830 = vmatpush1.bf16.msra.mxu0 %v14588_v42  ;;  %v14594_v44 = vld [vmem:[#allocation4 + $0x460] ss:$16 sps:$4 sm:$0xff]   ;;  %v2319_v60 = vpop.f32.mrb[220].mxu0  ;;  %v14597_v61 = vld [vmem:[#allocation4 + $0x468] ss:$16 sps:$4 sm:$0xff]   ;;  %v3320_v35 = vmax.f32 %v17060_v1, %v2808_v17 }
 0x2e8   :  { %v3335_v56 = vmax.f32 %v2507_v55, %v2823_v58  ;;  %v3334_v57 = vmax.f32 %v2316_v62, %v2822_v52  ;;  %6602 = vmatpush1.bf16.msra.mxu1 %v14591_v21  ;;  %5831 = vmatprep.subr.bf16.mxu0 %v14596_v46  ;;  %v14602_v31 = vld [vmem:[#allocation4 + $0x484] ss:$16 sps:$4 sm:$0xff]   ;;  %v3336_v26 = vmax.f32 %v2509_v20, %v2824_v59  ;;  %v2512_v34 = vpop.f32.mrb[220].mxu1  ;;  %v2321_v38 = vpop.f32.mrb[221].mxu0  ;;  %v14605_v42 = vld [vmem:[#allocation4 + $0x48c] ss:$16 sps:$4 sm:$0xff]  }
 0x2e9   :  { %v17074_v10 = vpack.c.bf16 %v3333_v33, %v3317_v53  ;;  %v2320_v6 = vadd.f32 %v2319_v60, %v16913_v13  ;;  %6603 = vmatprep.subr.bf16.mxu1 %v14599_v43  ;;  %v2513_v2 = vadd.f32 %v2512_v34, %v16919_v3  ;;  %v2322_v21 = vadd.f32 %v2321_v38, %v16923_v36  ;;  %v2514_v46 = vpop.f32.mrb[221].mxu1  ;;  %v2323_v5 = vpop.f32.mrb[222].mxu0  ;;  %v14600_v55 = vld [vmem:[#allocation4 + $0x480] ss:$16 sps:$4 sm:$0xff]   ;;  %v14603_v62 = vld [vmem:[#allocation4 + $0x488] ss:$16 sps:$4 sm:$0xff]  }
 0x2ea   :  { %v17077_v4 = vpack.c.bf16 %v3335_v56, %v3319_v16  ;;  %v17081_v1 = vpack.c.bf16 %v3334_v57, %v3318_v18  ;;  %v17084_v49 = vadd.f32 %v2514_v46, %v16928_v32  ;;  %v2324_v60 = vadd.f32 %v2323_v5, %v16913_v13  ;;  %v2516_v20 = vpop.f32.mrb[222].mxu1  ;;  %v2325_v43 = vpop.f32.mrb[223].mxu0  ;;  %v14608_v58 = vld [vmem:[#allocation4 + $0x4a4] ss:$16 sps:$4 sm:$0xff]   ;;  %v19362_v34 = vld [vmem:[#allocation18_spill] sm:$0xff]  ;;  %v19363_v38 = vld [vmem:[#allocation24_spill] sm:$0xff] }
 0x2eb   :  { %19358 = vst [vmem:[#allocation15_spill] sm:$0xff] %v17074_v10  ;;  %v2837_v17 = vmul.f32 0.01, %v2320_v6  ;;  %5832 = vmatpush1.bf16.msra.mxu0 %v14594_v44  ;;  %v17087_v52 = vpack.c.bf16 %v3336_v26, %v3320_v35  ;;  %v2839_v47 = vmul.f32 0.01, %v2513_v2  ;;  %v2517_v16 = vadd.f32 %v2516_v20, %v16919_v3  ;;  %v2518_v59 = vpop.f32.mrb[223].mxu1 }
 0x2ec   :  { %19359 = vst [vmem:[#allocation20_spill] sm:$0xff] %v17077_v4  ;;  %19360 = vst [vmem:[#allocation168_spill] sm:$0xff] %v17081_v1  ;;  %v2838_v53 = vmul.f32 0.01, %v2322_v21  ;;  %v2326_v33 = vadd.f32 %v2325_v43, %v16923_v36  ;;  %6604 = vmatpush1.bf16.msra.mxu1 %v14597_v61  ;;  %5833 = vmatprep.subr.bf16.mxu0 %v14602_v31  ;;  %v2840_v18 = vmul.f32 0.01, %v17084_v49 }
 0x2ed   :  { %19361 = vst [vmem:[#allocation169_spill] sm:$0xff] %v17087_v52  ;;  %v2853_v56 = vmul.f32 0.01, %v2324_v60  ;;  %v2519_v57 = vadd.f32 %v2518_v59, %v16928_v32  ;;  %5685 = vmatmul.mubr.bf16.gmra.mrb[8].mxu0 %v19362_v34  ;;  %6605 = vmatprep.subr.bf16.mxu1 %v14605_v42  ;;  %v14611_v44 = vld [vmem:[#allocation4 + $0x4ac] ss:$16 sps:$4 sm:$0xff]   ;;  %v3349_v46 = vmax.f32 %v2320_v6, %v2837_v17 }
 0x2ee   :  { %v2855_v35 = vmul.f32 0.01, %v2517_v16  ;;  %v2854_v26 = vmul.f32 0.01, %v2326_v33  ;;  %6457 = vmatmul.mubr.bf16.gmra.mrb[8].mxu1 %v19362_v34  ;;  %5694 = vmatprep.mubr.bf16.mxu0 %v19363_v38  ;;  %v3351_v5 = vmax.f32 %v2513_v2, %v2839_v47  ;;  %v14606_v31 = vld [vmem:[#allocation4 + $0x4a0] ss:$16 sps:$4 sm:$0xff]   ;;  %v3350_v43 = vmax.f32 %v2322_v21, %v2838_v53 }
 0x2ef   :  { %v3365_v20 = vmax.f32 %v2324_v60, %v2853_v56  ;;  %v2856_v61 = vmul.f32 0.01, %v2519_v57  ;;  %6466 = vmatprep.mubr.bf16.mxu1 %v19363_v38  ;;  %5834 = vmatpush1.bf16.msra.mxu0 %v14600_v55  ;;  %v2329_v52 = vpop.f32.mrb[224].mxu0  ;;  %v14609_v42 = vld [vmem:[#allocation4 + $0x4a8] ss:$16 sps:$4 sm:$0xff]   ;;  %v3352_v34 = vmax.f32 %v17084_v49, %v2840_v18 }
 0x2f0   :  { %v3367_v59 = vmax.f32 %v2517_v16, %v2855_v35  ;;  %v3366_v4 = vmax.f32 %v2326_v33, %v2854_v26  ;;  %6606 = vmatpush1.bf16.msra.mxu1 %v14603_v62  ;;  %5835 = vmatprep.subr.bf16.mxu0 %v14608_v58  ;;  %v14614_v10 = vld [vmem:[#allocation4 + $0x4c4] ss:$16 sps:$4 sm:$0xff]   ;;  %v2330_v2 = vadd.f32 %v2329_v52, %v16913_v13  ;;  %v2522_v17 = vpop.f32.mrb[224].mxu1  ;;  %v2331_v60 = vpop.f32.mrb[225].mxu0  ;;  %v14617_v55 = vld [vmem:[#allocation4 + $0x4cc] ss:$16 sps:$4 sm:$0xff]  }
 0x2f1   :  { %v17098_v1 = vpack.c.bf16 %v3365_v20, %v3349_v46  ;;  %v3368_v6 = vmax.f32 %v2519_v57, %v2856_v61  ;;  %6607 = vmatprep.subr.bf16.mxu1 %v14611_v44  ;;  %v2523_v21 = vadd.f32 %v2522_v17, %v16919_v3  ;;  %v2332_v62 = vadd.f32 %v2331_v60, %v16923_v36  ;;  %v2524_v58 = vpop.f32.mrb[225].mxu1  ;;  %v2333_v53 = vpop.f32.mrb[226].mxu0  ;;  %v14612_v16 = vld [vmem:[#allocation4 + $0x4c0] ss:$16 sps:$4 sm:$0xff]   ;;  %v14615_v33 = vld [vmem:[#allocation4 + $0x4c8] ss:$16 sps:$4 sm:$0xff]  }
 0x2f2   :  { %v17101_v47 = vpack.c.bf16 %v3367_v59, %v3351_v5  ;;  %v17105_v49 = vpack.c.bf16 %v3366_v4, %v3350_v43  ;;  %v2869_v18 = vmul.f32 0.01, %v2330_v2  ;;  %v17108_v56 = vadd.f32 %v2524_v58, %v16928_v32  ;;  %v2526_v57 = vpop.f32.mrb[226].mxu1  ;;  %v2335_v44 = vpop.f32.mrb[227].mxu0  ;;  %v14620_v35 = vld [vmem:[#allocation4 + $0x4e4] ss:$16 sps:$4 sm:$0xff]  }
 0x2f3   :  { %19364 = vst [vmem:[#allocation18_spill] sm:$0xff] %v17098_v1  ;;  %v2334_v52 = vadd.f32 %v2333_v53, %v16913_v13  ;;  %5836 = vmatpush1.bf16.msra.mxu0 %v14606_v31  ;;  %v17111_v26 = vpack.c.bf16 %v3368_v6, %v3352_v34  ;;  %v2871_v38 = vmul.f32 0.01, %v2523_v21  ;;  %v2870_v46 = vmul.f32 0.01, %v2332_v62  ;;  %v2528_v4 = vpop.f32.mrb[227].mxu1 }
 0x2f4   :  { %19365 = vst [vmem:[#allocation24_spill] sm:$0xff] %v17101_v47  ;;  %19366 = vst [vmem:[#allocation170_spill] sm:$0xff] %v17105_v49  ;;  %v2527_v5 = vadd.f32 %v2526_v57, %v16919_v3  ;;  %v2336_v20 = vadd.f32 %v2335_v44, %v16923_v36  ;;  %6608 = vmatpush1.bf16.msra.mxu1 %v14609_v42  ;;  %5837 = vmatprep.subr.bf16.mxu0 %v14614_v10  ;;  %v2872_v61 = vmul.f32 0.01, %v17108_v56  ;;  %v19368_v17 = vld [vmem:[#allocation22_spill] sm:$0xff] }
 0x2f5   :  { %19367 = vst [vmem:[#allocation171_spill] sm:$0xff] %v17111_v26  ;;  %v2885_v43 = vmul.f32 0.01, %v2334_v52  ;;  %v2529_v59 = vadd.f32 %v2528_v4, %v16928_v32  ;;  %5695 = vmatmul.mubr.bf16.gmra.mrb[12].mxu0 %v19368_v17  ;;  %6609 = vmatprep.subr.bf16.mxu1 %v14617_v55  ;;  %v14623_v31 = vld [vmem:[#allocation4 + $0x4ec] ss:$16 sps:$4 sm:$0xff]   ;;  %v3381_v58 = vmax.f32 %v2330_v2, %v2869_v18 }
 0x2f6   :  { %v2887_v34 = vmul.f32 0.01, %v2527_v5  ;;  %v2886_v6 = vmul.f32 0.01, %v2336_v20  ;;  %6467 = vmatmul.mubr.bf16.gmra.mrb[12].mxu1 %v19368_v17  ;;  %v19369_v60 = vld [vmem:[#allocation26_spill] sm:$0xff]  ;;  %v3383_v53 = vmax.f32 %v2523_v21, %v2871_v38  ;;  %v3382_v44 = vmax.f32 %v2332_v62, %v2870_v46 }
 0x2f7   :  { %5704 = vmatprep.mubr.bf16.mxu0 %v19369_v60  ;;  %v3397_v57 = vmax.f32 %v2334_v52, %v2885_v43  ;;  %v2888_v42 = vmul.f32 0.01, %v2529_v59  ;;  %6476 = vmatprep.mubr.bf16.mxu1 %v19369_v60  ;;  %v14618_v10 = vld [vmem:[#allocation4 + $0x4e0] ss:$16 sps:$4 sm:$0xff]   ;;  %v2339_v26 = vpop.f32.mrb[228].mxu0  ;;  %v3384_v17 = vmax.f32 %v17108_v56, %v2872_v61 }
 0x2f8   :  { %5838 = vmatpush1.bf16.msra.mxu0 %v14612_v16  ;;  %v3399_v4 = vmax.f32 %v2527_v5, %v2887_v34  ;;  %v3398_v47 = vmax.f32 %v2336_v20, %v2886_v6  ;;  %6610 = vmatpush1.bf16.msra.mxu1 %v14615_v33  ;;  %v14621_v55 = vld [vmem:[#allocation4 + $0x4e8] ss:$16 sps:$4 sm:$0xff]   ;;  %v14626_v1 = vld [vmem:[#allocation4 + $0x504] ss:$16 sps:$4 sm:$0xff]   ;;  %v2340_v21 = vadd.f32 %v2339_v26, %v16913_v13  ;;  %v2532_v18 = vpop.f32.mrb[228].mxu1  ;;  %v2341_v52 = vpop.f32.mrb[229].mxu0 }
 0x2f9   :  { %5839 = vmatprep.subr.bf16.mxu0 %v14620_v35  ;;  %v17122_v49 = vpack.c.bf16 %v3397_v57, %v3381_v58  ;;  %v3400_v2 = vmax.f32 %v2529_v59, %v2888_v42  ;;  %6611 = vmatprep.subr.bf16.mxu1 %v14623_v31  ;;  %v14629_v16 = vld [vmem:[#allocation4 + $0x50c] ss:$16 sps:$4 sm:$0xff]   ;;  %v2533_v62 = vadd.f32 %v2532_v18, %v16919_v3  ;;  %v2534_v35 = vpop.f32.mrb[229].mxu1  ;;  %v2343_v46 = vpop.f32.mrb[230].mxu0  ;;  %v14624_v5 = vld [vmem:[#allocation4 + $0x500] ss:$16 sps:$4 sm:$0xff]  }
 0x2fa   :  { %v17125_v38 = vpack.c.bf16 %v3399_v4, %v3383_v53  ;;  %v2342_v33 = vadd.f32 %v2341_v52, %v16923_v36  ;;  %v14627_v20 = vld [vmem:[#allocation4 + $0x508] ss:$16 sps:$4 sm:$0xff]   ;;  %v17129_v56 = vpack.c.bf16 %v3398_v47, %v3382_v44  ;;  %v2901_v61 = vmul.f32 0.01, %v2340_v21  ;;  %v2536_v59 = vpop.f32.mrb[230].mxu1  ;;  %v2345_v31 = vpop.f32.mrb[231].mxu0 }
 0x2fb   :  { %19370 = vst [vmem:[#allocation22_spill] sm:$0xff] %v17122_v49  ;;  %v17132_v43 = vadd.f32 %v2534_v35, %v16928_v32  ;;  %v2344_v26 = vadd.f32 %v2343_v46, %v16913_v13  ;;  %v14632_v34 = vld [vmem:[#allocation4 + $0x524] ss:$16 sps:$4 sm:$0xff]   ;;  %v17135_v6 = vpack.c.bf16 %v3400_v2, %v3384_v17  ;;  %v2903_v60 = vmul.f32 0.01, %v2533_v62  ;;  %v2538_v47 = vpop.f32.mrb[231].mxu1 }
 0x2fc   :  { %19371 = vst [vmem:[#allocation26_spill] sm:$0xff] %v17125_v38  ;;  %19372 = vst [vmem:[#allocation172_spill] sm:$0xff] %v17129_v56  ;;  %5840 = vmatpush1.bf16.msra.mxu0 %v14618_v10  ;;  %v2902_v58 = vmul.f32 0.01, %v2342_v33  ;;  %v2537_v53 = vadd.f32 %v2536_v59, %v16919_v3  ;;  %v2346_v57 = vadd.f32 %v2345_v31, %v16923_v36  ;;  %6612 = vmatpush1.bf16.msra.mxu1 %v14621_v55  ;;  %v19374_v18 = vld [vmem:[#allocation25_spill] sm:$0xff]  ;;  %v19375_v52 = vld [vmem:[#allocation28_spill] sm:$0xff] }
 0x2fd   :  { %19373 = vst [vmem:[#allocation173_spill] sm:$0xff] %v17135_v6  ;;  %5841 = vmatprep.subr.bf16.mxu0 %v14626_v1  ;;  %v2904_v42 = vmul.f32 0.01, %v17132_v43  ;;  %v2917_v44 = vmul.f32 0.01, %v2344_v26  ;;  %v2539_v4 = vadd.f32 %v2538_v47, %v16928_v32  ;;  %5705 = vmatmul.mubr.bf16.gmra.mrb[16].mxu0 %v19374_v18  ;;  %v3413_v35 = vmax.f32 %v2340_v21, %v2901_v61 }
 0x2fe   :  { %6613 = vmatprep.subr.bf16.mxu1 %v14629_v16  ;;  %v14635_v10 = vld [vmem:[#allocation4 + $0x52c] ss:$16 sps:$4 sm:$0xff]   ;;  %v2919_v17 = vmul.f32 0.01, %v2537_v53  ;;  %v2918_v2 = vmul.f32 0.01, %v2346_v57  ;;  %6477 = vmatmul.mubr.bf16.gmra.mrb[16].mxu1 %v19374_v18  ;;  %v3415_v46 = vmax.f32 %v2533_v62, %v2903_v60  ;;  %v3414_v31 = vmax.f32 %v2342_v33, %v2902_v58 }
 0x2ff   :  { %5714 = vmatprep.mubr.bf16.mxu0 %v19375_v52  ;;  %v3429_v59 = vmax.f32 %v2344_v26, %v2917_v44  ;;  %v2920_v55 = vmul.f32 0.01, %v2539_v4  ;;  %6486 = vmatprep.mubr.bf16.mxu1 %v19375_v52  ;;  %v14630_v1 = vld [vmem:[#allocation4 + $0x520] ss:$16 sps:$4 sm:$0xff]   ;;  %v2349_v6 = vpop.f32.mrb[232].mxu0  ;;  %v3416_v18 = vmax.f32 %v17132_v43, %v2904_v42 }
 0x300   :  { %5842 = vmatpush1.bf16.msra.mxu0 %v14624_v5  ;;  %v3431_v47 = vmax.f32 %v2537_v53, %v2919_v17  ;;  %v3430_v38 = vmax.f32 %v2346_v57, %v2918_v2  ;;  %6614 = vmatpush1.bf16.msra.mxu1 %v14627_v20  ;;  %v14633_v16 = vld [vmem:[#allocation4 + $0x528] ss:$16 sps:$4 sm:$0xff]   ;;  %v14638_v49 = vld [vmem:[#allocation4 + $0x544] ss:$16 sps:$4 sm:$0xff]   ;;  %v2350_v62 = vadd.f32 %v2349_v6, %v16913_v13  ;;  %v2542_v61 = vpop.f32.mrb[232].mxu1  ;;  %v2351_v26 = vpop.f32.mrb[233].mxu0 }
 0x301   :  { %5843 = vmatprep.subr.bf16.mxu0 %v14632_v34  ;;  %v17146_v56 = vpack.c.bf16 %v3429_v59, %v3413_v35  ;;  %v3432_v21 = vmax.f32 %v2539_v4, %v2920_v55  ;;  %6615 = vmatprep.subr.bf16.mxu1 %v14635_v10  ;;  %v14641_v5 = vld [vmem:[#allocation4 + $0x54c] ss:$16 sps:$4 sm:$0xff]   ;;  %v2543_v33 = vadd.f32 %v2542_v61, %v16919_v3  ;;  %v2544_v34 = vpop.f32.mrb[233].mxu1  ;;  %v2353_v58 = vpop.f32.mrb[234].mxu0  ;;  %v14636_v53 = vld [vmem:[#allocation4 + $0x540] ss:$16 sps:$4 sm:$0xff]  }
 0x302   :  { %v17149_v60 = vpack.c.bf16 %v3431_v47, %v3415_v46  ;;  %v2352_v20 = vadd.f32 %v2351_v26, %v16923_v36  ;;  %v14639_v57 = vld [vmem:[#allocation4 + $0x548] ss:$16 sps:$4 sm:$0xff]   ;;  %v17153_v43 = vpack.c.bf16 %v3430_v38, %v3414_v31  ;;  %v2933_v42 = vmul.f32 0.01, %v2350_v62  ;;  %v2546_v4 = vpop.f32.mrb[234].mxu1  ;;  %v2355_v10 = vpop.f32.mrb[235].mxu0 }
 0x303   :  { %19376 = vst [vmem:[#allocation25_spill] sm:$0xff] %v17146_v56  ;;  %v17156_v44 = vadd.f32 %v2544_v34, %v16928_v32  ;;  %v2354_v6 = vadd.f32 %v2353_v58, %v16913_v13  ;;  %v14644_v17 = vld [vmem:[#allocation4 + $0x564] ss:$16 sps:$4 sm:$0xff]   ;;  %v17159_v2 = vpack.c.bf16 %v3432_v21, %v3416_v18  ;;  %v2935_v52 = vmul.f32 0.01, %v2543_v33  ;;  %v2548_v38 = vpop.f32.mrb[235].mxu1 }
 0x304   :  { %19377 = vst [vmem:[#allocation28_spill] sm:$0xff] %v17149_v60  ;;  %19378 = vst [vmem:[#allocation174_spill] sm:$0xff] %v17153_v43  ;;  %5844 = vmatpush1.bf16.msra.mxu0 %v14630_v1  ;;  %v2934_v35 = vmul.f32 0.01, %v2352_v20  ;;  %v2547_v46 = vadd.f32 %v2546_v4, %v16919_v3  ;;  %v2356_v59 = vadd.f32 %v2355_v10, %v16923_v36  ;;  %6616 = vmatpush1.bf16.msra.mxu1 %v14633_v16  ;;  %v19380_v61 = vld [vmem:[#allocation27_spill] sm:$0xff]  ;;  %v19381_v26 = vld [vmem:[#allocation30_spill] sm:$0xff] }
 0x305   :  { %19379 = vst [vmem:[#allocation175_spill] sm:$0xff] %v17159_v2  ;;  %5845 = vmatprep.subr.bf16.mxu0 %v14638_v49  ;;  %v2936_v55 = vmul.f32 0.01, %v17156_v44  ;;  %v2949_v31 = vmul.f32 0.01, %v2354_v6  ;;  %v2549_v47 = vadd.f32 %v2548_v38, %v16928_v32  ;;  %5715 = vmatmul.mubr.bf16.gmra.mrb[20].mxu0 %v19380_v61  ;;  %v3445_v34 = vmax.f32 %v2350_v62, %v2933_v42 }
 0x306   :  { %6617 = vmatprep.subr.bf16.mxu1 %v14641_v5  ;;  %v14647_v1 = vld [vmem:[#allocation4 + $0x56c] ss:$16 sps:$4 sm:$0xff]   ;;  %v2951_v18 = vmul.f32 0.01, %v2547_v46  ;;  %v2950_v21 = vmul.f32 0.01, %v2356_v59  ;;  %6487 = vmatmul.mubr.bf16.gmra.mrb[20].mxu1 %v19380_v61  ;;  %v3447_v58 = vmax.f32 %v2543_v33, %v2935_v52  ;;  %v3446_v10 = vmax.f32 %v2352_v20, %v2934_v35 }
 0x307   :  { %5724 = vmatprep.mubr.bf16.mxu0 %v19381_v26  ;;  %v3461_v4 = vmax.f32 %v2354_v6, %v2949_v31  ;;  %v2952_v16 = vmul.f32 0.01, %v2549_v47  ;;  %6496 = vmatprep.mubr.bf16.mxu1 %v19381_v26  ;;  %v14642_v49 = vld [vmem:[#allocation4 + $0x560] ss:$16 sps:$4 sm:$0xff]   ;;  %v2359_v2 = vpop.f32.mrb[236].mxu0  ;;  %v3448_v61 = vmax.f32 %v17156_v44, %v2936_v55 }
 0x308   :  { %5846 = vmatpush1.bf16.msra.mxu0 %v14636_v53  ;;  %v3463_v38 = vmax.f32 %v2547_v46, %v2951_v18  ;;  %v3462_v60 = vmax.f32 %v2356_v59, %v2950_v21  ;;  %6618 = vmatpush1.bf16.msra.mxu1 %v14639_v57  ;;  %v14645_v5 = vld [vmem:[#allocation4 + $0x568] ss:$16 sps:$4 sm:$0xff]   ;;  %v14650_v56 = vld [vmem:[#allocation4 + $0x584] ss:$16 sps:$4 sm:$0xff]   ;;  %v2360_v33 = vadd.f32 %v2359_v2, %v16913_v13  ;;  %v2552_v42 = vpop.f32.mrb[236].mxu1  ;;  %v2361_v6 = vpop.f32.mrb[237].mxu0 }
 0x309   :  { %5847 = vmatprep.subr.bf16.mxu0 %v14644_v17  ;;  %v17170_v43 = vpack.c.bf16 %v3461_v4, %v3445_v34  ;;  %v3464_v62 = vmax.f32 %v2549_v47, %v2952_v16  ;;  %6619 = vmatprep.subr.bf16.mxu1 %v14647_v1  ;;  %v14653_v53 = vld [vmem:[#allocation4 + $0x58c] ss:$16 sps:$4 sm:$0xff]   ;;  %v2553_v20 = vadd.f32 %v2552_v42, %v16919_v3  ;;  %v2554_v17 = vpop.f32.mrb[237].mxu1  ;;  %v2363_v35 = vpop.f32.mrb[238].mxu0  ;;  %v14648_v46 = vld [vmem:[#allocation4 + $0x580] ss:$16 sps:$4 sm:$0xff]  }
 0x30a   :  { %v17173_v52 = vpack.c.bf16 %v3463_v38, %v3447_v58  ;;  %v2362_v57 = vadd.f32 %v2361_v6, %v16923_v36  ;;  %v14651_v59 = vld [vmem:[#allocation4 + $0x588] ss:$16 sps:$4 sm:$0xff]   ;;  %v17177_v44 = vpack.c.bf16 %v3462_v60, %v3446_v10  ;;  %v2965_v55 = vmul.f32 0.01, %v2360_v33  ;;  %v2556_v47 = vpop.f32.mrb[238].mxu1  ;;  %v2365_v1 = vpop.f32.mrb[239].mxu0 }
 0x30b   :  { %19382 = vst [vmem:[#allocation27_spill] sm:$0xff] %v17170_v43  ;;  %v17180_v31 = vadd.f32 %v2554_v17, %v16928_v32  ;;  %v2364_v2 = vadd.f32 %v2363_v35, %v16913_v13  ;;  %v14656_v18 = vld [vmem:[#allocation4 + $0x5a4] ss:$16 sps:$4 sm:$0xff]   ;;  %v17183_v21 = vpack.c.bf16 %v3464_v62, %v3448_v61  ;;  %v2967_v26 = vmul.f32 0.01, %v2553_v20  ;;  %v2558_v60 = vpop.f32.mrb[239].mxu1 }
 0x30c   :  { %19383 = vst [vmem:[#allocation30_spill] sm:$0xff] %v17173_v52  ;;  %19384 = vst [vmem:[#allocation176_spill] sm:$0xff] %v17177_v44  ;;  %5848 = vmatpush1.bf16.msra.mxu0 %v14642_v49  ;;  %v2966_v34 = vmul.f32 0.01, %v2362_v57  ;;  %v2557_v58 = vadd.f32 %v2556_v47, %v16919_v3  ;;  %v2366_v4 = vadd.f32 %v2365_v1, %v16923_v36  ;;  %6620 = vmatpush1.bf16.msra.mxu1 %v14645_v5  ;;  %v19386_v42 = vld [vmem:[#allocation29_spill] sm:$0xff]  ;;  %v19387_v6 = vld [vmem:[#allocation32_spill] sm:$0xff] }
 0x30d   :  { %19385 = vst [vmem:[#allocation177_spill] sm:$0xff] %v17183_v21  ;;  %5849 = vmatprep.subr.bf16.mxu0 %v14650_v56  ;;  %v2968_v16 = vmul.f32 0.01, %v17180_v31  ;;  %v2981_v10 = vmul.f32 0.01, %v2364_v2  ;;  %v2559_v38 = vadd.f32 %v2558_v60, %v16928_v32  ;;  %5725 = vmatmul.mubr.bf16.gmra.mrb[24].mxu0 %v19386_v42  ;;  %v3477_v17 = vmax.f32 %v2360_v33, %v2965_v55 }
 0x30e   :  { %6621 = vmatprep.subr.bf16.mxu1 %v14653_v53  ;;  %v14659_v49 = vld [vmem:[#allocation4 + $0x5ac] ss:$16 sps:$4 sm:$0xff]   ;;  %v2983_v61 = vmul.f32 0.01, %v2557_v58  ;;  %v2982_v62 = vmul.f32 0.01, %v2366_v4  ;;  %6497 = vmatmul.mubr.bf16.gmra.mrb[24].mxu1 %v19386_v42  ;;  %v3479_v35 = vmax.f32 %v2553_v20, %v2967_v26  ;;  %v3478_v1 = vmax.f32 %v2362_v57, %v2966_v34 }
 0x30f   :  { %5734 = vmatprep.mubr.bf16.mxu0 %v19387_v6  ;;  %v3493_v47 = vmax.f32 %v2364_v2, %v2981_v10  ;;  %v2984_v5 = vmul.f32 0.01, %v2559_v38  ;;  %6506 = vmatprep.mubr.bf16.mxu1 %v19387_v6  ;;  %v14654_v56 = vld [vmem:[#allocation4 + $0x5a0] ss:$16 sps:$4 sm:$0xff]   ;;  %v2369_v21 = vpop.f32.mrb[240].mxu0  ;;  %v3480_v42 = vmax.f32 %v17180_v31, %v2968_v16 }
 0x310   :  { %5850 = vmatpush1.bf16.msra.mxu0 %v14648_v46  ;;  %v3495_v60 = vmax.f32 %v2557_v58, %v2983_v61  ;;  %v3494_v52 = vmax.f32 %v2366_v4, %v2982_v62  ;;  %6622 = vmatpush1.bf16.msra.mxu1 %v14651_v59  ;;  %v14657_v53 = vld [vmem:[#allocation4 + $0x5a8] ss:$16 sps:$4 sm:$0xff]   ;;  %v14662_v43 = vld [vmem:[#allocation4 + $0x5c4] ss:$16 sps:$4 sm:$0xff]   ;;  %v2370_v20 = vadd.f32 %v2369_v21, %v16913_v13  ;;  %v2562_v55 = vpop.f32.mrb[240].mxu1  ;;  %v2371_v2 = vpop.f32.mrb[241].mxu0 }
 0x311   :  { %5851 = vmatprep.subr.bf16.mxu0 %v14656_v18  ;;  %v17194_v44 = vpack.c.bf16 %v3493_v47, %v3477_v17  ;;  %v3496_v33 = vmax.f32 %v2559_v38, %v2984_v5  ;;  %6623 = vmatprep.subr.bf16.mxu1 %v14659_v49  ;;  %v14665_v46 = vld [vmem:[#allocation4 + $0x5cc] ss:$16 sps:$4 sm:$0xff]   ;;  %v2563_v57 = vadd.f32 %v2562_v55, %v16919_v3  ;;  %v2564_v18 = vpop.f32.mrb[241].mxu1  ;;  %v2373_v34 = vpop.f32.mrb[242].mxu0  ;;  %v14660_v58 = vld [vmem:[#allocation4 + $0x5c0] ss:$16 sps:$4 sm:$0xff]  }
 0x312   :  { %v17197_v26 = vpack.c.bf16 %v3495_v60, %v3479_v35  ;;  %v2372_v59 = vadd.f32 %v2371_v2, %v16923_v36  ;;  %v14663_v4 = vld [vmem:[#allocation4 + $0x5c8] ss:$16 sps:$4 sm:$0xff]   ;;  %v17201_v31 = vpack.c.bf16 %v3494_v52, %v3478_v1  ;;  %v2997_v16 = vmul.f32 0.01, %v2370_v20  ;;  %v2566_v38 = vpop.f32.mrb[242].mxu1  ;;  %v2375_v49 = vpop.f32.mrb[243].mxu0 }
 0x313   :  { %19388 = vst [vmem:[#allocation29_spill] sm:$0xff] %v17194_v44  ;;  %v2565_v10 = vadd.f32 %v2564_v18, %v16928_v32  ;;  %v2374_v21 = vadd.f32 %v2373_v34, %v16913_v13  ;;  %v14668_v61 = vld [vmem:[#allocation4 + $0x5e4] ss:$16 sps:$4 sm:$0xff]   ;;  %v17205_v62 = vpack.c.bf16 %v3496_v33, %v3480_v42  ;;  %v2999_v6 = vmul.f32 0.01, %v2563_v57  ;;  %v2568_v5 = vpop.f32.mrb[243].mxu1 }
 0x314   :  { %19389 = vst [vmem:[#allocation32_spill] sm:$0xff] %v17197_v26  ;;  %19390 = vst [vmem:[#allocation178_spill] sm:$0xff] %v17201_v31  ;;  %5852 = vmatpush1.bf16.msra.mxu0 %v14654_v56  ;;  %v2998_v17 = vmul.f32 0.01, %v2372_v59  ;;  %v2567_v35 = vadd.f32 %v2566_v38, %v16919_v3  ;;  %v2376_v47 = vadd.f32 %v2375_v49, %v16923_v36  ;;  %6624 = vmatpush1.bf16.msra.mxu1 %v14657_v53  ;;  %v19392_v55 = vld [vmem:[#allocation31_spill] sm:$0xff]  ;;  %v19393_v33 = vld [vmem:[#allocation34_spill] sm:$0xff] }
 0x315   :  { %19391 = vst [vmem:[#allocation179_spill] sm:$0xff] %v17205_v62  ;;  %5853 = vmatprep.subr.bf16.mxu0 %v14662_v43  ;;  %v3000_v52 = vmul.f32 0.01, %v2565_v10  ;;  %v3013_v1 = vmul.f32 0.01, %v2374_v21  ;;  %v2569_v60 = vadd.f32 %v2568_v5, %v16928_v32  ;;  %5735 = vmatmul.mubr.bf16.gmra.mrb[28].mxu0 %v19392_v55  ;;  %v3509_v18 = vmax.f32 %v2370_v20, %v2997_v16 }
 0x316   :  { %6625 = vmatprep.subr.bf16.mxu1 %v14665_v46  ;;  %v14671_v56 = vld [vmem:[#allocation4 + $0x5ec] ss:$16 sps:$4 sm:$0xff]   ;;  %v3015_v2 = vmul.f32 0.01, %v2567_v35  ;;  %v3014_v42 = vmul.f32 0.01, %v2376_v47  ;;  %6507 = vmatmul.mubr.bf16.gmra.mrb[28].mxu1 %v19392_v55  ;;  %v3511_v34 = vmax.f32 %v2563_v57, %v2999_v6  ;;  %v3510_v53 = vmax.f32 %v2372_v59, %v2998_v17 }
 0x317   :  { %5744 = vmatprep.mubr.bf16.mxu0 %v19393_v33  ;;  %v3525_v38 = vmax.f32 %v2374_v21, %v3013_v1  ;;  %v3016_v49 = vmul.f32 0.01, %v2569_v60  ;;  %6516 = vmatprep.mubr.bf16.mxu1 %v19393_v33  ;;  %v14666_v43 = vld [vmem:[#allocation4 + $0x5e0] ss:$16 sps:$4 sm:$0xff]   ;;  %v2379_v62 = vpop.f32.mrb[244].mxu0  ;;  %v3512_v31 = vmax.f32 %v2565_v10, %v3000_v52 }
 0x318   :  { %5854 = vmatpush1.bf16.msra.mxu0 %v14660_v58  ;;  %v3527_v5 = vmax.f32 %v2567_v35, %v3015_v2  ;;  %v3526_v26 = vmax.f32 %v2376_v47, %v3014_v42  ;;  %6626 = vmatpush1.bf16.msra.mxu1 %v14663_v4  ;;  %v14669_v46 = vld [vmem:[#allocation4 + $0x5e8] ss:$16 sps:$4 sm:$0xff]   ;;  %v14674_v44 = vld [vmem:[#allocation4 + $0x604] ss:$16 sps:$4 sm:$0xff]   ;;  %v2380_v20 = vadd.f32 %v2379_v62, %v16913_v13  ;;  %v2572_v57 = vpop.f32.mrb[244].mxu1  ;;  %v2381_v16 = vpop.f32.mrb[245].mxu0 }
 0x319   :  { %5855 = vmatprep.subr.bf16.mxu0 %v14668_v61  ;;  %v17214_v55 = vpack.c.bf16 %v3525_v38, %v3509_v18  ;;  %v3528_v19 = vmax.f32 %v2569_v60, %v3016_v49  ;;  %6627 = vmatprep.subr.bf16.mxu1 %v14671_v56  ;;  %v14677_v21 = vld [vmem:[#allocation4 + $0x60c] ss:$16 sps:$4 sm:$0xff]   ;;  %v2573_v59 = vadd.f32 %v2572_v57, %v16919_v3  ;;  %v2574_v4 = vpop.f32.mrb[245].mxu1  ;;  %v2383_v61 = vpop.f32.mrb[246].mxu0  ;;  %v19396_v38 = vld [vmem:[#allocation33_spill] sm:$0xff] }
 0x31a   :  { %v17217_v58 = vpack.c.bf16 %v3527_v5, %v3511_v34  ;;  %v2382_v6 = vadd.f32 %v2381_v16, %v16923_v36  ;;  %v17221_v17 = vpack.c.bf16 %v3526_v26, %v3510_v53  ;;  %v3029_v10 = vmul.f32 0.01, %v2380_v20  ;;  %v2576_v62 = vpop.f32.mrb[246].mxu1  ;;  %v2385_v52 = vpop.f32.mrb[247].mxu0 }
 0x31b   :  { %v2575_v35 = vadd.f32 %v2574_v4, %v16928_v32  ;;  %v2384_v47 = vadd.f32 %v2383_v61, %v16913_v13  ;;  %v17225_v1 = vpack.c.bf16 %v3528_v19, %v3512_v31  ;;  %v3031_v60 = vmul.f32 0.01, %v2573_v59  ;;  %v2578_v33 = vpop.f32.mrb[247].mxu1  ;;  %v19397_v19 = vld [vmem:[#allocation36_spill] sm:$0xff] }
 0x31c   :  { %19394 = vst [vmem:[#allocation31_spill] sm:$0xff] %v17217_v58  ;;  %5856 = vmatpush1.bf16.msra.mxu0 %v14666_v43  ;;  %v3030_v56 = vmul.f32 0.01, %v2382_v6  ;;  %v2577_v2 = vadd.f32 %v2576_v62, %v16919_v3  ;;  %v2386_v42 = vadd.f32 %v2385_v52, %v16923_v36  ;;  %6628 = vmatpush1.bf16.msra.mxu1 %v14669_v46 }
 0x31d   :  { %19395 = vst [vmem:[#allocation34_spill] sm:$0xff] %v17225_v1  ;;  %6018 = vmatprep.subr.bf16.mxu0 %v14674_v44  ;;  %v3032_v26 = vmul.f32 0.01, %v2575_v35  ;;  %v3045_v18 = vmul.f32 0.01, %v2384_v47  ;;  %v2579_v34 = vadd.f32 %v2578_v33, %v16928_v32  ;;  %5745 = vmatmul.mubr.bf16.gmra.mrb[32].mxu0 %v19396_v38  ;;  %v3541_v31 = vmax.f32 %v2380_v20, %v3029_v10 }
 0x31e   :  { %6790 = vmatprep.subr.bf16.mxu1 %v14677_v21  ;;  %v3047_v49 = vmul.f32 0.01, %v2577_v2  ;;  %v3046_v43 = vmul.f32 0.01, %v2386_v42  ;;  %6517 = vmatmul.mubr.bf16.gmra.mrb[32].mxu1 %v19396_v38  ;;  %v3543_v46 = vmax.f32 %v2573_v59, %v3031_v60  ;;  %v3542_v44 = vmax.f32 %v2382_v6, %v3030_v56 }
 0x31f   :  { %5754 = vmatprep.mubr.bf16.mxu0 %v19397_v19  ;;  %v3557_v53 = vmax.f32 %v2384_v47, %v3045_v18  ;;  %v3048_v5 = vmul.f32 0.01, %v2579_v34  ;;  %6526 = vmatprep.mubr.bf16.mxu1 %v19397_v19  ;;  %v2389_v4 = vpop.f32.mrb[248].mxu0  ;;  %v3544_v61 = vmax.f32 %v2575_v35, %v3032_v26 }
 0x320   :  { %v3559_v57 = vmax.f32 %v2577_v2, %v3047_v49  ;;  %v3558_v16 = vmax.f32 %v2386_v42, %v3046_v43  ;;  %v2390_v52 = vadd.f32 %v2389_v4, %v16913_v13  ;;  %v2582_v33 = vpop.f32.mrb[248].mxu1  ;;  %v2391_v38 = vpop.f32.mrb[249].mxu0 }
 0x321   :  { %v17234_v62 = vpack.c.bf16 %v3557_v53, %v3541_v31  ;;  %v3560_v21 = vmax.f32 %v2579_v34, %v3048_v5  ;;  %v2583_v20 = vadd.f32 %v2582_v33, %v16919_v3  ;;  %v2392_v10 = vadd.f32 %v2391_v38, %v16923_v36  ;;  %v2584_v47 = vpop.f32.mrb[249].mxu1  ;;  %v2393_v59 = vpop.f32.mrb[250].mxu0 }
 0x322   :  { %v17237_v58 = vpack.c.bf16 %v3559_v57, %v3543_v46  ;;  %v17241_v6 = vpack.c.bf16 %v3558_v16, %v3542_v44  ;;  %v3061_v60 = vmul.f32 0.01, %v2390_v52  ;;  %v2585_v35 = vadd.f32 %v2584_v47, %v16928_v32  ;;  %v2586_v2 = vpop.f32.mrb[250].mxu1  ;;  %v2395_v42 = vpop.f32.mrb[251].mxu0  ;;  %v19401_v46 = vld [vmem:[#allocation35_spill] sm:$0xff]  ;;  %v19402_v16 = vld [vmem:[#allocation38_spill] sm:$0xff] }
 0x323   :  { %19398 = vst [vmem:[#allocation33_spill] sm:$0xff] %v17234_v62  ;;  %v2394_v56 = vadd.f32 %v2393_v59, %v16913_v13  ;;  %v17245_v26 = vpack.c.bf16 %v3560_v21, %v3544_v61  ;;  %v3063_v18 = vmul.f32 0.01, %v2583_v20  ;;  %v3062_v34 = vmul.f32 0.01, %v2392_v10  ;;  %v2588_v19 = vpop.f32.mrb[251].mxu1 }
 0x324   :  { %19399 = vst [vmem:[#allocation36_spill] sm:$0xff] %v17237_v58  ;;  %v2587_v49 = vadd.f32 %v2586_v2, %v16919_v3  ;;  %v2396_v43 = vadd.f32 %v2395_v42, %v16923_v36  ;;  %v3064_v31 = vmul.f32 0.01, %v2585_v35  ;;  %v2589_v5 = vadd.f32 %v2588_v19, %v16928_v32 }
 0x325   :  { %19400 = vst [vmem:[#allocation180_spill] sm:$0xff] %v17245_v26  ;;  %v3077_v53 = vmul.f32 0.01, %v2394_v56  ;;  %5755 = vmatmul.mubr.bf16.gmra.mrb[36].mxu0 %v19401_v46  ;;  %v3573_v4 = vmax.f32 %v2390_v52, %v3061_v60  ;;  %v3575_v33 = vmax.f32 %v2583_v20, %v3063_v18  ;;  %v3574_v38 = vmax.f32 %v2392_v10, %v3062_v34 }
 0x326   :  { %v3079_v44 = vmul.f32 0.01, %v2587_v49  ;;  %v3078_v57 = vmul.f32 0.01, %v2396_v43  ;;  %6527 = vmatmul.mubr.bf16.gmra.mrb[36].mxu1 %v19401_v46  ;;  %5764 = vmatprep.mubr.bf16.mxu0 %v19402_v16  ;;  %v3080_v21 = vmul.f32 0.01, %v2589_v5  ;;  %v3576_v42 = vmax.f32 %v2585_v35, %v3064_v31 }
 0x327   :  { %v3589_v61 = vmax.f32 %v2394_v56, %v3077_v53  ;;  %6536 = vmatprep.mubr.bf16.mxu1 %v19402_v16  ;;  %v2399_v2 = vpop.f32.mrb[252].mxu0 }
 0x328   :  { %v3591_v47 = vmax.f32 %v2587_v49, %v3079_v44  ;;  %v3590_v59 = vmax.f32 %v2396_v43, %v3078_v57  ;;  %v3592_v58 = vmax.f32 %v2589_v5, %v3080_v21  ;;  %v2400_v26 = vadd.f32 %v2399_v2, %v16913_v13  ;;  %v2592_v1 = vpop.f32.mrb[252].mxu1  ;;  %v2401_v46 = vpop.f32.mrb[253].mxu0  ;;  %v19403_v21 = vld [vmem:[#allocation37_spill] sm:$0xff] }
 0x329   :  { %v17254_v19 = vpack.c.bf16 %v3589_v61, %v3573_v4  ;;  %v2593_v52 = vadd.f32 %v2592_v1, %v16919_v3  ;;  %v2402_v60 = vadd.f32 %v2401_v46, %v16923_v36  ;;  %v2594_v56 = vpop.f32.mrb[253].mxu1  ;;  %v2403_v20 = vpop.f32.mrb[254].mxu0 }
 0x32a   :  { %v17257_v62 = vpack.c.bf16 %v3591_v47, %v3575_v33  ;;  %v17261_v10 = vpack.c.bf16 %v3590_v59, %v3574_v38  ;;  %v3093_v18 = vmul.f32 0.01, %v2400_v26  ;;  %v2595_v35 = vadd.f32 %v2594_v56, %v16928_v32  ;;  %v2596_v49 = vpop.f32.mrb[254].mxu1  ;;  %v2405_v43 = vpop.f32.mrb[255].mxu0 }
 0x32b   :  { %v2404_v34 = vadd.f32 %v2403_v20, %v16913_v13  ;;  %v17265_v31 = vpack.c.bf16 %v3592_v58, %v3576_v42  ;;  %v3095_v53 = vmul.f32 0.01, %v2593_v52  ;;  %v3094_v5 = vmul.f32 0.01, %v2402_v60  ;;  %v2598_v57 = vpop.f32.mrb[255].mxu1  ;;  %v19404_v13 = vld [vmem:[#allocation41_spill] sm:$0xff] }
 0x32c   :  { %v2597_v44 = vadd.f32 %v2596_v49, %v16919_v3  ;;  %v2406_v1 = vadd.f32 %v2405_v43, %v16923_v36  ;;  %v3096_v16 = vmul.f32 0.01, %v2595_v35  ;;  %v2599_v61 = vadd.f32 %v2598_v57, %v16928_v32  ;;  %v19405_v57 = vld [vmem:[#allocation40_spill] sm:$0xff] }
 0x32d   :  { %v3109_v4 = vmul.f32 0.01, %v2404_v34  ;;  %5765 = vmatmul.mubr.bf16.gmra.mrb[40].mxu0 %v19403_v21  ;;  %v3605_v58 = vmax.f32 %v2400_v26, %v3093_v18  ;;  %v3607_v3 = vmax.f32 %v2593_v52, %v3095_v53  ;;  %v3606_v36 = vmax.f32 %v2402_v60, %v3094_v5  ;;  %v19406_v26 = vld [vmem:[#allocation45_spill] sm:$0xff]  ;;  %v19407_v52 = vld [vmem:[#allocation43_spill] sm:$0xff]  ;;  %v19412_v53 = vld [vmem:[#allocation58_spill] sm:$0xff] }
 0x32e   :  { %v3111_v33 = vmul.f32 0.01, %v2597_v44  ;;  %v3110_v38 = vmul.f32 0.01, %v2406_v1  ;;  %6537 = vmatmul.mubr.bf16.gmra.mrb[40].mxu1 %v19403_v21  ;;  %5774 = vmatprep.mubr.bf16.mxu0 %v19404_v13  ;;  %v3112_v59 = vmul.f32 0.01, %v2599_v61  ;;  %v3608_v46 = vmax.f32 %v2595_v35, %v3096_v16 }
 0x32f   :  { %v3621_v47 = vmax.f32 %v2404_v34, %v3109_v4  ;;  %6546 = vmatprep.mubr.bf16.mxu1 %v19404_v13  ;;  %v19408_v60 = vld [vmem:[#allocation49_spill] sm:$0xff]  ;;  %v19409_v18 = vld [vmem:[#allocation47_spill] sm:$0xff]  ;;  %v14675_v16 = vld [vmem:[#allocation4 + $0x608] ss:$16 sps:$4 sm:$0xff]  }
 0x330   :  { %v3623_v2 = vmax.f32 %v2597_v44, %v3111_v33  ;;  %v3622_v42 = vmax.f32 %v2406_v1, %v3110_v38  ;;  %v3624_v32 = vmax.f32 %v2599_v61, %v3112_v59  ;;  %v19410_v35 = vld [vmem:[#allocation53_spill] sm:$0xff]  ;;  %v19411_v34 = vld [vmem:[#allocation51_spill] sm:$0xff]  ;;  %v19414_v44 = vld [vmem:[#allocation60_spill] sm:$0xff] }
 0x331   :  { %v17274_v56 = vpack.c.bf16 %v3621_v47, %v3605_v58  ;;  %v19413_v5 = vld [vmem:[#allocation55_spill] sm:$0xff]  ;;  %v19415_v61 = vld [vmem:[#allocation57_spill] sm:$0xff]  ;;  %v14683_v21 = vld [vmem:[#allocation4 + $0x62c] ss:$16 sps:$4 sm:$0xff]  }
 0x332   :  { %v17276_v20 = vpack.c.bf16 %v3623_v2, %v3607_v3  ;;  %v17278_v49 = vpack.c.bf16 %v3622_v42, %v3606_v36  ;;  %v17280_v43 = vpack.c.bf16 %v3624_v32, %v3608_v46  ;;  %v14672_v1 = vld [vmem:[#allocation4 + $0x600] ss:$16 sps:$4 sm:$0xff]   ;;  %v14680_v4 = vld [vmem:[#allocation4 + $0x624] ss:$16 sps:$4 sm:$0xff]   ;;  %v19416_v33 = vld [vmem:[#allocation64_spill] sm:$0xff] }
 0x333   :  { %v14678_v38 = vld [vmem:[#allocation4 + $0x620] ss:$16 sps:$4 sm:$0xff]   ;;  %v14681_v13 = vld [vmem:[#allocation4 + $0x628] ss:$16 sps:$4 sm:$0xff]   ;;  %v14686_v58 = vld [vmem:[#allocation4 + $0x644] ss:$16 sps:$4 sm:$0xff]  }
 0x334   :  { %v14689_v47 = vld [vmem:[#allocation4 + $0x64c] ss:$16 sps:$4 sm:$0xff]   ;;  %v14684_v59 = vld [vmem:[#allocation4 + $0x640] ss:$16 sps:$4 sm:$0xff]   ;;  %v14687_v3 = vld [vmem:[#allocation4 + $0x648] ss:$16 sps:$4 sm:$0xff]  }
 0x335   :  { %5775 = vmatmul.mubr.bf16.gmra.mrb[44].mxu0 %v19405_v57  ;;  %v14692_v36 = vld [vmem:[#allocation4 + $0x664] ss:$16 sps:$4 sm:$0xff]   ;;  %v19417_v2 = vld [vmem:[#allocation62_spill] sm:$0xff]  ;;  %v19418_v46 = vld [vmem:[#allocation68_spill] sm:$0xff] }
 0x336   :  { %6547 = vmatmul.mubr.bf16.gmra.mrb[44].mxu1 %v19405_v57  ;;  %5784 = vmatprep.mubr.bf16.mxu0 %v19406_v26  ;;  %v14695_v42 = vld [vmem:[#allocation4 + $0x66c] ss:$16 sps:$4 sm:$0xff]   ;;  %v14690_v32 = vld [vmem:[#allocation4 + $0x660] ss:$16 sps:$4 sm:$0xff]   ;;  %v14693_v57 = vld [vmem:[#allocation4 + $0x668] ss:$16 sps:$4 sm:$0xff]  }
 0x337   :  { %6556 = vmatprep.mubr.bf16.mxu1 %v19406_v26  ;;  %v14698_v26 = vld [vmem:[#allocation4 + $0x684] ss:$16 sps:$4 sm:$0xff]  }
 0x33d   :  { %5785 = vmatmul.mubr.bf16.gmra.mrb[48].mxu0 %v19407_v52 }
 0x33e   :  { %6557 = vmatmul.mubr.bf16.gmra.mrb[48].mxu1 %v19407_v52  ;;  %5794 = vmatprep.mubr.bf16.mxu0 %v19408_v60  ;;  %v14701_v52 = vld [vmem:[#allocation4 + $0x68c] ss:$16 sps:$4 sm:$0xff]  }
 0x33f   :  { %6566 = vmatprep.mubr.bf16.mxu1 %v19408_v60  ;;  %v14696_v60 = vld [vmem:[#allocation4 + $0x680] ss:$16 sps:$4 sm:$0xff]  }
 0x345   :  { %5795 = vmatmul.mubr.bf16.gmra.mrb[52].mxu0 %v19409_v18 }
 0x346   :  { %6567 = vmatmul.mubr.bf16.gmra.mrb[52].mxu1 %v19409_v18  ;;  %5804 = vmatprep.mubr.bf16.mxu0 %v19410_v35  ;;  %v14699_v18 = vld [vmem:[#allocation4 + $0x688] ss:$16 sps:$4 sm:$0xff]  }
 0x347   :  { %6576 = vmatprep.mubr.bf16.mxu1 %v19410_v35  ;;  %v14704_v35 = vld [vmem:[#allocation4 + $0x6a4] ss:$16 sps:$4 sm:$0xff]  }
 0x34d   :  { %5805 = vmatmul.mubr.bf16.gmra.mrb[56].mxu0 %v19411_v34 }
 0x34e   :  { %6577 = vmatmul.mubr.bf16.gmra.mrb[56].mxu1 %v19411_v34  ;;  %5814 = vmatprep.mubr.bf16.mxu0 %v19412_v53  ;;  %v19419_v34 = vld [vmem:[#allocation66_spill] sm:$0xff] }
 0x34f   :  { %6586 = vmatprep.mubr.bf16.mxu1 %v19412_v53  ;;  %v14707_v53 = vld [vmem:[#allocation4 + $0x6ac] ss:$16 sps:$4 sm:$0xff]  }
 0x355   :  { %5815 = vmatmul.mubr.bf16.gmra.mrb[60].mxu0 %v19413_v5 }
 0x356   :  { %6587 = vmatmul.mubr.bf16.gmra.mrb[60].mxu1 %v19413_v5  ;;  %5857 = vmatprep.mubr.bf16.mxu0 %v19414_v44  ;;  %v19420_v5 = vld [vmem:[#allocation72_spill] sm:$0xff] }
 0x357   :  { %6629 = vmatprep.mubr.bf16.mxu1 %v19414_v44  ;;  %v14702_v44 = vld [vmem:[#allocation4 + $0x6a0] ss:$16 sps:$4 sm:$0xff]  }
 0x35d   :  { %5858 = vmatmul.mubr.bf16.vlgmr.msra.gmra.mrb[0].mxu0 %v19415_v61 }
 0x35e   :  { %6630 = vmatmul.mubr.bf16.vlgmr.msra.gmra.mrb[0].mxu1 %v19415_v61  ;;  %5867 = vmatprep.mubr.bf16.mxu0 %v19416_v33  ;;  %v14708_v61 = vld [vmem:[#allocation4 + $0x6c0] ss:$16 sps:$4 sm:$0xff]  }
 0x35f   :  { %6019 = vmatpush1.bf16.msra.mxu0 %v14672_v1  ;;  %6639 = vmatprep.mubr.bf16.mxu1 %v19416_v33  ;;  %v14705_v1 = vld [vmem:[#allocation4 + $0x6a8] ss:$16 sps:$4 sm:$0xff]   ;;  %v14716_v33 = vld [vmem:[#allocation4 + $0x6e4] ss:$16 sps:$4 sm:$0xff]  }
 0x360   :  { %6791 = vmatpush1.bf16.msra.mxu1 %v14675_v16  ;;  %6020 = vmatprep.subr.bf16.mxu0 %v14680_v4  ;;  %v14710_v16 = vld [vmem:[#allocation4 + $0x6c4] ss:$16 sps:$4 sm:$0xff]   ;;  %v14713_v4 = vld [vmem:[#allocation4 + $0x6cc] ss:$16 sps:$4 sm:$0xff]  }
 0x361   :  { %6792 = vmatprep.subr.bf16.mxu1 %v14683_v21  ;;  %v14711_v21 = vld [vmem:[#allocation4 + $0x6c8] ss:$16 sps:$4 sm:$0xff]  }
 0x363   :  { %6021 = vmatpush1.bf16.msra.mxu0 %v14678_v38  ;;  %v19421_v38 = vld [vmem:[#allocation70_spill] sm:$0xff] }
 0x364   :  { %6793 = vmatpush1.bf16.msra.mxu1 %v14681_v13  ;;  %6022 = vmatprep.subr.bf16.mxu0 %v14686_v58  ;;  %v14719_v13 = vld [vmem:[#allocation4 + $0x6ec] ss:$16 sps:$4 sm:$0xff]  }
 0x365   :  { %5868 = vmatmul.mubr.bf16.gmra.mrb[4].mxu0 %v19417_v2  ;;  %6794 = vmatprep.subr.bf16.mxu1 %v14689_v47  ;;  %v19422_v58 = vld [vmem:[#allocation76_spill] sm:$0xff]  ;;  %v14714_v47 = vld [vmem:[#allocation4 + $0x6e0] ss:$16 sps:$4 sm:$0xff]  }
 0x366   :  { %6640 = vmatmul.mubr.bf16.gmra.mrb[4].mxu1 %v19417_v2  ;;  %5877 = vmatprep.mubr.bf16.mxu0 %v19418_v46  ;;  %v14720_v2 = vld [vmem:[#allocation4 + $0x700] ss:$16 sps:$4 sm:$0xff]  }
 0x367   :  { %6649 = vmatprep.mubr.bf16.mxu1 %v19418_v46  ;;  %6023 = vmatpush1.bf16.msra.mxu0 %v14684_v59  ;;  %v14717_v59 = vld [vmem:[#allocation4 + $0x6e8] ss:$16 sps:$4 sm:$0xff]   ;;  %v14728_v46 = vld [vmem:[#allocation4 + $0x724] ss:$16 sps:$4 sm:$0xff]  }
 0x368   :  { %6795 = vmatpush1.bf16.msra.mxu1 %v14687_v3  ;;  %6024 = vmatprep.subr.bf16.mxu0 %v14692_v36  ;;  %v14722_v3 = vld [vmem:[#allocation4 + $0x704] ss:$16 sps:$4 sm:$0xff]   ;;  %v14725_v36 = vld [vmem:[#allocation4 + $0x70c] ss:$16 sps:$4 sm:$0xff]  }
 0x369   :  { %6796 = vmatprep.subr.bf16.mxu1 %v14695_v42  ;;  %v14723_v42 = vld [vmem:[#allocation4 + $0x708] ss:$16 sps:$4 sm:$0xff]  }
 0x36b   :  { %6025 = vmatpush1.bf16.msra.mxu0 %v14690_v32  ;;  %v19423_v32 = vld [vmem:[#allocation74_spill] sm:$0xff] }
 0x36c   :  { %6797 = vmatpush1.bf16.msra.mxu1 %v14693_v57  ;;  %6026 = vmatprep.subr.bf16.mxu0 %v14698_v26  ;;  %v14731_v57 = vld [vmem:[#allocation4 + $0x72c] ss:$16 sps:$4 sm:$0xff]   ;;  %v14726_v26 = vld [vmem:[#allocation4 + $0x720] ss:$16 sps:$4 sm:$0xff]  }
 0x36d   :  { %5878 = vmatmul.mubr.bf16.gmra.mrb[8].mxu0 %v19419_v34  ;;  %6798 = vmatprep.subr.bf16.mxu1 %v14701_v52  ;;  %v14729_v52 = vld [vmem:[#allocation4 + $0x728] ss:$16 sps:$4 sm:$0xff]  }
 0x36e   :  { %6650 = vmatmul.mubr.bf16.gmra.mrb[8].mxu1 %v19419_v34  ;;  %5887 = vmatprep.mubr.bf16.mxu0 %v19420_v5  ;;  %v14735_v34 = vld [vmem:[#allocation4 + $0x748] ss:$16 sps:$4 sm:$0xff]  }
 0x36f   :  { %6659 = vmatprep.mubr.bf16.mxu1 %v19420_v5  ;;  %6027 = vmatpush1.bf16.msra.mxu0 %v14696_v60  ;;  %v14734_v60 = vld [vmem:[#allocation4 + $0x744] ss:$16 sps:$4 sm:$0xff]   ;;  %v14743_v5 = vld [vmem:[#allocation4 + $0x76c] ss:$16 sps:$4 sm:$0xff]  }
 0x370   :  { %6799 = vmatpush1.bf16.msra.mxu1 %v14699_v18  ;;  %6028 = vmatprep.subr.bf16.mxu0 %v14704_v35  ;;  %v14737_v18 = vld [vmem:[#allocation4 + $0x74c] ss:$16 sps:$4 sm:$0xff]   ;;  %v14732_v35 = vld [vmem:[#allocation4 + $0x740] ss:$16 sps:$4 sm:$0xff]  }
 0x371   :  { %6800 = vmatprep.subr.bf16.mxu1 %v14707_v53  ;;  %v14740_v53 = vld [vmem:[#allocation4 + $0x764] ss:$16 sps:$4 sm:$0xff]  }
 0x373   :  { %6029 = vmatpush1.bf16.msra.mxu0 %v14702_v44  ;;  %v14741_v44 = vld [vmem:[#allocation4 + $0x768] ss:$16 sps:$4 sm:$0xff]  }
 0x374   :  { %6801 = vmatpush1.bf16.msra.mxu1 %v14705_v1  ;;  %6030 = vmatprep.subr.bf16.mxu0 %v14710_v16  ;;  %v14746_v1 = vld [vmem:[#allocation4 + $0x784] ss:$16 sps:$4 sm:$0xff]   ;;  %v14749_v16 = vld [vmem:[#allocation4 + $0x78c] ss:$16 sps:$4 sm:$0xff]  }
 0x375   :  { %5888 = vmatmul.mubr.bf16.gmra.mrb[12].mxu0 %v19421_v38  ;;  %6802 = vmatprep.subr.bf16.mxu1 %v14713_v4  ;;  %v14744_v4 = vld [vmem:[#allocation4 + $0x780] ss:$16 sps:$4 sm:$0xff]  }
 0x376   :  { %6660 = vmatmul.mubr.bf16.gmra.mrb[12].mxu1 %v19421_v38  ;;  %5897 = vmatprep.mubr.bf16.mxu0 %v19422_v58  ;;  %v14750_v38 = vld [vmem:[#allocation4 + $0x7a0] ss:$16 sps:$4 sm:$0xff]  }
 0x377   :  { %6669 = vmatprep.mubr.bf16.mxu1 %v19422_v58  ;;  %6031 = vmatpush1.bf16.msra.mxu0 %v14708_v61  ;;  %v14747_v61 = vld [vmem:[#allocation4 + $0x788] ss:$16 sps:$4 sm:$0xff]   ;;  %v14758_v58 = vld [vmem:[#allocation4 + $0x7c4] ss:$16 sps:$4 sm:$0xff]  }
 0x378   :  { %6803 = vmatpush1.bf16.msra.mxu1 %v14711_v21  ;;  %6032 = vmatprep.subr.bf16.mxu0 %v14716_v33  ;;  %v14752_v21 = vld [vmem:[#allocation4 + $0x7a4] ss:$16 sps:$4 sm:$0xff]   ;;  %v19424_v33 = vld [vmem:[#allocation80_spill] sm:$0xff] }
 0x379   :  { %6804 = vmatprep.subr.bf16.mxu1 %v14719_v13  ;;  %v14753_v13 = vld [vmem:[#allocation4 + $0x7a8] ss:$16 sps:$4 sm:$0xff]  }
 0x37b   :  { %6033 = vmatpush1.bf16.msra.mxu0 %v14714_v47  ;;  %v14761_v47 = vld [vmem:[#allocation4 + $0x7cc] ss:$16 sps:$4 sm:$0xff]  }
 0x37c   :  { %6805 = vmatpush1.bf16.msra.mxu1 %v14717_v59  ;;  %6034 = vmatprep.subr.bf16.mxu0 %v14722_v3  ;;  %v14756_v59 = vld [vmem:[#allocation4 + $0x7c0] ss:$16 sps:$4 sm:$0xff]   ;;  %v14759_v3 = vld [vmem:[#allocation4 + $0x7c8] ss:$16 sps:$4 sm:$0xff]  }
 0x37d   :  { %5898 = vmatmul.mubr.bf16.gmra.mrb[16].mxu0 %v19423_v32  ;;  %6806 = vmatprep.subr.bf16.mxu1 %v14725_v36  ;;  %v14764_v36 = vld [vmem:[#allocation4 + $0x7e4] ss:$16 sps:$4 sm:$0xff]  }
 0x37e   :  { %6670 = vmatmul.mubr.bf16.gmra.mrb[16].mxu1 %v19423_v32  ;;  %5907 = vmatprep.mubr.bf16.mxu0 %v16339_v28  ;;  %v14762_v32 = vld [vmem:[#allocation4 + $0x7e0] ss:$16 sps:$4 sm:$0xff]  }
 0x37f   :  { %6679 = vmatprep.mubr.bf16.mxu1 %v16339_v28  ;;  %6035 = vmatpush1.bf16.msra.mxu0 %v14720_v2  ;;  %v14738_v28 = vld [vmem:[#allocation4 + $0x760] ss:$16 sps:$4 sm:$0xff]  }
 0x380   :  { %6807 = vmatpush1.bf16.msra.mxu1 %v14723_v42  ;;  %6036 = vmatprep.subr.bf16.mxu0 %v14728_v46  ;;  %v19426_v2 = vld [vmem:[#allocation83_spill] sm:$0xff]  ;;  %v14767_v42 = vld [vmem:[#allocation4 + $0x7ec] ss:$16 sps:$4 sm:$0xff]   ;;  %v19427_v46 = vld [vmem:[#allocation89_spill] sm:$0xff] }
 0x381   :  { %6808 = vmatprep.subr.bf16.mxu1 %v14731_v57  ;;  %v14765_v57 = vld [vmem:[#allocation4 + $0x7e8] ss:$16 sps:$4 sm:$0xff]  }
 0x383   :  { %6037 = vmatpush1.bf16.msra.mxu0 %v14726_v26  ;;  %v14770_v26 = vld [vmem:[#allocation6 + $0x4] ss:$16 sps:$4 sm:$0xff]  }
 0x384   :  { %6809 = vmatpush1.bf16.msra.mxu1 %v14729_v52  ;;  %6038 = vmatprep.subr.bf16.mxu0 %v14734_v60  ;;  %v14773_v52 = vld [vmem:[#allocation6 + $0xc] ss:$16 sps:$4 sm:$0xff]   ;;  %v19428_v60 = vld [vmem:[#allocation87_spill] sm:$0xff] }
 0x385   :  { %5908 = vmatmul.mubr.bf16.gmra.mrb[20].mxu0 %v16333_v7  ;;  %6810 = vmatprep.subr.bf16.mxu1 %v14737_v18  ;;  %v19429_v18 = vld [vmem:[#allocation93_spill] sm:$0xff] }
 0x386   :  { %6680 = vmatmul.mubr.bf16.gmra.mrb[20].mxu1 %v16333_v7  ;;  %5917 = vmatprep.mubr.bf16.mxu0 %v16360_v8  ;;  %v14755_v7 = vld [vmem:[#allocation4 + $0x7ac] ss:$16 sps:$4 sm:$0xff]  }
 0x387   :  { %6689 = vmatprep.mubr.bf16.mxu1 %v16360_v8  ;;  %6039 = vmatpush1.bf16.msra.mxu0 %v14732_v35  ;;  %v19425_v8 = vld [vmem:[#allocation85_spill] sm:$0xff]  ;;  %v19430_v35 = vld [vmem:[#allocation91_spill] sm:$0xff] }
 0x388   :  { %6811 = vmatpush1.bf16.msra.mxu1 %v14735_v34  ;;  %6040 = vmatprep.subr.bf16.mxu0 %v14740_v53  ;;  %v19431_v34 = vld [vmem:[#allocation97_spill] sm:$0xff]  ;;  %v19432_v53 = vld [vmem:[#allocation95_spill] sm:$0xff] }
 0x389   :  { %6812 = vmatprep.subr.bf16.mxu1 %v14743_v5  ;;  %v19433_v5 = vld [vmem:[#allocation101_spill] sm:$0xff] }
 0x38b   :  { %6041 = vmatpush1.bf16.msra.mxu0 %v14738_v28  ;;  %v19434_v28 = vld [vmem:[#allocation99_spill] sm:$0xff] }
 0x38c   :  { %6813 = vmatpush1.bf16.msra.mxu1 %v14741_v44  ;;  %6042 = vmatprep.subr.bf16.mxu0 %v14746_v1  ;;  %v19435_v44 = vld [vmem:[#allocation107_spill] sm:$0xff]  ;;  %v19436_v1 = vld [vmem:[#allocation105_spill] sm:$0xff] }
 0x38d   :  { %5918 = vmatmul.mubr.bf16.gmra.mrb[24].mxu0 %v19424_v33  ;;  %6814 = vmatprep.subr.bf16.mxu1 %v14749_v16  ;;  %v19437_v16 = vld [vmem:[#allocation111_spill] sm:$0xff] }
 0x38e   :  { %6690 = vmatmul.mubr.bf16.gmra.mrb[24].mxu1 %v19424_v33  ;;  %5927 = vmatprep.mubr.bf16.mxu0 %v19425_v8  ;;  %v14771_v33 = vld [vmem:[#allocation6 + $0x8] ss:$16 sps:$4 sm:$0xff]  }
 0x38f   :  { %6699 = vmatprep.mubr.bf16.mxu1 %v19425_v8  ;;  %6043 = vmatpush1.bf16.msra.mxu0 %v14744_v4  ;;  %v19438_v4 = vld [vmem:[#allocation109_spill] sm:$0xff]  ;;  %v19442_v8 = vld [vmem:[#allocation59_spill] sm:$0xff] }
 0x390   :  { %6815 = vmatpush1.bf16.msra.mxu1 %v14747_v61  ;;  %6044 = vmatprep.subr.bf16.mxu0 %v14752_v21  ;;  %v19441_v61 = vld [vmem:[#allocation61_spill] sm:$0xff] }
 0x391   :  { %6816 = vmatprep.subr.bf16.mxu1 %v14755_v7  ;;  %v14768_v21 = vld [vmem:[#allocation6] ss:$16 sps:$4 sm:$0xff]   ;;  %v14776_v7 = vld [vmem:[#allocation6 + $0x24] ss:$16 sps:$4 sm:$0xff]  }
 0x393   :  { %6045 = vmatpush1.bf16.msra.mxu0 %v14750_v38  ;;  %v14779_v38 = vld [vmem:[#allocation6 + $0x2c] ss:$16 sps:$4 sm:$0xff]  }
 0x394   :  { %6817 = vmatpush1.bf16.msra.mxu1 %v14753_v13  ;;  %6046 = vmatprep.subr.bf16.mxu0 %v14758_v58  ;;  %v19443_v13 = vld [vmem:[#allocation65_spill] sm:$0xff] }
 0x395   :  { %5928 = vmatmul.mubr.bf16.gmra.mrb[28].mxu0 %v19426_v2  ;;  %6818 = vmatprep.subr.bf16.mxu1 %v14761_v47  ;;  %v14774_v58 = vld [vmem:[#allocation6 + $0x20] ss:$16 sps:$4 sm:$0xff]   ;;  %v14777_v47 = vld [vmem:[#allocation6 + $0x28] ss:$16 sps:$4 sm:$0xff]  }
 0x396   :  { %6700 = vmatmul.mubr.bf16.gmra.mrb[28].mxu1 %v19426_v2  ;;  %5937 = vmatprep.mubr.bf16.mxu0 %v19427_v46  ;;  %v14783_v2 = vld [vmem:[#allocation6 + $0x48] ss:$16 sps:$4 sm:$0xff]  }
 0x397   :  { %6709 = vmatprep.mubr.bf16.mxu1 %v19427_v46  ;;  %6047 = vmatpush1.bf16.msra.mxu0 %v14756_v59  ;;  %v14782_v59 = vld [vmem:[#allocation6 + $0x44] ss:$16 sps:$4 sm:$0xff]  }
 0x398   :  { %6819 = vmatpush1.bf16.msra.mxu1 %v14759_v3  ;;  %6048 = vmatprep.subr.bf16.mxu0 %v14764_v36  ;;  %v14785_v3 = vld [vmem:[#allocation6 + $0x4c] ss:$16 sps:$4 sm:$0xff]   ;;  %v14780_v36 = vld [vmem:[#allocation6 + $0x40] ss:$16 sps:$4 sm:$0xff]  }
 0x399   :  { %6820 = vmatprep.subr.bf16.mxu1 %v14767_v42  ;;  %v14788_v42 = vld [vmem:[#allocation6 + $0x64] ss:$16 sps:$4 sm:$0xff]  }
 0x39a   :  { %v19444_v46 = vld [vmem:[#allocation63_spill] sm:$0xff] }
 0x39b   :  { %6049 = vmatpush1.bf16.msra.mxu0 %v14762_v32  ;;  %v14791_v32 = vld [vmem:[#allocation6 + $0x6c] ss:$16 sps:$4 sm:$0xff]  }
 0x39c   :  { %6821 = vmatpush1.bf16.msra.mxu1 %v14765_v57  ;;  %8861 = vmatprep.subr.bf16.mxu0 %v14770_v26  ;;  %v19445_v57 = vld [vmem:[#allocation69_spill] sm:$0xff] }
 0x39d   :  { %5938 = vmatmul.mubr.bf16.gmra.mrb[32].mxu0 %v19428_v60  ;;  %9633 = vmatprep.subr.bf16.mxu1 %v14773_v52  ;;  %v14786_v26 = vld [vmem:[#allocation6 + $0x60] ss:$16 sps:$4 sm:$0xff]   ;;  %v14789_v52 = vld [vmem:[#allocation6 + $0x68] ss:$16 sps:$4 sm:$0xff]  }
 0x39e   :  { %6710 = vmatmul.mubr.bf16.gmra.mrb[32].mxu1 %v19428_v60  ;;  %5947 = vmatprep.mubr.bf16.mxu0 %v19429_v18  ;;  %v14794_v60 = vld [vmem:[#allocation6 + $0x84] ss:$16 sps:$4 sm:$0xff]  }
 0x39f   :  { %6719 = vmatprep.mubr.bf16.mxu1 %v19429_v18  ;;  %v14797_v18 = vld [vmem:[#allocation6 + $0x8c] ss:$16 sps:$4 sm:$0xff]  }
 0x3a5   :  { %5948 = vmatmul.mubr.bf16.gmra.mrb[36].mxu0 %v19430_v35 }
 0x3a6   :  { %6720 = vmatmul.mubr.bf16.gmra.mrb[36].mxu1 %v19430_v35  ;;  %5957 = vmatprep.mubr.bf16.mxu0 %v19431_v34  ;;  %v14792_v35 = vld [vmem:[#allocation6 + $0x80] ss:$16 sps:$4 sm:$0xff]  }
 0x3a7   :  { %6729 = vmatprep.mubr.bf16.mxu1 %v19431_v34  ;;  %v14795_v34 = vld [vmem:[#allocation6 + $0x88] ss:$16 sps:$4 sm:$0xff]  }
 0x3ad   :  { %5958 = vmatmul.mubr.bf16.gmra.mrb[40].mxu0 %v19432_v53 }
 0x3ae   :  { %6730 = vmatmul.mubr.bf16.gmra.mrb[40].mxu1 %v19432_v53  ;;  %5967 = vmatprep.mubr.bf16.mxu0 %v19433_v5  ;;  %v14800_v53 = vld [vmem:[#allocation6 + $0xa4] ss:$16 sps:$4 sm:$0xff]  }
 0x3af   :  { %6739 = vmatprep.mubr.bf16.mxu1 %v19433_v5  ;;  %v19446_v5 = vld [vmem:[#allocation67_spill] sm:$0xff] }
 0x3b5   :  { %5968 = vmatmul.mubr.bf16.gmra.mrb[44].mxu0 %v19434_v28 }
 0x3b6   :  { %6740 = vmatmul.mubr.bf16.gmra.mrb[44].mxu1 %v19434_v28  ;;  %5977 = vmatprep.mubr.bf16.mxu0 %v16486_v63  ;;  %v14803_v28 = vld [vmem:[#allocation6 + $0xac] ss:$16 sps:$4 sm:$0xff]  }
 0x3b7   :  { %6749 = vmatprep.mubr.bf16.mxu1 %v16486_v63  ;;  %v19439_v63 = vld [vmem:[#allocation115_spill] sm:$0xff] }
 0x3bd   :  { %5978 = vmatmul.mubr.bf16.gmra.mrb[48].mxu0 %v16480_v37 }
 0x3be   :  { %6750 = vmatmul.mubr.bf16.gmra.mrb[48].mxu1 %v16480_v37  ;;  %5987 = vmatprep.mubr.bf16.mxu0 %v19435_v44  ;;  %v19440_v37 = vld [vmem:[#allocation113_spill] sm:$0xff] }
 0x3bf   :  { %6759 = vmatprep.mubr.bf16.mxu1 %v19435_v44  ;;  %v19447_v44 = vld [vmem:[#allocation73_spill] sm:$0xff] }
 0x3c5   :  { %5988 = vmatmul.mubr.bf16.gmra.mrb[52].mxu0 %v19436_v1 }
 0x3c6   :  { %6760 = vmatmul.mubr.bf16.gmra.mrb[52].mxu1 %v19436_v1  ;;  %5997 = vmatprep.mubr.bf16.mxu0 %v19437_v16  ;;  %v14798_v1 = vld [vmem:[#allocation6 + $0xa0] ss:$16 sps:$4 sm:$0xff]  }
 0x3c7   :  { %6769 = vmatprep.mubr.bf16.mxu1 %v19437_v16  ;;  %v14801_v16 = vld [vmem:[#allocation6 + $0xa8] ss:$16 sps:$4 sm:$0xff]  }
 0x3cd   :  { %5998 = vmatmul.mubr.bf16.gmra.mrb[56].mxu0 %v19438_v4 }
 0x3ce   :  { %6770 = vmatmul.mubr.bf16.gmra.mrb[56].mxu1 %v19438_v4  ;;  %6007 = vmatprep.mubr.bf16.mxu0 %v19439_v63  ;;  %v14806_v4 = vld [vmem:[#allocation6 + $0xc4] ss:$16 sps:$4 sm:$0xff]  }
 0x3cf   :  { %6779 = vmatprep.mubr.bf16.mxu1 %v19439_v63  ;;  %v14809_v63 = vld [vmem:[#allocation6 + $0xcc] ss:$16 sps:$4 sm:$0xff]  }
 0x3d5   :  { %6008 = vmatmul.mubr.bf16.gmra.mrb[60].mxu0 %v19440_v37 }
 0x3d6   :  { %6780 = vmatmul.mubr.bf16.gmra.mrb[60].mxu1 %v19440_v37  ;;  %6050 = vmatprep.mubr.bf16.mxu0 %v19441_v61  ;;  %v14804_v37 = vld [vmem:[#allocation6 + $0xc0] ss:$16 sps:$4 sm:$0xff]  }
 0x3d7   :  { %6822 = vmatprep.mubr.bf16.mxu1 %v19441_v61  ;;  %v14807_v61 = vld [vmem:[#allocation6 + $0xc8] ss:$16 sps:$4 sm:$0xff]  }
 0x3dd   :  { %6051 = vmatmul.mubr.bf16.vlgmr.msra.gmra.mrb[0].mxu0 %v19442_v8 }
 0x3de   :  { %6823 = vmatmul.mubr.bf16.vlgmr.msra.gmra.mrb[0].mxu1 %v19442_v8  ;;  %6060 = vmatprep.mubr.bf16.mxu0 %v19443_v13  ;;  %v19449_v8 = vld [vmem:[#allocation77_spill] sm:$0xff] }
 0x3df   :  { %6832 = vmatprep.mubr.bf16.mxu1 %v19443_v13  ;;  %8862 = vmatpush1.bf16.msra.mxu0 %v14768_v21  ;;  %v14812_v21 = vld [vmem:[#allocation6 + $0xe4] ss:$16 sps:$4 sm:$0xff]   ;;  %v14813_v13 = vld [vmem:[#allocation6 + $0xe8] ss:$16 sps:$4 sm:$0xff]  }
 0x3e0   :  { %9634 = vmatpush1.bf16.msra.mxu1 %v14771_v33  ;;  %8863 = vmatprep.subr.bf16.mxu0 %v14776_v7  ;;  %v19448_v33 = vld [vmem:[#allocation71_spill] sm:$0xff]  ;;  %v14815_v7 = vld [vmem:[#allocation6 + $0xec] ss:$16 sps:$4 sm:$0xff]  }
 0x3e1   :  { %9635 = vmatprep.subr.bf16.mxu1 %v14779_v38  ;;  %v14810_v38 = vld [vmem:[#allocation6 + $0xe0] ss:$16 sps:$4 sm:$0xff]  }
 0x3e3   :  { %8864 = vmatpush1.bf16.msra.mxu0 %v14774_v58  ;;  %v14818_v58 = vld [vmem:[#allocation6 + $0x104] ss:$16 sps:$4 sm:$0xff]  }
 0x3e4   :  { %9636 = vmatpush1.bf16.msra.mxu1 %v14777_v47  ;;  %8865 = vmatprep.subr.bf16.mxu0 %v14782_v59  ;;  %v14821_v47 = vld [vmem:[#allocation6 + $0x10c] ss:$16 sps:$4 sm:$0xff]   ;;  %v14816_v59 = vld [vmem:[#allocation6 + $0x100] ss:$16 sps:$4 sm:$0xff]  }
 0x3e5   :  { %6061 = vmatmul.mubr.bf16.gmra.mrb[4].mxu0 %v19444_v46  ;;  %9637 = vmatprep.subr.bf16.mxu1 %v14785_v3  ;;  %v14819_v3 = vld [vmem:[#allocation6 + $0x108] ss:$16 sps:$4 sm:$0xff]  }
 0x3e6   :  { %6833 = vmatmul.mubr.bf16.gmra.mrb[4].mxu1 %v19444_v46  ;;  %6070 = vmatprep.mubr.bf16.mxu0 %v19445_v57  ;;  %v19451_v46 = vld [vmem:[#allocation79_spill] sm:$0xff] }
 0x3e7   :  { %6842 = vmatprep.mubr.bf16.mxu1 %v19445_v57  ;;  %8866 = vmatpush1.bf16.msra.mxu0 %v14780_v36  ;;  %v14824_v36 = vld [vmem:[#allocation6 + $0x124] ss:$16 sps:$4 sm:$0xff]   ;;  %v14825_v57 = vld [vmem:[#allocation6 + $0x128] ss:$16 sps:$4 sm:$0xff]  }
 0x3e8   :  { %9638 = vmatpush1.bf16.msra.mxu1 %v14783_v2  ;;  %8867 = vmatprep.subr.bf16.mxu0 %v14788_v42  ;;  %v19450_v2 = vld [vmem:[#allocation75_spill] sm:$0xff]  ;;  %v14827_v42 = vld [vmem:[#allocation6 + $0x12c] ss:$16 sps:$4 sm:$0xff]  }
 0x3e9   :  { %9639 = vmatprep.subr.bf16.mxu1 %v14791_v32  ;;  %v14822_v32 = vld [vmem:[#allocation6 + $0x120] ss:$16 sps:$4 sm:$0xff]  }
 0x3eb   :  { %8868 = vmatpush1.bf16.msra.mxu0 %v14786_v26  ;;  %v14830_v26 = vld [vmem:[#allocation6 + $0x144] ss:$16 sps:$4 sm:$0xff]  }
 0x3ec   :  { %9640 = vmatpush1.bf16.msra.mxu1 %v14789_v52  ;;  %8869 = vmatprep.subr.bf16.mxu0 %v14794_v60  ;;  %v14833_v52 = vld [vmem:[#allocation6 + $0x14c] ss:$16 sps:$4 sm:$0xff]   ;;  %v14828_v60 = vld [vmem:[#allocation6 + $0x140] ss:$16 sps:$4 sm:$0xff]  }
 0x3ed   :  { %6071 = vmatmul.mubr.bf16.gmra.mrb[8].mxu0 %v19446_v5  ;;  %9641 = vmatprep.subr.bf16.mxu1 %v14797_v18  ;;  %v14831_v18 = vld [vmem:[#allocation6 + $0x148] ss:$16 sps:$4 sm:$0xff]  }
 0x3ee   :  { %6843 = vmatmul.mubr.bf16.gmra.mrb[8].mxu1 %v19446_v5  ;;  %6080 = vmatprep.mubr.bf16.mxu0 %v19447_v44  ;;  %v19453_v5 = vld [vmem:[#allocation82_spill] sm:$0xff] }
 0x3ef   :  { %6852 = vmatprep.mubr.bf16.mxu1 %v19447_v44  ;;  %8870 = vmatpush1.bf16.msra.mxu0 %v14792_v35  ;;  %v14836_v35 = vld [vmem:[#allocation6 + $0x164] ss:$16 sps:$4 sm:$0xff]   ;;  %v14837_v44 = vld [vmem:[#allocation6 + $0x168] ss:$16 sps:$4 sm:$0xff]  }
 0x3f0   :  { %9642 = vmatpush1.bf16.msra.mxu1 %v14795_v34  ;;  %8871 = vmatprep.subr.bf16.mxu0 %v14800_v53  ;;  %v19452_v34 = vld [vmem:[#allocation78_spill] sm:$0xff] }
 0x3f1   :  { %9643 = vmatprep.subr.bf16.mxu1 %v14803_v28  ;;  %v14839_v53 = vld [vmem:[#allocation6 + $0x16c] ss:$16 sps:$4 sm:$0xff]   ;;  %v14834_v28 = vld [vmem:[#allocation6 + $0x160] ss:$16 sps:$4 sm:$0xff]  }
 0x3f3   :  { %8872 = vmatpush1.bf16.msra.mxu0 %v14798_v1  ;;  %v14842_v1 = vld [vmem:[#allocation6 + $0x184] ss:$16 sps:$4 sm:$0xff]  }
 0x3f4   :  { %9644 = vmatpush1.bf16.msra.mxu1 %v14801_v16  ;;  %8873 = vmatprep.subr.bf16.mxu0 %v14806_v4  ;;  %v14845_v16 = vld [vmem:[#allocation6 + $0x18c] ss:$16 sps:$4 sm:$0xff]   ;;  %v14840_v4 = vld [vmem:[#allocation6 + $0x180] ss:$16 sps:$4 sm:$0xff]  }
 0x3f5   :  { %6081 = vmatmul.mubr.bf16.gmra.mrb[12].mxu0 %v19448_v33  ;;  %9645 = vmatprep.subr.bf16.mxu1 %v14809_v63  ;;  %v14843_v63 = vld [vmem:[#allocation6 + $0x188] ss:$16 sps:$4 sm:$0xff]  }
 0x3f6   :  { %6853 = vmatmul.mubr.bf16.gmra.mrb[12].mxu1 %v19448_v33  ;;  %6090 = vmatprep.mubr.bf16.mxu0 %v19449_v8  ;;  %v19455_v33 = vld [vmem:[#allocation86_spill] sm:$0xff] }
 0x3f7   :  { %6862 = vmatprep.mubr.bf16.mxu1 %v19449_v8  ;;  %8874 = vmatpush1.bf16.msra.mxu0 %v14804_v37  ;;  %v14848_v37 = vld [vmem:[#allocation6 + $0x1a4] ss:$16 sps:$4 sm:$0xff]   ;;  %v14849_v8 = vld [vmem:[#allocation6 + $0x1a8] ss:$16 sps:$4 sm:$0xff]  }
 0x3f8   :  { %9646 = vmatpush1.bf16.msra.mxu1 %v14807_v61  ;;  %8875 = vmatprep.subr.bf16.mxu0 %v14812_v21  ;;  %v19454_v61 = vld [vmem:[#allocation81_spill] sm:$0xff]  ;;  %v14851_v21 = vld [vmem:[#allocation6 + $0x1ac] ss:$16 sps:$4 sm:$0xff]  }
 0x3f9   :  { %9647 = vmatprep.subr.bf16.mxu1 %v14815_v7  ;;  %v14846_v7 = vld [vmem:[#allocation6 + $0x1a0] ss:$16 sps:$4 sm:$0xff]  }
 0x3fb   :  { %8876 = vmatpush1.bf16.msra.mxu0 %v14810_v38  ;;  %v14854_v38 = vld [vmem:[#allocation6 + $0x1c4] ss:$16 sps:$4 sm:$0xff]  }
 0x3fc   :  { %9648 = vmatpush1.bf16.msra.mxu1 %v14813_v13  ;;  %8877 = vmatprep.subr.bf16.mxu0 %v14818_v58  ;;  %v14857_v13 = vld [vmem:[#allocation6 + $0x1cc] ss:$16 sps:$4 sm:$0xff]   ;;  %v14852_v58 = vld [vmem:[#allocation6 + $0x1c0] ss:$16 sps:$4 sm:$0xff]  }
 0x3fd   :  { %6091 = vmatmul.mubr.bf16.gmra.mrb[16].mxu0 %v19450_v2  ;;  %9649 = vmatprep.subr.bf16.mxu1 %v14821_v47  ;;  %v14855_v47 = vld [vmem:[#allocation6 + $0x1c8] ss:$16 sps:$4 sm:$0xff]  }
 0x3fe   :  { %6863 = vmatmul.mubr.bf16.gmra.mrb[16].mxu1 %v19450_v2  ;;  %6100 = vmatprep.mubr.bf16.mxu0 %v19451_v46  ;;  %v19457_v2 = vld [vmem:[#allocation90_spill] sm:$0xff] }
 0x3ff   :  { %6872 = vmatprep.mubr.bf16.mxu1 %v19451_v46  ;;  %8878 = vmatpush1.bf16.msra.mxu0 %v14816_v59  ;;  %v14860_v59 = vld [vmem:[#allocation6 + $0x1e4] ss:$16 sps:$4 sm:$0xff]   ;;  %v14861_v46 = vld [vmem:[#allocation6 + $0x1e8] ss:$16 sps:$4 sm:$0xff]  }
 0x400   :  { %9650 = vmatpush1.bf16.msra.mxu1 %v14819_v3  ;;  %8879 = vmatprep.subr.bf16.mxu0 %v14824_v36  ;;  %v19456_v3 = vld [vmem:[#allocation84_spill] sm:$0xff] }
 0x401   :  { %9651 = vmatprep.subr.bf16.mxu1 %v14827_v42  ;;  %v14863_v36 = vld [vmem:[#allocation6 + $0x1ec] ss:$16 sps:$4 sm:$0xff]   ;;  %v14858_v42 = vld [vmem:[#allocation6 + $0x1e0] ss:$16 sps:$4 sm:$0xff]  }
 0x403   :  { %8880 = vmatpush1.bf16.msra.mxu0 %v14822_v32  ;;  %v14866_v32 = vld [vmem:[#allocation6 + $0x204] ss:$16 sps:$4 sm:$0xff]  }
 0x404   :  { %9652 = vmatpush1.bf16.msra.mxu1 %v14825_v57  ;;  %8881 = vmatprep.subr.bf16.mxu0 %v14830_v26  ;;  %v14869_v57 = vld [vmem:[#allocation6 + $0x20c] ss:$16 sps:$4 sm:$0xff]  }
 0x405   :  { %6101 = vmatmul.mubr.bf16.gmra.mrb[20].mxu0 %v19452_v34  ;;  %9653 = vmatprep.subr.bf16.mxu1 %v14833_v52  ;;  %v19458_v26 = vld [vmem:[#allocation88_spill] sm:$0xff]  ;;  %v19459_v52 = vld [vmem:[#allocation94_spill] sm:$0xff] }
 0x406   :  { %6873 = vmatmul.mubr.bf16.gmra.mrb[20].mxu1 %v19452_v34  ;;  %6110 = vmatprep.mubr.bf16.mxu0 %v19453_v5  ;;  %v19463_v34 = vld [vmem:[#allocation102_spill] sm:$0xff] }
 0x407   :  { %6882 = vmatprep.mubr.bf16.mxu1 %v19453_v5  ;;  %8882 = vmatpush1.bf16.msra.mxu0 %v14828_v60  ;;  %v19460_v60 = vld [vmem:[#allocation92_spill] sm:$0xff] }
 0x408   :  { %9654 = vmatpush1.bf16.msra.mxu1 %v14831_v18  ;;  %8883 = vmatprep.subr.bf16.mxu0 %v14836_v35  ;;  %v19461_v18 = vld [vmem:[#allocation98_spill] sm:$0xff]  ;;  %v19462_v35 = vld [vmem:[#allocation96_spill] sm:$0xff] }
 0x409   :  { %9655 = vmatprep.subr.bf16.mxu1 %v14839_v53  ;;  %v19464_v53 = vld [vmem:[#allocation100_spill] sm:$0xff] }
 0x40a   :  { %v19465_v5 = vld [vmem:[#allocation104_spill] sm:$0xff] }
 0x40b   :  { %8884 = vmatpush1.bf16.msra.mxu0 %v14834_v28  ;;  %v19466_v28 = vld [vmem:[#allocation103_spill] sm:$0xff] }
 0x40c   :  { %9656 = vmatpush1.bf16.msra.mxu1 %v14837_v44  ;;  %8885 = vmatprep.subr.bf16.mxu0 %v14842_v1  ;;  %v19467_v44 = vld [vmem:[#allocation108_spill] sm:$0xff]  ;;  %v19468_v1 = vld [vmem:[#allocation106_spill] sm:$0xff] }
 0x40d   :  { %6111 = vmatmul.mubr.bf16.gmra.mrb[24].mxu0 %v19454_v61  ;;  %9657 = vmatprep.subr.bf16.mxu1 %v14845_v16  ;;  %v19469_v16 = vld [vmem:[#allocation112_spill] sm:$0xff] }
 0x40e   :  { %6883 = vmatmul.mubr.bf16.gmra.mrb[24].mxu1 %v19454_v61  ;;  %6120 = vmatprep.mubr.bf16.mxu0 %v19455_v33  ;;  %v14867_v61 = vld [vmem:[#allocation6 + $0x208] ss:$16 sps:$4 sm:$0xff]  }
 0x40f   :  { %6892 = vmatprep.mubr.bf16.mxu1 %v19455_v33  ;;  %8886 = vmatpush1.bf16.msra.mxu0 %v14840_v4  ;;  %v19470_v4 = vld [vmem:[#allocation110_spill] sm:$0xff] }
 0x410   :  { %9658 = vmatpush1.bf16.msra.mxu1 %v14843_v63  ;;  %8887 = vmatprep.subr.bf16.mxu0 %v14848_v37  ;;  %v19471_v63 = vld [vmem:[#allocation114_spill] sm:$0xff]  ;;  %v14864_v37 = vld [vmem:[#allocation6 + $0x200] ss:$16 sps:$4 sm:$0xff]  }
 0x411   :  { %9659 = vmatprep.subr.bf16.mxu1 %v14851_v21  ;;  %v14872_v21 = vld [vmem:[#allocation6 + $0x224] ss:$16 sps:$4 sm:$0xff]   ;;  %v14875_v33 = vld [vmem:[#allocation6 + $0x22c] ss:$16 sps:$4 sm:$0xff]  }
 0x413   :  { %8888 = vmatpush1.bf16.msra.mxu0 %v14846_v7  ;;  %v14873_v7 = vld [vmem:[#allocation6 + $0x228] ss:$16 sps:$4 sm:$0xff]  }
 0x414   :  { %9660 = vmatpush1.bf16.msra.mxu1 %v14849_v8  ;;  %8889 = vmatprep.subr.bf16.mxu0 %v14854_v38  ;;  %v14878_v8 = vld [vmem:[#allocation6 + $0x244] ss:$16 sps:$4 sm:$0xff]   ;;  %v14876_v38 = vld [vmem:[#allocation6 + $0x240] ss:$16 sps:$4 sm:$0xff]  }
 0x415   :  { %6121 = vmatmul.mubr.bf16.gmra.mrb[28].mxu0 %v19456_v3  ;;  %9661 = vmatprep.subr.bf16.mxu1 %v14857_v13  ;;  %v14879_v13 = vld [vmem:[#allocation6 + $0x248] ss:$16 sps:$4 sm:$0xff]  }
 0x416   :  { %6893 = vmatmul.mubr.bf16.gmra.mrb[28].mxu1 %v19456_v3  ;;  %6130 = vmatprep.mubr.bf16.mxu0 %v19457_v2  ;;  %v14885_v3 = vld [vmem:[#allocation6 + $0x268] ss:$16 sps:$4 sm:$0xff]  }
 0x417   :  { %6902 = vmatprep.mubr.bf16.mxu1 %v19457_v2  ;;  %8890 = vmatpush1.bf16.msra.mxu0 %v14852_v58  ;;  %v14884_v58 = vld [vmem:[#allocation6 + $0x264] ss:$16 sps:$4 sm:$0xff]   ;;  %v14893_v2 = vld [vmem:[#allocation6 + $0x28c] ss:$16 sps:$4 sm:$0xff]  }
 0x418   :  { %9662 = vmatpush1.bf16.msra.mxu1 %v14855_v47  ;;  %8891 = vmatprep.subr.bf16.mxu0 %v14860_v59  ;;  %v19472_v47 = vld [vmem:[#allocation118_spill] sm:$0xff]  ;;  %v14882_v59 = vld [vmem:[#allocation6 + $0x260] ss:$16 sps:$4 sm:$0xff]  }
 0x419   :  { %9663 = vmatprep.subr.bf16.mxu1 %v14863_v36  ;;  %v14890_v36 = vld [vmem:[#allocation6 + $0x284] ss:$16 sps:$4 sm:$0xff]  }
 0x41b   :  { %8892 = vmatpush1.bf16.msra.mxu0 %v14858_v42  ;;  %v14888_v42 = vld [vmem:[#allocation6 + $0x280] ss:$16 sps:$4 sm:$0xff]  }
 0x41c   :  { %9664 = vmatpush1.bf16.msra.mxu1 %v14861_v46  ;;  %9054 = vmatprep.subr.bf16.mxu0 %v14866_v32  ;;  %v14891_v46 = vld [vmem:[#allocation6 + $0x288] ss:$16 sps:$4 sm:$0xff]   ;;  %v14896_v32 = vld [vmem:[#allocation6 + $0x2a4] ss:$16 sps:$4 sm:$0xff]  }
 0x41d   :  { %6131 = vmatmul.mubr.bf16.gmra.mrb[32].mxu0 %v19458_v26  ;;  %9826 = vmatprep.subr.bf16.mxu1 %v14869_v57  ;;  %v19474_v57 = vld [vmem:[#allocation121_spill] sm:$0xff] }
 0x41e   :  { %6903 = vmatmul.mubr.bf16.gmra.mrb[32].mxu1 %v19458_v26  ;;  %6140 = vmatprep.mubr.bf16.mxu0 %v19459_v52  ;;  %v14899_v26 = vld [vmem:[#allocation6 + $0x2ac] ss:$16 sps:$4 sm:$0xff]  }
 0x41f   :  { %6912 = vmatprep.mubr.bf16.mxu1 %v19459_v52  ;;  %v19475_v52 = vld [vmem:[#allocation127_spill] sm:$0xff] }
 0x425   :  { %6141 = vmatmul.mubr.bf16.gmra.mrb[36].mxu0 %v19460_v60 }
 0x426   :  { %6913 = vmatmul.mubr.bf16.gmra.mrb[36].mxu1 %v19460_v60  ;;  %6150 = vmatprep.mubr.bf16.mxu0 %v19461_v18  ;;  %v14894_v60 = vld [vmem:[#allocation6 + $0x2a0] ss:$16 sps:$4 sm:$0xff]  }
 0x427   :  { %6922 = vmatprep.mubr.bf16.mxu1 %v19461_v18  ;;  %v14897_v18 = vld [vmem:[#allocation6 + $0x2a8] ss:$16 sps:$4 sm:$0xff]  }
 0x42d   :  { %6151 = vmatmul.mubr.bf16.gmra.mrb[40].mxu0 %v19462_v35 }
 0x42e   :  { %6923 = vmatmul.mubr.bf16.gmra.mrb[40].mxu1 %v19462_v35  ;;  %6160 = vmatprep.mubr.bf16.mxu0 %v19463_v34  ;;  %v14902_v35 = vld [vmem:[#allocation6 + $0x2c4] ss:$16 sps:$4 sm:$0xff]  }
 0x42f   :  { %6932 = vmatprep.mubr.bf16.mxu1 %v19463_v34  ;;  %v14905_v34 = vld [vmem:[#allocation6 + $0x2cc] ss:$16 sps:$4 sm:$0xff]  }
 0x435   :  { %6161 = vmatmul.mubr.bf16.gmra.mrb[44].mxu0 %v19464_v53 }
 0x436   :  { %6933 = vmatmul.mubr.bf16.gmra.mrb[44].mxu1 %v19464_v53  ;;  %6170 = vmatprep.mubr.bf16.mxu0 %v19465_v5  ;;  %v14900_v53 = vld [vmem:[#allocation6 + $0x2c0] ss:$16 sps:$4 sm:$0xff]  }
 0x437   :  { %6942 = vmatprep.mubr.bf16.mxu1 %v19465_v5  ;;  %v14903_v5 = vld [vmem:[#allocation6 + $0x2c8] ss:$16 sps:$4 sm:$0xff]  }
 0x43d   :  { %6171 = vmatmul.mubr.bf16.gmra.mrb[48].mxu0 %v19466_v28 }
 0x43e   :  { %6943 = vmatmul.mubr.bf16.gmra.mrb[48].mxu1 %v19466_v28  ;;  %6180 = vmatprep.mubr.bf16.mxu0 %v19467_v44  ;;  %v14908_v28 = vld [vmem:[#allocation6 + $0x2e4] ss:$16 sps:$4 sm:$0xff]  }
 0x43f   :  { %6952 = vmatprep.mubr.bf16.mxu1 %v19467_v44  ;;  %v19476_v44 = vld [vmem:[#allocation125_spill] sm:$0xff] }
 0x445   :  { %6181 = vmatmul.mubr.bf16.gmra.mrb[52].mxu0 %v19468_v1 }
 0x446   :  { %6953 = vmatmul.mubr.bf16.gmra.mrb[52].mxu1 %v19468_v1  ;;  %6190 = vmatprep.mubr.bf16.mxu0 %v19469_v16  ;;  %v14911_v1 = vld [vmem:[#allocation6 + $0x2ec] ss:$16 sps:$4 sm:$0xff]  }
 0x447   :  { %6962 = vmatprep.mubr.bf16.mxu1 %v19469_v16  ;;  %v19477_v16 = vld [vmem:[#allocation131_spill] sm:$0xff] }
 0x44d   :  { %6191 = vmatmul.mubr.bf16.gmra.mrb[56].mxu0 %v19470_v4 }
 0x44e   :  { %6963 = vmatmul.mubr.bf16.gmra.mrb[56].mxu1 %v19470_v4  ;;  %6200 = vmatprep.mubr.bf16.mxu0 %v16584_v51  ;;  %v14906_v4 = vld [vmem:[#allocation6 + $0x2e0] ss:$16 sps:$4 sm:$0xff]  }
 0x44f   :  { %6972 = vmatprep.mubr.bf16.mxu1 %v16584_v51  ;;  %v14870_v51 = vld [vmem:[#allocation6 + $0x220] ss:$16 sps:$4 sm:$0xff]  }
 0x455   :  { %6201 = vmatmul.mubr.bf16.gmra.mrb[60].mxu0 %v19471_v63 }
 0x456   :  { %6973 = vmatmul.mubr.bf16.gmra.mrb[60].mxu1 %v19471_v63  ;;  %8893 = vmatprep.mubr.bf16.mxu0 %v16590_v11  ;;  %v14909_v63 = vld [vmem:[#allocation6 + $0x2e8] ss:$16 sps:$4 sm:$0xff]  }
 0x457   :  { %9665 = vmatprep.mubr.bf16.mxu1 %v16590_v11  ;;  %v14881_v11 = vld [vmem:[#allocation6 + $0x24c] ss:$16 sps:$4 sm:$0xff]  }
 0x45d   :  { %8894 = vmatmul.mubr.bf16.vlgmr.msra.gmra.mrb[64].mxu0 %v16581_v27 }
 0x45e   :  { %9666 = vmatmul.mubr.bf16.vlgmr.msra.gmra.mrb[64].mxu1 %v16581_v27  ;;  %8903 = vmatprep.mubr.bf16.mxu0 %v16611_v0  ;;  %v14887_v27 = vld [vmem:[#allocation6 + $0x26c] ss:$16 sps:$4 sm:$0xff]  }
 0x45f   :  { %9055 = vmatpush1.bf16.msra.mxu0 %v14864_v37  ;;  %9675 = vmatprep.mubr.bf16.mxu1 %v16611_v0  ;;  %v19473_v0 = vld [vmem:[#allocation123_spill] sm:$0xff] }
 0x460   :  { %9827 = vmatpush1.bf16.msra.mxu1 %v14867_v61  ;;  %9056 = vmatprep.subr.bf16.mxu0 %v14872_v21  ;;  %v14914_v37 = vld [vmem:[#allocation6 + $0x304] ss:$16 sps:$4 sm:$0xff]   ;;  %v14917_v61 = vld [vmem:[#allocation6 + $0x30c] ss:$16 sps:$4 sm:$0xff]   ;;  %v14912_v21 = vld [vmem:[#allocation6 + $0x300] ss:$16 sps:$4 sm:$0xff]  }
 0x461   :  { %9828 = vmatprep.subr.bf16.mxu1 %v14875_v33  ;;  %v14915_v33 = vld [vmem:[#allocation6 + $0x308] ss:$16 sps:$4 sm:$0xff]  }
 0x463   :  { %9057 = vmatpush1.bf16.msra.mxu0 %v14870_v51  ;;  %v14920_v51 = vld [vmem:[#allocation6 + $0x324] ss:$16 sps:$4 sm:$0xff]  }
 0x464   :  { %9829 = vmatpush1.bf16.msra.mxu1 %v14873_v7  ;;  %9058 = vmatprep.subr.bf16.mxu0 %v14878_v8  ;;  %v19478_v7 = vld [vmem:[#allocation129_spill] sm:$0xff]  ;;  %v14923_v8 = vld [vmem:[#allocation6 + $0x32c] ss:$16 sps:$4 sm:$0xff]  }
 0x465   :  { %8904 = vmatmul.mubr.bf16.gmra.mrb[68].mxu0 %v19472_v47  ;;  %9830 = vmatprep.subr.bf16.mxu1 %v14881_v11  ;;  %v14918_v11 = vld [vmem:[#allocation6 + $0x320] ss:$16 sps:$4 sm:$0xff]  }
 0x466   :  { %9676 = vmatmul.mubr.bf16.gmra.mrb[68].mxu1 %v19472_v47  ;;  %8913 = vmatprep.mubr.bf16.mxu0 %v19473_v0  ;;  %v14924_v47 = vld [vmem:[#allocation6 + $0x340] ss:$16 sps:$4 sm:$0xff]  }
 0x467   :  { %9685 = vmatprep.mubr.bf16.mxu1 %v19473_v0  ;;  %9059 = vmatpush1.bf16.msra.mxu0 %v14876_v38  ;;  %v14921_v38 = vld [vmem:[#allocation6 + $0x328] ss:$16 sps:$4 sm:$0xff]   ;;  %v14932_v0 = vld [vmem:[#allocation6 + $0x364] ss:$16 sps:$4 sm:$0xff]  }
 0x468   :  { %9831 = vmatpush1.bf16.msra.mxu1 %v14879_v13  ;;  %9060 = vmatprep.subr.bf16.mxu0 %v14884_v58  ;;  %v14926_v13 = vld [vmem:[#allocation6 + $0x344] ss:$16 sps:$4 sm:$0xff]   ;;  %v14929_v58 = vld [vmem:[#allocation6 + $0x34c] ss:$16 sps:$4 sm:$0xff]  }
 0x469   :  { %9832 = vmatprep.subr.bf16.mxu1 %v14887_v27  ;;  %v14927_v27 = vld [vmem:[#allocation6 + $0x348] ss:$16 sps:$4 sm:$0xff]  }
 0x46b   :  { %9061 = vmatpush1.bf16.msra.mxu0 %v14882_v59  ;;  %v14935_v59 = vld [vmem:[#allocation6 + $0x36c] ss:$16 sps:$4 sm:$0xff]  }
 0x46c   :  { %9833 = vmatpush1.bf16.msra.mxu1 %v14885_v3  ;;  %9062 = vmatprep.subr.bf16.mxu0 %v14890_v36  ;;  %v14930_v3 = vld [vmem:[#allocation6 + $0x360] ss:$16 sps:$4 sm:$0xff]   ;;  %v14933_v36 = vld [vmem:[#allocation6 + $0x368] ss:$16 sps:$4 sm:$0xff]  }
 0x46d   :  { %8914 = vmatmul.mubr.bf16.gmra.mrb[72].mxu0 %v19474_v57  ;;  %9834 = vmatprep.subr.bf16.mxu1 %v14893_v2  ;;  %v14938_v2 = vld [vmem:[#allocation6 + $0x384] ss:$16 sps:$4 sm:$0xff]  }
 0x46e   :  { %9686 = vmatmul.mubr.bf16.gmra.mrb[72].mxu1 %v19474_v57  ;;  %8923 = vmatprep.mubr.bf16.mxu0 %v19475_v52  ;;  %v14944_v57 = vld [vmem:[#allocation6 + $0x3a4] ss:$16 sps:$4 sm:$0xff]  }
 0x46f   :  { %9695 = vmatprep.mubr.bf16.mxu1 %v19475_v52  ;;  %9063 = vmatpush1.bf16.msra.mxu0 %v14888_v42  ;;  %v14941_v42 = vld [vmem:[#allocation6 + $0x38c] ss:$16 sps:$4 sm:$0xff]   ;;  %v14942_v52 = vld [vmem:[#allocation6 + $0x3a0] ss:$16 sps:$4 sm:$0xff]  }
 0x470   :  { %9835 = vmatpush1.bf16.msra.mxu1 %v14891_v46  ;;  %9064 = vmatprep.subr.bf16.mxu0 %v14896_v32  ;;  %v14936_v46 = vld [vmem:[#allocation6 + $0x380] ss:$16 sps:$4 sm:$0xff]   ;;  %v14939_v32 = vld [vmem:[#allocation6 + $0x388] ss:$16 sps:$4 sm:$0xff]  }
 0x471   :  { %9836 = vmatprep.subr.bf16.mxu1 %v14899_v26  ;;  %v19480_v26 = vld [vmem:[#allocation19_spill] sm:$0xff] }
 0x473   :  { %9065 = vmatpush1.bf16.msra.mxu0 %v14894_v60  ;;  %v14945_v60 = vld [vmem:[#allocation6 + $0x3a8] ss:$16 sps:$4 sm:$0xff]  }
 0x474   :  { %9837 = vmatpush1.bf16.msra.mxu1 %v14897_v18  ;;  %9066 = vmatprep.subr.bf16.mxu0 %v14902_v35  ;;  %v14950_v18 = vld [vmem:[#allocation6 + $0x3c4] ss:$16 sps:$4 sm:$0xff]   ;;  %v14953_v35 = vld [vmem:[#allocation6 + $0x3cc] ss:$16 sps:$4 sm:$0xff]  }
 0x475   :  { %8924 = vmatmul.mubr.bf16.gmra.mrb[76].mxu0 %v19476_v44  ;;  %9838 = vmatprep.subr.bf16.mxu1 %v14905_v34  ;;  %v14948_v34 = vld [vmem:[#allocation6 + $0x3c0] ss:$16 sps:$4 sm:$0xff]  }
 0x476   :  { %9696 = vmatmul.mubr.bf16.gmra.mrb[76].mxu1 %v19476_v44  ;;  %8933 = vmatprep.mubr.bf16.mxu0 %v19477_v16  ;;  %v14959_v44 = vld [vmem:[#allocation6 + $0x3ec] ss:$16 sps:$4 sm:$0xff]  }
 0x477   :  { %9705 = vmatprep.mubr.bf16.mxu1 %v19477_v16  ;;  %9067 = vmatpush1.bf16.msra.mxu0 %v14900_v53  ;;  %v14951_v53 = vld [vmem:[#allocation6 + $0x3c8] ss:$16 sps:$4 sm:$0xff]   ;;  %v14962_v16 = vld [vmem:[#allocation6 + $0x404] ss:$16 sps:$4 sm:$0xff]  }
 0x478   :  { %9839 = vmatpush1.bf16.msra.mxu1 %v14903_v5  ;;  %9068 = vmatprep.subr.bf16.mxu0 %v14908_v28  ;;  %v14956_v5 = vld [vmem:[#allocation6 + $0x3e4] ss:$16 sps:$4 sm:$0xff]  }
 0x479   :  { %9840 = vmatprep.subr.bf16.mxu1 %v14911_v1  ;;  %v19481_v28 = vld [vmem:[#allocation17_spill] sm:$0xff]  ;;  %v14957_v1 = vld [vmem:[#allocation6 + $0x3e8] ss:$16 sps:$4 sm:$0xff]  }
 0x47b   :  { %9069 = vmatpush1.bf16.msra.mxu0 %v14906_v4  ;;  %v14965_v4 = vld [vmem:[#allocation6 + $0x40c] ss:$16 sps:$4 sm:$0xff]  }
 0x47c   :  { %9841 = vmatpush1.bf16.msra.mxu1 %v14909_v63  ;;  %9070 = vmatprep.subr.bf16.mxu0 %v14914_v37  ;;  %v19482_v63 = vld [vmem:[#allocation9_spill] sm:$0xff] }
 0x47d   :  { %8934 = vmatmul.mubr.bf16.gmra.mrb[80].mxu0 %v19478_v7  ;;  %9842 = vmatprep.subr.bf16.mxu1 %v14917_v61 }
 0x47e   :  { %9706 = vmatmul.mubr.bf16.gmra.mrb[80].mxu1 %v19478_v7  ;;  %8943 = vmatprep.mubr.bf16.mxu0 %v16694_v30 }
 0x47f   :  { %9715 = vmatprep.mubr.bf16.mxu1 %v16694_v30  ;;  %9071 = vmatpush1.bf16.msra.mxu0 %v14912_v21  ;;  %v19479_v30 = vld [vmem:[#allocation136_spill] sm:$0xff] }
 0x480   :  { %9843 = vmatpush1.bf16.msra.mxu1 %v14915_v33  ;;  %9072 = vmatprep.subr.bf16.mxu0 %v14920_v51 }
 0x481   :  { %9844 = vmatprep.subr.bf16.mxu1 %v14923_v8 }
 0x483   :  { %9073 = vmatpush1.bf16.msra.mxu0 %v14918_v11 }
 0x484   :  { %9845 = vmatpush1.bf16.msra.mxu1 %v14921_v38  ;;  %9074 = vmatprep.subr.bf16.mxu0 %v14926_v13 }
 0x485   :  { %8944 = vmatmul.mubr.bf16.gmra.mrb[84].mxu0 %v16687_v23  ;;  %9846 = vmatprep.subr.bf16.mxu1 %v14929_v58 }
 0x486   :  { %9716 = vmatmul.mubr.bf16.gmra.mrb[84].mxu1 %v16687_v23  ;;  %8953 = vmatprep.mubr.bf16.mxu0 %v19479_v30  ;;  %v14947_v23 = vld [vmem:[#allocation6 + $0x3ac] ss:$16 sps:$4 sm:$0xff]  }
 0x487   :  { %9725 = vmatprep.mubr.bf16.mxu1 %v19479_v30  ;;  %9075 = vmatpush1.bf16.msra.mxu0 %v14924_v47 }
 0x488   :  { %9847 = vmatpush1.bf16.msra.mxu1 %v14927_v27  ;;  %9076 = vmatprep.subr.bf16.mxu0 %v14932_v0 }
 0x489   :  { %9848 = vmatprep.subr.bf16.mxu1 %v14935_v59 }
 0x48b   :  { %9077 = vmatpush1.bf16.msra.mxu0 %v14930_v3 }
 0x48c   :  { %9849 = vmatpush1.bf16.msra.mxu1 %v14933_v36  ;;  %9078 = vmatprep.subr.bf16.mxu0 %v14938_v2 }
 0x48d   :  { %8954 = vmatmul.mubr.bf16.gmra.mrb[88].mxu0 %v19480_v26  ;;  %9850 = vmatprep.subr.bf16.mxu1 %v14941_v42 }
 0x48e   :  { %9726 = vmatmul.mubr.bf16.gmra.mrb[88].mxu1 %v19480_v26  ;;  %8963 = vmatprep.mubr.bf16.mxu0 %v16742_v12 }
 0x48f   :  { %9735 = vmatprep.mubr.bf16.mxu1 %v16742_v12  ;;  %9079 = vmatpush1.bf16.msra.mxu0 %v14936_v46  ;;  %v14954_v12 = vld [vmem:[#allocation6 + $0x3e0] ss:$16 sps:$4 sm:$0xff]  }
 0x490   :  { %9851 = vmatpush1.bf16.msra.mxu1 %v14939_v32  ;;  %9080 = vmatprep.subr.bf16.mxu0 %v14944_v57  ;;  %v19486_v57 = vld [vmem:[#allocation144_spill] sm:$0xff] }
 0x491   :  { %9852 = vmatprep.subr.bf16.mxu1 %v14947_v23 }
 0x493   :  { %9081 = vmatpush1.bf16.msra.mxu0 %v14942_v52 }
 0x494   :  { %9853 = vmatpush1.bf16.msra.mxu1 %v14945_v60  ;;  %9082 = vmatprep.subr.bf16.mxu0 %v14950_v18 }
 0x495   :  { %8964 = vmatmul.mubr.bf16.gmra.mrb[92].mxu0 %v19481_v28  ;;  %9854 = vmatprep.subr.bf16.mxu1 %v14953_v35 }
 0x496   :  { %9736 = vmatmul.mubr.bf16.gmra.mrb[92].mxu1 %v19481_v28  ;;  %8973 = vmatprep.mubr.bf16.mxu0 %v16766_v50 }
 0x497   :  { %9745 = vmatprep.mubr.bf16.mxu1 %v16766_v50  ;;  %9083 = vmatpush1.bf16.msra.mxu0 %v14948_v34  ;;  %v4137_v50 = vld [vmem:[%s18916_s5] sm:$0xf] }
 0x498   :  { %9855 = vmatpush1.bf16.msra.mxu1 %v14951_v53  ;;  %9084 = vmatprep.subr.bf16.mxu0 %v14956_v5 }
 0x499   :  { %9856 = vmatprep.subr.bf16.mxu1 %v14959_v44 }
 0x49b   :  { %9085 = vmatpush1.bf16.msra.mxu0 %v14954_v12 }
 0x49c   :  { %9857 = vmatpush1.bf16.msra.mxu1 %v14957_v1  ;;  %9247 = vmatprep.subr.bf16.mxu0 %v14962_v16 }
 0x49d   :  { %8974 = vmatmul.mubr.bf16.gmra.mrb[96].mxu0 %v16759_v41  ;;  %10019 = vmatprep.subr.bf16.mxu1 %v14965_v4 }
 0x49e   :  { %9746 = vmatmul.mubr.bf16.gmra.mrb[96].mxu1 %v16759_v41  ;;  %8983 = vmatprep.mubr.bf16.mxu0 %v16790_v39  ;;  %v17475_v41 = vrot.slane %v4137_v50, %v19482_v63 }
 0x49f   :  { %9755 = vmatprep.mubr.bf16.mxu1 %v16790_v39  ;;  %v19483_v39 = vld [vmem:[#allocation10_spill] sm:$0xff] }
 0x4a0   :  { %v17480_v37 = vrot.slane %v4137_v50, %v19483_v39 }
 0x4a5   :  { %8984 = vmatmul.mubr.bf16.gmra.mrb[100].mxu0 %v16783_v15 }
 0x4a6   :  { %9756 = vmatmul.mubr.bf16.gmra.mrb[100].mxu1 %v16783_v15  ;;  %8993 = vmatprep.mubr.bf16.mxu0 %v16814_v14  ;;  %v19484_v15 = vld [vmem:[#allocation11_spill] sm:$0xff] }
 0x4a7   :  { %9765 = vmatprep.mubr.bf16.mxu1 %v16814_v14  ;;  %v17483_v61 = vrot.slane %v4137_v50, %v19484_v15  ;;  %v19485_v14 = vld [vmem:[#allocation12_spill] sm:$0xff] }
 0x4a8   :  { %v17487_v21 = vrot.slane %v4137_v50, %v19485_v14 }
 0x4ad   :  { %8994 = vmatmul.mubr.bf16.gmra.mrb[104].mxu0 %v16807_v24 }
 0x4ae   :  { %9766 = vmatmul.mubr.bf16.gmra.mrb[104].mxu1 %v16807_v24  ;;  %9003 = vmatprep.mubr.bf16.mxu0 %v16838_v45 }
 0x4af   :  { %9775 = vmatprep.mubr.bf16.mxu1 %v16838_v45 }
 0x4b0   :  { %v6052_v33 = vpop.f32.mrb[0].mxu0 }
 0x4b1   :  { %v13336_v51 = vadd.f32 %v6052_v33, %v17475_v41  ;;  %v6824_v7 = vpop.f32.mrb[0].mxu1  ;;  %v6054_v8 = vpop.f32.mrb[1].mxu0 }
 0x4b2   :  { %v13400_v24 = vadd.f32 %v6824_v7, %v17480_v37  ;;  %v13337_v11 = vadd.f32 %v6054_v8, %v17483_v61  ;;  %v6826_v38 = vpop.f32.mrb[1].mxu1  ;;  %v6056_v13 = vpop.f32.mrb[2].mxu0 }
 0x4b3   :  { %v6983_v58 = vmul.f32 0.01, %v13336_v51  ;;  %v13401_v47 = vadd.f32 %v6826_v38, %v17487_v21  ;;  %v13338_v27 = vadd.f32 %v6056_v13, %v17475_v41  ;;  %v6828_v45 = vpop.f32.mrb[2].mxu1  ;;  %v6058_v0 = vpop.f32.mrb[3].mxu0 }
 0x4b4   :  { %v6985_v59 = vmul.f32 0.01, %v13400_v24  ;;  %v6984_v30 = vmul.f32 0.01, %v13337_v11  ;;  %v13402_v3 = vadd.f32 %v6828_v45, %v17480_v37  ;;  %v13339_v36 = vadd.f32 %v6058_v0, %v17483_v61  ;;  %v6830_v2 = vpop.f32.mrb[3].mxu1 }
 0x4b5   :  { %v6986_v42 = vmul.f32 0.01, %v13401_v47  ;;  %v6987_v46 = vmul.f32 0.01, %v13338_v27  ;;  %v13403_v32 = vadd.f32 %v6830_v2, %v17487_v21  ;;  %9004 = vmatmul.mubr.bf16.gmra.mrb[108].mxu0 %v19486_v57  ;;  %v7111_v52 = vmax.f32 %v13336_v51, %v6983_v58 }
 0x4b6   :  { %v6989_v26 = vmul.f32 0.01, %v13402_v3  ;;  %v6988_v23 = vmul.f32 0.01, %v13339_v36  ;;  %9776 = vmatmul.mubr.bf16.gmra.mrb[108].mxu1 %v19486_v57  ;;  %9013 = vmatprep.mubr.bf16.mxu0 %v16858_v9  ;;  %v7113_v35 = vmax.f32 %v13400_v24, %v6985_v59  ;;  %v7112_v34 = vmax.f32 %v13337_v11, %v6984_v30 }
 0x4b7   :  { %v7115_v60 = vmax.f32 %v13338_v27, %v6987_v46  ;;  %v6990_v18 = vmul.f32 0.01, %v13403_v32  ;;  %9785 = vmatprep.mubr.bf16.mxu1 %v16858_v9  ;;  %v7114_v44 = vmax.f32 %v13401_v47, %v6986_v42 }
 0x4b8   :  { %v7117_v53 = vmax.f32 %v13402_v3, %v6989_v26  ;;  %v7116_v5 = vmax.f32 %v13339_v36, %v6988_v23  ;;  %v6062_v28 = vpop.f32.mrb[4].mxu0 }
 0x4b9   :  { %v17501_v12 = vpack.c.bf16 %v7115_v60, %v7111_v52  ;;  %v7118_v1 = vmax.f32 %v13403_v32, %v6990_v18  ;;  %v13340_v16 = vadd.f32 %v6062_v28, %v17475_v41  ;;  %v6834_v4 = vpop.f32.mrb[4].mxu1  ;;  %v6064_v50 = vpop.f32.mrb[5].mxu0 }
 0x4ba   :  { %v17504_v33 = vpack.c.bf16 %v7117_v53, %v7113_v35  ;;  %v13404_v51 = vadd.f32 %v6834_v4, %v17480_v37  ;;  %v13341_v7 = vadd.f32 %v6064_v50, %v17483_v61  ;;  %v6836_v9 = vpop.f32.mrb[5].mxu1  ;;  %v6066_v8 = vpop.f32.mrb[6].mxu0  ;;  %v17508_v24 = vpack.c.bf16 %v7116_v5, %v7112_v34 }
 0x4bb   :  { %v6991_v11 = vmul.f32 0.01, %v13340_v16  ;;  %v13405_v38 = vadd.f32 %v6836_v9, %v17487_v21  ;;  %v13342_v13 = vadd.f32 %v6066_v8, %v17475_v41  ;;  %v6838_v58 = vpop.f32.mrb[6].mxu1  ;;  %v6068_v47 = vpop.f32.mrb[7].mxu0  ;;  %v17512_v27 = vpack.c.bf16 %v7118_v1, %v7114_v44 }
 0x4bc   :  { %v6993_v45 = vmul.f32 0.01, %v13404_v51  ;;  %v6992_v0 = vmul.f32 0.01, %v13341_v7  ;;  %v13406_v59 = vadd.f32 %v6838_v58, %v17480_v37  ;;  %v13343_v30 = vadd.f32 %v6068_v47, %v17483_v61  ;;  %v6840_v3 = vpop.f32.mrb[7].mxu1 }
 0x4bd   :  { %v6994_v36 = vmul.f32 0.01, %v13405_v38  ;;  %v6995_v2 = vmul.f32 0.01, %v13342_v13  ;;  %v13407_v42 = vadd.f32 %v6840_v3, %v17487_v21  ;;  %9014 = vmatmul.mubr.bf16.gmra.mrb[112].mxu0 %v16851_v29  ;;  %v7119_v57 = vmax.f32 %v13340_v16, %v6991_v11 }
 0x4be   :  { %v6997_v46 = vmul.f32 0.01, %v13406_v59  ;;  %v6996_v32 = vmul.f32 0.01, %v13343_v30  ;;  %9786 = vmatmul.mubr.bf16.gmra.mrb[112].mxu1 %v16851_v29  ;;  %9023 = vmatprep.mubr.bf16.mxu0 %v16878_v22  ;;  %v7121_v52 = vmax.f32 %v13404_v51, %v6993_v45  ;;  %v7120_v60 = vmax.f32 %v13341_v7, %v6992_v0 }
 0x4bf   :  { %v7123_v26 = vmax.f32 %v13342_v13, %v6995_v2  ;;  %v6998_v23 = vmul.f32 0.01, %v13407_v42  ;;  %9795 = vmatprep.mubr.bf16.mxu1 %v16878_v22  ;;  %v7122_v53 = vmax.f32 %v13405_v38, %v6994_v36 }
 0x4c0   :  { %v7125_v18 = vmax.f32 %v13406_v59, %v6997_v46  ;;  %v7124_v35 = vmax.f32 %v13343_v30, %v6996_v32  ;;  %v6072_v34 = vpop.f32.mrb[8].mxu0 }
 0x4c1   :  { %v17521_v5 = vpack.c.bf16 %v7123_v26, %v7119_v57  ;;  %v7126_v28 = vmax.f32 %v13407_v42, %v6998_v23  ;;  %v13344_v44 = vadd.f32 %v6072_v34, %v17475_v41  ;;  %v6844_v1 = vpop.f32.mrb[8].mxu1  ;;  %v6074_v29 = vpop.f32.mrb[9].mxu0 }
 0x4c2   :  { %v17524_v4 = vpack.c.bf16 %v7125_v18, %v7121_v52  ;;  %v13408_v16 = vadd.f32 %v6844_v1, %v17480_v37  ;;  %v13345_v50 = vadd.f32 %v6074_v29, %v17483_v61  ;;  %v6846_v22 = vpop.f32.mrb[9].mxu1  ;;  %v6076_v51 = vpop.f32.mrb[10].mxu0  ;;  %v17528_v7 = vpack.c.bf16 %v7124_v35, %v7120_v60 }
 0x4c3   :  { %v6999_v9 = vmul.f32 0.01, %v13344_v44  ;;  %v13409_v8 = vadd.f32 %v6846_v22, %v17487_v21  ;;  %v13346_v11 = vadd.f32 %v6076_v51, %v17475_v41  ;;  %v6848_v38 = vpop.f32.mrb[10].mxu1  ;;  %v6078_v13 = vpop.f32.mrb[11].mxu0  ;;  %v17532_v58 = vpack.c.bf16 %v7126_v28, %v7122_v53 }
 0x4c4   :  { %v7001_v47 = vmul.f32 0.01, %v13408_v16  ;;  %v7000_v45 = vmul.f32 0.01, %v13345_v50  ;;  %v13410_v0 = vadd.f32 %v6848_v38, %v17480_v37  ;;  %v13347_v59 = vadd.f32 %v6078_v13, %v17483_v61  ;;  %v6850_v30 = vpop.f32.mrb[11].mxu1 }
 0x4c5   :  { %v7002_v3 = vmul.f32 0.01, %v13409_v8  ;;  %v7003_v36 = vmul.f32 0.01, %v13346_v11  ;;  %v13411_v2 = vadd.f32 %v6850_v30, %v17487_v21  ;;  %9024 = vmatmul.mubr.bf16.gmra.mrb[116].mxu0 %v16871_v48  ;;  %v7127_v32 = vmax.f32 %v13344_v44, %v6999_v9 }
 0x4c6   :  { %v7005_v42 = vmul.f32 0.01, %v13410_v0  ;;  %v7004_v46 = vmul.f32 0.01, %v13347_v59  ;;  %9796 = vmatmul.mubr.bf16.gmra.mrb[116].mxu1 %v16871_v48  ;;  %9033 = vmatprep.mubr.bf16.mxu0 %v16898_v40  ;;  %v7129_v23 = vmax.f32 %v13408_v16, %v7001_v47  ;;  %v7128_v52 = vmax.f32 %v13345_v50, %v7000_v45 }
 0x4c7   :  { %v7131_v57 = vmax.f32 %v13346_v11, %v7003_v36  ;;  %v7006_v26 = vmul.f32 0.01, %v13411_v2  ;;  %9805 = vmatprep.mubr.bf16.mxu1 %v16898_v40  ;;  %v7130_v34 = vmax.f32 %v13409_v8, %v7002_v3 }
 0x4c8   :  { %v7133_v60 = vmax.f32 %v13410_v0, %v7005_v42  ;;  %v7132_v18 = vmax.f32 %v13347_v59, %v7004_v46  ;;  %v6082_v35 = vpop.f32.mrb[12].mxu0 }
 0x4c9   :  { %v17541_v53 = vpack.c.bf16 %v7131_v57, %v7127_v32  ;;  %v7134_v28 = vmax.f32 %v13411_v2, %v7006_v26  ;;  %v13348_v1 = vadd.f32 %v6082_v35, %v17475_v41  ;;  %v6854_v29 = vpop.f32.mrb[12].mxu1  ;;  %v6084_v48 = vpop.f32.mrb[13].mxu0 }
 0x4ca   :  { %v17544_v22 = vpack.c.bf16 %v7133_v60, %v7129_v23  ;;  %v13412_v44 = vadd.f32 %v6854_v29, %v17480_v37  ;;  %v13349_v51 = vadd.f32 %v6084_v48, %v17483_v61  ;;  %v6856_v40 = vpop.f32.mrb[13].mxu1  ;;  %v6086_v16 = vpop.f32.mrb[14].mxu0  ;;  %v17548_v50 = vpack.c.bf16 %v7132_v18, %v7128_v52 }
 0x4cb   :  { %v7007_v9 = vmul.f32 0.01, %v13348_v1  ;;  %v13413_v8 = vadd.f32 %v6856_v40, %v17487_v21  ;;  %v13350_v11 = vadd.f32 %v6086_v16, %v17475_v41  ;;  %v6858_v38 = vpop.f32.mrb[14].mxu1  ;;  %v6088_v13 = vpop.f32.mrb[15].mxu0  ;;  %v17552_v47 = vpack.c.bf16 %v7134_v28, %v7130_v34 }
 0x4cc   :  { %v7009_v45 = vmul.f32 0.01, %v13412_v44  ;;  %v7008_v0 = vmul.f32 0.01, %v13349_v51  ;;  %v13414_v59 = vadd.f32 %v6858_v38, %v17480_v37  ;;  %v13351_v30 = vadd.f32 %v6088_v13, %v17483_v61  ;;  %v6860_v3 = vpop.f32.mrb[15].mxu1 }
 0x4cd   :  { %v7010_v36 = vmul.f32 0.01, %v13413_v8  ;;  %v7011_v2 = vmul.f32 0.01, %v13350_v11  ;;  %v13415_v42 = vadd.f32 %v6860_v3, %v17487_v21  ;;  %9034 = vmatmul.mubr.bf16.gmra.mrb[120].mxu0 %v16891_v25  ;;  %v7135_v57 = vmax.f32 %v13348_v1, %v7007_v9 }
 0x4ce   :  { %v7013_v46 = vmul.f32 0.01, %v13414_v59  ;;  %v7012_v32 = vmul.f32 0.01, %v13351_v30  ;;  %9806 = vmatmul.mubr.bf16.gmra.mrb[120].mxu1 %v16891_v25  ;;  %9043 = vmatprep.mubr.bf16.mxu0 %v16937_v54  ;;  %v7137_v52 = vmax.f32 %v13412_v44, %v7009_v45  ;;  %v7136_v60 = vmax.f32 %v13349_v51, %v7008_v0 }
 0x4cf   :  { %v7139_v26 = vmax.f32 %v13350_v11, %v7011_v2  ;;  %v7014_v23 = vmul.f32 0.01, %v13415_v42  ;;  %9815 = vmatprep.mubr.bf16.mxu1 %v16937_v54  ;;  %v7138_v28 = vmax.f32 %v13413_v8, %v7010_v36 }
 0x4d0   :  { %v7141_v18 = vmax.f32 %v13414_v59, %v7013_v46  ;;  %v7140_v35 = vmax.f32 %v13351_v30, %v7012_v32  ;;  %v6092_v34 = vpop.f32.mrb[16].mxu0 }
 0x4d1   :  { %v17561_v29 = vpack.c.bf16 %v7139_v26, %v7135_v57  ;;  %v7142_v48 = vmax.f32 %v13415_v42, %v7014_v23  ;;  %v13352_v40 = vadd.f32 %v6092_v34, %v17475_v41  ;;  %v6864_v16 = vpop.f32.mrb[16].mxu1  ;;  %v6094_v25 = vpop.f32.mrb[17].mxu0  ;;  %v19488_v26 = vld [vmem:[#allocation153_spill] sm:$0xff] }
 0x4d2   :  { %v17564_v38 = vpack.c.bf16 %v7141_v18, %v7137_v52  ;;  %v13416_v1 = vadd.f32 %v6864_v16, %v17480_v37  ;;  %v13353_v9 = vadd.f32 %v6094_v25, %v17483_v61  ;;  %v6866_v54 = vpop.f32.mrb[17].mxu1  ;;  %v6096_v44 = vpop.f32.mrb[18].mxu0  ;;  %v17568_v51 = vpack.c.bf16 %v7140_v35, %v7136_v60  ;;  %v19489_v60 = vld [vmem:[#allocation117_spill] sm:$0xff] }
 0x4d3   :  { %v7015_v11 = vmul.f32 0.01, %v13352_v40  ;;  %v13417_v8 = vadd.f32 %v6866_v54, %v17487_v21  ;;  %v13354_v13 = vadd.f32 %v6096_v44, %v17475_v41  ;;  %v6868_v45 = vpop.f32.mrb[18].mxu1  ;;  %v6098_v0 = vpop.f32.mrb[19].mxu0  ;;  %v17572_v59 = vpack.c.bf16 %v7142_v48, %v7138_v28 }
 0x4d4   :  { %19487 = vst [vmem:[#allocation35_spill] sm:$0xff] %v17564_v38  ;;  %v7017_v30 = vmul.f32 0.01, %v13416_v1  ;;  %v7016_v3 = vmul.f32 0.01, %v13353_v9  ;;  %v13418_v36 = vadd.f32 %v6868_v45, %v17480_v37  ;;  %v13355_v2 = vadd.f32 %v6098_v0, %v17483_v61  ;;  %v6870_v42 = vpop.f32.mrb[19].mxu1 }
 0x4d5   :  { %v7018_v46 = vmul.f32 0.01, %v13417_v8  ;;  %v7019_v32 = vmul.f32 0.01, %v13354_v13  ;;  %v13419_v57 = vadd.f32 %v6870_v42, %v17487_v21  ;;  %9044 = vmatmul.mubr.bf16.gmra.mrb[124].mxu0 %v19488_v26  ;;  %v7143_v18 = vmax.f32 %v13352_v40, %v7015_v11 }
 0x4d6   :  { %v7021_v23 = vmul.f32 0.01, %v13418_v36  ;;  %v7020_v52 = vmul.f32 0.01, %v13355_v2  ;;  %9816 = vmatmul.mubr.bf16.gmra.mrb[124].mxu1 %v19488_v26  ;;  %9086 = vmatprep.mubr.bf16.mxu0 %v19489_v60  ;;  %v7145_v28 = vmax.f32 %v13416_v1, %v7017_v30  ;;  %v7144_v48 = vmax.f32 %v13353_v9, %v7016_v3  ;;  %v14960_v9 = vld [vmem:[#allocation6 + $0x400] ss:$16 sps:$4 sm:$0xff]  }
 0x4d7   :  { %v7147_v35 = vmax.f32 %v13354_v13, %v7019_v32  ;;  %v7022_v34 = vmul.f32 0.01, %v13419_v57  ;;  %9858 = vmatprep.mubr.bf16.mxu1 %v19489_v60  ;;  %v7146_v44 = vmax.f32 %v13417_v8, %v7018_v46  ;;  %v14963_v30 = vld [vmem:[#allocation6 + $0x408] ss:$16 sps:$4 sm:$0xff]  }
 0x4d8   :  { %v7149_v16 = vmax.f32 %v13418_v36, %v7021_v23  ;;  %v7148_v25 = vmax.f32 %v13355_v2, %v7020_v52  ;;  %v6102_v54 = vpop.f32.mrb[20].mxu0 }
 0x4d9   :  { %v17581_v45 = vpack.c.bf16 %v7147_v35, %v7143_v18  ;;  %v7150_v0 = vmax.f32 %v13419_v57, %v7022_v34  ;;  %v13356_v42 = vadd.f32 %v6102_v54, %v17475_v41  ;;  %v6874_v14 = vpop.f32.mrb[20].mxu1  ;;  %v6104_v26 = vpop.f32.mrb[21].mxu0  ;;  %v14968_v57 = vld [vmem:[#allocation6 + $0x424] ss:$16 sps:$4 sm:$0xff]  }
 0x4da   :  { %v17584_v15 = vpack.c.bf16 %v7149_v16, %v7145_v28  ;;  %v13420_v40 = vadd.f32 %v6874_v14, %v17480_v37  ;;  %v13357_v11 = vadd.f32 %v6104_v26, %v17483_v61  ;;  %v6876_v13 = vpop.f32.mrb[21].mxu1  ;;  %v6106_v1 = vpop.f32.mrb[22].mxu0  ;;  %v17588_v3 = vpack.c.bf16 %v7148_v25, %v7144_v48  ;;  %v19494_v16 = vld [vmem:[#allocation116_spill] sm:$0xff] }
 0x4db   :  { %19490 = vst [vmem:[#allocation38_spill] sm:$0xff] %v17581_v45  ;;  %v7023_v8 = vmul.f32 0.01, %v13356_v42  ;;  %v13421_v36 = vadd.f32 %v6876_v13, %v17487_v21  ;;  %v13358_v2 = vadd.f32 %v6106_v1, %v17475_v41  ;;  %v6878_v46 = vpop.f32.mrb[22].mxu1  ;;  %v6108_v32 = vpop.f32.mrb[23].mxu0  ;;  %v17592_v23 = vpack.c.bf16 %v7150_v0, %v7146_v44  ;;  %v19495_v44 = vld [vmem:[#allocation120_spill] sm:$0xff] }
 0x4dc   :  { %19491 = vst [vmem:[#allocation37_spill] sm:$0xff] %v17584_v15  ;;  %19492 = vst [vmem:[#allocation41_spill] sm:$0xff] %v17588_v3  ;;  %v7025_v52 = vmul.f32 0.01, %v13420_v40  ;;  %v7024_v14 = vmul.f32 0.01, %v13357_v11  ;;  %v13422_v60 = vadd.f32 %v6878_v46, %v17480_v37  ;;  %v13359_v18 = vadd.f32 %v6108_v32, %v17483_v61 }
 0x4dd   :  { %19493 = vst [vmem:[#allocation40_spill] sm:$0xff] %v17592_v23  ;;  %v6880_v35 = vpop.f32.mrb[23].mxu1  ;;  %v7026_v34 = vmul.f32 0.01, %v13421_v36  ;;  %v7027_v28 = vmul.f32 0.01, %v13358_v2  ;;  %9087 = vmatmul.mubr.bf16.vlgmr.msra.gmra.mrb[64].mxu0 %v19494_v16  ;;  %v7151_v0 = vmax.f32 %v13356_v42, %v7023_v8 }
 0x4de   :  { %v13423_v48 = vadd.f32 %v6880_v35, %v17487_v21  ;;  %v14971_v25 = vld [vmem:[#allocation6 + $0x42c] ss:$16 sps:$4 sm:$0xff]   ;;  %v7029_v54 = vmul.f32 0.01, %v13422_v60  ;;  %v7028_v26 = vmul.f32 0.01, %v13359_v18  ;;  %9859 = vmatmul.mubr.bf16.vlgmr.msra.gmra.mrb[64].mxu1 %v19494_v16  ;;  %9096 = vmatprep.mubr.bf16.mxu0 %v19495_v44  ;;  %v7153_v13 = vmax.f32 %v13420_v40, %v7025_v52 }
 0x4df   :  { %v7155_v1 = vmax.f32 %v13358_v2, %v7027_v28  ;;  %9248 = vmatpush1.bf16.msra.mxu0 %v14960_v9  ;;  %9868 = vmatprep.mubr.bf16.mxu1 %v19495_v44  ;;  %v14966_v32 = vld [vmem:[#allocation6 + $0x420] ss:$16 sps:$4 sm:$0xff]   ;;  %v7152_v39 = vmax.f32 %v13357_v11, %v7024_v14  ;;  %v14969_v45 = vld [vmem:[#allocation6 + $0x428] ss:$16 sps:$4 sm:$0xff]   ;;  %v14974_v23 = vld [vmem:[#allocation6 + $0x444] ss:$16 sps:$4 sm:$0xff]   ;;  %v7154_v3 = vmax.f32 %v13421_v36, %v7026_v34 }
 0x4e0   :  { %v7030_v46 = vmul.f32 0.01, %v13423_v48  ;;  %v7157_v63 = vmax.f32 %v13422_v60, %v7029_v54  ;;  %v7156_v35 = vmax.f32 %v13359_v18, %v7028_v26  ;;  %v6112_v15 = vpop.f32.mrb[24].mxu0  ;;  %10020 = vmatpush1.bf16.msra.mxu1 %v14963_v30  ;;  %9249 = vmatprep.subr.bf16.mxu0 %v14968_v57  ;;  %v14977_v9 = vld [vmem:[#allocation6 + $0x44c] ss:$16 sps:$4 sm:$0xff]  }
 0x4e1   :  { %v17601_v16 = vpack.c.bf16 %v7155_v1, %v7151_v0  ;;  %v13360_v42 = vadd.f32 %v6112_v15, %v17475_v41  ;;  %v6884_v40 = vpop.f32.mrb[24].mxu1  ;;  %v6114_v8 = vpop.f32.mrb[25].mxu0  ;;  %10021 = vmatprep.subr.bf16.mxu1 %v14971_v25  ;;  %v14972_v14 = vld [vmem:[#allocation6 + $0x440] ss:$16 sps:$4 sm:$0xff]   ;;  %v14975_v60 = vld [vmem:[#allocation6 + $0x448] ss:$16 sps:$4 sm:$0xff]  }
 0x4e2   :  { %v7158_v38 = vmax.f32 %v13423_v48, %v7030_v46  ;;  %v17604_v2 = vpack.c.bf16 %v7157_v63, %v7153_v13  ;;  %v13424_v11 = vadd.f32 %v6884_v40, %v17480_v37  ;;  %v13361_v52 = vadd.f32 %v6114_v8, %v17483_v61  ;;  %v6886_v30 = vpop.f32.mrb[25].mxu1  ;;  %v6116_v57 = vpop.f32.mrb[26].mxu0  ;;  %v14980_v63 = vld [vmem:[#allocation6 + $0x464] ss:$16 sps:$4 sm:$0xff]   ;;  %v19501_v40 = vld [vmem:[#allocation124_spill] sm:$0xff] }
 0x4e3   :  { %19496 = vst [vmem:[#allocation45_spill] sm:$0xff] %v17601_v16  ;;  %v17608_v36 = vpack.c.bf16 %v7156_v35, %v7152_v39  ;;  %v7031_v18 = vmul.f32 0.01, %v13360_v42  ;;  %v17611_v34 = vadd.f32 %v6886_v30, %v17487_v21  ;;  %v13362_v15 = vadd.f32 %v6116_v57, %v17475_v41  ;;  %v6888_v28 = vpop.f32.mrb[26].mxu1  ;;  %v6118_v48 = vpop.f32.mrb[27].mxu0  ;;  %9250 = vmatpush1.bf16.msra.mxu0 %v14966_v32  ;;  %v19500_v35 = vld [vmem:[#allocation119_spill] sm:$0xff] }
 0x4e4   :  { %19497 = vst [vmem:[#allocation43_spill] sm:$0xff] %v17604_v2  ;;  %v17614_v25 = vpack.c.bf16 %v7158_v38, %v7154_v3  ;;  %v7033_v54 = vmul.f32 0.01, %v13424_v11  ;;  %v7032_v26 = vmul.f32 0.01, %v13361_v52  ;;  %v13426_v44 = vadd.f32 %v6888_v28, %v17480_v37  ;;  %v6890_v39 = vpop.f32.mrb[27].mxu1  ;;  %10022 = vmatpush1.bf16.msra.mxu1 %v14969_v45  ;;  %9251 = vmatprep.subr.bf16.mxu0 %v14974_v23 }
 0x4e5   :  { %19498 = vst [vmem:[#allocation49_spill] sm:$0xff] %v17608_v36  ;;  %v13363_v0 = vadd.f32 %v6118_v48, %v17483_v61  ;;  %v7034_v13 = vmul.f32 0.01, %v17611_v34  ;;  %v7035_v1 = vmul.f32 0.01, %v13362_v15  ;;  %v13427_v46 = vadd.f32 %v6890_v39, %v17487_v21  ;;  %9097 = vmatmul.mubr.bf16.gmra.mrb[68].mxu0 %v19500_v35  ;;  %10023 = vmatprep.subr.bf16.mxu1 %v14977_v9 }
 0x4e6   :  { %19499 = vst [vmem:[#allocation47_spill] sm:$0xff] %v17614_v25  ;;  %v14983_v32 = vld [vmem:[#allocation6 + $0x46c] ss:$16 sps:$4 sm:$0xff]   ;;  %v7037_v38 = vmul.f32 0.01, %v13426_v44  ;;  %9869 = vmatmul.mubr.bf16.gmra.mrb[68].mxu1 %v19500_v35  ;;  %9106 = vmatprep.mubr.bf16.mxu0 %v19501_v40  ;;  %v7159_v8 = vmax.f32 %v13360_v42, %v7031_v18  ;;  %v7161_v30 = vmax.f32 %v13424_v11, %v7033_v54 }
 0x4e7   :  { %v7036_v3 = vmul.f32 0.01, %v13363_v0  ;;  %v7163_v57 = vmax.f32 %v13362_v15, %v7035_v1  ;;  %v7038_v45 = vmul.f32 0.01, %v13427_v46  ;;  %9878 = vmatprep.mubr.bf16.mxu1 %v19501_v40  ;;  %9252 = vmatpush1.bf16.msra.mxu0 %v14972_v14  ;;  %v14978_v23 = vld [vmem:[#allocation6 + $0x460] ss:$16 sps:$4 sm:$0xff]   ;;  %v7160_v28 = vmax.f32 %v13361_v52, %v7032_v26 }
 0x4e8   :  { %v7165_v48 = vmax.f32 %v13426_v44, %v7037_v38  ;;  %v6122_v2 = vpop.f32.mrb[28].mxu0  ;;  %10024 = vmatpush1.bf16.msra.mxu1 %v14975_v60  ;;  %9253 = vmatprep.subr.bf16.mxu0 %v14980_v63  ;;  %v14981_v9 = vld [vmem:[#allocation6 + $0x468] ss:$16 sps:$4 sm:$0xff]   ;;  %v14986_v16 = vld [vmem:[#allocation6 + $0x484] ss:$16 sps:$4 sm:$0xff]   ;;  %v7162_v35 = vmax.f32 %v17611_v34, %v7034_v13 }
 0x4e9   :  { %v7164_v39 = vmax.f32 %v13363_v0, %v7036_v3  ;;  %v17625_v25 = vpack.c.bf16 %v7163_v57, %v7159_v8  ;;  %v7166_v42 = vmax.f32 %v13427_v46, %v7038_v45  ;;  %v13364_v11 = vadd.f32 %v6122_v2, %v17475_v41  ;;  %v6894_v18 = vpop.f32.mrb[28].mxu1  ;;  %v6124_v15 = vpop.f32.mrb[29].mxu0  ;;  %10025 = vmatprep.subr.bf16.mxu1 %v14983_v32  ;;  %v14989_v14 = vld [vmem:[#allocation6 + $0x48c] ss:$16 sps:$4 sm:$0xff]   ;;  %v14984_v44 = vld [vmem:[#allocation6 + $0x480] ss:$16 sps:$4 sm:$0xff]  }
 0x4ea   :  { %v17628_v54 = vpack.c.bf16 %v7165_v48, %v7161_v30  ;;  %v13428_v52 = vadd.f32 %v6894_v18, %v17480_v37  ;;  %v13365_v60 = vadd.f32 %v6124_v15, %v17483_v61  ;;  %v6896_v63 = vpop.f32.mrb[29].mxu1  ;;  %v6126_v26 = vpop.f32.mrb[30].mxu0  ;;  %v14987_v0 = vld [vmem:[#allocation6 + $0x488] ss:$16 sps:$4 sm:$0xff]   ;;  %v14992_v38 = vld [vmem:[#allocation6 + $0x4a4] ss:$16 sps:$4 sm:$0xff]  }
 0x4eb   :  { %19502 = vst [vmem:[#allocation53_spill] sm:$0xff] %v17625_v25  ;;  %v17632_v34 = vpack.c.bf16 %v7164_v39, %v7160_v28  ;;  %v7039_v13 = vmul.f32 0.01, %v13364_v11  ;;  %v17635_v1 = vadd.f32 %v6896_v63, %v17487_v21  ;;  %v13366_v2 = vadd.f32 %v6126_v26, %v17475_v41  ;;  %v6898_v46 = vpop.f32.mrb[30].mxu1  ;;  %v6128_v32 = vpop.f32.mrb[31].mxu0  ;;  %9254 = vmatpush1.bf16.msra.mxu0 %v14978_v23  ;;  %v19506_v18 = vld [vmem:[#allocation122_spill] sm:$0xff] }
 0x4ec   :  { %19503 = vst [vmem:[#allocation51_spill] sm:$0xff] %v17628_v54  ;;  %v17638_v3 = vpack.c.bf16 %v7166_v42, %v7162_v35  ;;  %v7041_v40 = vmul.f32 0.01, %v13428_v52  ;;  %v7040_v8 = vmul.f32 0.01, %v13365_v60  ;;  %v13430_v30 = vadd.f32 %v6898_v46, %v17480_v37  ;;  %v6900_v45 = vpop.f32.mrb[31].mxu1  ;;  %10026 = vmatpush1.bf16.msra.mxu1 %v14981_v9  ;;  %9255 = vmatprep.subr.bf16.mxu0 %v14986_v16 }
 0x4ed   :  { %19504 = vst [vmem:[#allocation58_spill] sm:$0xff] %v17632_v34  ;;  %v13367_v57 = vadd.f32 %v6128_v32, %v17483_v61  ;;  %v7042_v28 = vmul.f32 0.01, %v17635_v1  ;;  %v7043_v48 = vmul.f32 0.01, %v13366_v2  ;;  %v13431_v39 = vadd.f32 %v6900_v45, %v17487_v21  ;;  %9107 = vmatmul.mubr.bf16.gmra.mrb[72].mxu0 %v19506_v18  ;;  %10027 = vmatprep.subr.bf16.mxu1 %v14989_v14  ;;  %v19507_v15 = vld [vmem:[#allocation128_spill] sm:$0xff] }
 0x4ee   :  { %19505 = vst [vmem:[#allocation55_spill] sm:$0xff] %v17638_v3  ;;  %v14995_v23 = vld [vmem:[#allocation6 + $0x4ac] ss:$16 sps:$4 sm:$0xff]   ;;  %v7045_v35 = vmul.f32 0.01, %v13430_v30  ;;  %9879 = vmatmul.mubr.bf16.gmra.mrb[72].mxu1 %v19506_v18  ;;  %9116 = vmatprep.mubr.bf16.mxu0 %v19507_v15  ;;  %v7167_v63 = vmax.f32 %v13364_v11, %v7039_v13  ;;  %v7169_v26 = vmax.f32 %v13428_v52, %v7041_v40 }
 0x4ef   :  { %v7044_v42 = vmul.f32 0.01, %v13367_v57  ;;  %v7171_v46 = vmax.f32 %v13366_v2, %v7043_v48  ;;  %v7046_v9 = vmul.f32 0.01, %v13431_v39  ;;  %9888 = vmatprep.mubr.bf16.mxu1 %v19507_v15  ;;  %9256 = vmatpush1.bf16.msra.mxu0 %v14984_v44  ;;  %v14990_v16 = vld [vmem:[#allocation6 + $0x4a0] ss:$16 sps:$4 sm:$0xff]   ;;  %v7168_v32 = vmax.f32 %v13365_v60, %v7040_v8 }
 0x4f0   :  { %v7173_v45 = vmax.f32 %v13430_v30, %v7045_v35  ;;  %v6132_v25 = vpop.f32.mrb[32].mxu0  ;;  %10028 = vmatpush1.bf16.msra.mxu1 %v14987_v0  ;;  %9257 = vmatprep.subr.bf16.mxu0 %v14992_v38  ;;  %v14993_v14 = vld [vmem:[#allocation6 + $0x4a8] ss:$16 sps:$4 sm:$0xff]   ;;  %v14998_v3 = vld [vmem:[#allocation6 + $0x4c4] ss:$16 sps:$4 sm:$0xff]   ;;  %v7170_v18 = vmax.f32 %v17635_v1, %v7042_v28 }
 0x4f1   :  { %v7172_v54 = vmax.f32 %v13367_v57, %v7044_v42  ;;  %v17649_v34 = vpack.c.bf16 %v7171_v46, %v7167_v63  ;;  %v7174_v11 = vmax.f32 %v13431_v39, %v7046_v9  ;;  %v13368_v52 = vadd.f32 %v6132_v25, %v17475_v41  ;;  %v6904_v13 = vpop.f32.mrb[32].mxu1  ;;  %v6134_v2 = vpop.f32.mrb[33].mxu0  ;;  %10029 = vmatprep.subr.bf16.mxu1 %v14995_v23  ;;  %v15001_v44 = vld [vmem:[#allocation6 + $0x4cc] ss:$16 sps:$4 sm:$0xff]   ;;  %v14996_v30 = vld [vmem:[#allocation6 + $0x4c0] ss:$16 sps:$4 sm:$0xff]  }
 0x4f2   :  { %v17652_v40 = vpack.c.bf16 %v7173_v45, %v7169_v26  ;;  %v13432_v60 = vadd.f32 %v6904_v13, %v17480_v37  ;;  %v13369_v0 = vadd.f32 %v6134_v2, %v17483_v61  ;;  %v6906_v38 = vpop.f32.mrb[33].mxu1  ;;  %v6136_v8 = vpop.f32.mrb[34].mxu0  ;;  %v14999_v57 = vld [vmem:[#allocation6 + $0x4c8] ss:$16 sps:$4 sm:$0xff]   ;;  %v15004_v35 = vld [vmem:[#allocation6 + $0x4e4] ss:$16 sps:$4 sm:$0xff]  }
 0x4f3   :  { %19508 = vst [vmem:[#allocation60_spill] sm:$0xff] %v17649_v34  ;;  %v17656_v1 = vpack.c.bf16 %v7172_v54, %v7168_v32  ;;  %v7047_v28 = vmul.f32 0.01, %v13368_v52  ;;  %v17659_v48 = vadd.f32 %v6906_v38, %v17487_v21  ;;  %v13370_v25 = vadd.f32 %v6136_v8, %v17475_v41  ;;  %v6908_v39 = vpop.f32.mrb[34].mxu1  ;;  %v6138_v23 = vpop.f32.mrb[35].mxu0  ;;  %9258 = vmatpush1.bf16.msra.mxu0 %v14990_v16  ;;  %v19512_v13 = vld [vmem:[#allocation126_spill] sm:$0xff] }
 0x4f4   :  { %19509 = vst [vmem:[#allocation57_spill] sm:$0xff] %v17652_v40  ;;  %v17662_v42 = vpack.c.bf16 %v7174_v11, %v7170_v18  ;;  %v7049_v15 = vmul.f32 0.01, %v13432_v60  ;;  %v7048_v63 = vmul.f32 0.01, %v13369_v0  ;;  %v13434_v26 = vadd.f32 %v6908_v39, %v17480_v37  ;;  %v6910_v54 = vpop.f32.mrb[35].mxu1  ;;  %10030 = vmatpush1.bf16.msra.mxu1 %v14993_v14  ;;  %9259 = vmatprep.subr.bf16.mxu0 %v14998_v3 }
 0x4f5   :  { %19510 = vst [vmem:[#allocation64_spill] sm:$0xff] %v17656_v1  ;;  %v13371_v46 = vadd.f32 %v6138_v23, %v17483_v61  ;;  %v7050_v9 = vmul.f32 0.01, %v17659_v48  ;;  %v7051_v32 = vmul.f32 0.01, %v13370_v25  ;;  %v13435_v45 = vadd.f32 %v6910_v54, %v17487_v21  ;;  %9117 = vmatmul.mubr.bf16.gmra.mrb[76].mxu0 %v19512_v13  ;;  %10031 = vmatprep.subr.bf16.mxu1 %v15001_v44  ;;  %v19513_v2 = vld [vmem:[#allocation132_spill] sm:$0xff] }
 0x4f6   :  { %19511 = vst [vmem:[#allocation62_spill] sm:$0xff] %v17662_v42  ;;  %v15007_v16 = vld [vmem:[#allocation6 + $0x4ec] ss:$16 sps:$4 sm:$0xff]   ;;  %v7053_v18 = vmul.f32 0.01, %v13434_v26  ;;  %9889 = vmatmul.mubr.bf16.gmra.mrb[76].mxu1 %v19512_v13  ;;  %9126 = vmatprep.mubr.bf16.mxu0 %v19513_v2  ;;  %v7175_v38 = vmax.f32 %v13368_v52, %v7047_v28  ;;  %v7177_v8 = vmax.f32 %v13432_v60, %v7049_v15 }
 0x4f7   :  { %v7052_v11 = vmul.f32 0.01, %v13371_v46  ;;  %v7179_v39 = vmax.f32 %v13370_v25, %v7051_v32  ;;  %v7054_v14 = vmul.f32 0.01, %v13435_v45  ;;  %9898 = vmatprep.mubr.bf16.mxu1 %v19513_v2  ;;  %9260 = vmatpush1.bf16.msra.mxu0 %v14996_v30  ;;  %v15002_v3 = vld [vmem:[#allocation6 + $0x4e0] ss:$16 sps:$4 sm:$0xff]   ;;  %v7176_v23 = vmax.f32 %v13369_v0, %v7048_v63 }
 0x4f8   :  { %v7181_v54 = vmax.f32 %v13434_v26, %v7053_v18  ;;  %v6142_v34 = vpop.f32.mrb[36].mxu0  ;;  %10032 = vmatpush1.bf16.msra.mxu1 %v14999_v57  ;;  %9261 = vmatprep.subr.bf16.mxu0 %v15004_v35  ;;  %v15005_v44 = vld [vmem:[#allocation6 + $0x4e8] ss:$16 sps:$4 sm:$0xff]   ;;  %v15010_v42 = vld [vmem:[#allocation6 + $0x504] ss:$16 sps:$4 sm:$0xff]   ;;  %v7178_v13 = vmax.f32 %v17659_v48, %v7050_v9 }
 0x4f9   :  { %v7180_v40 = vmax.f32 %v13371_v46, %v7052_v11  ;;  %v17673_v1 = vpack.c.bf16 %v7179_v39, %v7175_v38  ;;  %v7182_v52 = vmax.f32 %v13435_v45, %v7054_v14  ;;  %v13372_v60 = vadd.f32 %v6142_v34, %v17475_v41  ;;  %v6914_v28 = vpop.f32.mrb[36].mxu1  ;;  %v6144_v25 = vpop.f32.mrb[37].mxu0  ;;  %10033 = vmatprep.subr.bf16.mxu1 %v15007_v16  ;;  %v15013_v30 = vld [vmem:[#allocation6 + $0x50c] ss:$16 sps:$4 sm:$0xff]   ;;  %v15008_v26 = vld [vmem:[#allocation6 + $0x500] ss:$16 sps:$4 sm:$0xff]  }
 0x4fa   :  { %v17676_v15 = vpack.c.bf16 %v7181_v54, %v7177_v8  ;;  %v13436_v0 = vadd.f32 %v6914_v28, %v17480_v37  ;;  %v13373_v57 = vadd.f32 %v6144_v25, %v17483_v61  ;;  %v6916_v35 = vpop.f32.mrb[37].mxu1  ;;  %v6146_v63 = vpop.f32.mrb[38].mxu0  ;;  %v15011_v46 = vld [vmem:[#allocation6 + $0x508] ss:$16 sps:$4 sm:$0xff]   ;;  %v15016_v18 = vld [vmem:[#allocation6 + $0x524] ss:$16 sps:$4 sm:$0xff]  }
 0x4fb   :  { %19514 = vst [vmem:[#allocation68_spill] sm:$0xff] %v17673_v1  ;;  %v17680_v48 = vpack.c.bf16 %v7180_v40, %v7176_v23  ;;  %v7055_v9 = vmul.f32 0.01, %v13372_v60  ;;  %v17683_v32 = vadd.f32 %v6916_v35, %v17487_v21  ;;  %v13374_v34 = vadd.f32 %v6146_v63, %v17475_v41  ;;  %v6918_v45 = vpop.f32.mrb[38].mxu1  ;;  %v6148_v16 = vpop.f32.mrb[39].mxu0  ;;  %9262 = vmatpush1.bf16.msra.mxu0 %v15002_v3  ;;  %v19518_v28 = vld [vmem:[#allocation130_spill] sm:$0xff] }
 0x4fc   :  { %19515 = vst [vmem:[#allocation66_spill] sm:$0xff] %v17676_v15  ;;  %v17686_v11 = vpack.c.bf16 %v7182_v52, %v7178_v13  ;;  %v7057_v2 = vmul.f32 0.01, %v13436_v0  ;;  %v7056_v38 = vmul.f32 0.01, %v13373_v57  ;;  %v13438_v8 = vadd.f32 %v6918_v45, %v17480_v37  ;;  %v6920_v40 = vpop.f32.mrb[39].mxu1  ;;  %10034 = vmatpush1.bf16.msra.mxu1 %v15005_v44  ;;  %9263 = vmatprep.subr.bf16.mxu0 %v15010_v42 }
 0x4fd   :  { %19516 = vst [vmem:[#allocation72_spill] sm:$0xff] %v17680_v48  ;;  %v13375_v39 = vadd.f32 %v6148_v16, %v17483_v61  ;;  %v7058_v14 = vmul.f32 0.01, %v17683_v32  ;;  %v7059_v23 = vmul.f32 0.01, %v13374_v34  ;;  %v13439_v54 = vadd.f32 %v6920_v40, %v17487_v21  ;;  %9127 = vmatmul.mubr.bf16.gmra.mrb[80].mxu0 %v19518_v28  ;;  %10035 = vmatprep.subr.bf16.mxu1 %v15013_v30  ;;  %v19519_v25 = vld [vmem:[#allocation134_spill] sm:$0xff] }
 0x4fe   :  { %19517 = vst [vmem:[#allocation70_spill] sm:$0xff] %v17686_v11  ;;  %v15019_v3 = vld [vmem:[#allocation6 + $0x52c] ss:$16 sps:$4 sm:$0xff]   ;;  %v7061_v13 = vmul.f32 0.01, %v13438_v8  ;;  %9899 = vmatmul.mubr.bf16.gmra.mrb[80].mxu1 %v19518_v28  ;;  %9136 = vmatprep.mubr.bf16.mxu0 %v19519_v25  ;;  %v7183_v35 = vmax.f32 %v13372_v60, %v7055_v9  ;;  %v7185_v63 = vmax.f32 %v13436_v0, %v7057_v2 }
 0x4ff   :  { %v7060_v52 = vmul.f32 0.01, %v13375_v39  ;;  %v7187_v45 = vmax.f32 %v13374_v34, %v7059_v23  ;;  %v7062_v44 = vmul.f32 0.01, %v13439_v54  ;;  %9908 = vmatprep.mubr.bf16.mxu1 %v19519_v25  ;;  %9264 = vmatpush1.bf16.msra.mxu0 %v15008_v26  ;;  %v15014_v42 = vld [vmem:[#allocation6 + $0x520] ss:$16 sps:$4 sm:$0xff]   ;;  %v7184_v16 = vmax.f32 %v13373_v57, %v7056_v38 }
 0x500   :  { %v7189_v40 = vmax.f32 %v13438_v8, %v7061_v13  ;;  %v6152_v1 = vpop.f32.mrb[40].mxu0  ;;  %10036 = vmatpush1.bf16.msra.mxu1 %v15011_v46  ;;  %9265 = vmatprep.subr.bf16.mxu0 %v15016_v18  ;;  %v15017_v30 = vld [vmem:[#allocation6 + $0x528] ss:$16 sps:$4 sm:$0xff]   ;;  %v15022_v11 = vld [vmem:[#allocation6 + $0x544] ss:$16 sps:$4 sm:$0xff]   ;;  %v7186_v28 = vmax.f32 %v17683_v32, %v7058_v14 }
 0x501   :  { %v7188_v15 = vmax.f32 %v13375_v39, %v7060_v52  ;;  %v17697_v48 = vpack.c.bf16 %v7187_v45, %v7183_v35  ;;  %v7190_v60 = vmax.f32 %v13439_v54, %v7062_v44  ;;  %v13376_v0 = vadd.f32 %v6152_v1, %v17475_v41  ;;  %v6924_v9 = vpop.f32.mrb[40].mxu1  ;;  %v6154_v34 = vpop.f32.mrb[41].mxu0  ;;  %10037 = vmatprep.subr.bf16.mxu1 %v15019_v3  ;;  %v15025_v26 = vld [vmem:[#allocation6 + $0x54c] ss:$16 sps:$4 sm:$0xff]   ;;  %v15020_v8 = vld [vmem:[#allocation6 + $0x540] ss:$16 sps:$4 sm:$0xff]  }
 0x502   :  { %v17700_v2 = vpack.c.bf16 %v7189_v40, %v7185_v63  ;;  %v13440_v57 = vadd.f32 %v6924_v9, %v17480_v37  ;;  %v13377_v46 = vadd.f32 %v6154_v34, %v17483_v61  ;;  %v6926_v18 = vpop.f32.mrb[41].mxu1  ;;  %v6156_v38 = vpop.f32.mrb[42].mxu0  ;;  %v15023_v39 = vld [vmem:[#allocation6 + $0x548] ss:$16 sps:$4 sm:$0xff]   ;;  %v15028_v13 = vld [vmem:[#allocation6 + $0x564] ss:$16 sps:$4 sm:$0xff]  }
 0x503   :  { %19520 = vst [vmem:[#allocation76_spill] sm:$0xff] %v17697_v48  ;;  %v17704_v32 = vpack.c.bf16 %v7188_v15, %v7184_v16  ;;  %v7063_v14 = vmul.f32 0.01, %v13376_v0  ;;  %v17707_v23 = vadd.f32 %v6926_v18, %v17487_v21  ;;  %v13378_v1 = vadd.f32 %v6156_v38, %v17475_v41  ;;  %v6928_v54 = vpop.f32.mrb[42].mxu1  ;;  %v6158_v3 = vpop.f32.mrb[43].mxu0  ;;  %9266 = vmatpush1.bf16.msra.mxu0 %v15014_v42  ;;  %v19524_v9 = vld [vmem:[#allocation133_spill] sm:$0xff] }
 0x504   :  { %19521 = vst [vmem:[#allocation74_spill] sm:$0xff] %v17700_v2  ;;  %v17710_v52 = vpack.c.bf16 %v7190_v60, %v7186_v28  ;;  %v7065_v25 = vmul.f32 0.01, %v13440_v57  ;;  %v7064_v35 = vmul.f32 0.01, %v13377_v46  ;;  %v13442_v63 = vadd.f32 %v6928_v54, %v17480_v37  ;;  %v6930_v15 = vpop.f32.mrb[43].mxu1  ;;  %10038 = vmatpush1.bf16.msra.mxu1 %v15017_v30  ;;  %9267 = vmatprep.subr.bf16.mxu0 %v15022_v11 }
 0x505   :  { %19522 = vst [vmem:[#allocation80_spill] sm:$0xff] %v17704_v32  ;;  %v13379_v45 = vadd.f32 %v6158_v3, %v17483_v61  ;;  %v7066_v44 = vmul.f32 0.01, %v17707_v23  ;;  %v7067_v16 = vmul.f32 0.01, %v13378_v1  ;;  %v13443_v40 = vadd.f32 %v6930_v15, %v17487_v21  ;;  %9137 = vmatmul.mubr.bf16.gmra.mrb[84].mxu0 %v19524_v9  ;;  %10039 = vmatprep.subr.bf16.mxu1 %v15025_v26  ;;  %v19525_v34 = vld [vmem:[#allocation137_spill] sm:$0xff] }
 0x506   :  { %19523 = vst [vmem:[#allocation85_spill] sm:$0xff] %v17710_v52  ;;  %v15031_v42 = vld [vmem:[#allocation6 + $0x56c] ss:$16 sps:$4 sm:$0xff]   ;;  %v7069_v28 = vmul.f32 0.01, %v13442_v63  ;;  %9909 = vmatmul.mubr.bf16.gmra.mrb[84].mxu1 %v19524_v9  ;;  %9146 = vmatprep.mubr.bf16.mxu0 %v19525_v34  ;;  %v7191_v18 = vmax.f32 %v13376_v0, %v7063_v14  ;;  %v7193_v38 = vmax.f32 %v13440_v57, %v7065_v25 }
 0x507   :  { %v7068_v60 = vmul.f32 0.01, %v13379_v45  ;;  %v7195_v54 = vmax.f32 %v13378_v1, %v7067_v16  ;;  %v7070_v30 = vmul.f32 0.01, %v13443_v40  ;;  %9918 = vmatprep.mubr.bf16.mxu1 %v19525_v34  ;;  %9268 = vmatpush1.bf16.msra.mxu0 %v15020_v8  ;;  %v15026_v11 = vld [vmem:[#allocation6 + $0x560] ss:$16 sps:$4 sm:$0xff]   ;;  %v7192_v3 = vmax.f32 %v13377_v46, %v7064_v35 }
 0x508   :  { %v7197_v15 = vmax.f32 %v13442_v63, %v7069_v28  ;;  %v6162_v48 = vpop.f32.mrb[44].mxu0  ;;  %10040 = vmatpush1.bf16.msra.mxu1 %v15023_v39  ;;  %9269 = vmatprep.subr.bf16.mxu0 %v15028_v13  ;;  %v15029_v26 = vld [vmem:[#allocation6 + $0x568] ss:$16 sps:$4 sm:$0xff]   ;;  %v15034_v52 = vld [vmem:[#allocation6 + $0x584] ss:$16 sps:$4 sm:$0xff]   ;;  %v7194_v9 = vmax.f32 %v17707_v23, %v7066_v44 }
 0x509   :  { %v7196_v2 = vmax.f32 %v13379_v45, %v7068_v60  ;;  %v17721_v32 = vpack.c.bf16 %v7195_v54, %v7191_v18  ;;  %v7198_v0 = vmax.f32 %v13443_v40, %v7070_v30  ;;  %v13380_v57 = vadd.f32 %v6162_v48, %v17475_v41  ;;  %v6934_v14 = vpop.f32.mrb[44].mxu1  ;;  %v6164_v1 = vpop.f32.mrb[45].mxu0  ;;  %10041 = vmatprep.subr.bf16.mxu1 %v15031_v42  ;;  %v15037_v8 = vld [vmem:[#allocation6 + $0x58c] ss:$16 sps:$4 sm:$0xff]   ;;  %v15032_v63 = vld [vmem:[#allocation6 + $0x580] ss:$16 sps:$4 sm:$0xff]  }
 0x50a   :  { %v17724_v25 = vpack.c.bf16 %v7197_v15, %v7193_v38  ;;  %v13444_v46 = vadd.f32 %v6934_v14, %v17480_v37  ;;  %v13381_v39 = vadd.f32 %v6164_v1, %v17483_v61  ;;  %v6936_v13 = vpop.f32.mrb[45].mxu1  ;;  %v6166_v35 = vpop.f32.mrb[46].mxu0  ;;  %v15035_v45 = vld [vmem:[#allocation6 + $0x588] ss:$16 sps:$4 sm:$0xff]   ;;  %v15040_v28 = vld [vmem:[#allocation6 + $0x5a4] ss:$16 sps:$4 sm:$0xff]  }
 0x50b   :  { %19526 = vst [vmem:[#allocation83_spill] sm:$0xff] %v17721_v32  ;;  %v17728_v23 = vpack.c.bf16 %v7196_v2, %v7192_v3  ;;  %v7071_v44 = vmul.f32 0.01, %v13380_v57  ;;  %v17731_v16 = vadd.f32 %v6936_v13, %v17487_v21  ;;  %v13382_v48 = vadd.f32 %v6166_v35, %v17475_v41  ;;  %v6938_v40 = vpop.f32.mrb[46].mxu1  ;;  %v6168_v42 = vpop.f32.mrb[47].mxu0  ;;  %9270 = vmatpush1.bf16.msra.mxu0 %v15026_v11  ;;  %v19530_v14 = vld [vmem:[#allocation135_spill] sm:$0xff] }
 0x50c   :  { %19527 = vst [vmem:[#allocation89_spill] sm:$0xff] %v17724_v25  ;;  %v17734_v60 = vpack.c.bf16 %v7198_v0, %v7194_v9  ;;  %v7073_v34 = vmul.f32 0.01, %v13444_v46  ;;  %v7072_v18 = vmul.f32 0.01, %v13381_v39  ;;  %v13446_v38 = vadd.f32 %v6938_v40, %v17480_v37  ;;  %v6940_v2 = vpop.f32.mrb[47].mxu1  ;;  %10042 = vmatpush1.bf16.msra.mxu1 %v15029_v26  ;;  %9271 = vmatprep.subr.bf16.mxu0 %v15034_v52 }
 0x50d   :  { %19528 = vst [vmem:[#allocation87_spill] sm:$0xff] %v17728_v23  ;;  %v13383_v54 = vadd.f32 %v6168_v42, %v17483_v61  ;;  %v7074_v30 = vmul.f32 0.01, %v17731_v16  ;;  %v7075_v3 = vmul.f32 0.01, %v13382_v48  ;;  %v13447_v15 = vadd.f32 %v6940_v2, %v17487_v21  ;;  %9147 = vmatmul.mubr.bf16.gmra.mrb[88].mxu0 %v19530_v14  ;;  %10043 = vmatprep.subr.bf16.mxu1 %v15037_v8  ;;  %v19531_v1 = vld [vmem:[#allocation138_spill] sm:$0xff] }
 0x50e   :  { %19529 = vst [vmem:[#allocation93_spill] sm:$0xff] %v17734_v60  ;;  %v15043_v11 = vld [vmem:[#allocation6 + $0x5ac] ss:$16 sps:$4 sm:$0xff]   ;;  %v7077_v9 = vmul.f32 0.01, %v13446_v38  ;;  %9919 = vmatmul.mubr.bf16.gmra.mrb[88].mxu1 %v19530_v14  ;;  %9156 = vmatprep.mubr.bf16.mxu0 %v19531_v1  ;;  %v7199_v13 = vmax.f32 %v13380_v57, %v7071_v44  ;;  %v7201_v35 = vmax.f32 %v13444_v46, %v7073_v34 }
 0x50f   :  { %v7076_v0 = vmul.f32 0.01, %v13383_v54  ;;  %v7203_v40 = vmax.f32 %v13382_v48, %v7075_v3  ;;  %v7078_v26 = vmul.f32 0.01, %v13447_v15  ;;  %9928 = vmatprep.mubr.bf16.mxu1 %v19531_v1  ;;  %9272 = vmatpush1.bf16.msra.mxu0 %v15032_v63  ;;  %v15038_v52 = vld [vmem:[#allocation6 + $0x5a0] ss:$16 sps:$4 sm:$0xff]   ;;  %v7200_v42 = vmax.f32 %v13381_v39, %v7072_v18 }
 0x510   :  { %v7205_v2 = vmax.f32 %v13446_v38, %v7077_v9  ;;  %v6172_v32 = vpop.f32.mrb[48].mxu0  ;;  %10044 = vmatpush1.bf16.msra.mxu1 %v15035_v45  ;;  %9273 = vmatprep.subr.bf16.mxu0 %v15040_v28  ;;  %v15041_v8 = vld [vmem:[#allocation6 + $0x5a8] ss:$16 sps:$4 sm:$0xff]   ;;  %v15046_v60 = vld [vmem:[#allocation6 + $0x5c4] ss:$16 sps:$4 sm:$0xff]   ;;  %v7202_v14 = vmax.f32 %v17731_v16, %v7074_v30 }
 0x511   :  { %v7204_v25 = vmax.f32 %v13383_v54, %v7076_v0  ;;  %v17745_v23 = vpack.c.bf16 %v7203_v40, %v7199_v13  ;;  %v7206_v57 = vmax.f32 %v13447_v15, %v7078_v26  ;;  %v13384_v46 = vadd.f32 %v6172_v32, %v17475_v41  ;;  %v6944_v44 = vpop.f32.mrb[48].mxu1  ;;  %v6174_v48 = vpop.f32.mrb[49].mxu0  ;;  %10045 = vmatprep.subr.bf16.mxu1 %v15043_v11  ;;  %v15049_v63 = vld [vmem:[#allocation6 + $0x5cc] ss:$16 sps:$4 sm:$0xff]   ;;  %v15044_v38 = vld [vmem:[#allocation6 + $0x5c0] ss:$16 sps:$4 sm:$0xff]  }
 0x512   :  { %v17748_v34 = vpack.c.bf16 %v7205_v2, %v7201_v35  ;;  %v13448_v39 = vadd.f32 %v6944_v44, %v17480_v37  ;;  %v13385_v45 = vadd.f32 %v6174_v48, %v17483_v61  ;;  %v6946_v28 = vpop.f32.mrb[49].mxu1  ;;  %v6176_v18 = vpop.f32.mrb[50].mxu0  ;;  %v15047_v54 = vld [vmem:[#allocation6 + $0x5c8] ss:$16 sps:$4 sm:$0xff]   ;;  %v15052_v9 = vld [vmem:[#allocation6 + $0x5e4] ss:$16 sps:$4 sm:$0xff]  }
 0x513   :  { %19532 = vst [vmem:[#allocation91_spill] sm:$0xff] %v17745_v23  ;;  %v17752_v16 = vpack.c.bf16 %v7204_v25, %v7200_v42  ;;  %v7079_v30 = vmul.f32 0.01, %v13384_v46  ;;  %v13449_v3 = vadd.f32 %v6946_v28, %v17487_v21  ;;  %v13386_v32 = vadd.f32 %v6176_v18, %v17475_v41  ;;  %v6948_v15 = vpop.f32.mrb[50].mxu1  ;;  %v6178_v11 = vpop.f32.mrb[51].mxu0  ;;  %9274 = vmatpush1.bf16.msra.mxu0 %v15038_v52  ;;  %v19536_v44 = vld [vmem:[#allocation23_spill] sm:$0xff] }
 0x514   :  { %19533 = vst [vmem:[#allocation97_spill] sm:$0xff] %v17748_v34  ;;  %v17756_v0 = vpack.c.bf16 %v7206_v57, %v7202_v14  ;;  %v7081_v1 = vmul.f32 0.01, %v13448_v39  ;;  %v7080_v13 = vmul.f32 0.01, %v13385_v45  ;;  %v13450_v35 = vadd.f32 %v6948_v15, %v17480_v37  ;;  %v6950_v26 = vpop.f32.mrb[51].mxu1  ;;  %10046 = vmatpush1.bf16.msra.mxu1 %v15041_v8  ;;  %9275 = vmatprep.subr.bf16.mxu0 %v15046_v60 }
 0x515   :  { %19534 = vst [vmem:[#allocation95_spill] sm:$0xff] %v17752_v16  ;;  %v13387_v40 = vadd.f32 %v6178_v11, %v17483_v61  ;;  %v7082_v25 = vmul.f32 0.01, %v13449_v3  ;;  %v7083_v42 = vmul.f32 0.01, %v13386_v32  ;;  %v13451_v2 = vadd.f32 %v6950_v26, %v17487_v21  ;;  %9157 = vmatmul.mubr.bf16.gmra.mrb[92].mxu0 %v19536_v44  ;;  %10047 = vmatprep.subr.bf16.mxu1 %v15049_v63  ;;  %v19537_v57 = vld [vmem:[#allocation139_spill] sm:$0xff] }
 0x516   :  { %19535 = vst [vmem:[#allocation101_spill] sm:$0xff] %v17756_v0  ;;  %v15055_v52 = vld [vmem:[#allocation6 + $0x5ec] ss:$16 sps:$4 sm:$0xff]   ;;  %v7085_v48 = vmul.f32 0.01, %v13450_v35  ;;  %9929 = vmatmul.mubr.bf16.gmra.mrb[92].mxu1 %v19536_v44  ;;  %9166 = vmatprep.mubr.bf16.mxu0 %v19537_v57  ;;  %v7207_v28 = vmax.f32 %v13384_v46, %v7079_v30  ;;  %v7209_v18 = vmax.f32 %v13448_v39, %v7081_v1 }
 0x517   :  { %v7084_v14 = vmul.f32 0.01, %v13387_v40  ;;  %v7211_v15 = vmax.f32 %v13386_v32, %v7083_v42  ;;  %v7086_v11 = vmul.f32 0.01, %v13451_v2  ;;  %9938 = vmatprep.mubr.bf16.mxu1 %v19537_v57  ;;  %9276 = vmatpush1.bf16.msra.mxu0 %v15044_v38  ;;  %v15050_v60 = vld [vmem:[#allocation6 + $0x5e0] ss:$16 sps:$4 sm:$0xff]   ;;  %v7208_v8 = vmax.f32 %v13385_v45, %v7080_v13 }
 0x518   :  { %v7213_v26 = vmax.f32 %v13450_v35, %v7085_v48  ;;  %v6182_v23 = vpop.f32.mrb[52].mxu0  ;;  %10048 = vmatpush1.bf16.msra.mxu1 %v15047_v54  ;;  %9277 = vmatprep.subr.bf16.mxu0 %v15052_v9  ;;  %v15053_v63 = vld [vmem:[#allocation6 + $0x5e8] ss:$16 sps:$4 sm:$0xff]   ;;  %v15058_v0 = vld [vmem:[#allocation6 + $0x604] ss:$16 sps:$4 sm:$0xff]   ;;  %v7210_v16 = vmax.f32 %v13449_v3, %v7082_v25 }
 0x519   :  { %v7212_v34 = vmax.f32 %v13387_v40, %v7084_v14  ;;  %v17765_v44 = vpack.c.bf16 %v7211_v15, %v7207_v28  ;;  %v7214_v36 = vmax.f32 %v13451_v2, %v7086_v11  ;;  %v13388_v46 = vadd.f32 %v6182_v23, %v17475_v41  ;;  %v6954_v39 = vpop.f32.mrb[52].mxu1  ;;  %v6184_v30 = vpop.f32.mrb[53].mxu0  ;;  %10049 = vmatprep.subr.bf16.mxu1 %v15055_v52  ;;  %v15061_v32 = vld [vmem:[#allocation6 + $0x60c] ss:$16 sps:$4 sm:$0xff]   ;;  %v19539_v15 = vld [vmem:[#allocation21_spill] sm:$0xff] }
 0x51a   :  { %v17768_v38 = vpack.c.bf16 %v7213_v26, %v7209_v18  ;;  %v13452_v45 = vadd.f32 %v6954_v39, %v17480_v37  ;;  %v13389_v1 = vadd.f32 %v6184_v30, %v17483_v61  ;;  %v6956_v54 = vpop.f32.mrb[53].mxu1  ;;  %v6186_v9 = vpop.f32.mrb[54].mxu0 }
 0x51b   :  { %v17772_v13 = vpack.c.bf16 %v7212_v34, %v7208_v8  ;;  %v7087_v3 = vmul.f32 0.01, %v13388_v46  ;;  %v13453_v35 = vadd.f32 %v6956_v54, %v17487_v21  ;;  %v13390_v40 = vadd.f32 %v6186_v9, %v17475_v41  ;;  %v6958_v23 = vpop.f32.mrb[54].mxu1  ;;  %v6188_v25 = vpop.f32.mrb[55].mxu0  ;;  %9278 = vmatpush1.bf16.msra.mxu0 %v15050_v60 }
 0x51c   :  { %19538 = vst [vmem:[#allocation99_spill] sm:$0xff] %v17768_v38  ;;  %v17776_v42 = vpack.c.bf16 %v7214_v36, %v7210_v16  ;;  %v7089_v2 = vmul.f32 0.01, %v13452_v45  ;;  %v7088_v52 = vmul.f32 0.01, %v13389_v1  ;;  %v13454_v48 = vadd.f32 %v6958_v23, %v17480_v37  ;;  %v6960_v57 = vpop.f32.mrb[55].mxu1  ;;  %10050 = vmatpush1.bf16.msra.mxu1 %v15053_v63  ;;  %9440 = vmatprep.subr.bf16.mxu0 %v15058_v0 }
 0x51d   :  { %v13391_v14 = vadd.f32 %v6188_v25, %v17483_v61  ;;  %v7090_v34 = vmul.f32 0.01, %v13453_v35  ;;  %v7091_v28 = vmul.f32 0.01, %v13390_v40  ;;  %v13455_v18 = vadd.f32 %v6960_v57, %v17487_v21  ;;  %9167 = vmatmul.mubr.bf16.gmra.mrb[96].mxu0 %v19539_v15  ;;  %10212 = vmatprep.subr.bf16.mxu1 %v15061_v32  ;;  %v19540_v36 = vld [vmem:[#allocation141_spill] sm:$0xff] }
 0x51e   :  { %v7093_v11 = vmul.f32 0.01, %v13454_v48  ;;  %9939 = vmatmul.mubr.bf16.gmra.mrb[96].mxu1 %v19539_v15  ;;  %9176 = vmatprep.mubr.bf16.mxu0 %v19540_v36  ;;  %v7215_v16 = vmax.f32 %v13388_v46, %v7087_v3  ;;  %v7217_v63 = vmax.f32 %v13452_v45, %v7089_v2  ;;  %v7216_v0 = vmax.f32 %v13389_v1, %v7088_v52 }
 0x51f   :  { %v7092_v60 = vmul.f32 0.01, %v13391_v14  ;;  %v7219_v8 = vmax.f32 %v13390_v40, %v7091_v28  ;;  %v7094_v26 = vmul.f32 0.01, %v13455_v18  ;;  %9948 = vmatprep.mubr.bf16.mxu1 %v19540_v36  ;;  %v7218_v9 = vmax.f32 %v13453_v35, %v7090_v34 }
 0x520   :  { %v7221_v39 = vmax.f32 %v13454_v48, %v7093_v11  ;;  %v6192_v54 = vpop.f32.mrb[56].mxu0 }
 0x521   :  { %v7220_v30 = vmax.f32 %v13391_v14, %v7092_v60  ;;  %v17785_v23 = vpack.c.bf16 %v7219_v8, %v7215_v16  ;;  %v7222_v32 = vmax.f32 %v13455_v18, %v7094_v26  ;;  %v13392_v25 = vadd.f32 %v6192_v54, %v17475_v41  ;;  %v6964_v57 = vpop.f32.mrb[56].mxu1  ;;  %v6194_v15 = vpop.f32.mrb[57].mxu0 }
 0x522   :  { %v17788_v38 = vpack.c.bf16 %v7221_v39, %v7217_v63  ;;  %v13456_v46 = vadd.f32 %v6964_v57, %v17480_v37  ;;  %v13393_v3 = vadd.f32 %v6194_v15, %v17483_v61  ;;  %v6966_v40 = vpop.f32.mrb[57].mxu1  ;;  %v6196_v45 = vpop.f32.mrb[58].mxu0  ;;  %v19545_v63 = vld [vmem:[#allocation140_spill] sm:$0xff] }
 0x523   :  { %19541 = vst [vmem:[#allocation107_spill] sm:$0xff] %v17785_v23  ;;  %v17792_v1 = vpack.c.bf16 %v7220_v30, %v7216_v0  ;;  %v7095_v2 = vmul.f32 0.01, %v13392_v25  ;;  %v13457_v35 = vadd.f32 %v6966_v40, %v17487_v21  ;;  %v13394_v52 = vadd.f32 %v6196_v45, %v17475_v41  ;;  %v6968_v48 = vpop.f32.mrb[58].mxu1  ;;  %v6198_v14 = vpop.f32.mrb[59].mxu0  ;;  %v19546_v30 = vld [vmem:[#allocation143_spill] sm:$0xff] }
 0x524   :  { %19542 = vst [vmem:[#allocation105_spill] sm:$0xff] %v17788_v38  ;;  %v17796_v34 = vpack.c.bf16 %v7222_v32, %v7218_v9  ;;  %v7097_v28 = vmul.f32 0.01, %v13456_v46  ;;  %v7096_v18 = vmul.f32 0.01, %v13393_v3  ;;  %v13458_v11 = vadd.f32 %v6968_v48, %v17480_v37  ;;  %v6970_v36 = vpop.f32.mrb[59].mxu1 }
 0x525   :  { %19543 = vst [vmem:[#allocation111_spill] sm:$0xff] %v17792_v1  ;;  %v13395_v60 = vadd.f32 %v6198_v14, %v17483_v61  ;;  %v7098_v16 = vmul.f32 0.01, %v13457_v35  ;;  %v7099_v8 = vmul.f32 0.01, %v13394_v52  ;;  %v13459_v26 = vadd.f32 %v6970_v36, %v17487_v21  ;;  %9177 = vmatmul.mubr.bf16.gmra.mrb[100].mxu0 %v19545_v63 }
 0x526   :  { %19544 = vst [vmem:[#allocation109_spill] sm:$0xff] %v17796_v34  ;;  %v7101_v0 = vmul.f32 0.01, %v13458_v11  ;;  %9949 = vmatmul.mubr.bf16.gmra.mrb[100].mxu1 %v19545_v63  ;;  %9186 = vmatprep.mubr.bf16.mxu0 %v19546_v30  ;;  %v7223_v54 = vmax.f32 %v13392_v25, %v7095_v2  ;;  %v7225_v57 = vmax.f32 %v13456_v46, %v7097_v28 }
 0x527   :  { %v7100_v39 = vmul.f32 0.01, %v13395_v60  ;;  %v7227_v9 = vmax.f32 %v13394_v52, %v7099_v8  ;;  %v7102_v32 = vmul.f32 0.01, %v13459_v26  ;;  %9958 = vmatprep.mubr.bf16.mxu1 %v19546_v30  ;;  %v7224_v15 = vmax.f32 %v13393_v3, %v7096_v18 }
 0x528   :  { %v7229_v40 = vmax.f32 %v13458_v11, %v7101_v0  ;;  %v6202_v48 = vpop.f32.mrb[60].mxu0  ;;  %v7226_v14 = vmax.f32 %v13457_v35, %v7098_v16 }
 0x529   :  { %v7228_v45 = vmax.f32 %v13395_v60, %v7100_v39  ;;  %v17805_v36 = vpack.c.bf16 %v7227_v9, %v7223_v54  ;;  %v7230_v38 = vmax.f32 %v13459_v26, %v7102_v32  ;;  %v13396_v23 = vadd.f32 %v6202_v48, %v17475_v41  ;;  %v6974_v34 = vpop.f32.mrb[60].mxu1  ;;  %v6204_v63 = vpop.f32.mrb[61].mxu0  ;;  %v19547_v32 = vld [vmem:[#allocation142_spill] sm:$0xff] }
 0x52a   :  { %v17808_v1 = vpack.c.bf16 %v7229_v40, %v7225_v57  ;;  %v13460_v25 = vadd.f32 %v6974_v34, %v17480_v37  ;;  %v13397_v2 = vadd.f32 %v6204_v63, %v17483_v61  ;;  %v6976_v52 = vpop.f32.mrb[61].mxu1  ;;  %v6206_v46 = vpop.f32.mrb[62].mxu0 }
 0x52b   :  { %v17812_v3 = vpack.c.bf16 %v7228_v45, %v7224_v15  ;;  %v7103_v28 = vmul.f32 0.01, %v13396_v23  ;;  %v13461_v35 = vadd.f32 %v6976_v52, %v17487_v21  ;;  %v13398_v18 = vadd.f32 %v6206_v46, %v17475_v41  ;;  %v6978_v11 = vpop.f32.mrb[62].mxu1  ;;  %v6208_v60 = vpop.f32.mrb[63].mxu0  ;;  %v19548_v41 = vld [vmem:[#allocation146_spill] sm:$0xff] }
 0x52c   :  { %v17816_v16 = vpack.c.bf16 %v7230_v38, %v7226_v14  ;;  %v7105_v8 = vmul.f32 0.01, %v13460_v25  ;;  %v7104_v26 = vmul.f32 0.01, %v13397_v2  ;;  %v13462_v0 = vadd.f32 %v6978_v11, %v17480_v37  ;;  %v6980_v39 = vpop.f32.mrb[63].mxu1 }
 0x52d   :  { %v13399_v34 = vadd.f32 %v6208_v60, %v17483_v61  ;;  %v7106_v30 = vmul.f32 0.01, %v13461_v35  ;;  %v7107_v54 = vmul.f32 0.01, %v13398_v18  ;;  %v13463_v9 = vadd.f32 %v6980_v39, %v17487_v21  ;;  %9187 = vmatmul.mubr.bf16.gmra.mrb[104].mxu0 %v19547_v32  ;;  %v19549_v39 = vld [vmem:[#allocation145_spill] sm:$0xff] }
 0x52e   :  { %v7109_v57 = vmul.f32 0.01, %v13462_v0  ;;  %9959 = vmatmul.mubr.bf16.gmra.mrb[104].mxu1 %v19547_v32  ;;  %9196 = vmatprep.mubr.bf16.mxu0 %v19548_v41  ;;  %v7231_v38 = vmax.f32 %v13396_v23, %v7103_v28  ;;  %v7233_v37 = vmax.f32 %v13460_v25, %v7105_v8  ;;  %v7232_v61 = vmax.f32 %v13397_v2, %v7104_v26  ;;  %v19550_v23 = vld [vmem:[#allocation148_spill] sm:$0xff]  ;;  %v19551_v25 = vld [vmem:[#allocation147_spill] sm:$0xff]  ;;  %v19552_v2 = vld [vmem:[#allocation150_spill] sm:$0xff] }
 0x52f   :  { %v7108_v15 = vmul.f32 0.01, %v13399_v34  ;;  %v7235_v40 = vmax.f32 %v13398_v18, %v7107_v54  ;;  %v7110_v45 = vmul.f32 0.01, %v13463_v9  ;;  %9968 = vmatprep.mubr.bf16.mxu1 %v19548_v41  ;;  %v7234_v63 = vmax.f32 %v13461_v35, %v7106_v30  ;;  %v19553_v28 = vld [vmem:[#allocation149_spill] sm:$0xff]  ;;  %v19554_v35 = vld [vmem:[#allocation152_spill] sm:$0xff] }
 0x530   :  { %v7237_v48 = vmax.f32 %v13462_v0, %v7109_v57  ;;  %v19555_v18 = vld [vmem:[#allocation151_spill] sm:$0xff]  ;;  %v19557_v26 = vld [vmem:[#allocation154_spill] sm:$0xff]  ;;  %v19558_v0 = vld [vmem:[#allocation156_spill] sm:$0xff] }
 0x531   :  { %v7236_v14 = vmax.f32 %v13399_v34, %v7108_v15  ;;  %v17825_v52 = vpack.c.bf16 %v7235_v40, %v7231_v38  ;;  %v7238_v21 = vmax.f32 %v13463_v9, %v7110_v45  ;;  %v19556_v8 = vld [vmem:[#allocation155_spill] sm:$0xff]  ;;  %v15059_v30 = vld [vmem:[#allocation6 + $0x608] ss:$16 sps:$4 sm:$0xff]   ;;  %v15067_v32 = vld [vmem:[#allocation6 + $0x62c] ss:$16 sps:$4 sm:$0xff]  }
 0x532   :  { %v17827_v46 = vpack.c.bf16 %v7237_v48, %v7233_v37  ;;  %v15056_v34 = vld [vmem:[#allocation6 + $0x600] ss:$16 sps:$4 sm:$0xff]   ;;  %v15064_v54 = vld [vmem:[#allocation6 + $0x624] ss:$16 sps:$4 sm:$0xff]   ;;  %v19560_v57 = vld [vmem:[#allocation158_spill] sm:$0xff] }
 0x533   :  { %v17829_v11 = vpack.c.bf16 %v7236_v14, %v7232_v61  ;;  %v17831_v60 = vpack.c.bf16 %v7238_v21, %v7234_v63  ;;  %v19559_v9 = vld [vmem:[#allocation39_spill] sm:$0xff]  ;;  %v15065_v41 = vld [vmem:[#allocation6 + $0x628] ss:$16 sps:$4 sm:$0xff]   ;;  %v15073_v40 = vld [vmem:[#allocation6 + $0x64c] ss:$16 sps:$4 sm:$0xff]  }
 0x534   :  { %v15062_v15 = vld [vmem:[#allocation6 + $0x620] ss:$16 sps:$4 sm:$0xff]   ;;  %v15070_v38 = vld [vmem:[#allocation6 + $0x644] ss:$16 sps:$4 sm:$0xff]   ;;  %v15071_v37 = vld [vmem:[#allocation6 + $0x648] ss:$16 sps:$4 sm:$0xff]  }
 0x535   :  { %9197 = vmatmul.mubr.bf16.gmra.mrb[108].mxu0 %v19549_v39  ;;  %v15068_v45 = vld [vmem:[#allocation6 + $0x640] ss:$16 sps:$4 sm:$0xff]   ;;  %v15076_v61 = vld [vmem:[#allocation6 + $0x664] ss:$16 sps:$4 sm:$0xff]   ;;  %v19561_v48 = vld [vmem:[#allocation42_spill] sm:$0xff] }
 0x536   :  { %9969 = vmatmul.mubr.bf16.gmra.mrb[108].mxu1 %v19549_v39  ;;  %9206 = vmatprep.mubr.bf16.mxu0 %v19550_v23  ;;  %v15079_v14 = vld [vmem:[#allocation6 + $0x66c] ss:$16 sps:$4 sm:$0xff]   ;;  %v15074_v21 = vld [vmem:[#allocation6 + $0x660] ss:$16 sps:$4 sm:$0xff]   ;;  %v15077_v39 = vld [vmem:[#allocation6 + $0x668] ss:$16 sps:$4 sm:$0xff]  }
 0x537   :  { %9978 = vmatprep.mubr.bf16.mxu1 %v19550_v23  ;;  %v19562_v63 = vld [vmem:[#allocation160_spill] sm:$0xff]  ;;  %v15082_v23 = vld [vmem:[#allocation6 + $0x684] ss:$16 sps:$4 sm:$0xff]  }
 0x53d   :  { %9207 = vmatmul.mubr.bf16.gmra.mrb[112].mxu0 %v19551_v25 }
 0x53e   :  { %9979 = vmatmul.mubr.bf16.gmra.mrb[112].mxu1 %v19551_v25  ;;  %9216 = vmatprep.mubr.bf16.mxu0 %v19552_v2  ;;  %v15085_v25 = vld [vmem:[#allocation6 + $0x68c] ss:$16 sps:$4 sm:$0xff]  }
 0x53f   :  { %9988 = vmatprep.mubr.bf16.mxu1 %v19552_v2  ;;  %v15080_v2 = vld [vmem:[#allocation6 + $0x680] ss:$16 sps:$4 sm:$0xff]  }
 0x545   :  { %9217 = vmatmul.mubr.bf16.gmra.mrb[116].mxu0 %v19553_v28 }
 0x546   :  { %9989 = vmatmul.mubr.bf16.gmra.mrb[116].mxu1 %v19553_v28  ;;  %9226 = vmatprep.mubr.bf16.mxu0 %v19554_v35  ;;  %v15083_v28 = vld [vmem:[#allocation6 + $0x688] ss:$16 sps:$4 sm:$0xff]  }
 0x547   :  { %9998 = vmatprep.mubr.bf16.mxu1 %v19554_v35  ;;  %v15088_v35 = vld [vmem:[#allocation6 + $0x6a4] ss:$16 sps:$4 sm:$0xff]  }
 0x54d   :  { %9227 = vmatmul.mubr.bf16.gmra.mrb[120].mxu0 %v19555_v18 }
 0x54e   :  { %9999 = vmatmul.mubr.bf16.gmra.mrb[120].mxu1 %v19555_v18  ;;  %9236 = vmatprep.mubr.bf16.mxu0 %v19556_v8  ;;  %v19563_v18 = vld [vmem:[#allocation46_spill] sm:$0xff] }
 0x54f   :  { %10008 = vmatprep.mubr.bf16.mxu1 %v19556_v8  ;;  %v15091_v8 = vld [vmem:[#allocation6 + $0x6ac] ss:$16 sps:$4 sm:$0xff]  }
 0x555   :  { %9237 = vmatmul.mubr.bf16.gmra.mrb[124].mxu0 %v19557_v26 }
 0x556   :  { %10009 = vmatmul.mubr.bf16.gmra.mrb[124].mxu1 %v19557_v26  ;;  %9279 = vmatprep.mubr.bf16.mxu0 %v19558_v0  ;;  %v19564_v26 = vld [vmem:[#allocation162_spill] sm:$0xff] }
 0x557   :  { %10051 = vmatprep.mubr.bf16.mxu1 %v19558_v0  ;;  %v15086_v0 = vld [vmem:[#allocation6 + $0x6a0] ss:$16 sps:$4 sm:$0xff]  }
 0x55d   :  { %9280 = vmatmul.mubr.bf16.vlgmr.msra.gmra.mrb[64].mxu0 %v19559_v9 }
 0x55e   :  { %10052 = vmatmul.mubr.bf16.vlgmr.msra.gmra.mrb[64].mxu1 %v19559_v9  ;;  %9289 = vmatprep.mubr.bf16.mxu0 %v19560_v57  ;;  %v15092_v9 = vld [vmem:[#allocation6 + $0x6c0] ss:$16 sps:$4 sm:$0xff]  }
 0x55f   :  { %9441 = vmatpush1.bf16.msra.mxu0 %v15056_v34  ;;  %10061 = vmatprep.mubr.bf16.mxu1 %v19560_v57  ;;  %v15089_v34 = vld [vmem:[#allocation6 + $0x6a8] ss:$16 sps:$4 sm:$0xff]   ;;  %v15100_v57 = vld [vmem:[#allocation6 + $0x6e4] ss:$16 sps:$4 sm:$0xff]  }
 0x560   :  { %10213 = vmatpush1.bf16.msra.mxu1 %v15059_v30  ;;  %9442 = vmatprep.subr.bf16.mxu0 %v15064_v54  ;;  %v15094_v30 = vld [vmem:[#allocation6 + $0x6c4] ss:$16 sps:$4 sm:$0xff]   ;;  %v15097_v54 = vld [vmem:[#allocation6 + $0x6cc] ss:$16 sps:$4 sm:$0xff]  }
 0x561   :  { %10214 = vmatprep.subr.bf16.mxu1 %v15067_v32  ;;  %v15095_v32 = vld [vmem:[#allocation6 + $0x6c8] ss:$16 sps:$4 sm:$0xff]  }
 0x563   :  { %9443 = vmatpush1.bf16.msra.mxu0 %v15062_v15  ;;  %v19565_v15 = vld [vmem:[#allocation50_spill] sm:$0xff] }
 0x564   :  { %10215 = vmatpush1.bf16.msra.mxu1 %v15065_v41  ;;  %9444 = vmatprep.subr.bf16.mxu0 %v15070_v38  ;;  %v15103_v41 = vld [vmem:[#allocation6 + $0x6ec] ss:$16 sps:$4 sm:$0xff]  }
 0x565   :  { %9290 = vmatmul.mubr.bf16.gmra.mrb[68].mxu0 %v19561_v48  ;;  %10216 = vmatprep.subr.bf16.mxu1 %v15073_v40  ;;  %v19566_v38 = vld [vmem:[#allocation164_spill] sm:$0xff]  ;;  %v15098_v40 = vld [vmem:[#allocation6 + $0x6e0] ss:$16 sps:$4 sm:$0xff]  }
 0x566   :  { %10062 = vmatmul.mubr.bf16.gmra.mrb[68].mxu1 %v19561_v48  ;;  %9299 = vmatprep.mubr.bf16.mxu0 %v19562_v63  ;;  %v15104_v48 = vld [vmem:[#allocation6 + $0x700] ss:$16 sps:$4 sm:$0xff]  }
 0x567   :  { %10071 = vmatprep.mubr.bf16.mxu1 %v19562_v63  ;;  %9445 = vmatpush1.bf16.msra.mxu0 %v15068_v45  ;;  %v15101_v45 = vld [vmem:[#allocation6 + $0x6e8] ss:$16 sps:$4 sm:$0xff]   ;;  %v15112_v63 = vld [vmem:[#allocation6 + $0x724] ss:$16 sps:$4 sm:$0xff]  }
 0x568   :  { %10217 = vmatpush1.bf16.msra.mxu1 %v15071_v37  ;;  %9446 = vmatprep.subr.bf16.mxu0 %v15076_v61  ;;  %v15106_v37 = vld [vmem:[#allocation6 + $0x704] ss:$16 sps:$4 sm:$0xff]   ;;  %v15109_v61 = vld [vmem:[#allocation6 + $0x70c] ss:$16 sps:$4 sm:$0xff]  }
 0x569   :  { %10218 = vmatprep.subr.bf16.mxu1 %v15079_v14  ;;  %v15107_v14 = vld [vmem:[#allocation6 + $0x708] ss:$16 sps:$4 sm:$0xff]  }
 0x56b   :  { %9447 = vmatpush1.bf16.msra.mxu0 %v15074_v21  ;;  %v19567_v21 = vld [vmem:[#allocation54_spill] sm:$0xff] }
 0x56c   :  { %10219 = vmatpush1.bf16.msra.mxu1 %v15077_v39  ;;  %9448 = vmatprep.subr.bf16.mxu0 %v15082_v23  ;;  %v15115_v39 = vld [vmem:[#allocation6 + $0x72c] ss:$16 sps:$4 sm:$0xff]  }
 0x56d   :  { %9300 = vmatmul.mubr.bf16.gmra.mrb[72].mxu0 %v19563_v18  ;;  %10220 = vmatprep.subr.bf16.mxu1 %v15085_v25  ;;  %v19568_v23 = vld [vmem:[#allocation166_spill] sm:$0xff]  ;;  %v15110_v25 = vld [vmem:[#allocation6 + $0x720] ss:$16 sps:$4 sm:$0xff]  }
 0x56e   :  { %10072 = vmatmul.mubr.bf16.gmra.mrb[72].mxu1 %v19563_v18  ;;  %9309 = vmatprep.mubr.bf16.mxu0 %v19564_v26  ;;  %v15116_v18 = vld [vmem:[#allocation6 + $0x740] ss:$16 sps:$4 sm:$0xff]  }
 0x56f   :  { %10081 = vmatprep.mubr.bf16.mxu1 %v19564_v26  ;;  %9449 = vmatpush1.bf16.msra.mxu0 %v15080_v2  ;;  %v15113_v2 = vld [vmem:[#allocation6 + $0x728] ss:$16 sps:$4 sm:$0xff]   ;;  %v15124_v26 = vld [vmem:[#allocation6 + $0x764] ss:$16 sps:$4 sm:$0xff]  }
 0x570   :  { %10221 = vmatpush1.bf16.msra.mxu1 %v15083_v28  ;;  %9450 = vmatprep.subr.bf16.mxu0 %v15088_v35  ;;  %v15118_v28 = vld [vmem:[#allocation6 + $0x744] ss:$16 sps:$4 sm:$0xff]   ;;  %v15121_v35 = vld [vmem:[#allocation6 + $0x74c] ss:$16 sps:$4 sm:$0xff]  }
 0x571   :  { %10222 = vmatprep.subr.bf16.mxu1 %v15091_v8  ;;  %v15119_v8 = vld [vmem:[#allocation6 + $0x748] ss:$16 sps:$4 sm:$0xff]  }
 0x573   :  { %9451 = vmatpush1.bf16.msra.mxu0 %v15086_v0  ;;  %v19569_v0 = vld [vmem:[#allocation13_spill] sm:$0xff] }
 0x574   :  { %10223 = vmatpush1.bf16.msra.mxu1 %v15089_v34  ;;  %9452 = vmatprep.subr.bf16.mxu0 %v15094_v30  ;;  %v15127_v34 = vld [vmem:[#allocation6 + $0x76c] ss:$16 sps:$4 sm:$0xff]  }
 0x575   :  { %9310 = vmatmul.mubr.bf16.gmra.mrb[76].mxu0 %v19565_v15  ;;  %10224 = vmatprep.subr.bf16.mxu1 %v15097_v54  ;;  %v19570_v30 = vld [vmem:[#allocation168_spill] sm:$0xff]  ;;  %v15122_v54 = vld [vmem:[#allocation6 + $0x760] ss:$16 sps:$4 sm:$0xff]  }
 0x576   :  { %10082 = vmatmul.mubr.bf16.gmra.mrb[76].mxu1 %v19565_v15  ;;  %9319 = vmatprep.mubr.bf16.mxu0 %v19566_v38  ;;  %v15128_v15 = vld [vmem:[#allocation6 + $0x780] ss:$16 sps:$4 sm:$0xff]  }
 0x577   :  { %10091 = vmatprep.mubr.bf16.mxu1 %v19566_v38  ;;  %9453 = vmatpush1.bf16.msra.mxu0 %v15092_v9  ;;  %v15125_v9 = vld [vmem:[#allocation6 + $0x768] ss:$16 sps:$4 sm:$0xff]   ;;  %v15136_v38 = vld [vmem:[#allocation6 + $0x7a4] ss:$16 sps:$4 sm:$0xff]  }
 0x578   :  { %10225 = vmatpush1.bf16.msra.mxu1 %v15095_v32  ;;  %9454 = vmatprep.subr.bf16.mxu0 %v15100_v57  ;;  %v15130_v32 = vld [vmem:[#allocation6 + $0x784] ss:$16 sps:$4 sm:$0xff]   ;;  %v15133_v57 = vld [vmem:[#allocation6 + $0x78c] ss:$16 sps:$4 sm:$0xff]  }
 0x579   :  { %10226 = vmatprep.subr.bf16.mxu1 %v15103_v41  ;;  %v15131_v41 = vld [vmem:[#allocation6 + $0x788] ss:$16 sps:$4 sm:$0xff]  }
 0x57b   :  { %9455 = vmatpush1.bf16.msra.mxu0 %v15098_v40  ;;  %v19571_v40 = vld [vmem:[#allocation15_spill] sm:$0xff] }
 0x57c   :  { %10227 = vmatpush1.bf16.msra.mxu1 %v15101_v45  ;;  %9456 = vmatprep.subr.bf16.mxu0 %v15106_v37  ;;  %v15139_v45 = vld [vmem:[#allocation6 + $0x7ac] ss:$16 sps:$4 sm:$0xff]  }
 0x57d   :  { %9320 = vmatmul.mubr.bf16.gmra.mrb[80].mxu0 %v19567_v21  ;;  %10228 = vmatprep.subr.bf16.mxu1 %v15109_v61  ;;  %v19572_v37 = vld [vmem:[#allocation170_spill] sm:$0xff]  ;;  %v15134_v61 = vld [vmem:[#allocation6 + $0x7a0] ss:$16 sps:$4 sm:$0xff]  }
 0x57e   :  { %10092 = vmatmul.mubr.bf16.gmra.mrb[80].mxu1 %v19567_v21  ;;  %9329 = vmatprep.mubr.bf16.mxu0 %v19568_v23  ;;  %v15140_v21 = vld [vmem:[#allocation6 + $0x7c0] ss:$16 sps:$4 sm:$0xff]  }
 0x57f   :  { %10101 = vmatprep.mubr.bf16.mxu1 %v19568_v23  ;;  %9457 = vmatpush1.bf16.msra.mxu0 %v15104_v48  ;;  %v15137_v48 = vld [vmem:[#allocation6 + $0x7a8] ss:$16 sps:$4 sm:$0xff]   ;;  %v15148_v23 = vld [vmem:[#allocation6 + $0x7e4] ss:$16 sps:$4 sm:$0xff]  }
 0x580   :  { %10229 = vmatpush1.bf16.msra.mxu1 %v15107_v14  ;;  %9458 = vmatprep.subr.bf16.mxu0 %v15112_v63  ;;  %v15142_v14 = vld [vmem:[#allocation6 + $0x7c4] ss:$16 sps:$4 sm:$0xff]   ;;  %v15145_v63 = vld [vmem:[#allocation6 + $0x7cc] ss:$16 sps:$4 sm:$0xff]  }
 0x581   :  { %10230 = vmatprep.subr.bf16.mxu1 %v15115_v39  ;;  %v15143_v39 = vld [vmem:[#allocation6 + $0x7c8] ss:$16 sps:$4 sm:$0xff]  }
 0x583   :  { %9459 = vmatpush1.bf16.msra.mxu0 %v15110_v25  ;;  %v19573_v25 = vld [vmem:[#allocation18_spill] sm:$0xff] }
 0x584   :  { %10231 = vmatpush1.bf16.msra.mxu1 %v15113_v2  ;;  %9460 = vmatprep.subr.bf16.mxu0 %v15118_v28  ;;  %v15151_v2 = vld [vmem:[#allocation6 + $0x7ec] ss:$16 sps:$4 sm:$0xff]  }
 0x585   :  { %9330 = vmatmul.mubr.bf16.gmra.mrb[84].mxu0 %v19569_v0  ;;  %10232 = vmatprep.subr.bf16.mxu1 %v15121_v35  ;;  %v19574_v28 = vld [vmem:[#allocation172_spill] sm:$0xff]  ;;  %v15146_v35 = vld [vmem:[#allocation6 + $0x7e0] ss:$16 sps:$4 sm:$0xff]  }
 0x586   :  { %10102 = vmatmul.mubr.bf16.gmra.mrb[84].mxu1 %v19569_v0  ;;  %9339 = vmatprep.mubr.bf16.mxu0 %v19570_v30  ;;  %v19575_v0 = vld [vmem:[#allocation22_spill] sm:$0xff] }
 0x587   :  { %10111 = vmatprep.mubr.bf16.mxu1 %v19570_v30  ;;  %9461 = vmatpush1.bf16.msra.mxu0 %v15116_v18  ;;  %v15149_v18 = vld [vmem:[#allocation6 + $0x7e8] ss:$16 sps:$4 sm:$0xff]   ;;  %v19577_v30 = vld [vmem:[#allocation25_spill] sm:$0xff] }
 0x588   :  { %10233 = vmatpush1.bf16.msra.mxu1 %v15119_v8  ;;  %9462 = vmatprep.subr.bf16.mxu0 %v15124_v26  ;;  %v15152_v8 = vld [vmem:[%s18919_s8 + $0x40] sm:$0xff]  }
 0x589   :  { %10234 = vmatprep.subr.bf16.mxu1 %v15127_v34  ;;  %v15154_v26 = vld [vmem:[%s18919_s8 + $0xc0] sm:$0xff]   ;;  %v19576_v34 = vld [vmem:[#allocation174_spill] sm:$0xff] }
 0x58b   :  { %9463 = vmatpush1.bf16.msra.mxu0 %v15122_v54  ;;  %v19578_v54 = vld [vmem:[#allocation176_spill] sm:$0xff] }
 0x58c   :  { %10235 = vmatpush1.bf16.msra.mxu1 %v15125_v9  ;;  %9464 = vmatprep.subr.bf16.mxu0 %v15130_v32  ;;  %v19579_v9 = vld [vmem:[#allocation27_spill] sm:$0xff]  ;;  %v19580_v32 = vld [vmem:[#allocation178_spill] sm:$0xff] }
 0x58d   :  { %9340 = vmatmul.mubr.bf16.gmra.mrb[88].mxu0 %v19571_v40  ;;  %10236 = vmatprep.subr.bf16.mxu1 %v15133_v57  ;;  %v19581_v57 = vld [vmem:[#allocation29_spill] sm:$0xff] }
 0x58e   :  { %10112 = vmatmul.mubr.bf16.gmra.mrb[88].mxu1 %v19571_v40  ;;  %9349 = vmatprep.mubr.bf16.mxu0 %v19572_v37  ;;  %v15160_v40 = vld [vmem:[%s18919_s8 + $0x50] sm:$0xff]  }
 0x58f   :  { %10121 = vmatprep.mubr.bf16.mxu1 %v19572_v37  ;;  %9465 = vmatpush1.bf16.msra.mxu0 %v15128_v15  ;;  %v19582_v15 = vld [vmem:[#allocation33_spill] sm:$0xff]  ;;  %v15161_v37 = vld [vmem:[%s18919_s8 + $0x10] sm:$0xff]  }
 0x590   :  { %10237 = vmatpush1.bf16.msra.mxu1 %v15131_v41  ;;  %9466 = vmatprep.subr.bf16.mxu0 %v15136_v38  ;;  %v15157_v41 = vld [vmem:[%s18919_s8 + $0x8] sm:$0xff]  }
 0x591   :  { %10238 = vmatprep.subr.bf16.mxu1 %v15139_v45  ;;  %v15159_v38 = vld [vmem:[%s18919_s8 + $0x88] sm:$0xff]   ;;  %v15162_v45 = vld [vmem:[%s18919_s8 + $0xd0] sm:$0xff]  }
 0x593   :  { %9467 = vmatpush1.bf16.msra.mxu0 %v15134_v61  ;;  %v15163_v61 = vld [vmem:[%s18919_s8 + $0x90] sm:$0xff]  }
 0x594   :  { %10239 = vmatpush1.bf16.msra.mxu1 %v15137_v48  ;;  %9468 = vmatprep.subr.bf16.mxu0 %v15142_v14  ;;  %v15164_v48 = vld [vmem:[%s18919_s8 + $0x58] sm:$0xff]  }
 0x595   :  { %9350 = vmatmul.mubr.bf16.gmra.mrb[92].mxu0 %v19573_v25  ;;  %10240 = vmatprep.subr.bf16.mxu1 %v15145_v63  ;;  %v19586_v14 = vld [vmem:[#allocation48_spill] sm:$0xff] }
 0x596   :  { %10122 = vmatmul.mubr.bf16.gmra.mrb[92].mxu1 %v19573_v25  ;;  %9359 = vmatprep.mubr.bf16.mxu0 %v19574_v28  ;;  %v15166_v63 = vld [vmem:[%s18919_s8 + $0xd8] sm:$0xff]   ;;  %v15168_v25 = vld [vmem:[%s18919_s8 + $0x60] sm:$0xff]  }
 0x597   :  { %10131 = vmatprep.mubr.bf16.mxu1 %v19574_v28  ;;  %9469 = vmatpush1.bf16.msra.mxu0 %v15140_v21  ;;  %v19587_v21 = vld [vmem:[#allocation161_spill] sm:$0xff] }
 0x598   :  { %10241 = vmatpush1.bf16.msra.mxu1 %v15143_v39  ;;  %9470 = vmatprep.subr.bf16.mxu0 %v15148_v23  ;;  %v15165_v39 = vld [vmem:[%s18919_s8 + $0x18] sm:$0xff]   ;;  %v15169_v28 = vld [vmem:[%s18919_s8 + $0x20] sm:$0xff]  }
 0x599   :  { %10242 = vmatprep.subr.bf16.mxu1 %v15151_v2  ;;  %v15167_v23 = vld [vmem:[%s18919_s8 + $0x98] sm:$0xff]   ;;  %v15170_v2 = vld [vmem:[%s18919_s8 + $0xe0] sm:$0xff]  }
 0x59b   :  { %9471 = vmatpush1.bf16.msra.mxu0 %v15146_v35  ;;  %v15171_v35 = vld [vmem:[%s18919_s8 + $0xa0] sm:$0xff]  }
 0x59c   :  { %10243 = vmatpush1.bf16.msra.mxu1 %v15149_v18  ;;  %12888 = vmatprep.subr.bf16.mxu0 %v15152_v8  ;;  %v15172_v18 = vld [vmem:[%s18919_s8 + $0x68] sm:$0xff]   ;;  %v19588_v8 = vld [vmem:[#allocation52_spill] sm:$0xff] }
 0x59d   :  { %9360 = vmatmul.mubr.bf16.gmra.mrb[96].mxu0 %v19575_v0  ;;  %13000 = vmatprep.subr.bf16.mxu1 %v15154_v26  ;;  %v15174_v26 = vld [vmem:[%s18919_s8 + $0xe8] sm:$0xff]  }
 0x59e   :  { %10132 = vmatmul.mubr.bf16.gmra.mrb[96].mxu1 %v19575_v0  ;;  %9369 = vmatprep.mubr.bf16.mxu0 %v19576_v34  ;;  %v19589_v0 = vld [vmem:[#allocation163_spill] sm:$0xff] }
 0x59f   :  { %10141 = vmatprep.mubr.bf16.mxu1 %v19576_v34  ;;  %v15173_v34 = vld [vmem:[%s18919_s8 + $0x28] sm:$0xff]  }
 0x5a5   :  { %9370 = vmatmul.mubr.bf16.gmra.mrb[100].mxu0 %v19577_v30 }
 0x5a6   :  { %10142 = vmatmul.mubr.bf16.gmra.mrb[100].mxu1 %v19577_v30  ;;  %9379 = vmatprep.mubr.bf16.mxu0 %v19578_v54  ;;  %v15175_v30 = vld [vmem:[%s18919_s8 + $0xa8] sm:$0xff]  }
 0x5a7   :  { %10151 = vmatprep.mubr.bf16.mxu1 %v19578_v54  ;;  %v15176_v54 = vld [vmem:[%s18919_s8 + $0x70] sm:$0xff]  }
 0x5ad   :  { %9380 = vmatmul.mubr.bf16.gmra.mrb[104].mxu0 %v19579_v9 }
 0x5ae   :  { %10152 = vmatmul.mubr.bf16.gmra.mrb[104].mxu1 %v19579_v9  ;;  %9389 = vmatprep.mubr.bf16.mxu0 %v19580_v32  ;;  %v15178_v9 = vld [vmem:[%s18919_s8 + $0xf0] sm:$0xff]  }
 0x5af   :  { %10161 = vmatprep.mubr.bf16.mxu1 %v19580_v32  ;;  %v15177_v32 = vld [vmem:[%s18919_s8 + $0x30] sm:$0xff]  }
 0x5b5   :  { %9390 = vmatmul.mubr.bf16.gmra.mrb[108].mxu0 %v19581_v57 }
 0x5b6   :  { %10162 = vmatmul.mubr.bf16.gmra.mrb[108].mxu1 %v19581_v57  ;;  %9399 = vmatprep.mubr.bf16.mxu0 %v17221_v17  ;;  %v15179_v57 = vld [vmem:[%s18919_s8 + $0xb0] sm:$0xff]  }
 0x5b7   :  { %10171 = vmatprep.mubr.bf16.mxu1 %v17221_v17  ;;  %v15153_v17 = vld [vmem:[%s18919_s8] sm:$0xff]  }
 0x5bd   :  { %9400 = vmatmul.mubr.bf16.gmra.mrb[112].mxu0 %v17214_v55 }
 0x5be   :  { %10172 = vmatmul.mubr.bf16.gmra.mrb[112].mxu1 %v17214_v55  ;;  %9409 = vmatprep.mubr.bf16.mxu0 %v17241_v6  ;;  %v19583_v55 = vld [vmem:[#allocation157_spill] sm:$0xff] }
 0x5bf   :  { %10181 = vmatprep.mubr.bf16.mxu1 %v17241_v6  ;;  %v15155_v6 = vld [vmem:[%s18919_s8 + $0x80] sm:$0xff]  }
 0x5c5   :  { %9410 = vmatmul.mubr.bf16.gmra.mrb[116].mxu0 %v19582_v15 }
 0x5c6   :  { %10182 = vmatmul.mubr.bf16.gmra.mrb[116].mxu1 %v19582_v15  ;;  %9419 = vmatprep.mubr.bf16.mxu0 %v17261_v10  ;;  %v15180_v15 = vld [vmem:[%s18919_s8 + $0x78] sm:$0xff]  }
 0x5c7   :  { %10191 = vmatprep.mubr.bf16.mxu1 %v17261_v10  ;;  %v19584_v10 = vld [vmem:[#allocation44_spill] sm:$0xff] }
 0x5cd   :  { %9420 = vmatmul.mubr.bf16.gmra.mrb[120].mxu0 %v17254_v19 }
 0x5ce   :  { %10192 = vmatmul.mubr.bf16.gmra.mrb[120].mxu1 %v17254_v19  ;;  %9429 = vmatprep.mubr.bf16.mxu0 %v17278_v49  ;;  %v15156_v19 = vld [vmem:[%s18919_s8 + $0x48] sm:$0xff]  }
 0x5cf   :  { %10201 = vmatprep.mubr.bf16.mxu1 %v17278_v49  ;;  %v19585_v49 = vld [vmem:[#allocation159_spill] sm:$0xff] }
 0x5d5   :  { %9430 = vmatmul.mubr.bf16.gmra.mrb[124].mxu0 %v17274_v56 }
 0x5d6   :  { %10202 = vmatmul.mubr.bf16.gmra.mrb[124].mxu1 %v17274_v56  ;;  %9472 = vmatprep.mubr.bf16.mxu0 %v19583_v55  ;;  %v15158_v56 = vld [vmem:[%s18919_s8 + $0xc8] sm:$0xff]  }
 0x5d7   :  { %10244 = vmatprep.mubr.bf16.mxu1 %v19583_v55  ;;  %v19590_v55 = vld [vmem:[#allocation56_spill] sm:$0xff] }
 0x5dd   :  { %9473 = vmatmul.mubr.bf16.vlgmr.msra.gmra.mrb[64].mxu0 %v19584_v10 }
 0x5de   :  { %10245 = vmatmul.mubr.bf16.vlgmr.msra.gmra.mrb[64].mxu1 %v19584_v10  ;;  %9482 = vmatprep.mubr.bf16.mxu0 %v19585_v49  ;;  %v15183_v10 = vld [vmem:[%s18919_s8 + $0xb8] sm:$0xff]  }
 0x5df   :  { %10254 = vmatprep.mubr.bf16.mxu1 %v19585_v49  ;;  %12889 = vmatpush3.bf16.msra.mxu0 %v15153_v17  ;;  %v15182_v17 = vld [vmem:[%s18919_s8 + $0xf8] sm:$0xff]   ;;  %v15186_v49 = vld [vmem:[%s18919_s8 + $0x1c0] sm:$0xff]  }
 0x5e0   :  { %13001 = vmatpush3.bf16.msra.mxu1 %v15155_v6  ;;  %12890 = vmatprep.subr.bf16.mxu0 %v15156_v19  ;;  %v19591_v6 = vld [vmem:[#allocation165_spill] sm:$0xff]  ;;  %v15181_v19 = vld [vmem:[%s18919_s8 + $0x38] sm:$0xff]  }
 0x5e1   :  { %13002 = vmatprep.subr.bf16.mxu1 %v15158_v56  ;;  %v15184_v56 = vld [vmem:[%s18919_s8 + $0x140] sm:$0xff]  }
 0x5e3   :  { %12891 = vmatpush3.bf16.msra.mxu0 %v15157_v41  ;;  %v19592_v41 = vld [vmem:[#allocation14_spill] sm:$0xff] }
 0x5e4   :  { %13003 = vmatpush3.bf16.msra.mxu1 %v15159_v38  ;;  %12892 = vmatprep.subr.bf16.mxu0 %v15160_v40  ;;  %v19593_v38 = vld [vmem:[#allocation167_spill] sm:$0xff]  ;;  %v19594_v40 = vld [vmem:[#allocation16_spill] sm:$0xff] }
 0x5e5   :  { %9483 = vmatmul.mubr.bf16.gmra.mrb[68].mxu0 %v19586_v14  ;;  %13004 = vmatprep.subr.bf16.mxu1 %v15162_v45  ;;  %v19595_v45 = vld [vmem:[#allocation169_spill] sm:$0xff] }
 0x5e6   :  { %10255 = vmatmul.mubr.bf16.gmra.mrb[68].mxu1 %v19586_v14  ;;  %9492 = vmatprep.mubr.bf16.mxu0 %v19587_v21  ;;  %v19599_v14 = vld [vmem:[#allocation173_spill] sm:$0xff] }
 0x5e7   :  { %10264 = vmatprep.mubr.bf16.mxu1 %v19587_v21  ;;  %12893 = vmatpush3.bf16.msra.mxu0 %v15161_v37  ;;  %v19596_v37 = vld [vmem:[#allocation20_spill] sm:$0xff]  ;;  %v19601_v21 = vld [vmem:[#allocation175_spill] sm:$0xff] }
 0x5e8   :  { %13005 = vmatpush3.bf16.msra.mxu1 %v15163_v61  ;;  %12894 = vmatprep.subr.bf16.mxu0 %v15164_v48  ;;  %v19597_v61 = vld [vmem:[#allocation171_spill] sm:$0xff]  ;;  %v19598_v48 = vld [vmem:[#allocation24_spill] sm:$0xff] }
 0x5e9   :  { %13006 = vmatprep.subr.bf16.mxu1 %v15166_v63  ;;  %v19600_v63 = vld [vmem:[#allocation26_spill] sm:$0xff] }
 0x5eb   :  { %12895 = vmatpush3.bf16.msra.mxu0 %v15165_v39  ;;  %v19602_v39 = vld [vmem:[#allocation28_spill] sm:$0xff] }
 0x5ec   :  { %13007 = vmatpush3.bf16.msra.mxu1 %v15167_v23  ;;  %12896 = vmatprep.subr.bf16.mxu0 %v15168_v25  ;;  %v19603_v23 = vld [vmem:[#allocation177_spill] sm:$0xff]  ;;  %v19604_v25 = vld [vmem:[#allocation30_spill] sm:$0xff] }
 0x5ed   :  { %9493 = vmatmul.mubr.bf16.gmra.mrb[72].mxu0 %v19588_v8  ;;  %13008 = vmatprep.subr.bf16.mxu1 %v15170_v2  ;;  %v19605_v2 = vld [vmem:[#allocation179_spill] sm:$0xff] }
 0x5ee   :  { %10265 = vmatmul.mubr.bf16.gmra.mrb[72].mxu1 %v19588_v8  ;;  %9502 = vmatprep.mubr.bf16.mxu0 %v19589_v0  ;;  %v19609_v8 = vld [vmem:[#allocation180_spill] sm:$0xff] }
 0x5ef   :  { %10274 = vmatprep.mubr.bf16.mxu1 %v19589_v0  ;;  %12897 = vmatpush3.bf16.msra.mxu0 %v15169_v28  ;;  %v19606_v28 = vld [vmem:[#allocation32_spill] sm:$0xff] }
 0x5f0   :  { %13009 = vmatpush3.bf16.msra.mxu1 %v15171_v35  ;;  %12898 = vmatprep.subr.bf16.mxu0 %v15172_v18  ;;  %v19607_v35 = vld [vmem:[#allocation34_spill] sm:$0xff]  ;;  %v19608_v18 = vld [vmem:[#allocation31_spill] sm:$0xff]  ;;  %v15196_v0 = vld [vmem:[%s18919_s8 + $0x158] sm:$0xff]  }
 0x5f1   :  { %13010 = vmatprep.subr.bf16.mxu1 %v15174_v26  ;;  %v19610_v26 = vld [vmem:[#allocation36_spill] sm:$0xff] }
 0x5f3   :  { %12899 = vmatpush3.bf16.msra.mxu0 %v15173_v34  ;;  %v15198_v34 = vld [vmem:[%s18919_s8 + $0x1d8] sm:$0xff]  }
 0x5f4   :  { %13011 = vmatpush3.bf16.msra.mxu1 %v15175_v30  ;;  %12900 = vmatprep.subr.bf16.mxu0 %v15176_v54  ;;  %v15197_v30 = vld [vmem:[%s18919_s8 + $0x118] sm:$0xff]   ;;  %v15200_v54 = vld [vmem:[%s18919_s8 + $0x160] sm:$0xff]  }
 0x5f5   :  { %9503 = vmatmul.mubr.bf16.gmra.mrb[76].mxu0 %v19590_v55  ;;  %13012 = vmatprep.subr.bf16.mxu1 %v15178_v9  ;;  %v15204_v9 = vld [vmem:[%s18919_s8 + $0x168] sm:$0xff]  }
 0x5f6   :  { %10275 = vmatmul.mubr.bf16.gmra.mrb[76].mxu1 %v19590_v55  ;;  %9512 = vmatprep.mubr.bf16.mxu0 %v19591_v6  ;;  %v15212_v55 = vld [vmem:[%s18919_s8 + $0x178] sm:$0xff]  }
 0x5f7   :  { %10284 = vmatprep.mubr.bf16.mxu1 %v19591_v6  ;;  %12901 = vmatpush3.bf16.msra.mxu0 %v15177_v32  ;;  %v15206_v32 = vld [vmem:[%s18919_s8 + $0x1e8] sm:$0xff]   ;;  %v19611_v6 = vld [vmem:[#allocation35_spill] sm:$0xff] }
 0x5f8   :  { %13013 = vmatpush3.bf16.msra.mxu1 %v15179_v57  ;;  %12902 = vmatprep.subr.bf16.mxu0 %v15180_v15  ;;  %v15205_v57 = vld [vmem:[%s18919_s8 + $0x128] sm:$0xff]   ;;  %v15208_v15 = vld [vmem:[%s18919_s8 + $0x170] sm:$0xff]  }
 0x5f9   :  { %13014 = vmatprep.subr.bf16.mxu1 %v15182_v17  ;;  %v15214_v17 = vld [vmem:[%s18919_s8 + $0x1f8] sm:$0xff]  }
 0x5fb   :  { %12903 = vmatpush3.bf16.msra.mxu0 %v15181_v19  ;;  %v19612_v19 = vld [vmem:[#allocation41_spill] sm:$0xff] }
 0x5fc   :  { %13015 = vmatpush3.bf16.msra.mxu1 %v15183_v10  ;;  %13112 = vmatprep.subr.bf16.mxu0 %v15184_v56  ;;  %v19613_v10 = vld [vmem:[#allocation40_spill] sm:$0xff] }
 0x5fd   :  { %9513 = vmatmul.mubr.bf16.gmra.mrb[80].mxu0 %v19592_v41  ;;  %13224 = vmatprep.subr.bf16.mxu1 %v15186_v49  ;;  %v15213_v56 = vld [vmem:[%s18919_s8 + $0x138] sm:$0xff]   ;;  %v19614_v49 = vld [vmem:[#allocation38_spill] sm:$0xff] }
 0x5fe   :  { %10285 = vmatmul.mubr.bf16.gmra.mrb[80].mxu1 %v19592_v41  ;;  %9522 = vmatprep.mubr.bf16.mxu0 %v19593_v38  ;;  %v19615_v41 = vld [vmem:[#allocation37_spill] sm:$0xff] }
 0x5ff   :  { %10294 = vmatprep.mubr.bf16.mxu1 %v19593_v38  ;;  %v19616_v38 = vld [vmem:[#allocation49_spill] sm:$0xff] }
 0x605   :  { %9523 = vmatmul.mubr.bf16.gmra.mrb[84].mxu0 %v19594_v40 }
 0x606   :  { %10295 = vmatmul.mubr.bf16.gmra.mrb[84].mxu1 %v19594_v40  ;;  %9532 = vmatprep.mubr.bf16.mxu0 %v19595_v45  ;;  %v19617_v40 = vld [vmem:[#allocation47_spill] sm:$0xff] }
 0x607   :  { %10304 = vmatprep.mubr.bf16.mxu1 %v19595_v45  ;;  %v19618_v45 = vld [vmem:[#allocation45_spill] sm:$0xff] }
 0x60d   :  { %9533 = vmatmul.mubr.bf16.gmra.mrb[88].mxu0 %v19596_v37 }
 0x60e   :  { %10305 = vmatmul.mubr.bf16.gmra.mrb[88].mxu1 %v19596_v37  ;;  %9542 = vmatprep.mubr.bf16.mxu0 %v19597_v61  ;;  %v19619_v37 = vld [vmem:[#allocation43_spill] sm:$0xff] }
 0x60f   :  { %10314 = vmatprep.mubr.bf16.mxu1 %v19597_v61  ;;  %v19620_v61 = vld [vmem:[#allocation58_spill] sm:$0xff] }
 0x615   :  { %9543 = vmatmul.mubr.bf16.gmra.mrb[92].mxu0 %v19598_v48 }
 0x616   :  { %10315 = vmatmul.mubr.bf16.gmra.mrb[92].mxu1 %v19598_v48  ;;  %9552 = vmatprep.mubr.bf16.mxu0 %v19599_v14  ;;  %v19621_v48 = vld [vmem:[#allocation55_spill] sm:$0xff] }
 0x617   :  { %10324 = vmatprep.mubr.bf16.mxu1 %v19599_v14  ;;  %v19622_v14 = vld [vmem:[#allocation53_spill] sm:$0xff] }
 0x61d   :  { %9553 = vmatmul.mubr.bf16.gmra.mrb[96].mxu0 %v19600_v63 }
 0x61e   :  { %10325 = vmatmul.mubr.bf16.gmra.mrb[96].mxu1 %v19600_v63  ;;  %9562 = vmatprep.mubr.bf16.mxu0 %v19601_v21  ;;  %v19623_v63 = vld [vmem:[#allocation51_spill] sm:$0xff] }
 0x61f   :  { %10334 = vmatprep.mubr.bf16.mxu1 %v19601_v21  ;;  %v19624_v21 = vld [vmem:[#allocation64_spill] sm:$0xff] }
 0x625   :  { %9563 = vmatmul.mubr.bf16.gmra.mrb[100].mxu0 %v19602_v39 }
 0x626   :  { %10335 = vmatmul.mubr.bf16.gmra.mrb[100].mxu1 %v19602_v39  ;;  %9572 = vmatprep.mubr.bf16.mxu0 %v19603_v23  ;;  %v19625_v39 = vld [vmem:[#allocation62_spill] sm:$0xff] }
 0x627   :  { %10344 = vmatprep.mubr.bf16.mxu1 %v19603_v23  ;;  %v19626_v23 = vld [vmem:[#allocation60_spill] sm:$0xff] }
 0x62d   :  { %9573 = vmatmul.mubr.bf16.gmra.mrb[104].mxu0 %v19604_v25 }
 0x62e   :  { %10345 = vmatmul.mubr.bf16.gmra.mrb[104].mxu1 %v19604_v25  ;;  %9582 = vmatprep.mubr.bf16.mxu0 %v19605_v2  ;;  %v19627_v25 = vld [vmem:[#allocation57_spill] sm:$0xff] }
 0x62f   :  { %10354 = vmatprep.mubr.bf16.mxu1 %v19605_v2  ;;  %v19628_v2 = vld [vmem:[#allocation72_spill] sm:$0xff] }
 0x635   :  { %9583 = vmatmul.mubr.bf16.gmra.mrb[108].mxu0 %v19606_v28 }
 0x636   :  { %10355 = vmatmul.mubr.bf16.gmra.mrb[108].mxu1 %v19606_v28  ;;  %9592 = vmatprep.mubr.bf16.mxu0 %v19607_v35  ;;  %v19629_v28 = vld [vmem:[#allocation70_spill] sm:$0xff] }
 0x637   :  { %10364 = vmatprep.mubr.bf16.mxu1 %v19607_v35  ;;  %v19630_v35 = vld [vmem:[#allocation68_spill] sm:$0xff] }
 0x63d   :  { %9593 = vmatmul.mubr.bf16.gmra.mrb[112].mxu0 %v19608_v18 }
 0x63e   :  { %10365 = vmatmul.mubr.bf16.gmra.mrb[112].mxu1 %v19608_v18  ;;  %9602 = vmatprep.mubr.bf16.mxu0 %v19609_v8  ;;  %v19631_v18 = vld [vmem:[#allocation66_spill] sm:$0xff] }
 0x63f   :  { %10374 = vmatprep.mubr.bf16.mxu1 %v19609_v8  ;;  %v19632_v8 = vld [vmem:[#allocation80_spill] sm:$0xff] }
 0x645   :  { %9603 = vmatmul.mubr.bf16.gmra.mrb[116].mxu0 %v19610_v26 }
 0x646   :  { %10375 = vmatmul.mubr.bf16.gmra.mrb[116].mxu1 %v19610_v26  ;;  %9612 = vmatprep.mubr.bf16.mxu0 %v17265_v31  ;;  %v19633_v26 = vld [vmem:[#allocation85_spill] sm:$0xff] }
 0x647   :  { %10384 = vmatprep.mubr.bf16.mxu1 %v17265_v31  ;;  %v15185_v31 = vld [vmem:[%s18919_s8 + $0x100] sm:$0xff]  }
 0x64d   :  { %9613 = vmatmul.mubr.bf16.gmra.mrb[120].mxu0 %v17257_v62 }
 0x64e   :  { %10385 = vmatmul.mubr.bf16.gmra.mrb[120].mxu1 %v17257_v62  ;;  %9622 = vmatprep.mubr.bf16.mxu0 %v17280_v43  ;;  %v15187_v62 = vld [vmem:[%s18919_s8 + $0x180] sm:$0xff]  }
 0x64f   :  { %10394 = vmatprep.mubr.bf16.mxu1 %v17280_v43  ;;  %v15188_v43 = vld [vmem:[%s18919_s8 + $0x148] sm:$0xff]  }
 0x655   :  { %9623 = vmatmul.mubr.bf16.gmra.mrb[124].mxu0 %v17276_v20 }
 0x656   :  { %10395 = vmatmul.mubr.bf16.gmra.mrb[124].mxu1 %v17276_v20  ;;  %11276 = vmatprep.mubr.bf16.mxu0 %v17508_v24  ;;  %v15190_v20 = vld [vmem:[%s18919_s8 + $0x1c8] sm:$0xff]  }
 0x657   :  { %11437 = vmatprep.mubr.bf16.mxu1 %v17512_v27  ;;  %v15189_v24 = vld [vmem:[%s18919_s8 + $0x108] sm:$0xff]   ;;  %v15192_v27 = vld [vmem:[%s18919_s8 + $0x150] sm:$0xff]  }
 0x65d   :  { %11277 = vmatmul.mubr.bf16.vlgmr.msra.gmra.mrb[128].mxu0 %v17501_v12  ;;  %v15191_v12 = vld [vmem:[%s18919_s8 + $0x188] sm:$0xff]  }
 0x65e   :  { %11438 = vmatmul.mubr.bf16.vlgmr.msra.gmra.mrb[128].mxu1 %v17504_v33  ;;  %11284 = vmatprep.mubr.bf16.mxu0 %v17528_v7  ;;  %v15194_v33 = vld [vmem:[%s18919_s8 + $0x1d0] sm:$0xff]  }
 0x65f   :  { %11445 = vmatprep.mubr.bf16.mxu1 %v17532_v58  ;;  %13113 = vmatpush3.bf16.msra.mxu0 %v15185_v31  ;;  %v15193_v7 = vld [vmem:[%s18919_s8 + $0x110] sm:$0xff]   ;;  %v19634_v31 = vld [vmem:[#allocation76_spill] sm:$0xff] }
 0x660   :  { %13225 = vmatpush3.bf16.msra.mxu1 %v15187_v62  ;;  %13114 = vmatprep.subr.bf16.mxu0 %v15188_v43  ;;  %v15195_v58 = vld [vmem:[%s18919_s8 + $0x190] sm:$0xff]   ;;  %v19635_v62 = vld [vmem:[#allocation74_spill] sm:$0xff] }
 0x661   :  { %13226 = vmatprep.subr.bf16.mxu1 %v15190_v20  ;;  %v19636_v43 = vld [vmem:[#allocation87_spill] sm:$0xff]  ;;  %v19637_v20 = vld [vmem:[#allocation93_spill] sm:$0xff] }
 0x663   :  { %13115 = vmatpush3.bf16.msra.mxu0 %v15189_v24  ;;  %v7559_v24 = vld [vmem:[%s18918_s7] sm:$0xf] }
 0x664   :  { %13227 = vmatpush3.bf16.msra.mxu1 %v15191_v12  ;;  %13116 = vmatprep.subr.bf16.mxu0 %v15192_v27  ;;  %v19638_v12 = vld [vmem:[#allocation83_spill] sm:$0xff]  ;;  %v19639_v27 = vld [vmem:[#allocation9_spill] sm:$0xff] }
 0x665   :  { %11285 = vmatmul.mubr.bf16.gmra.mrb[132].mxu0 %v17521_v5  ;;  %13228 = vmatprep.subr.bf16.mxu1 %v15194_v33  ;;  %v15199_v5 = vld [vmem:[%s18919_s8 + $0x198] sm:$0xff]   ;;  %v18218_v33 = vrot.slane %v7559_v24, %v19639_v27 }
 0x666   :  { %11446 = vmatmul.mubr.bf16.gmra.mrb[132].mxu1 %v17524_v4  ;;  %11292 = vmatprep.mubr.bf16.mxu0 %v17548_v50  ;;  %v15202_v4 = vld [vmem:[%s18919_s8 + $0x1e0] sm:$0xff]  }
 0x667   :  { %11453 = vmatprep.mubr.bf16.mxu1 %v17552_v47  ;;  %13117 = vmatpush3.bf16.msra.mxu0 %v15193_v7  ;;  %v15201_v50 = vld [vmem:[%s18919_s8 + $0x120] sm:$0xff]  }
 0x668   :  { %13229 = vmatpush3.bf16.msra.mxu1 %v15195_v58  ;;  %13118 = vmatprep.subr.bf16.mxu0 %v15196_v0  ;;  %v15203_v47 = vld [vmem:[%s18919_s8 + $0x1a0] sm:$0xff]   ;;  %v19641_v58 = vld [vmem:[#allocation95_spill] sm:$0xff]  ;;  %v19642_v0 = vld [vmem:[#allocation10_spill] sm:$0xff] }
 0x669   :  { %13230 = vmatprep.subr.bf16.mxu1 %v15198_v34  ;;  %v19640_v7 = vld [vmem:[#allocation89_spill] sm:$0xff]  ;;  %v18223_v34 = vrot.slane %v7559_v24, %v19642_v0 }
 0x66b   :  { %13119 = vmatpush3.bf16.msra.mxu0 %v15197_v30  ;;  %v19643_v30 = vld [vmem:[#allocation11_spill] sm:$0xff] }
 0x66c   :  { %13231 = vmatpush3.bf16.msra.mxu1 %v15199_v5  ;;  %13120 = vmatprep.subr.bf16.mxu0 %v15200_v54  ;;  %v18226_v5 = vrot.slane %v7559_v24, %v19643_v30  ;;  %v19644_v54 = vld [vmem:[#allocation101_spill] sm:$0xff] }
 0x66d   :  { %11293 = vmatmul.mubr.bf16.gmra.mrb[136].mxu0 %v17541_v53  ;;  %13232 = vmatprep.subr.bf16.mxu1 %v15202_v4  ;;  %v15207_v53 = vld [vmem:[%s18919_s8 + $0x1a8] sm:$0xff]   ;;  %v19645_v4 = vld [vmem:[#allocation12_spill] sm:$0xff] }
 0x66e   :  { %11454 = vmatmul.mubr.bf16.gmra.mrb[136].mxu1 %v17544_v22  ;;  %11300 = vmatprep.mubr.bf16.mxu0 %v17568_v51  ;;  %v15210_v22 = vld [vmem:[%s18919_s8 + $0x1f0] sm:$0xff]  }
 0x66f   :  { %11461 = vmatprep.mubr.bf16.mxu1 %v17572_v59  ;;  %13121 = vmatpush3.bf16.msra.mxu0 %v15201_v50  ;;  %v15209_v51 = vld [vmem:[%s18919_s8 + $0x130] sm:$0xff]   ;;  %v18230_v50 = vrot.slane %v7559_v24, %v19645_v4 }
 0x670   :  { %13233 = vmatpush3.bf16.msra.mxu1 %v15203_v47  ;;  %13122 = vmatprep.subr.bf16.mxu0 %v15204_v9  ;;  %v15211_v59 = vld [vmem:[%s18919_s8 + $0x1b0] sm:$0xff]  }
 0x671   :  { %13234 = vmatprep.subr.bf16.mxu1 %v15206_v32 }
 0x673   :  { %13123 = vmatpush3.bf16.msra.mxu0 %v15205_v57 }
 0x674   :  { %13235 = vmatpush3.bf16.msra.mxu1 %v15207_v53  ;;  %13124 = vmatprep.subr.bf16.mxu0 %v15208_v15 }
 0x675   :  { %11301 = vmatmul.mubr.bf16.gmra.mrb[140].mxu0 %v17561_v29  ;;  %13236 = vmatprep.subr.bf16.mxu1 %v15210_v22  ;;  %v15215_v29 = vld [vmem:[%s18919_s8 + $0x1b8] sm:$0xff]  }
 0x676   :  { %11462 = vmatmul.mubr.bf16.gmra.mrb[140].mxu1 %v19611_v6  ;;  %11308 = vmatprep.mubr.bf16.mxu0 %v19612_v19 }
 0x677   :  { %11469 = vmatprep.mubr.bf16.mxu1 %v19613_v10  ;;  %13125 = vmatpush3.bf16.msra.mxu0 %v15209_v51 }
 0x678   :  { %13237 = vmatpush3.bf16.msra.mxu1 %v15211_v59  ;;  %13126 = vmatprep.subr.bf16.mxu0 %v15212_v55 }
 0x679   :  { %13238 = vmatprep.subr.bf16.mxu1 %v15214_v17 }
 0x67b   :  { %13127 = vmatpush3.bf16.msra.mxu0 %v15213_v56 }
 0x67c   :  { %13239 = vmatpush3.bf16.msra.mxu1 %v15215_v29 }
 0x67d   :  { %11309 = vmatmul.mubr.bf16.gmra.mrb[144].mxu0 %v19614_v49 }
 0x67e   :  { %11470 = vmatmul.mubr.bf16.gmra.mrb[144].mxu1 %v19615_v41  ;;  %11316 = vmatprep.mubr.bf16.mxu0 %v19616_v38 }
 0x67f   :  { %11477 = vmatprep.mubr.bf16.mxu1 %v19617_v40 }
 0x685   :  { %11317 = vmatmul.mubr.bf16.gmra.mrb[148].mxu0 %v19618_v45 }
 0x686   :  { %11478 = vmatmul.mubr.bf16.gmra.mrb[148].mxu1 %v19619_v37  ;;  %11324 = vmatprep.mubr.bf16.mxu0 %v19620_v61  ;;  %v19646_v37 = vld [vmem:[#allocation91_spill] sm:$0xff] }
 0x687   :  { %11485 = vmatprep.mubr.bf16.mxu1 %v19621_v48 }
 0x68d   :  { %11325 = vmatmul.mubr.bf16.gmra.mrb[152].mxu0 %v19622_v14  ;;  %v19647_v14 = vld [vmem:[#allocation97_spill] sm:$0xff] }
 0x68e   :  { %11486 = vmatmul.mubr.bf16.gmra.mrb[152].mxu1 %v19623_v63  ;;  %11332 = vmatprep.mubr.bf16.mxu0 %v19624_v21 }
 0x68f   :  { %11493 = vmatprep.mubr.bf16.mxu1 %v19625_v39 }
 0x695   :  { %11333 = vmatmul.mubr.bf16.gmra.mrb[156].mxu0 %v19626_v23 }
 0x696   :  { %11494 = vmatmul.mubr.bf16.gmra.mrb[156].mxu1 %v19627_v25  ;;  %11340 = vmatprep.mubr.bf16.mxu0 %v19628_v2 }
 0x697   :  { %11501 = vmatprep.mubr.bf16.mxu1 %v19629_v28 }
 0x69d   :  { %11341 = vmatmul.mubr.bf16.gmra.mrb[160].mxu0 %v19630_v35 }
 0x69e   :  { %11502 = vmatmul.mubr.bf16.gmra.mrb[160].mxu1 %v19631_v18  ;;  %11348 = vmatprep.mubr.bf16.mxu0 %v19632_v8 }
 0x69f   :  { %11509 = vmatprep.mubr.bf16.mxu1 %v19633_v26 }
 0x6a5   :  { %11349 = vmatmul.mubr.bf16.gmra.mrb[164].mxu0 %v19634_v31 }
 0x6a6   :  { %11510 = vmatmul.mubr.bf16.gmra.mrb[164].mxu1 %v19635_v62  ;;  %11356 = vmatprep.mubr.bf16.mxu0 %v19636_v43 }
 0x6a7   :  { %11517 = vmatprep.mubr.bf16.mxu1 %v19637_v20 }
 0x6ad   :  { %11357 = vmatmul.mubr.bf16.gmra.mrb[168].mxu0 %v19638_v12 }
 0x6ae   :  { %11518 = vmatmul.mubr.bf16.gmra.mrb[168].mxu1 %v19640_v7  ;;  %11364 = vmatprep.mubr.bf16.mxu0 %v19641_v58 }
 0x6af   :  { %11525 = vmatprep.mubr.bf16.mxu1 %v19644_v54 }
 0x6b0   :  { %v9474_v47 = vpop.f32.mrb[64].mxu0 }
 0x6b1   :  { %v13464_v9 = vadd.f32 %v9474_v47, %v18218_v33  ;;  %v10246_v32 = vpop.f32.mrb[64].mxu1  ;;  %v9476_v57 = vpop.f32.mrb[65].mxu0 }
 0x6b2   :  { %v13528_v53 = vadd.f32 %v10246_v32, %v18223_v34  ;;  %v13465_v15 = vadd.f32 %v9476_v57, %v18226_v5  ;;  %v10248_v22 = vpop.f32.mrb[65].mxu1  ;;  %v9478_v51 = vpop.f32.mrb[66].mxu0 }
 0x6b3   :  { %v10405_v59 = vmul.f32 0.01, %v13464_v9  ;;  %v13529_v55 = vadd.f32 %v10248_v22, %v18230_v50  ;;  %v13466_v17 = vadd.f32 %v9478_v51, %v18218_v33  ;;  %v10250_v6 = vpop.f32.mrb[66].mxu1  ;;  %v9480_v19 = vpop.f32.mrb[67].mxu0 }
 0x6b4   :  { %v10407_v10 = vmul.f32 0.01, %v13528_v53  ;;  %v10406_v56 = vmul.f32 0.01, %v13465_v15  ;;  %v13530_v29 = vadd.f32 %v10250_v6, %v18223_v34  ;;  %v13467_v49 = vadd.f32 %v9480_v19, %v18226_v5  ;;  %v10252_v41 = vpop.f32.mrb[67].mxu1  ;;  %v19649_v6 = vld [vmem:[#allocation111_spill] sm:$0xff] }
 0x6b5   :  { %v10408_v38 = vmul.f32 0.01, %v13529_v55  ;;  %v10409_v40 = vmul.f32 0.01, %v13466_v17  ;;  %v13531_v45 = vadd.f32 %v10252_v41, %v18230_v50  ;;  %11365 = vmatmul.mubr.bf16.gmra.mrb[172].mxu0 %v19646_v37  ;;  %v10533_v63 = vmax.f32 %v13464_v9, %v10405_v59 }
 0x6b6   :  { %v10411_v61 = vmul.f32 0.01, %v13530_v29  ;;  %v10410_v48 = vmul.f32 0.01, %v13467_v49  ;;  %11526 = vmatmul.mubr.bf16.gmra.mrb[172].mxu1 %v19647_v14  ;;  %11372 = vmatprep.mubr.bf16.mxu0 %v17772_v13  ;;  %v10535_v23 = vmax.f32 %v13528_v53, %v10407_v10  ;;  %v10534_v25 = vmax.f32 %v13465_v15, %v10406_v56 }
 0x6b7   :  { %v10537_v21 = vmax.f32 %v13466_v17, %v10409_v40  ;;  %v10412_v39 = vmul.f32 0.01, %v13531_v45  ;;  %11533 = vmatprep.mubr.bf16.mxu1 %v17776_v42  ;;  %v10536_v18 = vmax.f32 %v13529_v55, %v10408_v38  ;;  %v19648_v17 = vld [vmem:[#allocation99_spill] sm:$0xff] }
 0x6b8   :  { %v10539_v2 = vmax.f32 %v13530_v29, %v10411_v61  ;;  %v10538_v28 = vmax.f32 %v13467_v49, %v10410_v48  ;;  %v9484_v35 = vpop.f32.mrb[68].mxu0  ;;  %v19650_v29 = vld [vmem:[#allocation109_spill] sm:$0xff] }
 0x6b9   :  { %v18244_v8 = vpack.c.bf16 %v10537_v21, %v10533_v63  ;;  %v10540_v26 = vmax.f32 %v13531_v45, %v10412_v39  ;;  %v13468_v31 = vadd.f32 %v9484_v35, %v18218_v33  ;;  %v10256_v62 = vpop.f32.mrb[68].mxu1  ;;  %v9486_v43 = vpop.f32.mrb[69].mxu0 }
 0x6ba   :  { %v18247_v20 = vpack.c.bf16 %v10539_v2, %v10535_v23  ;;  %v13532_v13 = vadd.f32 %v10256_v62, %v18223_v34  ;;  %v13469_v24 = vadd.f32 %v9486_v43, %v18226_v5  ;;  %v10258_v42 = vpop.f32.mrb[69].mxu1  ;;  %v9488_v12 = vpop.f32.mrb[70].mxu0  ;;  %v18251_v27 = vpack.c.bf16 %v10538_v28, %v10534_v25 }
 0x6bb   :  { %v10413_v7 = vmul.f32 0.01, %v13468_v31  ;;  %v13533_v58 = vadd.f32 %v10258_v42, %v18230_v50  ;;  %v13470_v0 = vadd.f32 %v9488_v12, %v18218_v33  ;;  %v10260_v30 = vpop.f32.mrb[70].mxu1  ;;  %v9490_v54 = vpop.f32.mrb[71].mxu0  ;;  %v18255_v4 = vpack.c.bf16 %v10540_v26, %v10536_v18 }
 0x6bc   :  { %v10415_v47 = vmul.f32 0.01, %v13532_v13  ;;  %v10414_v9 = vmul.f32 0.01, %v13469_v24  ;;  %v13534_v32 = vadd.f32 %v10260_v30, %v18223_v34  ;;  %v13471_v57 = vadd.f32 %v9490_v54, %v18226_v5  ;;  %v10262_v53 = vpop.f32.mrb[71].mxu1  ;;  %v19651_v54 = vld [vmem:[#allocation107_spill] sm:$0xff] }
 0x6bd   :  { %v10416_v15 = vmul.f32 0.01, %v13533_v58  ;;  %v10417_v22 = vmul.f32 0.01, %v13470_v0  ;;  %v13535_v51 = vadd.f32 %v10262_v53, %v18230_v50  ;;  %11373 = vmatmul.mubr.bf16.gmra.mrb[176].mxu0 %v17765_v44  ;;  %v10541_v19 = vmax.f32 %v13468_v31, %v10413_v7 }
 0x6be   :  { %v10419_v59 = vmul.f32 0.01, %v13534_v32  ;;  %v10418_v55 = vmul.f32 0.01, %v13471_v57  ;;  %11534 = vmatmul.mubr.bf16.gmra.mrb[176].mxu1 %v19648_v17  ;;  %11380 = vmatprep.mubr.bf16.mxu0 %v19649_v6  ;;  %v10543_v49 = vmax.f32 %v13532_v13, %v10415_v47  ;;  %v10542_v41 = vmax.f32 %v13469_v24, %v10414_v9 }
 0x6bf   :  { %v10545_v10 = vmax.f32 %v13470_v0, %v10417_v22  ;;  %v10420_v56 = vmul.f32 0.01, %v13535_v51  ;;  %11541 = vmatprep.mubr.bf16.mxu1 %v19650_v29  ;;  %v10544_v37 = vmax.f32 %v13533_v58, %v10416_v15 }
 0x6c0   :  { %v10547_v38 = vmax.f32 %v13534_v32, %v10419_v59  ;;  %v10546_v40 = vmax.f32 %v13471_v57, %v10418_v55  ;;  %v9494_v45 = vpop.f32.mrb[72].mxu0  ;;  %v19652_v32 = vld [vmem:[#allocation105_spill] sm:$0xff] }
 0x6c1   :  { %v18264_v61 = vpack.c.bf16 %v10545_v10, %v10541_v19  ;;  %v10548_v44 = vmax.f32 %v13535_v51, %v10420_v56  ;;  %v13472_v48 = vadd.f32 %v9494_v45, %v18218_v33  ;;  %v10266_v14 = vpop.f32.mrb[72].mxu1  ;;  %v9496_v63 = vpop.f32.mrb[73].mxu0 }
 0x6c2   :  { %v18267_v21 = vpack.c.bf16 %v10547_v38, %v10543_v49  ;;  %v13536_v39 = vadd.f32 %v10266_v14, %v18223_v34  ;;  %v13473_v23 = vadd.f32 %v9496_v63, %v18226_v5  ;;  %v10268_v25 = vpop.f32.mrb[73].mxu1  ;;  %v9498_v2 = vpop.f32.mrb[74].mxu0  ;;  %v18271_v28 = vpack.c.bf16 %v10546_v40, %v10542_v41 }
 0x6c3   :  { %v10421_v35 = vmul.f32 0.01, %v13472_v48  ;;  %v13537_v18 = vadd.f32 %v10268_v25, %v18230_v50  ;;  %v13474_v26 = vadd.f32 %v9498_v2, %v18218_v33  ;;  %v10270_v31 = vpop.f32.mrb[74].mxu1  ;;  %v9500_v62 = vpop.f32.mrb[75].mxu0  ;;  %v18275_v43 = vpack.c.bf16 %v10548_v44, %v10544_v37 }
 0x6c4   :  { %v10423_v13 = vmul.f32 0.01, %v13536_v39  ;;  %v10422_v24 = vmul.f32 0.01, %v13473_v23  ;;  %v13538_v42 = vadd.f32 %v10270_v31, %v18223_v34  ;;  %v13475_v12 = vadd.f32 %v9500_v62, %v18226_v5  ;;  %v10272_v7 = vpop.f32.mrb[75].mxu1 }
 0x6c5   :  { %v10424_v58 = vmul.f32 0.01, %v13537_v18  ;;  %v10425_v0 = vmul.f32 0.01, %v13474_v26  ;;  %v13539_v30 = vadd.f32 %v10272_v7, %v18230_v50  ;;  %11381 = vmatmul.mubr.bf16.gmra.mrb[180].mxu0 %v19651_v54  ;;  %v10549_v57 = vmax.f32 %v13472_v48, %v10421_v35 }
 0x6c6   :  { %v10427_v47 = vmul.f32 0.01, %v13538_v42  ;;  %v10426_v9 = vmul.f32 0.01, %v13475_v12  ;;  %11542 = vmatmul.mubr.bf16.gmra.mrb[180].mxu1 %v19652_v32  ;;  %11388 = vmatprep.mubr.bf16.mxu0 %v17812_v3  ;;  %v10551_v22 = vmax.f32 %v13536_v39, %v10423_v13  ;;  %v10550_v51 = vmax.f32 %v13473_v23, %v10422_v24 }
 0x6c7   :  { %v10553_v53 = vmax.f32 %v13474_v26, %v10425_v0  ;;  %v10428_v15 = vmul.f32 0.01, %v13539_v30  ;;  %11549 = vmatprep.mubr.bf16.mxu1 %v17816_v16  ;;  %v10552_v6 = vmax.f32 %v13537_v18, %v10424_v58 }
 0x6c8   :  { %v10555_v59 = vmax.f32 %v13538_v42, %v10427_v47  ;;  %v10554_v55 = vmax.f32 %v13475_v12, %v10426_v9  ;;  %v9504_v17 = vpop.f32.mrb[76].mxu0 }
 0x6c9   :  { %v18284_v19 = vpack.c.bf16 %v10553_v53, %v10549_v57  ;;  %v10556_v10 = vmax.f32 %v13539_v30, %v10428_v15  ;;  %v13476_v56 = vadd.f32 %v9504_v17, %v18218_v33  ;;  %v10276_v29 = vpop.f32.mrb[76].mxu1  ;;  %v9506_v49 = vpop.f32.mrb[77].mxu0 }
 0x6ca   :  { %v18287_v41 = vpack.c.bf16 %v10555_v59, %v10551_v22  ;;  %v13540_v3 = vadd.f32 %v10276_v29, %v18223_v34  ;;  %v13477_v38 = vadd.f32 %v9506_v49, %v18226_v5  ;;  %v10278_v16 = vpop.f32.mrb[77].mxu1  ;;  %v9508_v40 = vpop.f32.mrb[78].mxu0  ;;  %v18291_v45 = vpack.c.bf16 %v10554_v55, %v10550_v51 }
 0x6cb   :  { %v10429_v37 = vmul.f32 0.01, %v13476_v56  ;;  %v13541_v44 = vadd.f32 %v10278_v16, %v18230_v50  ;;  %v13478_v48 = vadd.f32 %v9508_v40, %v18218_v33  ;;  %v10280_v14 = vpop.f32.mrb[78].mxu1  ;;  %v9510_v63 = vpop.f32.mrb[79].mxu0  ;;  %v18295_v39 = vpack.c.bf16 %v10556_v10, %v10552_v6 }
 0x6cc   :  { %v10431_v23 = vmul.f32 0.01, %v13540_v3  ;;  %v10430_v25 = vmul.f32 0.01, %v13477_v38  ;;  %v13542_v2 = vadd.f32 %v10280_v14, %v18223_v34  ;;  %v13479_v35 = vadd.f32 %v9510_v63, %v18226_v5  ;;  %v10282_v18 = vpop.f32.mrb[79].mxu1 }
 0x6cd   :  { %v10432_v26 = vmul.f32 0.01, %v13541_v44  ;;  %v10433_v31 = vmul.f32 0.01, %v13478_v48  ;;  %v13543_v62 = vadd.f32 %v10282_v18, %v18230_v50  ;;  %11389 = vmatmul.mubr.bf16.gmra.mrb[184].mxu0 %v17805_v36  ;;  %v10557_v42 = vmax.f32 %v13476_v56, %v10429_v37 }
 0x6ce   :  { %v10435_v13 = vmul.f32 0.01, %v13542_v2  ;;  %v10434_v24 = vmul.f32 0.01, %v13479_v35  ;;  %11550 = vmatmul.mubr.bf16.gmra.mrb[184].mxu1 %v17808_v1  ;;  %11396 = vmatprep.mubr.bf16.mxu0 %v17829_v11  ;;  %v10559_v58 = vmax.f32 %v13540_v3, %v10431_v23  ;;  %v10558_v0 = vmax.f32 %v13477_v38, %v10430_v25 }
 0x6cf   :  { %v10561_v12 = vmax.f32 %v13478_v48, %v10433_v31  ;;  %v10436_v7 = vmul.f32 0.01, %v13543_v62  ;;  %11557 = vmatprep.mubr.bf16.mxu1 %v17831_v60  ;;  %v10560_v9 = vmax.f32 %v13541_v44, %v10432_v26 }
 0x6d0   :  { %v10563_v30 = vmax.f32 %v13542_v2, %v10435_v13  ;;  %v10562_v54 = vmax.f32 %v13479_v35, %v10434_v24  ;;  %v9514_v47 = vpop.f32.mrb[80].mxu0 }
 0x6d1   :  { %v18304_v32 = vpack.c.bf16 %v10561_v12, %v10557_v42  ;;  %v10564_v36 = vmax.f32 %v13543_v62, %v10436_v7  ;;  %v13480_v57 = vadd.f32 %v9514_v47, %v18218_v33  ;;  %v10286_v53 = vpop.f32.mrb[80].mxu1  ;;  %v9516_v1 = vpop.f32.mrb[81].mxu0 }
 0x6d2   :  { %v18307_v15 = vpack.c.bf16 %v10563_v30, %v10559_v58  ;;  %v13544_v11 = vadd.f32 %v10286_v53, %v18223_v34  ;;  %v13481_v22 = vadd.f32 %v9516_v1, %v18226_v5  ;;  %v10288_v60 = vpop.f32.mrb[81].mxu1  ;;  %v9518_v51 = vpop.f32.mrb[82].mxu0  ;;  %v18311_v59 = vpack.c.bf16 %v10562_v54, %v10558_v0 }
 0x6d3   :  { %v10437_v55 = vmul.f32 0.01, %v13480_v57  ;;  %v13545_v17 = vadd.f32 %v10288_v60, %v18230_v50  ;;  %v13482_v6 = vadd.f32 %v9518_v51, %v18218_v33  ;;  %v10290_v10 = vpop.f32.mrb[82].mxu1  ;;  %v9520_v56 = vpop.f32.mrb[83].mxu0  ;;  %v18315_v29 = vpack.c.bf16 %v10564_v36, %v10560_v9 }
 0x6d4   :  { %v10439_v49 = vmul.f32 0.01, %v13544_v11  ;;  %v10438_v3 = vmul.f32 0.01, %v13481_v22  ;;  %v13546_v38 = vadd.f32 %v10290_v10, %v18223_v34  ;;  %v13483_v16 = vadd.f32 %v9520_v56, %v18226_v5  ;;  %v10292_v40 = vpop.f32.mrb[83].mxu1 }
 0x6d5   :  { %v10440_v37 = vmul.f32 0.01, %v13545_v17  ;;  %v10441_v44 = vmul.f32 0.01, %v13482_v6  ;;  %v13547_v48 = vadd.f32 %v10292_v40, %v18230_v50  ;;  %11397 = vmatmul.mubr.bf16.gmra.mrb[188].mxu0 %v17825_v52  ;;  %v10565_v23 = vmax.f32 %v13480_v57, %v10437_v55 }
 0x6d6   :  { %v10443_v14 = vmul.f32 0.01, %v13546_v38  ;;  %v10442_v63 = vmul.f32 0.01, %v13483_v16  ;;  %11558 = vmatmul.mubr.bf16.gmra.mrb[188].mxu1 %v17827_v46  ;;  %11598 = vmatprep.mubr.bf16.mxu0 %v18251_v27  ;;  %v10567_v35 = vmax.f32 %v13544_v11, %v10439_v49  ;;  %v10566_v18 = vmax.f32 %v13481_v22, %v10438_v3 }
 0x6d7   :  { %v10569_v25 = vmax.f32 %v13482_v6, %v10441_v44  ;;  %v10444_v2 = vmul.f32 0.01, %v13547_v48  ;;  %11759 = vmatprep.mubr.bf16.mxu1 %v18255_v4  ;;  %v10568_v13 = vmax.f32 %v13545_v17, %v10440_v37 }
 0x6d8   :  { %v10571_v26 = vmax.f32 %v13546_v38, %v10443_v14  ;;  %v10570_v31 = vmax.f32 %v13483_v16, %v10442_v63  ;;  %v9524_v62 = vpop.f32.mrb[84].mxu0 }
 0x6d9   :  { %v18324_v24 = vpack.c.bf16 %v10569_v25, %v10565_v23  ;;  %v10572_v52 = vmax.f32 %v13547_v48, %v10444_v2  ;;  %v13484_v42 = vadd.f32 %v9524_v62, %v18218_v33  ;;  %v10296_v12 = vpop.f32.mrb[84].mxu1  ;;  %v9526_v46 = vpop.f32.mrb[85].mxu0 }
 0x6da   :  { %v18327_v7 = vpack.c.bf16 %v10571_v26, %v10567_v35  ;;  %v13548_v27 = vadd.f32 %v10296_v12, %v18223_v34  ;;  %v13485_v58 = vadd.f32 %v9526_v46, %v18226_v5  ;;  %v10298_v4 = vpop.f32.mrb[85].mxu1  ;;  %v9528_v0 = vpop.f32.mrb[86].mxu0  ;;  %v18331_v30 = vpack.c.bf16 %v10570_v31, %v10566_v18 }
 0x6db   :  { %v10445_v54 = vmul.f32 0.01, %v13484_v42  ;;  %v13549_v47 = vadd.f32 %v10298_v4, %v18230_v50  ;;  %v13486_v9 = vadd.f32 %v9528_v0, %v18218_v33  ;;  %v10300_v36 = vpop.f32.mrb[86].mxu1  ;;  %v9530_v57 = vpop.f32.mrb[87].mxu0  ;;  %v18335_v53 = vpack.c.bf16 %v10572_v52, %v10568_v13 }
 0x6dc   :  { %v10447_v1 = vmul.f32 0.01, %v13548_v27  ;;  %v10446_v11 = vmul.f32 0.01, %v13485_v58  ;;  %v13550_v22 = vadd.f32 %v10300_v36, %v18223_v34  ;;  %v13487_v60 = vadd.f32 %v9530_v57, %v18226_v5  ;;  %v10302_v51 = vpop.f32.mrb[87].mxu1 }
 0x6dd   :  { %v10448_v55 = vmul.f32 0.01, %v13549_v47  ;;  %v10449_v17 = vmul.f32 0.01, %v13486_v9  ;;  %v13551_v6 = vadd.f32 %v10302_v51, %v18230_v50  ;;  %11599 = vmatmul.mubr.bf16.vlgmr.msra.gmra.mrb[192].mxu0 %v18244_v8  ;;  %v10573_v49 = vmax.f32 %v13484_v42, %v10445_v54 }
 0x6de   :  { %v10451_v10 = vmul.f32 0.01, %v13550_v22  ;;  %v10450_v56 = vmul.f32 0.01, %v13487_v60  ;;  %11760 = vmatmul.mubr.bf16.vlgmr.msra.gmra.mrb[192].mxu1 %v18247_v20  ;;  %11606 = vmatprep.mubr.bf16.mxu0 %v18271_v28  ;;  %v10575_v16 = vmax.f32 %v13548_v27, %v10447_v1  ;;  %v10574_v40 = vmax.f32 %v13485_v58, %v10446_v11 }
 0x6df   :  { %v10577_v3 = vmax.f32 %v13486_v9, %v10449_v17  ;;  %v10452_v38 = vmul.f32 0.01, %v13551_v6  ;;  %11767 = vmatprep.mubr.bf16.mxu1 %v18275_v43  ;;  %v10576_v14 = vmax.f32 %v13549_v47, %v10448_v55 }
 0x6e0   :  { %v10579_v37 = vmax.f32 %v13550_v22, %v10451_v10  ;;  %v10578_v44 = vmax.f32 %v13487_v60, %v10450_v56  ;;  %v9534_v48 = vpop.f32.mrb[88].mxu0 }
 0x6e1   :  { %v18344_v63 = vpack.c.bf16 %v10577_v3, %v10573_v49  ;;  %v10580_v8 = vmax.f32 %v13551_v6, %v10452_v38  ;;  %v13488_v23 = vadd.f32 %v9534_v48, %v18218_v33  ;;  %v10306_v25 = vpop.f32.mrb[88].mxu1  ;;  %v9536_v20 = vpop.f32.mrb[89].mxu0 }
 0x6e2   :  { %v18347_v2 = vpack.c.bf16 %v10579_v37, %v10575_v16  ;;  %v13552_v28 = vadd.f32 %v10306_v25, %v18223_v34  ;;  %v13489_v35 = vadd.f32 %v9536_v20, %v18226_v5  ;;  %v10308_v43 = vpop.f32.mrb[89].mxu1  ;;  %v9538_v18 = vpop.f32.mrb[90].mxu0  ;;  %v18351_v26 = vpack.c.bf16 %v10578_v44, %v10574_v40 }
 0x6e3   :  { %v10453_v31 = vmul.f32 0.01, %v13488_v23  ;;  %v13553_v62 = vadd.f32 %v10308_v43, %v18230_v50  ;;  %v13490_v13 = vadd.f32 %v9538_v18, %v18218_v33  ;;  %v10310_v52 = vpop.f32.mrb[90].mxu1  ;;  %v9540_v42 = vpop.f32.mrb[91].mxu0  ;;  %v18355_v12 = vpack.c.bf16 %v10580_v8, %v10576_v14 }
 0x6e4   :  { %v10455_v46 = vmul.f32 0.01, %v13552_v28  ;;  %v10454_v27 = vmul.f32 0.01, %v13489_v35  ;;  %v13554_v58 = vadd.f32 %v10310_v52, %v18223_v34  ;;  %v13491_v4 = vadd.f32 %v9540_v42, %v18226_v5  ;;  %v10312_v0 = vpop.f32.mrb[91].mxu1 }
 0x6e5   :  { %v10456_v54 = vmul.f32 0.01, %v13553_v62  ;;  %v10457_v47 = vmul.f32 0.01, %v13490_v13  ;;  %v13555_v9 = vadd.f32 %v10312_v0, %v18230_v50  ;;  %11607 = vmatmul.mubr.bf16.gmra.mrb[196].mxu0 %v18264_v61  ;;  %v10581_v1 = vmax.f32 %v13488_v23, %v10453_v31 }
 0x6e6   :  { %v10459_v36 = vmul.f32 0.01, %v13554_v58  ;;  %v10458_v57 = vmul.f32 0.01, %v13491_v4  ;;  %11768 = vmatmul.mubr.bf16.gmra.mrb[196].mxu1 %v18267_v21  ;;  %11614 = vmatprep.mubr.bf16.mxu0 %v18291_v45  ;;  %v10583_v60 = vmax.f32 %v13552_v28, %v10455_v46  ;;  %v10582_v51 = vmax.f32 %v13489_v35, %v10454_v27 }
 0x6e7   :  { %v10585_v11 = vmax.f32 %v13490_v13, %v10457_v47  ;;  %v10460_v22 = vmul.f32 0.01, %v13555_v9  ;;  %11775 = vmatprep.mubr.bf16.mxu1 %v18295_v39  ;;  %v10584_v10 = vmax.f32 %v13553_v62, %v10456_v54 }
 0x6e8   :  { %v10587_v55 = vmax.f32 %v13554_v58, %v10459_v36  ;;  %v10586_v17 = vmax.f32 %v13491_v4, %v10458_v57  ;;  %v9544_v6 = vpop.f32.mrb[92].mxu0 }
 0x6e9   :  { %v18364_v56 = vpack.c.bf16 %v10585_v11, %v10581_v1  ;;  %v10588_v61 = vmax.f32 %v13555_v9, %v10460_v22  ;;  %v13492_v49 = vadd.f32 %v9544_v6, %v18218_v33  ;;  %v10316_v3 = vpop.f32.mrb[92].mxu1  ;;  %v9546_v21 = vpop.f32.mrb[93].mxu0 }
 0x6ea   :  { %v18367_v38 = vpack.c.bf16 %v10587_v55, %v10583_v60  ;;  %v13556_v45 = vadd.f32 %v10316_v3, %v18223_v34  ;;  %v13493_v16 = vadd.f32 %v9546_v21, %v18226_v5  ;;  %v10318_v39 = vpop.f32.mrb[93].mxu1  ;;  %v9548_v40 = vpop.f32.mrb[94].mxu0  ;;  %v18371_v37 = vpack.c.bf16 %v10586_v17, %v10582_v51 }
 0x6eb   :  { %v10461_v44 = vmul.f32 0.01, %v13492_v49  ;;  %v13557_v48 = vadd.f32 %v10318_v39, %v18230_v50  ;;  %v13494_v14 = vadd.f32 %v9548_v40, %v18218_v33  ;;  %v10320_v8 = vpop.f32.mrb[94].mxu1  ;;  %v9550_v23 = vpop.f32.mrb[95].mxu0  ;;  %v18375_v25 = vpack.c.bf16 %v10588_v61, %v10584_v10 }
 0x6ec   :  { %v10463_v20 = vmul.f32 0.01, %v13556_v45  ;;  %v10462_v28 = vmul.f32 0.01, %v13493_v16  ;;  %v13558_v35 = vadd.f32 %v10320_v8, %v18223_v34  ;;  %v13495_v43 = vadd.f32 %v9550_v23, %v18226_v5  ;;  %v10322_v18 = vpop.f32.mrb[95].mxu1 }
 0x6ed   :  { %v10464_v31 = vmul.f32 0.01, %v13557_v48  ;;  %v10465_v62 = vmul.f32 0.01, %v13494_v14  ;;  %v13559_v13 = vadd.f32 %v10322_v18, %v18230_v50  ;;  %11615 = vmatmul.mubr.bf16.gmra.mrb[200].mxu0 %v18284_v19  ;;  %v10589_v46 = vmax.f32 %v13492_v49, %v10461_v44 }
 0x6ee   :  { %v10467_v52 = vmul.f32 0.01, %v13558_v35  ;;  %v10466_v42 = vmul.f32 0.01, %v13495_v43  ;;  %11776 = vmatmul.mubr.bf16.gmra.mrb[200].mxu1 %v18287_v41  ;;  %11622 = vmatprep.mubr.bf16.mxu0 %v18311_v59  ;;  %v10591_v4 = vmax.f32 %v13556_v45, %v10463_v20  ;;  %v10590_v0 = vmax.f32 %v13493_v16, %v10462_v28 }
 0x6ef   :  { %v10593_v27 = vmax.f32 %v13494_v14, %v10465_v62  ;;  %v10468_v58 = vmul.f32 0.01, %v13559_v13  ;;  %11783 = vmatprep.mubr.bf16.mxu1 %v18315_v29  ;;  %v10592_v36 = vmax.f32 %v13557_v48, %v10464_v31 }
 0x6f0   :  { %v10595_v54 = vmax.f32 %v13558_v35, %v10467_v52  ;;  %v10594_v47 = vmax.f32 %v13495_v43, %v10466_v42  ;;  %v9554_v9 = vpop.f32.mrb[96].mxu0 }
 0x6f1   :  { %v18384_v57 = vpack.c.bf16 %v10593_v27, %v10589_v46  ;;  %v10596_v19 = vmax.f32 %v13559_v13, %v10468_v58  ;;  %v13496_v1 = vadd.f32 %v9554_v9, %v18218_v33  ;;  %v10326_v11 = vpop.f32.mrb[96].mxu1  ;;  %v9556_v41 = vpop.f32.mrb[97].mxu0 }
 0x6f2   :  { %v18387_v22 = vpack.c.bf16 %v10595_v54, %v10591_v4  ;;  %v13560_v59 = vadd.f32 %v10326_v11, %v18223_v34  ;;  %v13497_v60 = vadd.f32 %v9556_v41, %v18226_v5  ;;  %v10328_v29 = vpop.f32.mrb[97].mxu1  ;;  %v9558_v51 = vpop.f32.mrb[98].mxu0  ;;  %v18391_v55 = vpack.c.bf16 %v10594_v47, %v10590_v0 }
 0x6f3   :  { %v10469_v17 = vmul.f32 0.01, %v13496_v1  ;;  %v13561_v6 = vadd.f32 %v10328_v29, %v18230_v50  ;;  %v13498_v10 = vadd.f32 %v9558_v51, %v18218_v33  ;;  %v10330_v61 = vpop.f32.mrb[98].mxu1  ;;  %v9560_v49 = vpop.f32.mrb[99].mxu0  ;;  %v18395_v3 = vpack.c.bf16 %v10596_v19, %v10592_v36 }
 0x6f4   :  { %v10471_v21 = vmul.f32 0.01, %v13560_v59  ;;  %v10470_v45 = vmul.f32 0.01, %v13497_v60  ;;  %v13562_v16 = vadd.f32 %v10330_v61, %v18223_v34  ;;  %v13499_v39 = vadd.f32 %v9560_v49, %v18226_v5  ;;  %v10332_v40 = vpop.f32.mrb[99].mxu1 }
 0x6f5   :  { %v10472_v44 = vmul.f32 0.01, %v13561_v6  ;;  %v10473_v48 = vmul.f32 0.01, %v13498_v10  ;;  %v13563_v14 = vadd.f32 %v10332_v40, %v18230_v50  ;;  %11623 = vmatmul.mubr.bf16.gmra.mrb[204].mxu0 %v18304_v32  ;;  %v10597_v20 = vmax.f32 %v13496_v1, %v10469_v17 }
 0x6f6   :  { %v10475_v8 = vmul.f32 0.01, %v13562_v16  ;;  %v10474_v23 = vmul.f32 0.01, %v13499_v39  ;;  %11784 = vmatmul.mubr.bf16.gmra.mrb[204].mxu1 %v18307_v15  ;;  %11630 = vmatprep.mubr.bf16.mxu0 %v18331_v30  ;;  %v10599_v43 = vmax.f32 %v13560_v59, %v10471_v21  ;;  %v10598_v18 = vmax.f32 %v13497_v60, %v10470_v45 }
 0x6f7   :  { %v10601_v28 = vmax.f32 %v13498_v10, %v10473_v48  ;;  %v10476_v35 = vmul.f32 0.01, %v13563_v14  ;;  %11791 = vmatprep.mubr.bf16.mxu1 %v18335_v53  ;;  %v10600_v52 = vmax.f32 %v13561_v6, %v10472_v44 }
 0x6f8   :  { %v10603_v31 = vmax.f32 %v13562_v16, %v10475_v8  ;;  %v10602_v62 = vmax.f32 %v13499_v39, %v10474_v23  ;;  %v9564_v13 = vpop.f32.mrb[100].mxu0 }
 0x6f9   :  { %v18404_v42 = vpack.c.bf16 %v10601_v28, %v10597_v20  ;;  %v10604_v32 = vmax.f32 %v13563_v14, %v10476_v35  ;;  %v13500_v46 = vadd.f32 %v9564_v13, %v18218_v33  ;;  %v10336_v27 = vpop.f32.mrb[100].mxu1  ;;  %v9566_v15 = vpop.f32.mrb[101].mxu0 }
 0x6fa   :  { %v18407_v58 = vpack.c.bf16 %v10603_v31, %v10599_v43  ;;  %v13564_v30 = vadd.f32 %v10336_v27, %v18223_v34  ;;  %v13501_v4 = vadd.f32 %v9566_v15, %v18226_v5  ;;  %v10338_v53 = vpop.f32.mrb[101].mxu1  ;;  %v9568_v0 = vpop.f32.mrb[102].mxu0  ;;  %v18411_v54 = vpack.c.bf16 %v10602_v62, %v10598_v18 }
 0x6fb   :  { %v10477_v47 = vmul.f32 0.01, %v13500_v46  ;;  %v13565_v9 = vadd.f32 %v10338_v53, %v18230_v50  ;;  %v13502_v36 = vadd.f32 %v9568_v0, %v18218_v33  ;;  %v10340_v19 = vpop.f32.mrb[102].mxu1  ;;  %v9570_v1 = vpop.f32.mrb[103].mxu0  ;;  %v18415_v11 = vpack.c.bf16 %v10604_v32, %v10600_v52 }
 0x6fc   :  { %v10479_v41 = vmul.f32 0.01, %v13564_v30  ;;  %v10478_v59 = vmul.f32 0.01, %v13501_v4  ;;  %v13566_v60 = vadd.f32 %v10340_v19, %v18223_v34  ;;  %v13503_v29 = vadd.f32 %v9570_v1, %v18226_v5  ;;  %v10342_v51 = vpop.f32.mrb[103].mxu1 }
 0x6fd   :  { %v10480_v17 = vmul.f32 0.01, %v13565_v9  ;;  %v10481_v6 = vmul.f32 0.01, %v13502_v36  ;;  %v13567_v10 = vadd.f32 %v10342_v51, %v18230_v50  ;;  %11631 = vmatmul.mubr.bf16.gmra.mrb[208].mxu0 %v18324_v24  ;;  %v10605_v21 = vmax.f32 %v13500_v46, %v10477_v47 }
 0x6fe   :  { %v10483_v61 = vmul.f32 0.01, %v13566_v60  ;;  %v10482_v49 = vmul.f32 0.01, %v13503_v29  ;;  %11792 = vmatmul.mubr.bf16.gmra.mrb[208].mxu1 %v18327_v7  ;;  %11638 = vmatprep.mubr.bf16.mxu0 %v18351_v26  ;;  %v10607_v39 = vmax.f32 %v13564_v30, %v10479_v41  ;;  %v10606_v40 = vmax.f32 %v13501_v4, %v10478_v59 }
 0x6ff   :  { %v10609_v45 = vmax.f32 %v13502_v36, %v10481_v6  ;;  %v10484_v16 = vmul.f32 0.01, %v13567_v10  ;;  %11799 = vmatprep.mubr.bf16.mxu1 %v18355_v12  ;;  %v10608_v8 = vmax.f32 %v13565_v9, %v10480_v17 }
 0x700   :  { %v10611_v44 = vmax.f32 %v13566_v60, %v10483_v61  ;;  %v10610_v48 = vmax.f32 %v13503_v29, %v10482_v49  ;;  %v9574_v14 = vpop.f32.mrb[104].mxu0 }
 0x701   :  { %v18424_v23 = vpack.c.bf16 %v10609_v45, %v10605_v21  ;;  %v10612_v24 = vmax.f32 %v13567_v10, %v10484_v16  ;;  %v13504_v20 = vadd.f32 %v9574_v14, %v18218_v33  ;;  %v10346_v28 = vpop.f32.mrb[104].mxu1  ;;  %v9576_v7 = vpop.f32.mrb[105].mxu0 }
 0x702   :  { %v18427_v35 = vpack.c.bf16 %v10611_v44, %v10607_v39  ;;  %v13568_v26 = vadd.f32 %v10346_v28, %v18223_v34  ;;  %v13505_v43 = vadd.f32 %v9576_v7, %v18226_v5  ;;  %v10348_v12 = vpop.f32.mrb[105].mxu1  ;;  %v9578_v18 = vpop.f32.mrb[106].mxu0  ;;  %v18431_v31 = vpack.c.bf16 %v10610_v48, %v10606_v40 }
 0x703   :  { %v10485_v62 = vmul.f32 0.01, %v13504_v20  ;;  %v13569_v13 = vadd.f32 %v10348_v12, %v18230_v50  ;;  %v13506_v52 = vadd.f32 %v9578_v18, %v18218_v33  ;;  %v10350_v32 = vpop.f32.mrb[106].mxu1  ;;  %v9580_v46 = vpop.f32.mrb[107].mxu0  ;;  %v18435_v27 = vpack.c.bf16 %v10612_v24, %v10608_v8 }
 0x704   :  { %v10487_v15 = vmul.f32 0.01, %v13568_v26  ;;  %v10486_v30 = vmul.f32 0.01, %v13505_v43  ;;  %v13570_v4 = vadd.f32 %v10350_v32, %v18223_v34  ;;  %v13507_v53 = vadd.f32 %v9580_v46, %v18226_v5  ;;  %v10352_v0 = vpop.f32.mrb[107].mxu1 }
 0x705   :  { %v10488_v47 = vmul.f32 0.01, %v13569_v13  ;;  %v10489_v9 = vmul.f32 0.01, %v13506_v52  ;;  %v13571_v36 = vadd.f32 %v10352_v0, %v18230_v50  ;;  %11639 = vmatmul.mubr.bf16.gmra.mrb[212].mxu0 %v18344_v63  ;;  %v10613_v41 = vmax.f32 %v13504_v20, %v10485_v62 }
 0x706   :  { %v10491_v19 = vmul.f32 0.01, %v13570_v4  ;;  %v10490_v1 = vmul.f32 0.01, %v13507_v53  ;;  %11800 = vmatmul.mubr.bf16.gmra.mrb[212].mxu1 %v18347_v2  ;;  %11646 = vmatprep.mubr.bf16.mxu0 %v18371_v37  ;;  %v10615_v29 = vmax.f32 %v13568_v26, %v10487_v15  ;;  %v10614_v51 = vmax.f32 %v13505_v43, %v10486_v30 }
 0x707   :  { %v10617_v59 = vmax.f32 %v13506_v52, %v10489_v9  ;;  %v10492_v60 = vmul.f32 0.01, %v13571_v36  ;;  %11807 = vmatprep.mubr.bf16.mxu1 %v18375_v25  ;;  %v10616_v61 = vmax.f32 %v13569_v13, %v10488_v47 }
 0x708   :  { %v10619_v17 = vmax.f32 %v13570_v4, %v10491_v19  ;;  %v10618_v6 = vmax.f32 %v13507_v53, %v10490_v1  ;;  %v9584_v10 = vpop.f32.mrb[108].mxu0 }
 0x709   :  { %v18444_v49 = vpack.c.bf16 %v10617_v59, %v10613_v41  ;;  %v10620_v63 = vmax.f32 %v13571_v36, %v10492_v60  ;;  %v13508_v21 = vadd.f32 %v9584_v10, %v18218_v33  ;;  %v10356_v45 = vpop.f32.mrb[108].mxu1  ;;  %v9586_v2 = vpop.f32.mrb[109].mxu0 }
 0x70a   :  { %v18447_v16 = vpack.c.bf16 %v10619_v17, %v10615_v29  ;;  %v13572_v37 = vadd.f32 %v10356_v45, %v18223_v34  ;;  %v13509_v39 = vadd.f32 %v9586_v2, %v18226_v5  ;;  %v10358_v25 = vpop.f32.mrb[109].mxu1  ;;  %v9588_v40 = vpop.f32.mrb[110].mxu0  ;;  %v18451_v44 = vpack.c.bf16 %v10618_v6, %v10614_v51 }
 0x70b   :  { %v10493_v48 = vmul.f32 0.01, %v13508_v21  ;;  %v13573_v14 = vadd.f32 %v10358_v25, %v18230_v50  ;;  %v13510_v8 = vadd.f32 %v9588_v40, %v18218_v33  ;;  %v10360_v24 = vpop.f32.mrb[110].mxu1  ;;  %v9590_v20 = vpop.f32.mrb[111].mxu0  ;;  %v18455_v28 = vpack.c.bf16 %v10620_v63, %v10616_v61 }
 0x70c   :  { %v10495_v7 = vmul.f32 0.01, %v13572_v37  ;;  %v10494_v26 = vmul.f32 0.01, %v13509_v39  ;;  %v13574_v43 = vadd.f32 %v10360_v24, %v18223_v34  ;;  %v13511_v12 = vadd.f32 %v9590_v20, %v18226_v5  ;;  %v10362_v18 = vpop.f32.mrb[111].mxu1 }
 0x70d   :  { %v10496_v62 = vmul.f32 0.01, %v13573_v14  ;;  %v10497_v13 = vmul.f32 0.01, %v13510_v8  ;;  %v13575_v52 = vadd.f32 %v10362_v18, %v18230_v50  ;;  %11647 = vmatmul.mubr.bf16.gmra.mrb[216].mxu0 %v18364_v56  ;;  %v10621_v15 = vmax.f32 %v13508_v21, %v10493_v48 }
 0x70e   :  { %v10499_v32 = vmul.f32 0.01, %v13574_v43  ;;  %v10498_v46 = vmul.f32 0.01, %v13511_v12  ;;  %11808 = vmatmul.mubr.bf16.gmra.mrb[216].mxu1 %v18367_v38  ;;  %11654 = vmatprep.mubr.bf16.mxu0 %v18391_v55  ;;  %v10623_v53 = vmax.f32 %v13572_v37, %v10495_v7  ;;  %v10622_v0 = vmax.f32 %v13509_v39, %v10494_v26 }
 0x70f   :  { %v10625_v30 = vmax.f32 %v13510_v8, %v10497_v13  ;;  %v10500_v4 = vmul.f32 0.01, %v13575_v52  ;;  %11815 = vmatprep.mubr.bf16.mxu1 %v18395_v3  ;;  %v10624_v19 = vmax.f32 %v13573_v14, %v10496_v62 }
 0x710   :  { %v10627_v47 = vmax.f32 %v13574_v43, %v10499_v32  ;;  %v10626_v9 = vmax.f32 %v13511_v12, %v10498_v46  ;;  %v9594_v36 = vpop.f32.mrb[112].mxu0 }
 0x711   :  { %v18464_v1 = vpack.c.bf16 %v10625_v30, %v10621_v15  ;;  %v10628_v56 = vmax.f32 %v13575_v52, %v10500_v4  ;;  %v13512_v41 = vadd.f32 %v9594_v36, %v18218_v33  ;;  %v10366_v59 = vpop.f32.mrb[112].mxu1  ;;  %v9596_v38 = vpop.f32.mrb[113].mxu0 }
 0x712   :  { %v18467_v60 = vpack.c.bf16 %v10627_v47, %v10623_v53  ;;  %v13576_v55 = vadd.f32 %v10366_v59, %v18223_v34  ;;  %v13513_v29 = vadd.f32 %v9596_v38, %v18226_v5  ;;  %v10368_v3 = vpop.f32.mrb[113].mxu1  ;;  %v9598_v51 = vpop.f32.mrb[114].mxu0  ;;  %v18471_v17 = vpack.c.bf16 %v10626_v9, %v10622_v0 }
 0x713   :  { %v10501_v6 = vmul.f32 0.01, %v13512_v41  ;;  %v13577_v10 = vadd.f32 %v10368_v3, %v18230_v50  ;;  %v13514_v61 = vadd.f32 %v9598_v51, %v18218_v33  ;;  %v10370_v63 = vpop.f32.mrb[114].mxu1  ;;  %v9600_v21 = vpop.f32.mrb[115].mxu0  ;;  %v18475_v45 = vpack.c.bf16 %v10628_v56, %v10624_v19 }
 0x714   :  { %v10503_v2 = vmul.f32 0.01, %v13576_v55  ;;  %v10502_v37 = vmul.f32 0.01, %v13513_v29  ;;  %v13578_v39 = vadd.f32 %v10370_v63, %v18223_v34  ;;  %v13515_v25 = vadd.f32 %v9600_v21, %v18226_v5  ;;  %v10372_v40 = vpop.f32.mrb[115].mxu1 }
 0x715   :  { %v10504_v48 = vmul.f32 0.01, %v13577_v10  ;;  %v10505_v14 = vmul.f32 0.01, %v13514_v61  ;;  %v13579_v8 = vadd.f32 %v10372_v40, %v18230_v50  ;;  %11655 = vmatmul.mubr.bf16.gmra.mrb[220].mxu0 %v18384_v57  ;;  %v10629_v7 = vmax.f32 %v13512_v41, %v10501_v6 }
 0x716   :  { %v10507_v24 = vmul.f32 0.01, %v13578_v39  ;;  %v10506_v20 = vmul.f32 0.01, %v13515_v25  ;;  %11816 = vmatmul.mubr.bf16.gmra.mrb[220].mxu1 %v18387_v22  ;;  %11662 = vmatprep.mubr.bf16.mxu0 %v18411_v54  ;;  %v10631_v12 = vmax.f32 %v13576_v55, %v10503_v2  ;;  %v10630_v18 = vmax.f32 %v13513_v29, %v10502_v37 }
 0x717   :  { %v10633_v26 = vmax.f32 %v13514_v61, %v10505_v14  ;;  %v10508_v43 = vmul.f32 0.01, %v13579_v8  ;;  %11823 = vmatprep.mubr.bf16.mxu1 %v18415_v11  ;;  %v10632_v32 = vmax.f32 %v13577_v10, %v10504_v48 }
 0x718   :  { %v10635_v62 = vmax.f32 %v13578_v39, %v10507_v24  ;;  %v10634_v13 = vmax.f32 %v13515_v25, %v10506_v20  ;;  %v9604_v52 = vpop.f32.mrb[116].mxu0 }
 0x719   :  { %v18484_v46 = vpack.c.bf16 %v10633_v26, %v10629_v7  ;;  %v10636_v57 = vmax.f32 %v13579_v8, %v10508_v43  ;;  %v13516_v15 = vadd.f32 %v9604_v52, %v18218_v33  ;;  %v10376_v30 = vpop.f32.mrb[116].mxu1  ;;  %v9606_v22 = vpop.f32.mrb[117].mxu0 }
 0x71a   :  { %v18487_v4 = vpack.c.bf16 %v10635_v62, %v10631_v12  ;;  %v13580_v54 = vadd.f32 %v10376_v30, %v18223_v34  ;;  %v13517_v53 = vadd.f32 %v9606_v22, %v18226_v5  ;;  %v10378_v11 = vpop.f32.mrb[117].mxu1  ;;  %v9608_v0 = vpop.f32.mrb[118].mxu0  ;;  %v18491_v47 = vpack.c.bf16 %v10634_v13, %v10630_v18 }
 0x71b   :  { %v10509_v9 = vmul.f32 0.01, %v13516_v15  ;;  %v13581_v36 = vadd.f32 %v10378_v11, %v18230_v50  ;;  %v13518_v19 = vadd.f32 %v9608_v0, %v18218_v33  ;;  %v10380_v56 = vpop.f32.mrb[118].mxu1  ;;  %v9610_v41 = vpop.f32.mrb[119].mxu0  ;;  %v18495_v59 = vpack.c.bf16 %v10636_v57, %v10632_v32 }
 0x71c   :  { %v10511_v38 = vmul.f32 0.01, %v13580_v54  ;;  %v10510_v55 = vmul.f32 0.01, %v13517_v53  ;;  %v13582_v29 = vadd.f32 %v10380_v56, %v18223_v34  ;;  %v13519_v3 = vadd.f32 %v9610_v41, %v18226_v5  ;;  %v10382_v51 = vpop.f32.mrb[119].mxu1 }
 0x71d   :  { %v10512_v6 = vmul.f32 0.01, %v13581_v36  ;;  %v10513_v10 = vmul.f32 0.01, %v13518_v19  ;;  %v13583_v61 = vadd.f32 %v10382_v51, %v18230_v50  ;;  %11663 = vmatmul.mubr.bf16.gmra.mrb[224].mxu0 %v18404_v42  ;;  %v10637_v2 = vmax.f32 %v13516_v15, %v10509_v9 }
 0x71e   :  { %v10515_v63 = vmul.f32 0.01, %v13582_v29  ;;  %v10514_v21 = vmul.f32 0.01, %v13519_v3  ;;  %11824 = vmatmul.mubr.bf16.gmra.mrb[224].mxu1 %v18407_v58  ;;  %11670 = vmatprep.mubr.bf16.mxu0 %v18431_v31  ;;  %v10639_v25 = vmax.f32 %v13580_v54, %v10511_v38  ;;  %v10638_v40 = vmax.f32 %v13517_v53, %v10510_v55 }
 0x71f   :  { %v10641_v37 = vmax.f32 %v13518_v19, %v10513_v10  ;;  %v10516_v39 = vmul.f32 0.01, %v13583_v61  ;;  %11831 = vmatprep.mubr.bf16.mxu1 %v18435_v27  ;;  %v10640_v24 = vmax.f32 %v13581_v36, %v10512_v6 }
 0x720   :  { %v10643_v48 = vmax.f32 %v13582_v29, %v10515_v63  ;;  %v10642_v14 = vmax.f32 %v13519_v3, %v10514_v21  ;;  %v9614_v8 = vpop.f32.mrb[120].mxu0 }
 0x721   :  { %v18504_v20 = vpack.c.bf16 %v10641_v37, %v10637_v2  ;;  %v10644_v42 = vmax.f32 %v13583_v61, %v10516_v39  ;;  %v13520_v7 = vadd.f32 %v9614_v8, %v18218_v33  ;;  %v10386_v26 = vpop.f32.mrb[120].mxu1  ;;  %v9616_v58 = vpop.f32.mrb[121].mxu0 }
 0x722   :  { %v18507_v43 = vpack.c.bf16 %v10643_v48, %v10639_v25  ;;  %v13584_v31 = vadd.f32 %v10386_v26, %v18223_v34  ;;  %v13521_v12 = vadd.f32 %v9616_v58, %v18226_v5  ;;  %v10388_v27 = vpop.f32.mrb[121].mxu1  ;;  %v9618_v18 = vpop.f32.mrb[122].mxu0  ;;  %v18511_v62 = vpack.c.bf16 %v10642_v14, %v10638_v40 }
 0x723   :  { %v10517_v13 = vmul.f32 0.01, %v13520_v7  ;;  %v13585_v52 = vadd.f32 %v10388_v27, %v18230_v50  ;;  %v13522_v32 = vadd.f32 %v9618_v18, %v18218_v33  ;;  %v10390_v57 = vpop.f32.mrb[122].mxu1  ;;  %v9620_v15 = vpop.f32.mrb[123].mxu0  ;;  %v18515_v30 = vpack.c.bf16 %v10644_v42, %v10640_v24 }
 0x724   :  { %v10519_v22 = vmul.f32 0.01, %v13584_v31  ;;  %v10518_v54 = vmul.f32 0.01, %v13521_v12  ;;  %v13586_v53 = vadd.f32 %v10390_v57, %v18223_v34  ;;  %v13523_v11 = vadd.f32 %v9620_v15, %v18226_v5  ;;  %v10392_v0 = vpop.f32.mrb[123].mxu1 }
 0x725   :  { %v10520_v9 = vmul.f32 0.01, %v13585_v52  ;;  %v10521_v36 = vmul.f32 0.01, %v13522_v32  ;;  %v13587_v19 = vadd.f32 %v10392_v0, %v18230_v50  ;;  %11671 = vmatmul.mubr.bf16.gmra.mrb[228].mxu0 %v18424_v23  ;;  %v10645_v38 = vmax.f32 %v13520_v7, %v10517_v13 }
 0x726   :  { %v10523_v56 = vmul.f32 0.01, %v13586_v53  ;;  %v10522_v41 = vmul.f32 0.01, %v13523_v11  ;;  %11832 = vmatmul.mubr.bf16.gmra.mrb[228].mxu1 %v18427_v35  ;;  %11678 = vmatprep.mubr.bf16.mxu0 %v18451_v44  ;;  %v10647_v3 = vmax.f32 %v13584_v31, %v10519_v22  ;;  %v10646_v51 = vmax.f32 %v13521_v12, %v10518_v54 }
 0x727   :  { %v10649_v55 = vmax.f32 %v13522_v32, %v10521_v36  ;;  %v10524_v29 = vmul.f32 0.01, %v13587_v19  ;;  %11839 = vmatprep.mubr.bf16.mxu1 %v18455_v28  ;;  %v10648_v63 = vmax.f32 %v13585_v52, %v10520_v9 }
 0x728   :  { %v10651_v6 = vmax.f32 %v13586_v53, %v10523_v56  ;;  %v10650_v10 = vmax.f32 %v13523_v11, %v10522_v41  ;;  %v9624_v61 = vpop.f32.mrb[124].mxu0 }
 0x729   :  { %v18524_v21 = vpack.c.bf16 %v10649_v55, %v10645_v38  ;;  %v10652_v23 = vmax.f32 %v13587_v19, %v10524_v29  ;;  %v13524_v2 = vadd.f32 %v9624_v61, %v18218_v33  ;;  %v10396_v37 = vpop.f32.mrb[124].mxu1  ;;  %v9626_v35 = vpop.f32.mrb[125].mxu0 }
 0x72a   :  { %v18527_v39 = vpack.c.bf16 %v10651_v6, %v10647_v3  ;;  %v13588_v44 = vadd.f32 %v10396_v37, %v18223_v34  ;;  %v13525_v25 = vadd.f32 %v9626_v35, %v18226_v5  ;;  %v10398_v28 = vpop.f32.mrb[125].mxu1  ;;  %v9628_v40 = vpop.f32.mrb[126].mxu0  ;;  %v18531_v48 = vpack.c.bf16 %v10650_v10, %v10646_v51 }
 0x72b   :  { %v10525_v14 = vmul.f32 0.01, %v13524_v2  ;;  %v13589_v8 = vadd.f32 %v10398_v28, %v18230_v50  ;;  %v13526_v24 = vadd.f32 %v9628_v40, %v18218_v33  ;;  %v10400_v42 = vpop.f32.mrb[126].mxu1  ;;  %v9630_v7 = vpop.f32.mrb[127].mxu0  ;;  %v18535_v26 = vpack.c.bf16 %v10652_v23, %v10648_v63 }
 0x72c   :  { %v10527_v58 = vmul.f32 0.01, %v13588_v44  ;;  %v10526_v31 = vmul.f32 0.01, %v13525_v25  ;;  %v13590_v12 = vadd.f32 %v10400_v42, %v18223_v34  ;;  %v13527_v27 = vadd.f32 %v9630_v7, %v18226_v5  ;;  %v10402_v18 = vpop.f32.mrb[127].mxu1 }
 0x72d   :  { %v10528_v13 = vmul.f32 0.01, %v13589_v8  ;;  %v10529_v52 = vmul.f32 0.01, %v13526_v24  ;;  %v13591_v32 = vadd.f32 %v10402_v18, %v18230_v50  ;;  %11679 = vmatmul.mubr.bf16.gmra.mrb[232].mxu0 %v18444_v49  ;;  %v10653_v33 = vmax.f32 %v13524_v2, %v10525_v14 }
 0x72e   :  { %v10531_v57 = vmul.f32 0.01, %v13590_v12  ;;  %v10530_v15 = vmul.f32 0.01, %v13527_v27  ;;  %11840 = vmatmul.mubr.bf16.gmra.mrb[232].mxu1 %v18447_v16  ;;  %11686 = vmatprep.mubr.bf16.mxu0 %v18471_v17  ;;  %v10655_v34 = vmax.f32 %v13588_v44, %v10527_v58  ;;  %v10654_v5 = vmax.f32 %v13525_v25, %v10526_v31  ;;  %v18549_v16 = vld [vmem:[%s18920_s9] ss:$0 sm:$0xff] }
 0x72f   :  { %v10657_v22 = vmax.f32 %v13526_v24, %v10529_v52  ;;  %v10532_v54 = vmul.f32 0.01, %v13591_v32  ;;  %11847 = vmatprep.mubr.bf16.mxu1 %v18475_v45  ;;  %v10656_v9 = vmax.f32 %v13589_v8, %v10528_v13 }
 0x730   :  { %v10659_v53 = vmax.f32 %v13590_v12, %v10531_v57  ;;  %v10658_v11 = vmax.f32 %v13527_v27, %v10530_v15  ;;  %v12904_v0 = vpop.f32.mrb[128].mxu0 }
 0x731   :  { %v18544_v50 = vpack.c.bf16 %v10657_v22, %v10653_v33  ;;  %v10660_v49 = vmax.f32 %v13591_v32, %v10532_v54  ;;  %v13016_v36 = vpop.f32.mrb[128].mxu1  ;;  %v12905_v17 = vpop.f32.mrb[129].mxu0 }
 0x732   :  { %v18551_v19 = vpack.c.bf16 %v10659_v53, %v10655_v34  ;;  %v12906_v56 = vadd.f32 %v12905_v17, %v12904_v0  ;;  %v13017_v45 = vpop.f32.mrb[129].mxu1  ;;  %v12907_v41 = vpop.f32.mrb[130].mxu0  ;;  %v18553_v38 = vpack.c.bf16 %v10658_v11, %v10654_v5 }
 0x733   :  { %v13018_v55 = vadd.f32 %v13017_v45, %v13016_v36  ;;  %v13019_v29 = vpop.f32.mrb[130].mxu1  ;;  %v12908_v3 = vpop.f32.mrb[131].mxu0  ;;  %v18555_v51 = vpack.c.bf16 %v10660_v49, %v10656_v9 }
 0x734   :  { %v11279_v6 = vadd.f32 %v12906_v56, %v18549_v16  ;;  %v12909_v10 = vadd.f32 %v12908_v3, %v12907_v41  ;;  %v13020_v61 = vpop.f32.mrb[131].mxu1 }
 0x735   :  { %v13021_v63 = vadd.f32 %v13020_v61, %v13019_v29  ;;  %11687 = vmatmul.mubr.bf16.gmra.mrb[236].mxu0 %v18464_v1 }
 0x736   :  { %v18559_v23 = vadd.f32 %v13018_v55, %v11279_v6  ;;  %v11282_v2 = vadd.f32 %v12909_v10, %v18549_v16  ;;  %11848 = vmatmul.mubr.bf16.gmra.mrb[236].mxu1 %v18467_v60  ;;  %11694 = vmatprep.mubr.bf16.mxu0 %v18491_v47 }
 0x737   :  { %11855 = vmatprep.mubr.bf16.mxu1 %v18495_v59 }
 0x738   :  { %v18565_v37 = vadd.f32 %v13021_v63, %v11282_v2  ;;  %v12910_v35 = vpop.f32.mrb[132].mxu0 }
 0x739   :  { %v13022_v44 = vpop.f32.mrb[132].mxu1  ;;  %v12911_v25 = vpop.f32.mrb[133].mxu0 }
 0x73a   :  { %v12912_v28 = vadd.f32 %v12911_v25, %v12910_v35  ;;  %v13023_v40 = vpop.f32.mrb[133].mxu1  ;;  %v12913_v14 = vpop.f32.mrb[134].mxu0 }
 0x73b   :  { %v13024_v8 = vadd.f32 %v13023_v40, %v13022_v44  ;;  %v13025_v1 = vpop.f32.mrb[134].mxu1  ;;  %v12914_v24 = vpop.f32.mrb[135].mxu0 }
 0x73c   :  { %v11287_v42 = vadd.f32 %v12912_v28, %v18549_v16  ;;  %v12915_v7 = vadd.f32 %v12914_v24, %v12913_v14  ;;  %v13026_v58 = vpop.f32.mrb[135].mxu1 }
 0x73d   :  { %v13027_v60 = vadd.f32 %v13026_v58, %v13025_v1  ;;  %11695 = vmatmul.mubr.bf16.gmra.mrb[240].mxu0 %v18484_v46 }
 0x73e   :  { %v18569_v47 = vadd.f32 %v13024_v8, %v11287_v42  ;;  %v11290_v59 = vadd.f32 %v12915_v7, %v18549_v16  ;;  %11856 = vmatmul.mubr.bf16.gmra.mrb[240].mxu1 %v18487_v4  ;;  %11702 = vmatprep.mubr.bf16.mxu0 %v18511_v62 }
 0x73f   :  { %11863 = vmatprep.mubr.bf16.mxu1 %v18515_v30 }
 0x740   :  { %v18575_v31 = vadd.f32 %v13027_v60, %v11290_v59  ;;  %v12916_v12 = vpop.f32.mrb[136].mxu0 }
 0x741   :  { %v13028_v27 = vpop.f32.mrb[136].mxu1  ;;  %v12917_v18 = vpop.f32.mrb[137].mxu0 }
 0x742   :  { %v12918_v13 = vadd.f32 %v12917_v18, %v12916_v12  ;;  %v13029_v52 = vpop.f32.mrb[137].mxu1  ;;  %v12919_v32 = vpop.f32.mrb[138].mxu0 }
 0x743   :  { %v13030_v57 = vadd.f32 %v13029_v52, %v13028_v27  ;;  %v13031_v46 = vpop.f32.mrb[138].mxu1  ;;  %v12920_v15 = vpop.f32.mrb[139].mxu0 }
 0x744   :  { %v11295_v33 = vadd.f32 %v12918_v13, %v18549_v16  ;;  %v12921_v22 = vadd.f32 %v12920_v15, %v12919_v32  ;;  %v13032_v54 = vpop.f32.mrb[139].mxu1 }
 0x745   :  { %v13033_v4 = vadd.f32 %v13032_v54, %v13031_v46  ;;  %11703 = vmatmul.mubr.bf16.gmra.mrb[244].mxu0 %v18504_v20 }
 0x746   :  { %v18579_v62 = vadd.f32 %v13030_v57, %v11295_v33  ;;  %v11298_v30 = vadd.f32 %v12921_v22, %v18549_v16  ;;  %11864 = vmatmul.mubr.bf16.gmra.mrb[244].mxu1 %v18507_v43  ;;  %11710 = vmatprep.mubr.bf16.mxu0 %v18531_v48 }
 0x747   :  { %11871 = vmatprep.mubr.bf16.mxu1 %v18535_v26 }
 0x748   :  { %v18585_v34 = vadd.f32 %v13033_v4, %v11298_v30  ;;  %v12922_v5 = vpop.f32.mrb[140].mxu0 }
 0x749   :  { %v13034_v53 = vpop.f32.mrb[140].mxu1  ;;  %v12923_v11 = vpop.f32.mrb[141].mxu0 }
 0x74a   :  { %v12924_v0 = vadd.f32 %v12923_v11, %v12922_v5  ;;  %v13035_v9 = vpop.f32.mrb[141].mxu1  ;;  %v12925_v49 = vpop.f32.mrb[142].mxu0 }
 0x74b   :  { %v13036_v36 = vadd.f32 %v13035_v9, %v13034_v53  ;;  %v13037_v20 = vpop.f32.mrb[142].mxu1  ;;  %v12926_v17 = vpop.f32.mrb[143].mxu0 }
 0x74c   :  { %v11303_v56 = vadd.f32 %v12924_v0, %v18549_v16  ;;  %v12927_v45 = vadd.f32 %v12926_v17, %v12925_v49  ;;  %v13038_v41 = vpop.f32.mrb[143].mxu1 }
 0x74d   :  { %v13039_v43 = vadd.f32 %v13038_v41, %v13037_v20  ;;  %11711 = vmatmul.mubr.bf16.gmra.mrb[248].mxu0 %v18524_v21 }
 0x74e   :  { %v18589_v48 = vadd.f32 %v13036_v36, %v11303_v56  ;;  %v11306_v26 = vadd.f32 %v12927_v45, %v18549_v16  ;;  %11872 = vmatmul.mubr.bf16.gmra.mrb[248].mxu1 %v18527_v39  ;;  %11718 = vmatprep.mubr.bf16.mxu0 %v18553_v38 }
 0x74f   :  { %11879 = vmatprep.mubr.bf16.mxu1 %v18555_v51 }
 0x750   :  { %v18595_v55 = vadd.f32 %v13039_v43, %v11306_v26  ;;  %v12928_v29 = vpop.f32.mrb[144].mxu0 }
 0x751   :  { %v13040_v3 = vpop.f32.mrb[144].mxu1  ;;  %v12929_v6 = vpop.f32.mrb[145].mxu0 }
 0x752   :  { %v12930_v10 = vadd.f32 %v12929_v6, %v12928_v29  ;;  %v13041_v61 = vpop.f32.mrb[145].mxu1  ;;  %v12931_v63 = vpop.f32.mrb[146].mxu0 }
 0x753   :  { %v13042_v2 = vadd.f32 %v13041_v61, %v13040_v3  ;;  %v13043_v21 = vpop.f32.mrb[146].mxu1  ;;  %v12932_v35 = vpop.f32.mrb[147].mxu0 }
 0x754   :  { %v11311_v44 = vadd.f32 %v12930_v10, %v18549_v16  ;;  %v12933_v25 = vadd.f32 %v12932_v35, %v12931_v63  ;;  %v13044_v28 = vpop.f32.mrb[147].mxu1 }
 0x755   :  { %v13045_v39 = vadd.f32 %v13044_v28, %v13043_v21  ;;  %11719 = vmatmul.mubr.bf16.gmra.mrb[252].mxu0 %v18544_v50 }
 0x756   :  { %v18599_v38 = vadd.f32 %v13042_v2, %v11311_v44  ;;  %v11314_v51 = vadd.f32 %v12933_v25, %v18549_v16  ;;  %11880 = vmatmul.mubr.bf16.gmra.mrb[252].mxu1 %v18551_v19 }
 0x758   :  { %v18603_v40 = vadd.f32 %v13045_v39, %v11314_v51  ;;  %v12934_v14 = vpop.f32.mrb[148].mxu0 }
 0x759   :  { %v13046_v8 = vpop.f32.mrb[148].mxu1  ;;  %v12935_v1 = vpop.f32.mrb[149].mxu0 }
 0x75a   :  { %v12936_v24 = vadd.f32 %v12935_v1, %v12934_v14  ;;  %v13047_v42 = vpop.f32.mrb[149].mxu1  ;;  %v12937_v7 = vpop.f32.mrb[150].mxu0 }
 0x75b   :  { %v13048_v58 = vadd.f32 %v13047_v42, %v13046_v8  ;;  %v13049_v60 = vpop.f32.mrb[150].mxu1  ;;  %v12938_v59 = vpop.f32.mrb[151].mxu0 }
 0x75c   :  { %v11319_v12 = vadd.f32 %v12936_v24, %v18549_v16  ;;  %v12939_v50 = vadd.f32 %v12938_v59, %v12937_v7  ;;  %v13050_v27 = vpop.f32.mrb[151].mxu1 }
 0x75d   :  { %v13051_v18 = vadd.f32 %v13050_v27, %v13049_v60 }
 0x75e   :  { %v18606_v13 = vadd.f32 %v13048_v58, %v11319_v12  ;;  %v11322_v19 = vadd.f32 %v12939_v50, %v18549_v16 }
 0x760   :  { %v18609_v52 = vadd.f32 %v13051_v18, %v11322_v19  ;;  %v12940_v32 = vpop.f32.mrb[152].mxu0 }
 0x761   :  { %v13052_v57 = vpop.f32.mrb[152].mxu1  ;;  %v12941_v46 = vpop.f32.mrb[153].mxu0 }
 0x762   :  { %v12942_v15 = vadd.f32 %v12941_v46, %v12940_v32  ;;  %v13053_v33 = vpop.f32.mrb[153].mxu1  ;;  %v12943_v22 = vpop.f32.mrb[154].mxu0 }
 0x763   :  { %v13054_v54 = vadd.f32 %v13053_v33, %v13052_v57  ;;  %v13055_v4 = vpop.f32.mrb[154].mxu1  ;;  %v12944_v30 = vpop.f32.mrb[155].mxu0 }
 0x764   :  { %v11327_v5 = vadd.f32 %v12942_v15, %v18549_v16  ;;  %v12945_v53 = vadd.f32 %v12944_v30, %v12943_v22  ;;  %v13056_v11 = vpop.f32.mrb[155].mxu1 }
 0x765   :  { %v13057_v0 = vadd.f32 %v13056_v11, %v13055_v4 }
 0x766   :  { %v18612_v9 = vadd.f32 %v13054_v54, %v11327_v5  ;;  %v11330_v49 = vadd.f32 %v12945_v53, %v18549_v16 }
 0x768   :  { %v18615_v36 = vadd.f32 %v13057_v0, %v11330_v49  ;;  %v12946_v20 = vpop.f32.mrb[156].mxu0 }
 0x769   :  { %v13058_v17 = vpop.f32.mrb[156].mxu1  ;;  %v12947_v56 = vpop.f32.mrb[157].mxu0 }
 0x76a   :  { %v12948_v45 = vadd.f32 %v12947_v56, %v12946_v20  ;;  %v13059_v41 = vpop.f32.mrb[157].mxu1  ;;  %v12949_v43 = vpop.f32.mrb[158].mxu0 }
 0x76b   :  { %v13060_v26 = vadd.f32 %v13059_v41, %v13058_v17  ;;  %v13061_v29 = vpop.f32.mrb[158].mxu1  ;;  %v12950_v3 = vpop.f32.mrb[159].mxu0 }
 0x76c   :  { %v11335_v6 = vadd.f32 %v12948_v45, %v18549_v16  ;;  %v12951_v10 = vadd.f32 %v12950_v3, %v12949_v43  ;;  %v13062_v61 = vpop.f32.mrb[159].mxu1 }
 0x76d   :  { %v13063_v63 = vadd.f32 %v13062_v61, %v13061_v29 }
 0x76e   :  { %v18618_v2 = vadd.f32 %v13060_v26, %v11335_v6  ;;  %v11338_v21 = vadd.f32 %v12951_v10, %v18549_v16 }
 0x770   :  { %v18621_v35 = vadd.f32 %v13063_v63, %v11338_v21  ;;  %v12952_v44 = vpop.f32.mrb[160].mxu0 }
 0x771   :  { %v13064_v25 = vpop.f32.mrb[160].mxu1  ;;  %v12953_v28 = vpop.f32.mrb[161].mxu0 }
 0x772   :  { %v12954_v39 = vadd.f32 %v12953_v28, %v12952_v44  ;;  %v13065_v51 = vpop.f32.mrb[161].mxu1  ;;  %v12955_v14 = vpop.f32.mrb[162].mxu0 }
 0x773   :  { %v13066_v8 = vadd.f32 %v13065_v51, %v13064_v25  ;;  %v13067_v1 = vpop.f32.mrb[162].mxu1  ;;  %v12956_v24 = vpop.f32.mrb[163].mxu0 }
 0x774   :  { %v11343_v42 = vadd.f32 %v12954_v39, %v18549_v16  ;;  %v12957_v7 = vadd.f32 %v12956_v24, %v12955_v14  ;;  %v13068_v58 = vpop.f32.mrb[163].mxu1 }
 0x775   :  { %v13069_v60 = vadd.f32 %v13068_v58, %v13067_v1 }
 0x776   :  { %v18624_v59 = vadd.f32 %v13066_v8, %v11343_v42  ;;  %v11346_v12 = vadd.f32 %v12957_v7, %v18549_v16 }
 0x778   :  { %v18627_v50 = vadd.f32 %v13069_v60, %v11346_v12  ;;  %v12958_v27 = vpop.f32.mrb[164].mxu0 }
 0x779   :  { %v13070_v18 = vpop.f32.mrb[164].mxu1  ;;  %v12959_v19 = vpop.f32.mrb[165].mxu0 }
 0x77a   :  { %v12960_v32 = vadd.f32 %v12959_v19, %v12958_v27  ;;  %v13071_v57 = vpop.f32.mrb[165].mxu1  ;;  %v12961_v46 = vpop.f32.mrb[166].mxu0 }
 0x77b   :  { %v13072_v15 = vadd.f32 %v13071_v57, %v13070_v18  ;;  %v13073_v33 = vpop.f32.mrb[166].mxu1  ;;  %v12962_v22 = vpop.f32.mrb[167].mxu0 }
 0x77c   :  { %v11351_v54 = vadd.f32 %v12960_v32, %v18549_v16  ;;  %v12963_v4 = vadd.f32 %v12962_v22, %v12961_v46  ;;  %v13074_v30 = vpop.f32.mrb[167].mxu1 }
 0x77d   :  { %v13075_v5 = vadd.f32 %v13074_v30, %v13073_v33 }
 0x77e   :  { %v18630_v53 = vadd.f32 %v13072_v15, %v11351_v54  ;;  %v11354_v11 = vadd.f32 %v12963_v4, %v18549_v16 }
 0x780   :  { %v18633_v0 = vadd.f32 %v13075_v5, %v11354_v11  ;;  %v12964_v49 = vpop.f32.mrb[168].mxu0 }
 0x781   :  { %v13076_v20 = vpop.f32.mrb[168].mxu1  ;;  %v12965_v17 = vpop.f32.mrb[169].mxu0 }
 0x782   :  { %v12966_v56 = vadd.f32 %v12965_v17, %v12964_v49  ;;  %v13077_v45 = vpop.f32.mrb[169].mxu1  ;;  %v12967_v41 = vpop.f32.mrb[170].mxu0 }
 0x783   :  { %v13078_v43 = vadd.f32 %v13077_v45, %v13076_v20  ;;  %v13079_v26 = vpop.f32.mrb[170].mxu1  ;;  %v12968_v29 = vpop.f32.mrb[171].mxu0 }
 0x784   :  { %v11359_v3 = vadd.f32 %v12966_v56, %v18549_v16  ;;  %v12969_v6 = vadd.f32 %v12968_v29, %v12967_v41  ;;  %v13080_v10 = vpop.f32.mrb[171].mxu1 }
 0x785   :  { %v13081_v61 = vadd.f32 %v13080_v10, %v13079_v26 }
 0x786   :  { %v18636_v63 = vadd.f32 %v13078_v43, %v11359_v3  ;;  %v11362_v21 = vadd.f32 %v12969_v6, %v18549_v16 }
 0x788   :  { %v18639_v44 = vadd.f32 %v13081_v61, %v11362_v21  ;;  %v12970_v25 = vpop.f32.mrb[172].mxu0 }
 0x789   :  { %v13082_v28 = vpop.f32.mrb[172].mxu1  ;;  %v12971_v39 = vpop.f32.mrb[173].mxu0 }
 0x78a   :  { %v12972_v51 = vadd.f32 %v12971_v39, %v12970_v25  ;;  %v13083_v14 = vpop.f32.mrb[173].mxu1  ;;  %v12973_v8 = vpop.f32.mrb[174].mxu0 }
 0x78b   :  { %v13084_v1 = vadd.f32 %v13083_v14, %v13082_v28  ;;  %v13085_v24 = vpop.f32.mrb[174].mxu1  ;;  %v12974_v42 = vpop.f32.mrb[175].mxu0 }
 0x78c   :  { %v11367_v7 = vadd.f32 %v12972_v51, %v18549_v16  ;;  %v12975_v58 = vadd.f32 %v12974_v42, %v12973_v8  ;;  %v13086_v60 = vpop.f32.mrb[175].mxu1 }
 0x78d   :  { %v13087_v12 = vadd.f32 %v13086_v60, %v13085_v24 }
 0x78e   :  { %v18642_v27 = vadd.f32 %v13084_v1, %v11367_v7  ;;  %v11370_v18 = vadd.f32 %v12975_v58, %v18549_v16 }
 0x790   :  { %v18645_v19 = vadd.f32 %v13087_v12, %v11370_v18  ;;  %v12976_v32 = vpop.f32.mrb[176].mxu0 }
 0x791   :  { %v13088_v57 = vpop.f32.mrb[176].mxu1  ;;  %v12977_v46 = vpop.f32.mrb[177].mxu0 }
 0x792   :  { %v12978_v15 = vadd.f32 %v12977_v46, %v12976_v32  ;;  %v13089_v33 = vpop.f32.mrb[177].mxu1  ;;  %v12979_v22 = vpop.f32.mrb[178].mxu0 }
 0x793   :  { %v13090_v54 = vadd.f32 %v13089_v33, %v13088_v57  ;;  %v13091_v4 = vpop.f32.mrb[178].mxu1  ;;  %v12980_v30 = vpop.f32.mrb[179].mxu0 }
 0x794   :  { %v11375_v5 = vadd.f32 %v12978_v15, %v18549_v16  ;;  %v12981_v11 = vadd.f32 %v12980_v30, %v12979_v22  ;;  %v13092_v49 = vpop.f32.mrb[179].mxu1 }
 0x795   :  { %v13093_v20 = vadd.f32 %v13092_v49, %v13091_v4 }
 0x796   :  { %v18648_v17 = vadd.f32 %v13090_v54, %v11375_v5  ;;  %v11378_v56 = vadd.f32 %v12981_v11, %v18549_v16 }
 0x798   :  { %v18651_v45 = vadd.f32 %v13093_v20, %v11378_v56  ;;  %v12982_v41 = vpop.f32.mrb[180].mxu0 }
 0x799   :  { %v13094_v43 = vpop.f32.mrb[180].mxu1  ;;  %v12983_v26 = vpop.f32.mrb[181].mxu0 }
 0x79a   :  { %v12984_v29 = vadd.f32 %v12983_v26, %v12982_v41  ;;  %v13095_v3 = vpop.f32.mrb[181].mxu1  ;;  %v12985_v6 = vpop.f32.mrb[182].mxu0 }
 0x79b   :  { %v13096_v10 = vadd.f32 %v13095_v3, %v13094_v43  ;;  %v13097_v61 = vpop.f32.mrb[182].mxu1  ;;  %v12986_v21 = vpop.f32.mrb[183].mxu0  ;;  %v12810_v3 = vld [vmem:[%s18912_s1] sm:$0xff]  }
 0x79c   :  { %v11383_v25 = vadd.f32 %v12984_v29, %v18549_v16  ;;  %v12987_v28 = vadd.f32 %v12986_v21, %v12985_v6  ;;  %v13098_v39 = vpop.f32.mrb[183].mxu1 }
 0x79d   :  { %v13099_v51 = vadd.f32 %v13098_v39, %v13097_v61  ;;  %v12811_v39 = vunpack.c.l.bf16 %v12810_v3 }
 0x79e   :  { %v18654_v14 = vadd.f32 %v13096_v10, %v11383_v25  ;;  %v11386_v8 = vadd.f32 %v12987_v28, %v18549_v16 }
 0x7a0   :  { %v18657_v1 = vadd.f32 %v13099_v51, %v11386_v8  ;;  %v12988_v24 = vpop.f32.mrb[184].mxu0 }
 0x7a1   :  { %v13100_v42 = vpop.f32.mrb[184].mxu1  ;;  %v12989_v7 = vpop.f32.mrb[185].mxu0 }
 0x7a2   :  { %v12990_v58 = vadd.f32 %v12989_v7, %v12988_v24  ;;  %v13101_v60 = vpop.f32.mrb[185].mxu1  ;;  %v12991_v12 = vpop.f32.mrb[186].mxu0  ;;  %v12812_v24 = vunpack.c.h.bf16 %v12810_v3 }
 0x7a3   :  { %v13102_v18 = vadd.f32 %v13101_v60, %v13100_v42  ;;  %v13103_v32 = vpop.f32.mrb[186].mxu1  ;;  %v12992_v57 = vpop.f32.mrb[187].mxu0 }
 0x7a4   :  { %v11391_v46 = vadd.f32 %v12990_v58, %v18549_v16  ;;  %v12993_v15 = vadd.f32 %v12992_v57, %v12991_v12  ;;  %v13104_v33 = vpop.f32.mrb[187].mxu1  ;;  %v11953_v12 = vsel %vm11952_vm0, %v12811_v39, 1.0 }
 0x7a5   :  { %v13105_v22 = vadd.f32 %v13104_v33, %v13103_v32 }
 0x7a6   :  { %v18660_v54 = vadd.f32 %v13102_v18, %v11391_v46  ;;  %v11394_v4 = vadd.f32 %v12993_v15, %v18549_v16 }
 0x7a8   :  { %v18663_v30 = vadd.f32 %v13105_v22, %v11394_v4  ;;  %v12994_v5 = vpop.f32.mrb[188].mxu0  ;;  %v11954_v4 = vsel %vm11952_vm0, %v12812_v24, 1.0 }
 0x7a9   :  { %v13106_v11 = vpop.f32.mrb[188].mxu1  ;;  %v12995_v49 = vpop.f32.mrb[189].mxu0 }
 0x7aa   :  { %v12996_v20 = vadd.f32 %v12995_v49, %v12994_v5  ;;  %v13107_v56 = vpop.f32.mrb[189].mxu1  ;;  %v12997_v41 = vpop.f32.mrb[190].mxu0  ;;  %v11986_v5 = vsel %vm11985_vm1, %v11953_v12, 0.0 }
 0x7ab   :  { %v13108_v43 = vadd.f32 %v13107_v56, %v13106_v11  ;;  %v13109_v26 = vpop.f32.mrb[190].mxu1  ;;  %v12998_v29 = vpop.f32.mrb[191].mxu0 }
 0x7ac   :  { %v11399_v6 = vadd.f32 %v12996_v20, %v18549_v16  ;;  %v12999_v10 = vadd.f32 %v12998_v29, %v12997_v41  ;;  %v13110_v61 = vpop.f32.mrb[191].mxu1  ;;  %v11987_v41 = vsel %vm11985_vm1, %v11954_v4, 0.0 }
 0x7ad   :  { %v13111_v21 = vadd.f32 %v13110_v61, %v13109_v26 }
 0x7ae   :  { %v18669_v25 = vadd.f32 %v13108_v43, %v11399_v6  ;;  %v11402_v28 = vadd.f32 %v12999_v10, %v18549_v16  ;;  %v12873_v16 = vld [vmem:[%s18912_s1 + $0x8] sm:$0xff]  }
 0x7af   :  { %v12815_v56 = vunpack.c.l.bf16 %v12873_v16  ;;  %v12816_v3 = vunpack.c.h.bf16 %v12873_v16 }
 0x7b0   :  { %v18672_v51 = vadd.f32 %v13111_v21, %v11402_v28  ;;  %v13128_v8 = vpop.f32.mrb[192].mxu0 }
 0x7b1   :  { %v13240_v42 = vpop.f32.mrb[192].mxu1  ;;  %v13129_v7 = vpop.f32.mrb[193].mxu0  ;;  %v11955_v28 = vsel %vm11952_vm0, %v12815_v56, 1.0  ;;  %v11956_v12 = vsel %vm11952_vm0, %v12816_v3, 1.0  ;;  %v12875_v3 = vld [vmem:[%s18912_s1 + $0x18] sm:$0xff]  }
 0x7b2   :  { %v13130_v58 = vadd.f32 %v13129_v7, %v13128_v8  ;;  %v13241_v60 = vpop.f32.mrb[193].mxu1  ;;  %v13131_v18 = vpop.f32.mrb[194].mxu0 }
 0x7b3   :  { %v13242_v32 = vadd.f32 %v13241_v60, %v13240_v42  ;;  %v13243_v57 = vpop.f32.mrb[194].mxu1  ;;  %v13132_v46 = vpop.f32.mrb[195].mxu0  ;;  %v12874_v42 = vld [vmem:[%s18912_s1 + $0x10] sm:$0xff]  }
 0x7b4   :  { %v11601_v15 = vadd.f32 %v13130_v58, %v18559_v23  ;;  %v13133_v33 = vadd.f32 %v13132_v46, %v13131_v18  ;;  %v13244_v22 = vpop.f32.mrb[195].mxu1  ;;  %v11988_v18 = vsel %vm11985_vm1, %v11955_v28, 0.0  ;;  %v12819_v16 = vunpack.c.l.bf16 %v12874_v42 }
 0x7b5   :  { %v13245_v11 = vadd.f32 %v13244_v22, %v13243_v57 }
 0x7b6   :  { %v11762_v49 = vadd.f32 %v13242_v32, %v11601_v15  ;;  %v11604_v20 = vadd.f32 %v13133_v33, %v18565_v37  ;;  %v11989_v15 = vsel %vm11985_vm1, %v11956_v12, 0.0 }
 0x7b8   :  { %v12018_v43 = vmul.f32 %v11986_v5, %v11762_v49  ;;  %v11765_v26 = vadd.f32 %v13245_v11, %v11604_v20  ;;  %v13134_v29 = vpop.f32.mrb[196].mxu0  ;;  %v12820_v5 = vunpack.c.h.bf16 %v12874_v42 }
 0x7b9   :  { %v13246_v6 = vpop.f32.mrb[196].mxu1  ;;  %v13135_v10 = vpop.f32.mrb[197].mxu0 }
 0x7ba   :  { %12050 = vst [vmem:[%s18921_s10] sm:$0xff] %v12018_v43  ;;  %v12019_v23 = vmul.f32 %v11987_v41, %v11765_v26  ;;  %v13136_v61 = vadd.f32 %v13135_v10, %v13134_v29  ;;  %v13247_v21 = vpop.f32.mrb[197].mxu1  ;;  %v13137_v39 = vpop.f32.mrb[198].mxu0  ;;  %v11957_v41 = vsel %vm11952_vm0, %v12819_v16, 1.0 }
 0x7bb   :  { %v13248_v37 = vadd.f32 %v13247_v21, %v13246_v6  ;;  %v13249_v8 = vpop.f32.mrb[198].mxu1  ;;  %v13138_v24 = vpop.f32.mrb[199].mxu0  ;;  %v11990_v21 = vsel %vm11985_vm1, %v11957_v41, 0.0 }
 0x7bc   :  { %12051 = vst [vmem:[%s18921_s10 + $0x8] sm:$0xff] %v12019_v23  ;;  %v11609_v7 = vadd.f32 %v13136_v61, %v18569_v47  ;;  %v13139_v58 = vadd.f32 %v13138_v24, %v13137_v39  ;;  %v13250_v60 = vpop.f32.mrb[199].mxu1  ;;  %v11958_v61 = vsel %vm11952_vm0, %v12820_v5, 1.0 }
 0x7bd   :  { %v13251_v32 = vadd.f32 %v13250_v60, %v13249_v8  ;;  %v12823_v8 = vunpack.c.l.bf16 %v12875_v3  ;;  %v11991_v24 = vsel %vm11985_vm1, %v11958_v61, 0.0  ;;  %v12824_v60 = vunpack.c.h.bf16 %v12875_v3 }
 0x7be   :  { %v11770_v57 = vadd.f32 %v13248_v37, %v11609_v7  ;;  %v11612_v46 = vadd.f32 %v13139_v58, %v18575_v31 }
 0x7c0   :  { %v12020_v33 = vmul.f32 %v11988_v18, %v11770_v57  ;;  %v11773_v22 = vadd.f32 %v13251_v32, %v11612_v46  ;;  %v13140_v4 = vpop.f32.mrb[200].mxu0  ;;  %v11959_v46 = vsel %vm11952_vm0, %v12823_v8, 1.0 }
 0x7c1   :  { %v13252_v11 = vpop.f32.mrb[200].mxu1  ;;  %v13141_v49 = vpop.f32.mrb[201].mxu0 }
 0x7c2   :  { %12052 = vst [vmem:[%s18921_s10 + $0x10] sm:$0xff] %v12020_v33  ;;  %v12021_v47 = vmul.f32 %v11989_v15, %v11773_v22  ;;  %v13142_v20 = vadd.f32 %v13141_v49, %v13140_v4  ;;  %v13253_v56 = vpop.f32.mrb[201].mxu1  ;;  %v13143_v43 = vpop.f32.mrb[202].mxu0  ;;  %v12876_v22 = vld [vmem:[%s18912_s1 + $0x20] sm:$0xff]   ;;  %v11960_v49 = vsel %vm11952_vm0, %v12824_v60, 1.0 }
 0x7c3   :  { %v13254_v31 = vadd.f32 %v13253_v56, %v13252_v11  ;;  %v13255_v26 = vpop.f32.mrb[202].mxu1  ;;  %v13144_v29 = vpop.f32.mrb[203].mxu0 }
 0x7c4   :  { %12053 = vst [vmem:[%s18921_s10 + $0x18] sm:$0xff] %v12021_v47  ;;  %v11617_v6 = vadd.f32 %v13142_v20, %v18579_v62  ;;  %v13145_v10 = vadd.f32 %v13144_v29, %v13143_v43  ;;  %v13256_v23 = vpop.f32.mrb[203].mxu1  ;;  %v11992_v47 = vsel %vm11985_vm1, %v11959_v46, 0.0  ;;  %v12827_v43 = vunpack.c.l.bf16 %v12876_v22 }
 0x7c5   :  { %v13257_v28 = vadd.f32 %v13256_v23, %v13255_v26 }
 0x7c6   :  { %v11778_v39 = vadd.f32 %v13254_v31, %v11617_v6  ;;  %v11620_v37 = vadd.f32 %v13145_v10, %v18585_v34  ;;  %v11993_v31 = vsel %vm11985_vm1, %v11960_v49, 0.0  ;;  %v12828_v6 = vunpack.c.h.bf16 %v12876_v22 }
 0x7c8   :  { %v12022_v42 = vmul.f32 %v11990_v21, %v11778_v39  ;;  %v11781_v7 = vadd.f32 %v13257_v28, %v11620_v37  ;;  %v13146_v58 = vpop.f32.mrb[204].mxu0  ;;  %v11961_v28 = vsel %vm11952_vm0, %v12827_v43, 1.0  ;;  %v11962_v60 = vsel %vm11952_vm0, %v12828_v6, 1.0 }
 0x7c9   :  { %v13258_v12 = vpop.f32.mrb[204].mxu1  ;;  %v13147_v18 = vpop.f32.mrb[205].mxu0  ;;  %v11995_v46 = vsel %vm11985_vm1, %v11962_v60, 0.0 }
 0x7ca   :  { %12054 = vst [vmem:[%s18921_s10 + $0x20] sm:$0xff] %v12022_v42  ;;  %v12023_v62 = vmul.f32 %v11991_v24, %v11781_v7  ;;  %v13148_v32 = vadd.f32 %v13147_v18, %v13146_v58  ;;  %v13259_v57 = vpop.f32.mrb[205].mxu1  ;;  %v13149_v16 = vpop.f32.mrb[206].mxu0  ;;  %v12877_v24 = vld [vmem:[%s18912_s1 + $0x28] sm:$0xff]  }
 0x7cb   :  { %v13260_v34 = vadd.f32 %v13259_v57, %v13258_v12  ;;  %v13261_v15 = vpop.f32.mrb[206].mxu1  ;;  %v13150_v33 = vpop.f32.mrb[207].mxu0  ;;  %v11994_v12 = vsel %vm11985_vm1, %v11961_v28, 0.0  ;;  %v12831_v57 = vunpack.c.l.bf16 %v12877_v24 }
 0x7cc   :  { %12055 = vst [vmem:[%s18921_s10 + $0x28] sm:$0xff] %v12023_v62  ;;  %v11625_v4 = vadd.f32 %v13148_v32, %v18589_v48  ;;  %v13151_v5 = vadd.f32 %v13150_v33, %v13149_v16  ;;  %v13262_v11 = vpop.f32.mrb[207].mxu1  ;;  %v12832_v33 = vunpack.c.h.bf16 %v12877_v24 }
 0x7cd   :  { %v13263_v20 = vadd.f32 %v13262_v11, %v13261_v15  ;;  %v11963_v49 = vsel %vm11952_vm0, %v12831_v57, 1.0 }
 0x7ce   :  { %v11786_v56 = vadd.f32 %v13260_v34, %v11625_v4  ;;  %v11628_v41 = vadd.f32 %v13151_v5, %v18595_v55 }
 0x7d0   :  { %v12024_v26 = vmul.f32 %v11992_v47, %v11786_v56  ;;  %v11789_v29 = vadd.f32 %v13263_v20, %v11628_v41  ;;  %v13152_v3 = vpop.f32.mrb[208].mxu0  ;;  %v12878_v41 = vld [vmem:[%s18912_s1 + $0x30] sm:$0xff]  }
 0x7d1   :  { %v13264_v10 = vpop.f32.mrb[208].mxu1  ;;  %v13153_v23 = vpop.f32.mrb[209].mxu0 }
 0x7d2   :  { %12056 = vst [vmem:[%s18921_s10 + $0x30] sm:$0xff] %v12024_v26  ;;  %v12025_v48 = vmul.f32 %v11993_v31, %v11789_v29  ;;  %v13154_v61 = vadd.f32 %v13153_v23, %v13152_v3  ;;  %v13265_v21 = vpop.f32.mrb[209].mxu1  ;;  %v13155_v39 = vpop.f32.mrb[210].mxu0  ;;  %v11964_v29 = vsel %vm11952_vm0, %v12832_v33, 1.0  ;;  %v11996_v3 = vsel %vm11985_vm1, %v11963_v49, 0.0 }
 0x7d3   :  { %v13266_v55 = vadd.f32 %v13265_v21, %v13264_v10  ;;  %v13267_v37 = vpop.f32.mrb[210].mxu1  ;;  %v13156_v8 = vpop.f32.mrb[211].mxu0 }
 0x7d4   :  { %12057 = vst [vmem:[%s18921_s10 + $0x38] sm:$0xff] %v12025_v48  ;;  %v11633_v42 = vadd.f32 %v13154_v61, %v18599_v38  ;;  %v13157_v7 = vadd.f32 %v13156_v8, %v13155_v39  ;;  %v13268_v58 = vpop.f32.mrb[211].mxu1  ;;  %v12835_v48 = vunpack.c.l.bf16 %v12878_v41  ;;  %v11997_v61 = vsel %vm11985_vm1, %v11964_v29, 0.0  ;;  %v12880_v29 = vld [vmem:[%s18912_s1 + $0x40] sm:$0xff]  }
 0x7d5   :  { %v13269_v18 = vadd.f32 %v13268_v58, %v13267_v37 }
 0x7d6   :  { %v11794_v62 = vadd.f32 %v13266_v55, %v11633_v42  ;;  %v11636_v32 = vadd.f32 %v13157_v7, %v18603_v40  ;;  %v12836_v55 = vunpack.c.h.bf16 %v12878_v41  ;;  %v11965_v7 = vsel %vm11952_vm0, %v12835_v48, 1.0 }
 0x7d8   :  { %v12026_v16 = vmul.f32 %v11994_v12, %v11794_v62  ;;  %v11797_v34 = vadd.f32 %v13269_v18, %v11636_v32  ;;  %v13158_v15 = vpop.f32.mrb[212].mxu0  ;;  %v12879_v18 = vld [vmem:[%s18912_s1 + $0x38] sm:$0xff]  }
 0x7d9   :  { %v13270_v22 = vpop.f32.mrb[212].mxu1  ;;  %v13159_v4 = vpop.f32.mrb[213].mxu0  ;;  %v12840_v49 = vunpack.c.h.bf16 %v12879_v18 }
 0x7da   :  { %12058 = vst [vmem:[%s18921_s10 + $0x40] sm:$0xff] %v12026_v16  ;;  %v12027_v38 = vmul.f32 %v11995_v46, %v11797_v34  ;;  %v13160_v5 = vadd.f32 %v13159_v4, %v13158_v15  ;;  %v13271_v11 = vpop.f32.mrb[213].mxu1  ;;  %v13161_v47 = vpop.f32.mrb[214].mxu0  ;;  %v11966_v46 = vsel %vm11952_vm0, %v12836_v55, 1.0  ;;  %v11998_v16 = vsel %vm11985_vm1, %v11965_v7, 0.0 }
 0x7db   :  { %v13272_v40 = vadd.f32 %v13271_v11, %v13270_v22  ;;  %v13273_v20 = vpop.f32.mrb[214].mxu1  ;;  %v13162_v56 = vpop.f32.mrb[215].mxu0  ;;  %v12839_v22 = vunpack.c.l.bf16 %v12879_v18  ;;  %v11999_v4 = vsel %vm11985_vm1, %v11966_v46, 0.0 }
 0x7dc   :  { %12059 = vst [vmem:[%s18921_s10 + $0x48] sm:$0xff] %v12027_v38  ;;  %v11641_v43 = vadd.f32 %v13160_v5, %v18606_v13  ;;  %v13163_v31 = vadd.f32 %v13162_v56, %v13161_v47  ;;  %v13274_v26 = vpop.f32.mrb[215].mxu1 }
 0x7dd   :  { %v13275_v6 = vadd.f32 %v13274_v26, %v13273_v20  ;;  %v11967_v41 = vsel %vm11952_vm0, %v12839_v22, 1.0 }
 0x7de   :  { %v11802_v10 = vadd.f32 %v13272_v40, %v11641_v43  ;;  %v11644_v23 = vadd.f32 %v13163_v31, %v18609_v52  ;;  %v12000_v48 = vsel %vm11985_vm1, %v11967_v41, 0.0 }
 0x7e0   :  { %v12028_v21 = vmul.f32 %v11996_v3, %v11802_v10  ;;  %v11805_v28 = vadd.f32 %v13275_v6, %v11644_v23  ;;  %v13164_v39 = vpop.f32.mrb[216].mxu0  ;;  %v11968_v23 = vsel %vm11952_vm0, %v12840_v49, 1.0 }
 0x7e1   :  { %v13276_v37 = vpop.f32.mrb[216].mxu1  ;;  %v13165_v8 = vpop.f32.mrb[217].mxu0  ;;  %v12001_v55 = vsel %vm11985_vm1, %v11968_v23, 0.0 }
 0x7e2   :  { %12060 = vst [vmem:[%s18921_s10 + $0x50] sm:$0xff] %v12028_v21  ;;  %v12029_v13 = vmul.f32 %v11997_v61, %v11805_v28  ;;  %v13166_v24 = vadd.f32 %v13165_v8, %v13164_v39  ;;  %v13277_v42 = vpop.f32.mrb[217].mxu1  ;;  %v13167_v58 = vpop.f32.mrb[218].mxu0  ;;  %v12843_v39 = vunpack.c.l.bf16 %v12880_v29 }
 0x7e3   :  { %v13278_v52 = vadd.f32 %v13277_v42, %v13276_v37  ;;  %v13279_v60 = vpop.f32.mrb[218].mxu1  ;;  %v13168_v12 = vpop.f32.mrb[219].mxu0 }
 0x7e4   :  { %12061 = vst [vmem:[%s18921_s10 + $0x58] sm:$0xff] %v12029_v13  ;;  %v11649_v62 = vadd.f32 %v13166_v24, %v18612_v9  ;;  %v13169_v32 = vadd.f32 %v13168_v12, %v13167_v58  ;;  %v13280_v57 = vpop.f32.mrb[219].mxu1  ;;  %v12844_v24 = vunpack.c.h.bf16 %v12880_v29  ;;  %v12882_v29 = vld [vmem:[%s18912_s1 + $0x50] sm:$0xff]  }
 0x7e5   :  { %v13281_v34 = vadd.f32 %v13280_v57, %v13279_v60  ;;  %v11969_v60 = vsel %vm11952_vm0, %v12843_v39, 1.0  ;;  %v12851_v39 = vunpack.c.l.bf16 %v12882_v29 }
 0x7e6   :  { %v11810_v15 = vadd.f32 %v13278_v52, %v11649_v62  ;;  %v11652_v33 = vadd.f32 %v13169_v32, %v18615_v36  ;;  %v12881_v32 = vld [vmem:[%s18912_s1 + $0x48] sm:$0xff]  }
 0x7e8   :  { %v12030_v38 = vmul.f32 %v11998_v16, %v11810_v15  ;;  %v11813_v5 = vadd.f32 %v13281_v34, %v11652_v33  ;;  %v13170_v11 = vpop.f32.mrb[220].mxu0  ;;  %v11970_v34 = vsel %vm11952_vm0, %v12844_v24, 1.0  ;;  %v12002_v15 = vsel %vm11985_vm1, %v11969_v60, 0.0 }
 0x7e9   :  { %v13282_v47 = vpop.f32.mrb[220].mxu1  ;;  %v13171_v40 = vpop.f32.mrb[221].mxu0  ;;  %v12852_v24 = vunpack.c.h.bf16 %v12882_v29 }
 0x7ea   :  { %12062 = vst [vmem:[%s18921_s10 + $0x60] sm:$0xff] %v12030_v38  ;;  %v12031_v9 = vmul.f32 %v11999_v4, %v11813_v5  ;;  %v13172_v20 = vadd.f32 %v13171_v40, %v13170_v11  ;;  %v13283_v56 = vpop.f32.mrb[221].mxu1  ;;  %v13173_v43 = vpop.f32.mrb[222].mxu0  ;;  %v12847_v38 = vunpack.c.l.bf16 %v12881_v32  ;;  %v12003_v5 = vsel %vm11985_vm1, %v11970_v34, 0.0 }
 0x7eb   :  { %v13284_v36 = vadd.f32 %v13283_v56, %v13282_v47  ;;  %v13285_v31 = vpop.f32.mrb[222].mxu1  ;;  %v13174_v26 = vpop.f32.mrb[223].mxu0  ;;  %v12848_v40 = vunpack.c.h.bf16 %v12881_v32 }
 0x7ec   :  { %12063 = vst [vmem:[%s18921_s10 + $0x68] sm:$0xff] %v12031_v9  ;;  %v11657_v3 = vadd.f32 %v13172_v20, %v18618_v2  ;;  %v13175_v6 = vadd.f32 %v13174_v26, %v13173_v43  ;;  %v13286_v10 = vpop.f32.mrb[223].mxu1  ;;  %v11971_v43 = vsel %vm11952_vm0, %v12847_v38, 1.0 }
 0x7ed   :  { %v13287_v61 = vadd.f32 %v13286_v10, %v13285_v31  ;;  %v11972_v23 = vsel %vm11952_vm0, %v12848_v40, 1.0 }
 0x7ee   :  { %v11818_v21 = vadd.f32 %v13284_v36, %v11657_v3  ;;  %v11660_v28 = vadd.f32 %v13175_v6, %v18621_v35 }
 0x7f0   :  { %v12032_v37 = vmul.f32 %v12000_v48, %v11818_v21  ;;  %v11821_v8 = vadd.f32 %v13287_v61, %v11660_v28  ;;  %v13176_v13 = vpop.f32.mrb[224].mxu0  ;;  %v12004_v48 = vsel %vm11985_vm1, %v11971_v43, 0.0 }
 0x7f1   :  { %v13288_v42 = vpop.f32.mrb[224].mxu1  ;;  %v13177_v7 = vpop.f32.mrb[225].mxu0 }
 0x7f2   :  { %12064 = vst [vmem:[%s18921_s10 + $0x70] sm:$0xff] %v12032_v37  ;;  %v12033_v2 = vmul.f32 %v12001_v55, %v11821_v8  ;;  %v13178_v58 = vadd.f32 %v13177_v7, %v13176_v13  ;;  %v13289_v52 = vpop.f32.mrb[225].mxu1  ;;  %v13179_v12 = vpop.f32.mrb[226].mxu0  ;;  %v12005_v55 = vsel %vm11985_vm1, %v11972_v23, 0.0 }
 0x7f3   :  { %v13290_v35 = vadd.f32 %v13289_v52, %v13288_v42  ;;  %v13291_v18 = vpop.f32.mrb[226].mxu1  ;;  %v13180_v62 = vpop.f32.mrb[227].mxu0  ;;  %v11973_v52 = vsel %vm11952_vm0, %v12851_v39, 1.0 }
 0x7f4   :  { %12065 = vst [vmem:[%s18921_s10 + $0x78] sm:$0xff] %v12033_v2  ;;  %v11665_v57 = vadd.f32 %v13178_v58, %v18624_v59  ;;  %v13181_v46 = vadd.f32 %v13180_v62, %v13179_v12  ;;  %v13292_v16 = vpop.f32.mrb[227].mxu1 }
 0x7f5   :  { %v13293_v33 = vadd.f32 %v13292_v16, %v13291_v18  ;;  %v12883_v18 = vld [vmem:[%s18912_s1 + $0x58] sm:$0xff]   ;;  %v12006_v16 = vsel %vm11985_vm1, %v11973_v52, 0.0 }
 0x7f6   :  { %v11826_v22 = vadd.f32 %v13290_v35, %v11665_v57  ;;  %v11668_v4 = vadd.f32 %v13181_v46, %v18627_v50  ;;  %v11974_v46 = vsel %vm11952_vm0, %v12852_v24, 1.0 }
 0x7f8   :  { %v12034_v11 = vmul.f32 %v12002_v15, %v11826_v22  ;;  %v11829_v49 = vadd.f32 %v13293_v33, %v11668_v4  ;;  %v13182_v47 = vpop.f32.mrb[228].mxu0  ;;  %v12855_v22 = vunpack.c.l.bf16 %v12883_v18  ;;  %v12007_v4 = vsel %vm11985_vm1, %v11974_v46, 0.0 }
 0x7f9   :  { %v13294_v9 = vpop.f32.mrb[228].mxu1  ;;  %v13183_v20 = vpop.f32.mrb[229].mxu0 }
 0x7fa   :  { %12066 = vst [vmem:[%s18921_s10 + $0x80] sm:$0xff] %v12034_v11  ;;  %v12035_v59 = vmul.f32 %v12003_v5, %v11829_v49  ;;  %v13184_v56 = vadd.f32 %v13183_v20, %v13182_v47  ;;  %v13295_v41 = vpop.f32.mrb[229].mxu1  ;;  %v13185_v36 = vpop.f32.mrb[230].mxu0  ;;  %v12856_v49 = vunpack.c.h.bf16 %v12883_v18 }
 0x7fb   :  { %v13296_v50 = vadd.f32 %v13295_v41, %v13294_v9  ;;  %v13297_v31 = vpop.f32.mrb[230].mxu1  ;;  %v13186_v26 = vpop.f32.mrb[231].mxu0 }
 0x7fc   :  { %12067 = vst [vmem:[%s18921_s10 + $0x88] sm:$0xff] %v12035_v59  ;;  %v11673_v3 = vadd.f32 %v13184_v56, %v18630_v53  ;;  %v13187_v6 = vadd.f32 %v13186_v26, %v13185_v36  ;;  %v13298_v10 = vpop.f32.mrb[231].mxu1  ;;  %v11975_v59 = vsel %vm11952_vm0, %v12855_v22, 1.0  ;;  %v12884_v36 = vld [vmem:[%s18912_s1 + $0x60] sm:$0xff]   ;;  %v11976_v29 = vsel %vm11952_vm0, %v12856_v49, 1.0 }
 0x7fd   :  { %v13299_v61 = vadd.f32 %v13298_v10, %v13297_v31 }
 0x7fe   :  { %v11834_v21 = vadd.f32 %v13296_v50, %v11673_v3  ;;  %v11676_v28 = vadd.f32 %v13187_v6, %v18633_v0  ;;  %v12008_v3 = vsel %vm11985_vm1, %v11975_v59, 0.0 }
 0x800   :  { %v12036_v37 = vmul.f32 %v12004_v48, %v11834_v21  ;;  %v11837_v8 = vadd.f32 %v13299_v61, %v11676_v28  ;;  %v13188_v13 = vpop.f32.mrb[232].mxu0  ;;  %v12859_v48 = vunpack.c.l.bf16 %v12884_v36  ;;  %v12009_v61 = vsel %vm11985_vm1, %v11976_v29, 0.0 }
 0x801   :  { %v13300_v42 = vpop.f32.mrb[232].mxu1  ;;  %v13189_v7 = vpop.f32.mrb[233].mxu0 }
 0x802   :  { %12068 = vst [vmem:[%s18921_s10 + $0x90] sm:$0xff] %v12036_v37  ;;  %v12037_v53 = vmul.f32 %v12005_v55, %v11837_v8  ;;  %v13190_v2 = vadd.f32 %v13189_v7, %v13188_v13  ;;  %v13301_v58 = vpop.f32.mrb[233].mxu1  ;;  %v13191_v60 = vpop.f32.mrb[234].mxu0  ;;  %v12860_v55 = vunpack.c.h.bf16 %v12884_v36 }
 0x803   :  { %v13302_v0 = vadd.f32 %v13301_v58, %v13300_v42  ;;  %v13303_v12 = vpop.f32.mrb[234].mxu1  ;;  %v13192_v35 = vpop.f32.mrb[235].mxu0  ;;  %v11977_v42 = vsel %vm11952_vm0, %v12859_v48, 1.0  ;;  %v12885_v58 = vld [vmem:[%s18912_s1 + $0x68] sm:$0xff]  }
 0x804   :  { %12069 = vst [vmem:[%s18921_s10 + $0x98] sm:$0xff] %v12037_v53  ;;  %v11681_v62 = vadd.f32 %v13190_v2, %v18636_v63  ;;  %v13193_v32 = vadd.f32 %v13192_v35, %v13191_v60  ;;  %v13304_v57 = vpop.f32.mrb[235].mxu1  ;;  %v12010_v35 = vsel %vm11985_vm1, %v11977_v42, 0.0 }
 0x805   :  { %v13305_v34 = vadd.f32 %v13304_v57, %v13303_v12  ;;  %v11978_v12 = vsel %vm11952_vm0, %v12860_v55, 1.0  ;;  %v12863_v57 = vunpack.c.l.bf16 %v12885_v58 }
 0x806   :  { %v11842_v15 = vadd.f32 %v13302_v0, %v11681_v62  ;;  %v11684_v33 = vadd.f32 %v13193_v32, %v18639_v44  ;;  %v12011_v46 = vsel %vm11985_vm1, %v11978_v12, 0.0 }
 0x808   :  { %v12038_v38 = vmul.f32 %v12006_v16, %v11842_v15  ;;  %v11845_v5 = vadd.f32 %v13305_v34, %v11684_v33  ;;  %v13194_v11 = vpop.f32.mrb[236].mxu0  ;;  %v12864_v33 = vunpack.c.h.bf16 %v12885_v58 }
 0x809   :  { %v13306_v47 = vpop.f32.mrb[236].mxu1  ;;  %v13195_v40 = vpop.f32.mrb[237].mxu0 }
 0x80a   :  { %12070 = vst [vmem:[%s18921_s10 + $0xa0] sm:$0xff] %v12038_v38  ;;  %v12039_v63 = vmul.f32 %v12007_v4, %v11845_v5  ;;  %v13196_v9 = vadd.f32 %v13195_v40, %v13194_v11  ;;  %v13307_v20 = vpop.f32.mrb[237].mxu1  ;;  %v13197_v56 = vpop.f32.mrb[238].mxu0  ;;  %v11979_v11 = vsel %vm11952_vm0, %v12863_v57, 1.0 }
 0x80b   :  { %v13308_v44 = vadd.f32 %v13307_v20, %v13306_v47  ;;  %v13309_v41 = vpop.f32.mrb[238].mxu1  ;;  %v13198_v43 = vpop.f32.mrb[239].mxu0 }
 0x80c   :  { %12071 = vst [vmem:[%s18921_s10 + $0xa8] sm:$0xff] %v12039_v63  ;;  %v11689_v50 = vadd.f32 %v13196_v9, %v18642_v27  ;;  %v13199_v31 = vadd.f32 %v13198_v43, %v13197_v56  ;;  %v13310_v26 = vpop.f32.mrb[239].mxu1  ;;  %v12886_v63 = vld [vmem:[%s18912_s1 + $0x70] sm:$0xff]   ;;  %v11980_v56 = vsel %vm11952_vm0, %v12864_v33, 1.0 }
 0x80d   :  { %v13311_v6 = vadd.f32 %v13310_v26, %v13309_v41 }
 0x80e   :  { %v11850_v10 = vadd.f32 %v13308_v44, %v11689_v50  ;;  %v11692_v23 = vadd.f32 %v13199_v31, %v18645_v19  ;;  %v12012_v44 = vsel %vm11985_vm1, %v11979_v11, 0.0  ;;  %v12867_v50 = vunpack.c.l.bf16 %v12886_v63 }
 0x80f   :  { %v12013_v31 = vsel %vm11985_vm1, %v11980_v56, 0.0 }
 0x810   :  { %v12040_v21 = vmul.f32 %v12008_v3, %v11850_v10  ;;  %v11853_v28 = vadd.f32 %v13311_v6, %v11692_v23  ;;  %v13200_v39 = vpop.f32.mrb[240].mxu0  ;;  %v12868_v6 = vunpack.c.h.bf16 %v12886_v63 }
 0x811   :  { %v13312_v37 = vpop.f32.mrb[240].mxu1  ;;  %v13201_v8 = vpop.f32.mrb[241].mxu0 }
 0x812   :  { %12072 = vst [vmem:[%s18921_s10 + $0xb0] sm:$0xff] %v12040_v21  ;;  %v12041_v27 = vmul.f32 %v12009_v61, %v11853_v28  ;;  %v13202_v13 = vadd.f32 %v13201_v8, %v13200_v39  ;;  %v13313_v24 = vpop.f32.mrb[241].mxu1  ;;  %v13203_v7 = vpop.f32.mrb[242].mxu0  ;;  %v11981_v21 = vsel %vm11952_vm0, %v12867_v50, 1.0 }
 0x813   :  { %v13314_v19 = vadd.f32 %v13313_v24, %v13312_v37  ;;  %v13315_v53 = vpop.f32.mrb[242].mxu1  ;;  %v13204_v2 = vpop.f32.mrb[243].mxu0  ;;  %v12887_v37 = vld [vmem:[%s18912_s1 + $0x78] sm:$0xff]   ;;  %v11982_v24 = vsel %vm11952_vm0, %v12868_v6, 1.0  ;;  %v12014_v42 = vsel %vm11985_vm1, %v11981_v21, 0.0 }
 0x814   :  { %12073 = vst [vmem:[%s18921_s10 + $0xb8] sm:$0xff] %v12041_v27  ;;  %v11697_v52 = vadd.f32 %v13202_v13, %v18648_v17  ;;  %v13205_v60 = vadd.f32 %v13204_v2, %v13203_v7  ;;  %v13316_v0 = vpop.f32.mrb[243].mxu1  ;;  %v12871_v2 = vunpack.c.l.bf16 %v12887_v37  ;;  %v12015_v58 = vsel %vm11985_vm1, %v11982_v24, 0.0 }
 0x815   :  { %v13317_v18 = vadd.f32 %v13316_v0, %v13315_v53  ;;  %v12872_v12 = vunpack.c.h.bf16 %v12887_v37 }
 0x816   :  { %v11858_v62 = vadd.f32 %v13314_v19, %v11697_v52  ;;  %v11700_v32 = vadd.f32 %v13205_v60, %v18651_v45  ;;  %v11983_v57 = vsel %vm11952_vm0, %v12871_v2, 1.0 }
 0x818   :  { %v12042_v16 = vmul.f32 %v12010_v35, %v11858_v62  ;;  %v11861_v34 = vadd.f32 %v13317_v18, %v11700_v32  ;;  %v13206_v15 = vpop.f32.mrb[244].mxu0 }
 0x819   :  { %v13318_v22 = vpop.f32.mrb[244].mxu1  ;;  %v13207_v4 = vpop.f32.mrb[245].mxu0 }
 0x81a   :  { %12074 = vst [vmem:[%s18921_s10 + $0xc0] sm:$0xff] %v12042_v16  ;;  %v12043_v17 = vmul.f32 %v12011_v46, %v11861_v34  ;;  %v13208_v38 = vadd.f32 %v13207_v4, %v13206_v15  ;;  %v13319_v5 = vpop.f32.mrb[245].mxu1  ;;  %v13209_v49 = vpop.f32.mrb[246].mxu0  ;;  %v11984_v4 = vsel %vm11952_vm0, %v12872_v12, 1.0 }
 0x81b   :  { %v13320_v45 = vadd.f32 %v13319_v5, %v13318_v22  ;;  %v13321_v47 = vpop.f32.mrb[246].mxu1  ;;  %v13210_v40 = vpop.f32.mrb[247].mxu0 }
 0x81c   :  { %12075 = vst [vmem:[%s18921_s10 + $0xc8] sm:$0xff] %v12043_v17  ;;  %v11705_v9 = vadd.f32 %v13208_v38, %v18654_v14  ;;  %v13211_v20 = vadd.f32 %v13210_v40, %v13209_v49  ;;  %v13322_v59 = vpop.f32.mrb[247].mxu1  ;;  %v12016_v17 = vsel %vm11985_vm1, %v11983_v57, 0.0  ;;  %v12017_v49 = vsel %vm11985_vm1, %v11984_v4, 0.0 }
 0x81d   :  { %v13323_v41 = vadd.f32 %v13322_v59, %v13321_v47 }
 0x81e   :  { %v11866_v43 = vadd.f32 %v13320_v45, %v11705_v9  ;;  %v11708_v36 = vadd.f32 %v13211_v20, %v18657_v1 }
 0x820   :  { %v12044_v26 = vmul.f32 %v12012_v44, %v11866_v43  ;;  %v11869_v29 = vadd.f32 %v13323_v41, %v11708_v36  ;;  %v13212_v3 = vpop.f32.mrb[248].mxu0 }
 0x821   :  { %v13324_v10 = vpop.f32.mrb[248].mxu1  ;;  %v13213_v23 = vpop.f32.mrb[249].mxu0 }
 0x822   :  { %12076 = vst [vmem:[%s18921_s10 + $0xd0] sm:$0xff] %v12044_v26  ;;  %v12045_v14 = vmul.f32 %v12013_v31, %v11869_v29  ;;  %v13214_v48 = vadd.f32 %v13213_v23, %v13212_v3  ;;  %v13325_v61 = vpop.f32.mrb[249].mxu1  ;;  %v13215_v28 = vpop.f32.mrb[250].mxu0 }
 0x823   :  { %v13326_v1 = vadd.f32 %v13325_v61, %v13324_v10  ;;  %v13327_v39 = vpop.f32.mrb[250].mxu1  ;;  %v13216_v55 = vpop.f32.mrb[251].mxu0 }
 0x824   :  { %12077 = vst [vmem:[%s18921_s10 + $0xd8] sm:$0xff] %v12045_v14  ;;  %v11713_v8 = vadd.f32 %v13214_v48, %v18660_v54  ;;  %v13217_v27 = vadd.f32 %v13216_v55, %v13215_v28  ;;  %v13328_v13 = vpop.f32.mrb[251].mxu1 }
 0x825   :  { %v13329_v7 = vadd.f32 %v13328_v13, %v13327_v39 }
 0x826   :  { %v11874_v19 = vadd.f32 %v13326_v1, %v11713_v8  ;;  %v11716_v53 = vadd.f32 %v13217_v27, %v18663_v30 }
 0x828   :  { %v12046_v52 = vmul.f32 %v12014_v42, %v11874_v19  ;;  %v11877_v60 = vadd.f32 %v13329_v7, %v11716_v53  ;;  %v13218_v0 = vpop.f32.mrb[252].mxu0 }
 0x829   :  { %v13330_v35 = vpop.f32.mrb[252].mxu1  ;;  %v13219_v18 = vpop.f32.mrb[253].mxu0 }
 0x82a   :  { %12078 = vst [vmem:[%s18921_s10 + $0xe0] sm:$0xff] %v12046_v52  ;;  %v12047_v54 = vmul.f32 %v12015_v58, %v11877_v60  ;;  %v13220_v62 = vadd.f32 %v13219_v18, %v13218_v0  ;;  %v13331_v32 = vpop.f32.mrb[253].mxu1  ;;  %v13221_v46 = vpop.f32.mrb[254].mxu0 }
 0x82b   :  { %v13332_v30 = vadd.f32 %v13331_v32, %v13330_v35  ;;  %v13333_v16 = vpop.f32.mrb[254].mxu1  ;;  %v13222_v34 = vpop.f32.mrb[255].mxu0 }
 0x82c   :  { %12079 = vst [vmem:[%s18921_s10 + $0xe8] sm:$0xff] %v12047_v54  ;;  %v11721_v15 = vadd.f32 %v13220_v62, %v18669_v25  ;;  %v13223_v33 = vadd.f32 %v13222_v34, %v13221_v46  ;;  %v13334_v22 = vpop.f32.mrb[255].mxu1 }
 0x82d   :  { %v13335_v38 = vadd.f32 %v13334_v22, %v13333_v16 }
 0x82e   :  { %v11882_v5 = vadd.f32 %v13332_v30, %v11721_v15  ;;  %v11724_v11 = vadd.f32 %v13223_v33, %v18672_v51 }
 0x830   :  { %v12048_v45 = vmul.f32 %v12016_v17, %v11882_v5  ;;  %v11885_v47 = vadd.f32 %v13335_v38, %v11724_v11 }
 0x832   :  { %12080 = vst [vmem:[%s18921_s10 + $0xf0] sm:$0xff] %v12048_v45  ;;  %v12049_v40 = vmul.f32 %v12017_v49, %v11885_v47 }
 0x834   :  { %12081 = vst [vmem:[%s18921_s10 + $0xf8] sm:$0xff] %v12049_v40 }
 0x835   :  { %12086 = vsyncpa [#allocation3], 1 }
 0x836   :  { %12087 = vsyncpa [#allocation5], 1 }

</bundles_post_ra>
